<compile_context>
chip_gen: v7x
topology: tpu7x:2x2x1
jax: 0.10.0
libtpu: 0.0.40
codegen_flags: <defaults>
</compile_context>

<pallas_src>
import functools

import jax
import jax.numpy as jnp
from jax.experimental import pallas as pl
from jax.experimental.pallas import tpu as pltpu

ALPHA = 0.2  # LeakyReLU negative slope used throughout the module


# ---------------------------------------------------------------------------
# Pallas kernels
# ---------------------------------------------------------------------------

def _conv_mm_kernel(a_ref, w_ref, b_ref, o_ref, *, alpha):
    """A @ W + bias (+ LeakyReLU). A is an im2col patch-matrix tile."""
    acc = jnp.dot(a_ref[...], w_ref[...], preferred_element_type=jnp.float32)
    acc = acc + b_ref[...]
    if alpha is not None:
        acc = jnp.where(acc >= 0, acc, alpha * acc)
    o_ref[...] = acc


def _conv3_stats_kernel(a_ref, w_ref, b_ref,
                        x0_ref, heat_ref, avg_ref, max_ref, *, alpha, nb, hw):
    """Last backbone conv fused with heatmap_0 + global avg/max pool epilogue."""
    acc = jnp.dot(a_ref[...], w_ref[...], preferred_element_type=jnp.float32)
    acc = acc + b_ref[...]
    x0 = jnp.where(acc >= 0, acc, alpha * acc)             # (M, C), M = nb*hw
    x0_ref[...] = x0
    heat_ref[...] = jnp.sum(x0, axis=-1, keepdims=True)    # (M, 1) channel sum
    for b in range(nb):                                    # static unroll (nb small)
        xb = x0[b * hw:(b + 1) * hw, :]                    # (hw, C) static slice
        avg_ref[b:b + 1, :] = jnp.mean(xb, axis=0, keepdims=True)
        max_ref[b:b + 1, :] = jnp.max(xb, axis=0, keepdims=True)


def _cam1_kernel(x0_ref, gw_ref, mw_ref, wt_ref, wb_ref, b_ref, lam_ref,
                 xres_ref, heat_ref, *, alpha):
    """CAM branch 1: (x0*gw, x0*mw) -> conv1x1 -> leaky -> lamda*x + x0 -> heatmap."""
    x0 = x0_ref[...]                                       # (M, C)
    g = x0 * gw_ref[...]                                   # (M, C) * (1, C)
    m = x0 * mw_ref[...]
    acc = (jnp.dot(g, wt_ref[...], preferred_element_type=jnp.float32)
           + jnp.dot(m, wb_ref[...], preferred_element_type=jnp.float32)
           + b_ref[...])
    xattn = jnp.where(acc >= 0, acc, alpha * acc)
    xres = lam_ref[...] * xattn + x0
    xres_ref[...] = xres
    heat_ref[...] = jnp.sum(xres, axis=-1, keepdims=True)


def _cam2_kernel(x0_ref, gw_ref, mw_ref, w121_ref, b121_ref, w122_ref, b122_ref,
                 w2t_ref, w2b_ref, b2_ref, xi_ref, heat_ref, *, alpha):
    """One CAM branch-2 iteration per grid step; gpath/mpath never leave VMEM."""
    x0 = x0_ref[...]                                       # (M, C)
    g = x0 * gw_ref[0]                                     # per-branch channel scale
    m = x0 * mw_ref[0]
    g = jnp.dot(g, w121_ref[...], preferred_element_type=jnp.float32) + b121_ref[...]
    g = jnp.where(g >= 0, g, alpha * g)
    m = jnp.dot(m, w122_ref[...], preferred_element_type=jnp.float32) + b122_ref[...]
    m = jnp.where(m >= 0, m, alpha * m)
    acc = (jnp.dot(g, w2t_ref[0], preferred_element_type=jnp.float32)
           + jnp.dot(m, w2b_ref[0], preferred_element_type=jnp.float32)
           + b2_ref[0])
    xi = jnp.where(acc >= 0, acc, alpha * acc)
    xi_ref[0] = xi
    heat_ref[0] = jnp.sum(xi, axis=-1, keepdims=True)


def _head_conv_kernel(a_ref, w_ref, o_ref):
    """Batched 4x4-head conv as im2col matmul: one conv per grid step."""
    o_ref[0] = jnp.dot(a_ref[0], w_ref[0], preferred_element_type=jnp.float32)


# ---------------------------------------------------------------------------
# Pallas wrappers
# ---------------------------------------------------------------------------

def _pick_tm(M):
    if M <= 1024:
        return M
    for t in (1024, 512, 256, 128):
        if M % t == 0:
            return t
    return M  # TODO(synk): ragged M > 1024 falls back to a single block.


def conv_matmul(A, Wm, bias, alpha):
    """(M,K) @ (K,N) + bias, LeakyReLU.  M-tiled grid; weights stay resident."""
    M, K = A.shape
    _, N = Wm.shape
    if bias is None:
        bias = jnp.zeros((N,), jnp.float32)
    tm = _pick_tm(M)
    return pl.pallas_call(
        functools.partial(_conv_mm_kernel, alpha=alpha),
        out_shape=jax.ShapeDtypeStruct((M, N), jnp.float32),
        grid=(M // tm,),
        in_specs=[pl.BlockSpec((tm, K), lambda i: (i, 0)),
                  pl.BlockSpec((K, N), lambda i: (0, 0)),
                  pl.BlockSpec((1, N), lambda i: (0, 0))],
        out_specs=pl.BlockSpec((tm, N), lambda i: (i, 0)),
        compiler_params=pltpu.CompilerParams(dimension_semantics=("parallel",)),
    )(A.astype(jnp.float32), Wm.astype(jnp.float32),
      bias.reshape(1, N).astype(jnp.float32))


def reflect_im2col(x_nhwc, KH, KW, stride, pad):
    """Reflection pad + patch extraction (JAX glue); returns (B*OH*OW, KH*KW*Cin)."""
    if pad:
        x_nhwc = jnp.pad(x_nhwc, ((0, 0), (pad, pad), (pad, pad), (0, 0)),
                         mode="reflect")
    B, H, W, Cin = x_nhwc.shape
    OH = (H - KH) // stride + 1
    OW = (W - KW) // stride + 1
    cols = [x_nhwc[:, i:i + OH * stride:stride, j:j + OW * stride:stride, :]
            for i in range(KH) for j in range(KW)]
    patches = jnp.concatenate(cols, axis=-1)               # (B, OH, OW, KH*KW*Cin)
    return patches.reshape(B * OH * OW, KH * KW * Cin), OH, OW


def conv2d_reflect(x_nhwc, w_oihw, bias, stride):
    Cout, Cin, KH, KW = w_oihw.shape
    A, OH, OW = reflect_im2col(x_nhwc, KH, KW, stride, 1)
    Wm = jnp.transpose(w_oihw, (2, 3, 1, 0)).reshape(KH * KW * Cin, Cout)
    out = conv_matmul(A, Wm, bias, ALPHA)
    return out.reshape(x_nhwc.shape[0], OH, OW, Cout)


def conv3_with_stats(x_nhwc, w_oihw, bias):
    """Last backbone conv fused with heatmap_0 and global avg/max pooling."""
    Bn = x_nhwc.shape[0]
    Cout, Cin, KH, KW = w_oihw.shape
    A, OH, OW = reflect_im2col(x_nhwc, KH, KW, 1, 1)
    Wm = jnp.transpose(w_oihw, (2, 3, 1, 0)).reshape(KH * KW * Cin, Cout)
    M = A.shape[0]
    x0_flat, heat0, avg_p, max_p = pl.pallas_call(
        functools.partial(_conv3_stats_kernel, alpha=ALPHA, nb=Bn, hw=OH * OW),
        out_shape=(jax.ShapeDtypeStruct((M, Cout), jnp.float32),
                   jax.ShapeDtypeStruct((M, 1), jnp.float32),
                   jax.ShapeDtypeStruct((Bn, Cout), jnp.float32),
                   jax.ShapeDtypeStruct((Bn, Cout), jnp.float32)),
    )(A.astype(jnp.float32), Wm.astype(jnp.float32),
      bias.reshape(1, Cout).astype(jnp.float32))
    return x0_flat, heat0, avg_p, max_p, OH, OW


def cam_branch1(x0_flat, gap_w, gmp_w, w1x1, b1x1, lamda):
    M, C = x0_flat.shape
    wtop = w1x1[:, :C].T                                   # (C, C) — gap half
    wbot = w1x1[:, C:].T                                   # (C, C) — gmp half
    return pl.pallas_call(
        functools.partial(_cam1_kernel, alpha=ALPHA),
        out_shape=(jax.ShapeDtypeStruct((M, C), jnp.float32),
                   jax.ShapeDtypeStruct((M, 1), jnp.float32)),
    )(x0_flat, gap_w.reshape(1, C), gmp_w.reshape(1, C),
      wtop, wbot, b1x1.reshape(1, C), lamda.reshape(1, 1).astype(jnp.float32))


def cam_branch2(x0_flat, gw2, mw2, w121, b121, w122, b122, w2t, w2b, b2):
    """All four CAM branch-2 iterations in one pallas_call (grid=(4,))."""
    M, C = x0_flat.shape
    nbr = gw2.shape[0]
    gw2 = gw2.reshape(nbr, 1, C)
    mw2 = mw2.reshape(nbr, 1, C)
    b2 = b2.reshape(nbr, 1, C)
    return pl.pallas_call(
        functools.partial(_cam2_kernel, alpha=ALPHA),
        out_shape=(jax.ShapeDtypeStruct((nbr, M, C), jnp.float32),
                   jax.ShapeDtypeStruct((nbr, M, 1), jnp.float32)),
        grid=(nbr,),
        in_specs=[
            pl.BlockSpec((M, C), lambda i: (0, 0)),        # x0 (resident across grid)
            pl.BlockSpec((1, 1, C), lambda i: (i, 0, 0)),  # gap_fc_2 weight row i
            pl.BlockSpec((1, 1, C), lambda i: (i, 0, 0)),  # gmp_fc_2 weight row i
            pl.BlockSpec((C, C), lambda i: (0, 0)),        # conv1x121 weight
            pl.BlockSpec((1, C), lambda i: (0, 0)),        # conv1x121 bias
            pl.BlockSpec((C, C), lambda i: (0, 0)),        # conv1x122 weight
            pl.BlockSpec((1, C), lambda i: (0, 0)),        # conv1x122 bias
            pl.BlockSpec((1, C, C), lambda i: (i, 0, 0)),  # conv1x1_2_i (gap half)
            pl.BlockSpec((1, C, C), lambda i: (i, 0, 0)),  # conv1x1_2_i (gmp half)
            pl.BlockSpec((1, 1, C), lambda i: (i, 0, 0)),  # conv1x1_2_i bias
        ],
        out_specs=(pl.BlockSpec((1, M, C), lambda i: (i, 0, 0)),
                   pl.BlockSpec((1, M, 1), lambda i: (i, 0, 0))),
        compiler_params=pltpu.CompilerParams(dimension_semantics=("parallel",)),
    )(x0_flat, gw2, mw2, w121, b121.reshape(1, C), w122, b122.reshape(1, C),
      w2t, w2b, b2)


def head_convs(A5, W5):
    """Five 4x4 Cout=1 convs (branch-1 `out` + 4 branch-2) as one batched matmul."""
    S, Mo, Kc = A5.shape
    return pl.pallas_call(
        _head_conv_kernel,
        out_shape=jax.ShapeDtypeStruct((S, Mo, 1), jnp.float32),
        grid=(S,),
        in_specs=[pl.BlockSpec((1, Mo, Kc), lambda i: (i, 0, 0)),
                  pl.BlockSpec((1, Kc, 1), lambda i: (i, 0, 0))],
        out_specs=pl.BlockSpec((1, Mo, 1), lambda i: (i, 0, 0)),
        compiler_params=pltpu.CompilerParams(dimension_semantics=("parallel",)),
    )(A5, W5)


# ---------------------------------------------------------------------------
# Parameters (deterministic synthetic init; shapes follow the PyTorch module)
# ---------------------------------------------------------------------------

def init_params(key, input_nc=4, ndf=8):
    C = ndf * 8                                            # mult = 2**(n_layers-2) = 8
    keys = iter(jax.random.split(key, 64))

    def p(shape, scale=0.05):
        return jax.random.normal(next(keys), shape, jnp.float32) * scale

    return dict(
        # backbone (n_layers = 5)
        w0=p((ndf, input_nc, 4, 4)),        b0=p((ndf,)),
        w1=p((ndf * 2, ndf, 4, 4)),         b1=p((ndf * 2,)),
        w2=p((ndf * 4, ndf * 2, 4, 4)),     b2=p((ndf * 4,)),
        w3=p((ndf * 8, ndf * 4, 3, 3)),     b3=p((ndf * 8,)),
        # heads
        head2_w=p((8, C)),                  head2_b=p((8,)),
        gap_fc_w=p((1, C)),                 gmp_fc_w=p((1, C)),
        conv1x1_w=p((C, 2 * C, 1, 1)),      conv1x1_b=p((C,)),
        conv_w=p((1, C, 4, 4)),
        lamda=jnp.zeros((1,), jnp.float32),
        gap_fc_2_w=p((4, C)),               gmp_fc_2_w=p((4, C)),
        lina_w=p((4, 4)),                   linm_w=p((4, 4)),
        lamda_2=jnp.zeros((1,), jnp.float32),
        conv1x121_w=p((C, C, 1, 1)),        conv1x121_b=p((C,)),
        conv1x122_w=p((C, C, 1, 1)),        conv1x122_b=p((C,)),
        conv1x1_2_w=[p((C, 2 * C, 1, 1)) for _ in range(4)],
        conv1x1_2_b=[p((C,)) for _ in range(4)],
        conv_2_w=[p((1, C, 4, 4)) for _ in range(4)],
    )


# ---------------------------------------------------------------------------
# Forward pass
# ---------------------------------------------------------------------------

def discriminator_forward(params, x_nchw):
    x = jnp.transpose(x_nchw, (0, 2, 3, 1)).astype(jnp.float32)    # -> NHWC
    Bn = x.shape[0]

    # --- backbone: self.model ---
    x = conv2d_reflect(x, params["w0"], params["b0"], stride=2)
    x = conv2d_reflect(x, params["w1"], params["b1"], stride=2)
    x = conv2d_reflect(x, params["w2"], params["b2"], stride=2)
    x0_flat, heat0, avg_p, max_p, OH, OW = conv3_with_stats(
        x, params["w3"], params["b3"])
    C = params["w3"].shape[0]

    # --- contra head (tiny matmul; plain jnp so XLA fuses it) ---
    x0_nhwc = x0_flat.reshape(Bn, OH, OW, C)
    ph, pw = OH // 8, OW // 8
    # TODO(synk): matches adaptive_avg_pool2d(x0, 8) only when OH, OW are multiples of 8.
    contra_nhwc = x0_nhwc.reshape(Bn, 8, ph, 8, pw, C).mean(axis=(2, 4))
    contra_nchw = jnp.transpose(contra_nhwc, (0, 3, 1, 2))          # (B, C, 8, 8)
    xcon = contra_nchw.reshape(-1, C)                               # torch .view(-1, C)
    contra = (xcon @ params["head2_w"].T + params["head2_b"]).reshape(Bn, 1, -1)

    heatmap_0 = heat0.reshape(Bn, OH, OW)[:, None]                  # (B, 1, H, W)

    # --- tiny CAM logits (plain jnp: M=B, N<=4) ---
    gap_logit = avg_p @ params["gap_fc_w"].T                        # (B, 1)
    gmp_logit = max_p @ params["gmp_fc_w"].T                        # (B, 1)
    cam_logit = jnp.concatenate([gap_logit, gmp_logit], axis=1)     # (B, 2)
    gap_logit_2 = avg_p @ params["gap_fc_2_w"].T                    # (B, 4)
    gmp_logit_2 = max_p @ params["gmp_fc_2_w"].T                    # (B, 4)
    gla = gap_logit_2 @ params["lina_w"].T
    glm = gmp_logit_2 @ params["linm_w"].T
    cam_logit_2 = jax.nn.softmax((gla + glm) * 0.5, axis=1)         # mean over dim 2

    # --- CAM branch 1: fused attention + conv1x1 + residual + heatmap ---
    w1x1 = params["conv1x1_w"][:, :, 0, 0]                          # (C, 2C)
    xres_flat, heat1 = cam_branch1(x0_flat, params["gap_fc_w"][0],
                                   params["gmp_fc_w"][0], w1x1,
                                   params["conv1x1_b"], params["lamda"])
    heatmap_1 = heat1.reshape(Bn, OH, OW)[:, None]

    # (lamda_2 * x0 + x0 is computed in torch but never used downstream)

    # --- CAM branch 2: 4 branches in one pallas_call ---
    w121 = params["conv1x121_w"][:, :, 0, 0].T                      # (C, C)
    w122 = params["conv1x122_w"][:, :, 0, 0].T
    w2s = jnp.stack([w[:, :, 0, 0] for w in params["conv1x1_2_w"]], axis=0)  # (4, C, 2C)
    w2t = jnp.transpose(w2s[:, :, :C], (0, 2, 1))                   # (4, C, C)
    w2b = jnp.transpose(w2s[:, :, C:], (0, 2, 1))
    b2s = jnp.stack(params["conv1x1_2_b"], axis=0)                  # (4, C)
    xi_all, heat2 = cam_branch2(x0_flat, params["gap_fc_2_w"], params["gmp_fc_2_w"],
                                w121, params["conv1x121_b"],
                                w122, params["conv1x122_b"], w2t, w2b, b2s)
    heat2 = heat2.reshape(4, Bn, OH, OW)

    # --- five 4x4 head convs (branch-1 `out` + 4 branch-2) in one batched call ---
    imgs = jnp.concatenate([xres_flat.reshape(1, Bn, OH, OW, C),
                            xi_all.reshape(4, Bn, OH, OW, C)], axis=0)
    imgs_p = jnp.pad(imgs, ((0, 0), (0, 0), (1, 1), (1, 1), (0, 0)), mode="reflect")
    OHc, OWc = OH - 1, OW - 1
    cols = [imgs_p[:, :, i:i + OHc, j:j + OWc, :] for i in range(4) for j in range(4)]
    A5 = jnp.concatenate(cols, axis=-1).reshape(5, Bn * OHc * OWc, 16 * C)
    w_all = jnp.stack([params["conv_w"]] + list(params["conv_2_w"]), axis=0)  # (5,1,C,4,4)
    W5 = jnp.transpose(w_all[:, 0], (0, 2, 3, 1)).reshape(5, 16 * C, 1)
    O5 = head_convs(A5, W5)                                          # (5, B*7*7, 1)

    out = jnp.transpose(O5[0].reshape(Bn, OHc, OWc, 1), (0, 3, 1, 2))  # (B, 1, 7, 7)
    out_2 = jax.nn.softmax(
        jnp.transpose(O5[1:].reshape(4, Bn, OHc * OWc).mean(axis=-1)), axis=1)  # (B, 4)

    return (contra, out, cam_logit, out_2, cam_logit_2,
            heatmap_0, heatmap_1,
            heat2[0], heat2[1], heat2[2], heat2[3])


# ---------------------------------------------------------------------------
# Demo
# ---------------------------------------------------------------------------

if __name__ == "__main__":
    key = jax.random.PRNGKey(0)
    k_param, k_in = jax.random.split(key)

    input_nc, ndf = 4, 8                  # small config (feature dim ndf*8 = 64)
    params = init_params(k_param, input_nc=input_nc, ndf=ndf)

    # input: NCHW, 64x64 so the backbone output is 8x8 (matches adaptive pool to 8)
    x = jax.random.normal(k_in, (2, input_nc, 64, 64), jnp.float32)

    fwd = jax.jit(discriminator_forward)
    outputs = fwd(params, x)
    jax.block_until_ready(outputs)

    # sanity on shapes (mirrors the PyTorch return tuple)
    assert outputs[0].shape == (2, 1, 512)      # contra
    assert outputs[1].shape == (2, 1, 7, 7)     # out
    assert outputs[2].shape == (2, 2)           # cam_logit
    assert outputs[3].shape == (2, 4)           # out_2
    assert outputs[4].shape == (2, 4)           # cam_logit_2
    assert outputs[5].shape == (2, 1, 8, 8)     # heatmap_0
    assert outputs[6].shape == (2, 1, 8, 8)     # heatmap_1
    for t in outputs[7:]:
        assert t.shape == (2, 8, 8)             # heatmap_2[:, i]

    print("KERNEL_OK")
</pallas_src>

<mosaic_0001>
module attributes {stable_mosaic.version = 11 : i64} {
  func.func @_conv_mm_kernel(%arg0: i32, %arg1: memref<1024x64xf32, #tpu.memory_space<vmem>>, %arg2: memref<64x8xf32, #tpu.memory_space<vmem>>, %arg3: memref<1x8xf32, #tpu.memory_space<vmem>>, %arg4: memref<1024x8xf32, #tpu.memory_space<vmem>>) attributes {dimension_semantics = [#tpu.dimension_semantics<parallel>], iteration_bounds = array<i64: 2>, scalar_prefetch = 0 : i64, scratch_operands = 0 : i64, tpu.core_type = #tpu.core_type<tc>, window_params = [{transform_indices = @transform_0, window_bounds = array<i64: 1024, 64>}, {pipeline_mode = #tpu.pipeline_mode<synchronous>, transform_indices = @transform_1, window_bounds = array<i64: 64, 8>}, {pipeline_mode = #tpu.pipeline_mode<synchronous>, transform_indices = @transform_2, window_bounds = array<i64: 1, 8>}, {transform_indices = @transform_3, window_bounds = array<i64: 1024, 8>}]} {
    %c0 = arith.constant 0 : index
    %c0_0 = arith.constant 0 : index
    %0 = vector.load %arg1[%c0, %c0_0] : memref<1024x64xf32, #tpu.memory_space<vmem>>, vector<1024x64xf32>
    %c0_1 = arith.constant 0 : index
    %c0_2 = arith.constant 0 : index
    %1 = vector.load %arg2[%c0_1, %c0_2] : memref<64x8xf32, #tpu.memory_space<vmem>>, vector<64x8xf32>
    %cst = arith.constant dense<0.000000e+00> : vector<1024x8xf32>
    %2 = tpu.matmul %0, %1, %cst {dimension_numbers = #tpu.dot_dimension_numbers<[1], [0], [0], [1], [0, 0, 1, 1], [], []>} : vector<1024x64xf32>, vector<64x8xf32>, vector<1024x8xf32> -> vector<1024x8xf32>
    %c0_3 = arith.constant 0 : index
    %c0_4 = arith.constant 0 : index
    %3 = vector.load %arg3[%c0_3, %c0_4] : memref<1x8xf32, #tpu.memory_space<vmem>>, vector<1x8xf32>
    %4 = vector.broadcast %3 : vector<1x8xf32> to vector<1024x8xf32>
    %5 = arith.addf %2, %4 : vector<1024x8xf32>
    %cst_5 = arith.constant 0.000000e+00 : f32
    %6 = vector.broadcast %cst_5 : f32 to vector<1024x8xf32>
    %7 = arith.cmpf oge, %5, %6 : vector<1024x8xf32>
    %cst_6 = arith.constant 2.000000e-01 : f32
    %8 = vector.broadcast %cst_6 : f32 to vector<1024x8xf32>
    %9 = arith.mulf %8, %5 : vector<1024x8xf32>
    %10 = arith.select %7, %5, %9 : vector<1024x8xi1>, vector<1024x8xf32>
    %c0_7 = arith.constant 0 : index
    %c0_8 = arith.constant 0 : index
    %11 = vector.load %arg4[%c0_7, %c0_8] : memref<1024x8xf32, #tpu.memory_space<vmem>>, vector<1024x8xf32>
    tpu.vector_store %arg4[%c0_7, %c0_8], %10 {strides = array<i32>} : memref<1024x8xf32, #tpu.memory_space<vmem>>, vector<1024x8xf32>,
    return
  }
  func.func @transform_0(%arg0: i32) -> (i32, i32) {
    %c0_i32 = arith.constant 0 : i32
    %c0_i32_0 = arith.constant 0 : i32
    return %arg0, %c0_i32 : i32, i32
  }
  func.func @transform_1(%arg0: i32) -> (i32, i32) {
    %c0_i32 = arith.constant 0 : i32
    %c0_i32_0 = arith.constant 0 : i32
    %c0_i32_1 = arith.constant 0 : i32
    return %c0_i32, %c0_i32_0 : i32, i32
  }
  func.func @transform_2(%arg0: i32) -> (i32, i32) {
    %c0_i32 = arith.constant 0 : i32
    %c0_i32_0 = arith.constant 0 : i32
    %c0_i32_1 = arith.constant 0 : i32
    return %c0_i32, %c0_i32_0 : i32, i32
  }
  func.func @transform_3(%arg0: i32) -> (i32, i32) {
    %c0_i32 = arith.constant 0 : i32
    %c0_i32_0 = arith.constant 0 : i32
    return %arg0, %c0_i32 : i32, i32
  }
}

module attributes {stable_mosaic.version = 11 : i64} {
  func.func @_conv_mm_kernel(%arg0: i32, %arg1: memref<512x128xf32, #tpu.memory_space<vmem>>, %arg2: memref<128x16xf32, #tpu.memory_space<vmem>>, %arg3: memref<1x16xf32, #tpu.memory_space<vmem>>, %arg4: memref<512x16xf32, #tpu.memory_space<vmem>>) attributes {dimension_semantics = [#tpu.dimension_semantics<parallel>], iteration_bounds = array<i64: 1>, scalar_prefetch = 0 : i64, scratch_operands = 0 : i64, tpu.core_type = #tpu.core_type<tc>, window_params = [{transform_indices = @transform_0, window_bounds = array<i64: 512, 128>}, {pipeline_mode = #tpu.pipeline_mode<synchronous>, transform_indices = @transform_1, window_bounds = array<i64: 128, 16>}, {pipeline_mode = #tpu.pipeline_mode<synchronous>, transform_indices = @transform_2, window_bounds = array<i64: 1, 16>}, {transform_indices = @transform_3, window_bounds = array<i64: 512, 16>}]} {
    %c0 = arith.constant 0 : index
    %c0_0 = arith.constant 0 : index
    %0 = vector.load %arg1[%c0, %c0_0] : memref<512x128xf32, #tpu.memory_space<vmem>>, vector<512x128xf32>
    %c0_1 = arith.constant 0 : index
    %c0_2 = arith.constant 0 : index
    %1 = vector.load %arg2[%c0_1, %c0_2] : memref<128x16xf32, #tpu.memory_space<vmem>>, vector<128x16xf32>
    %cst = arith.constant dense<0.000000e+00> : vector<512x16xf32>
    %2 = tpu.matmul %0, %1, %cst {dimension_numbers = #tpu.dot_dimension_numbers<[1], [0], [0], [1], [0, 0, 1, 1], [], []>} : vector<512x128xf32>, vector<128x16xf32>, vector<512x16xf32> -> vector<512x16xf32>
    %c0_3 = arith.constant 0 : index
    %c0_4 = arith.constant 0 : index
    %3 = vector.load %arg3[%c0_3, %c0_4] : memref<1x16xf32, #tpu.memory_space<vmem>>, vector<1x16xf32>
    %4 = vector.broadcast %3 : vector<1x16xf32> to vector<512x16xf32>
    %5 = arith.addf %2, %4 : vector<512x16xf32>
    %cst_5 = arith.constant 0.000000e+00 : f32
    %6 = vector.broadcast %cst_5 : f32 to vector<512x16xf32>
    %7 = arith.cmpf oge, %5, %6 : vector<512x16xf32>
    %cst_6 = arith.constant 2.000000e-01 : f32
    %8 = vector.broadcast %cst_6 : f32 to vector<512x16xf32>
    %9 = arith.mulf %8, %5 : vector<512x16xf32>
    %10 = arith.select %7, %5, %9 : vector<512x16xi1>, vector<512x16xf32>
    %c0_7 = arith.constant 0 : index
    %c0_8 = arith.constant 0 : index
    %11 = vector.load %arg4[%c0_7, %c0_8] : memref<512x16xf32, #tpu.memory_space<vmem>>, vector<512x16xf32>
    tpu.vector_store %arg4[%c0_7, %c0_8], %10 {strides = array<i32>} : memref<512x16xf32, #tpu.memory_space<vmem>>, vector<512x16xf32>,
    return
  }
  func.func @transform_0(%arg0: i32) -> (i32, i32) {
    %c0_i32 = arith.constant 0 : i32
    %c0_i32_0 = arith.constant 0 : i32
    return %arg0, %c0_i32 : i32, i32
  }
  func.func @transform_1(%arg0: i32) -> (i32, i32) {
    %c0_i32 = arith.constant 0 : i32
    %c0_i32_0 = arith.constant 0 : i32
    %c0_i32_1 = arith.constant 0 : i32
    return %c0_i32, %c0_i32_0 : i32, i32
  }
  func.func @transform_2(%arg0: i32) -> (i32, i32) {
    %c0_i32 = arith.constant 0 : i32
    %c0_i32_0 = arith.constant 0 : i32
    %c0_i32_1 = arith.constant 0 : i32
    return %c0_i32, %c0_i32_0 : i32, i32
  }
  func.func @transform_3(%arg0: i32) -> (i32, i32) {
    %c0_i32 = arith.constant 0 : i32
    %c0_i32_0 = arith.constant 0 : i32
    return %arg0, %c0_i32 : i32, i32
  }
}

module attributes {stable_mosaic.version = 11 : i64} {
  func.func @_conv_mm_kernel(%arg0: i32, %arg1: memref<128x256xf32, #tpu.memory_space<vmem>>, %arg2: memref<256x32xf32, #tpu.memory_space<vmem>>, %arg3: memref<1x32xf32, #tpu.memory_space<vmem>>, %arg4: memref<128x32xf32, #tpu.memory_space<vmem>>) attributes {dimension_semantics = [#tpu.dimension_semantics<parallel>], iteration_bounds = array<i64: 1>, scalar_prefetch = 0 : i64, scratch_operands = 0 : i64, tpu.core_type = #tpu.core_type<tc>, window_params = [{transform_indices = @transform_0, window_bounds = array<i64: 128, 256>}, {pipeline_mode = #tpu.pipeline_mode<synchronous>, transform_indices = @transform_1, window_bounds = array<i64: 256, 32>}, {pipeline_mode = #tpu.pipeline_mode<synchronous>, transform_indices = @transform_2, window_bounds = array<i64: 1, 32>}, {transform_indices = @transform_3, window_bounds = array<i64: 128, 32>}]} {
    %c0 = arith.constant 0 : index
    %c0_0 = arith.constant 0 : index
    %0 = vector.load %arg1[%c0, %c0_0] : memref<128x256xf32, #tpu.memory_space<vmem>>, vector<128x256xf32>
    %c0_1 = arith.constant 0 : index
    %c0_2 = arith.constant 0 : index
    %1 = vector.load %arg2[%c0_1, %c0_2] : memref<256x32xf32, #tpu.memory_space<vmem>>, vector<256x32xf32>
    %cst = arith.constant dense<0.000000e+00> : vector<128x32xf32>
    %2 = tpu.matmul %0, %1, %cst {dimension_numbers = #tpu.dot_dimension_numbers<[1], [0], [0], [1], [0, 0, 1, 1], [], []>} : vector<128x256xf32>, vector<256x32xf32>, vector<128x32xf32> -> vector<128x32xf32>
    %c0_3 = arith.constant 0 : index
    %c0_4 = arith.constant 0 : index
    %3 = vector.load %arg3[%c0_3, %c0_4] : memref<1x32xf32, #tpu.memory_space<vmem>>, vector<1x32xf32>
    %4 = vector.broadcast %3 : vector<1x32xf32> to vector<128x32xf32>
    %5 = arith.addf %2, %4 : vector<128x32xf32>
    %cst_5 = arith.constant 0.000000e+00 : f32
    %6 = vector.broadcast %cst_5 : f32 to vector<128x32xf32>
    %7 = arith.cmpf oge, %5, %6 : vector<128x32xf32>
    %cst_6 = arith.constant 2.000000e-01 : f32
    %8 = vector.broadcast %cst_6 : f32 to vector<128x32xf32>
    %9 = arith.mulf %8, %5 : vector<128x32xf32>
    %10 = arith.select %7, %5, %9 : vector<128x32xi1>, vector<128x32xf32>
    %c0_7 = arith.constant 0 : index
    %c0_8 = arith.constant 0 : index
    %11 = vector.load %arg4[%c0_7, %c0_8] : memref<128x32xf32, #tpu.memory_space<vmem>>, vector<128x32xf32>
    tpu.vector_store %arg4[%c0_7, %c0_8], %10 {strides = array<i32>} : memref<128x32xf32, #tpu.memory_space<vmem>>, vector<128x32xf32>,
    return
  }
  func.func @transform_0(%arg0: i32) -> (i32, i32) {
    %c0_i32 = arith.constant 0 : i32
    %c0_i32_0 = arith.constant 0 : i32
    return %arg0, %c0_i32 : i32, i32
  }
  func.func @transform_1(%arg0: i32) -> (i32, i32) {
    %c0_i32 = arith.constant 0 : i32
    %c0_i32_0 = arith.constant 0 : i32
    %c0_i32_1 = arith.constant 0 : i32
    return %c0_i32, %c0_i32_0 : i32, i32
  }
  func.func @transform_2(%arg0: i32) -> (i32, i32) {
    %c0_i32 = arith.constant 0 : i32
    %c0_i32_0 = arith.constant 0 : i32
    %c0_i32_1 = arith.constant 0 : i32
    return %c0_i32, %c0_i32_0 : i32, i32
  }
  func.func @transform_3(%arg0: i32) -> (i32, i32) {
    %c0_i32 = arith.constant 0 : i32
    %c0_i32_0 = arith.constant 0 : i32
    return %arg0, %c0_i32 : i32, i32
  }
}

module attributes {stable_mosaic.version = 11 : i64} {
  func.func @_conv3_stats_kernel(%arg0: memref<128x288xf32, #tpu.memory_space<vmem>>, %arg1: memref<288x64xf32, #tpu.memory_space<vmem>>, %arg2: memref<1x64xf32, #tpu.memory_space<vmem>>, %arg3: memref<128x64xf32, #tpu.memory_space<vmem>>, %arg4: memref<128x1xf32, #tpu.memory_space<vmem>>, %arg5: memref<2x64xf32, #tpu.memory_space<vmem>>, %arg6: memref<2x64xf32, #tpu.memory_space<vmem>>) attributes {dimension_semantics = [], scalar_prefetch = 0 : i64, scratch_operands = 0 : i64, tpu.core_type = #tpu.core_type<tc>} {
    %c0 = arith.constant 0 : index
    %c0_0 = arith.constant 0 : index
    %0 = vector.load %arg0[%c0, %c0_0] : memref<128x288xf32, #tpu.memory_space<vmem>>, vector<128x288xf32>
    %c0_1 = arith.constant 0 : index
    %c0_2 = arith.constant 0 : index
    %1 = vector.load %arg1[%c0_1, %c0_2] : memref<288x64xf32, #tpu.memory_space<vmem>>, vector<288x64xf32>
    %cst = arith.constant dense<0.000000e+00> : vector<128x64xf32>
    %2 = tpu.matmul %0, %1, %cst {dimension_numbers = #tpu.dot_dimension_numbers<[1], [0], [0], [1], [0, 0, 1, 1], [], []>} : vector<128x288xf32>, vector<288x64xf32>, vector<128x64xf32> -> vector<128x64xf32>
    %c0_3 = arith.constant 0 : index
    %c0_4 = arith.constant 0 : index
    %3 = vector.load %arg2[%c0_3, %c0_4] : memref<1x64xf32, #tpu.memory_space<vmem>>, vector<1x64xf32>
    %4 = vector.broadcast %3 : vector<1x64xf32> to vector<128x64xf32>
    %5 = arith.addf %2, %4 : vector<128x64xf32>
    %cst_5 = arith.constant 0.000000e+00 : f32
    %6 = vector.broadcast %cst_5 : f32 to vector<128x64xf32>
    %7 = arith.cmpf oge, %5, %6 : vector<128x64xf32>
    %cst_6 = arith.constant 2.000000e-01 : f32
    %8 = vector.broadcast %cst_6 : f32 to vector<128x64xf32>
    %9 = arith.mulf %8, %5 : vector<128x64xf32>
    %10 = arith.select %7, %5, %9 : vector<128x64xi1>, vector<128x64xf32>
    %c0_7 = arith.constant 0 : index
    %c0_8 = arith.constant 0 : index
    %11 = vector.load %arg3[%c0_7, %c0_8] : memref<128x64xf32, #tpu.memory_space<vmem>>, vector<128x64xf32>
    tpu.vector_store %arg3[%c0_7, %c0_8], %10 {strides = array<i32>} : memref<128x64xf32, #tpu.memory_space<vmem>>, vector<128x64xf32>,
    %cst_9 = arith.constant dense<0.000000e+00> : vector<128xf32>
    %12 = vector.multi_reduction <add>, %10, %cst_9 [1] : vector<128x64xf32> to vector<128xf32>
    %13 = vector.shape_cast %12 : vector<128xf32> to vector<128x1xf32>
    %c0_10 = arith.constant 0 : index
    %c0_11 = arith.constant 0 : index
    %14 = vector.load %arg4[%c0_10, %c0_11] : memref<128x1xf32, #tpu.memory_space<vmem>>, vector<128x1xf32>
    tpu.vector_store %arg4[%c0_10, %c0_11], %13 {strides = array<i32>} : memref<128x1xf32, #tpu.memory_space<vmem>>, vector<128x1xf32>,
    %15 = vector.extract_strided_slice %10 {offsets = [0, 0], sizes = [64, 64], strides = [1, 1]} : vector<128x64xf32> to vector<64x64xf32>
    %cst_12 = arith.constant dense<0.000000e+00> : vector<64xf32>
    %16 = vector.multi_reduction <add>, %15, %cst_12 [0] : vector<64x64xf32> to vector<64xf32>
    %17 = vector.shape_cast %16 : vector<64xf32> to vector<1x64xf32>
    %cst_13 = arith.constant 6.400000e+01 : f32
    %18 = vector.broadcast %cst_13 : f32 to vector<1x64xf32>
    %19 = arith.divf %17, %18 : vector<1x64xf32>
    %c0_14 = arith.constant 0 : index
    %c0_15 = arith.constant 0 : index
    %20 = vector.load %arg5[%c0_14, %c0_15] : memref<2x64xf32, #tpu.memory_space<vmem>>, vector<1x64xf32>
    tpu.vector_store %arg5[%c0_14, %c0_15], %19 {strides = array<i32>} : memref<2x64xf32, #tpu.memory_space<vmem>>, vector<1x64xf32>,
    %cst_16 = arith.constant dense<0xFF800000> : vector<64xf32>
    %21 = vector.multi_reduction <maximumf>, %15, %cst_16 [0] : vector<64x64xf32> to vector<64xf32>
    %22 = vector.shape_cast %21 : vector<64xf32> to vector<1x64xf32>
    %c0_17 = arith.constant 0 : index
    %c0_18 = arith.constant 0 : index
    %23 = vector.load %arg6[%c0_17, %c0_18] : memref<2x64xf32, #tpu.memory_space<vmem>>, vector<1x64xf32>
    tpu.vector_store %arg6[%c0_17, %c0_18], %22 {strides = array<i32>} : memref<2x64xf32, #tpu.memory_space<vmem>>, vector<1x64xf32>,
    %24 = vector.extract_strided_slice %10 {offsets = [64, 0], sizes = [64, 64], strides = [1, 1]} : vector<128x64xf32> to vector<64x64xf32>
    %cst_19 = arith.constant dense<0.000000e+00> : vector<64xf32>
    %25 = vector.multi_reduction <add>, %24, %cst_19 [0] : vector<64x64xf32> to vector<64xf32>
    %26 = vector.shape_cast %25 : vector<64xf32> to vector<1x64xf32>
    %cst_20 = arith.constant 6.400000e+01 : f32
    %27 = vector.broadcast %cst_20 : f32 to vector<1x64xf32>
    %28 = arith.divf %26, %27 : vector<1x64xf32>
    %c1 = arith.constant 1 : index
    %c0_21 = arith.constant 0 : index
    %29 = vector.load %arg5[%c1, %c0_21] : memref<2x64xf32, #tpu.memory_space<vmem>>, vector<1x64xf32>
    tpu.vector_store %arg5[%c1, %c0_21], %28 {strides = array<i32>} : memref<2x64xf32, #tpu.memory_space<vmem>>, vector<1x64xf32>,
    %cst_22 = arith.constant dense<0xFF800000> : vector<64xf32>
    %30 = vector.multi_reduction <maximumf>, %24, %cst_22 [0] : vector<64x64xf32> to vector<64xf32>
    %31 = vector.shape_cast %30 : vector<64xf32> to vector<1x64xf32>
    %c1_23 = arith.constant 1 : index
    %c0_24 = arith.constant 0 : index
    %32 = vector.load %arg6[%c1_23, %c0_24] : memref<2x64xf32, #tpu.memory_space<vmem>>, vector<1x64xf32>
    tpu.vector_store %arg6[%c1_23, %c0_24], %31 {strides = array<i32>} : memref<2x64xf32, #tpu.memory_space<vmem>>, vector<1x64xf32>,
    return
  }
}

module attributes {stable_mosaic.version = 11 : i64} {
  func.func @_cam1_kernel(%arg0: memref<128x64xf32, #tpu.memory_space<vmem>>, %arg1: memref<1x64xf32, #tpu.memory_space<vmem>>, %arg2: memref<1x64xf32, #tpu.memory_space<vmem>>, %arg3: memref<64x64xf32, #tpu.memory_space<vmem>>, %arg4: memref<64x64xf32, #tpu.memory_space<vmem>>, %arg5: memref<1x64xf32, #tpu.memory_space<vmem>>, %arg6: memref<1x1xf32, #tpu.memory_space<vmem>>, %arg7: memref<128x64xf32, #tpu.memory_space<vmem>>, %arg8: memref<128x1xf32, #tpu.memory_space<vmem>>) attributes {dimension_semantics = [], scalar_prefetch = 0 : i64, scratch_operands = 0 : i64, tpu.core_type = #tpu.core_type<tc>} {
    %c0 = arith.constant 0 : index
    %c0_0 = arith.constant 0 : index
    %0 = vector.load %arg0[%c0, %c0_0] : memref<128x64xf32, #tpu.memory_space<vmem>>, vector<128x64xf32>
    %c0_1 = arith.constant 0 : index
    %c0_2 = arith.constant 0 : index
    %1 = vector.load %arg1[%c0_1, %c0_2] : memref<1x64xf32, #tpu.memory_space<vmem>>, vector<1x64xf32>
    %2 = vector.broadcast %1 : vector<1x64xf32> to vector<128x64xf32>
    %3 = arith.mulf %0, %2 : vector<128x64xf32>
    %c0_3 = arith.constant 0 : index
    %c0_4 = arith.constant 0 : index
    %4 = vector.load %arg2[%c0_3, %c0_4] : memref<1x64xf32, #tpu.memory_space<vmem>>, vector<1x64xf32>
    %5 = vector.broadcast %4 : vector<1x64xf32> to vector<128x64xf32>
    %6 = arith.mulf %0, %5 : vector<128x64xf32>
    %c0_5 = arith.constant 0 : index
    %c0_6 = arith.constant 0 : index
    %7 = vector.load %arg3[%c0_5, %c0_6] : memref<64x64xf32, #tpu.memory_space<vmem>>, vector<64x64xf32>
    %cst = arith.constant dense<0.000000e+00> : vector<128x64xf32>
    %8 = tpu.matmul %3, %7, %cst {dimension_numbers = #tpu.dot_dimension_numbers<[1], [0], [0], [1], [0, 0, 1, 1], [], []>} : vector<128x64xf32>, vector<64x64xf32>, vector<128x64xf32> -> vector<128x64xf32>
    %c0_7 = arith.constant 0 : index
    %c0_8 = arith.constant 0 : index
    %9 = vector.load %arg4[%c0_7, %c0_8] : memref<64x64xf32, #tpu.memory_space<vmem>>, vector<64x64xf32>
    %cst_9 = arith.constant dense<0.000000e+00> : vector<128x64xf32>
    %10 = tpu.matmul %6, %9, %cst_9 {dimension_numbers = #tpu.dot_dimension_numbers<[1], [0], [0], [1], [0, 0, 1, 1], [], []>} : vector<128x64xf32>, vector<64x64xf32>, vector<128x64xf32> -> vector<128x64xf32>
    %11 = arith.addf %8, %10 : vector<128x64xf32>
    %c0_10 = arith.constant 0 : index
    %c0_11 = arith.constant 0 : index
    %12 = vector.load %arg5[%c0_10, %c0_11] : memref<1x64xf32, #tpu.memory_space<vmem>>, vector<1x64xf32>
    %13 = vector.broadcast %12 : vector<1x64xf32> to vector<128x64xf32>
    %14 = arith.addf %11, %13 : vector<128x64xf32>
    %cst_12 = arith.constant 0.000000e+00 : f32
    %15 = vector.broadcast %cst_12 : f32 to vector<128x64xf32>
    %16 = arith.cmpf oge, %14, %15 : vector<128x64xf32>
    %cst_13 = arith.constant 2.000000e-01 : f32
    %17 = vector.broadcast %cst_13 : f32 to vector<128x64xf32>
    %18 = arith.mulf %17, %14 : vector<128x64xf32>
    %19 = arith.select %16, %14, %18 : vector<128x64xi1>, vector<128x64xf32>
    %c0_14 = arith.constant 0 : index
    %c0_15 = arith.constant 0 : index
    %20 = vector.load %arg6[%c0_14, %c0_15] : memref<1x1xf32, #tpu.memory_space<vmem>>, vector<1x1xf32>
    %21 = vector.broadcast %20 : vector<1x1xf32> to vector<128x64xf32>
    %22 = arith.mulf %21, %19 : vector<128x64xf32>
    %23 = arith.addf %22, %0 : vector<128x64xf32>
    %c0_16 = arith.constant 0 : index
    %c0_17 = arith.constant 0 : index
    %24 = vector.load %arg7[%c0_16, %c0_17] : memref<128x64xf32, #tpu.memory_space<vmem>>, vector<128x64xf32>
    tpu.vector_store %arg7[%c0_16, %c0_17], %23 {strides = array<i32>} : memref<128x64xf32, #tpu.memory_space<vmem>>, vector<128x64xf32>,
    %cst_18 = arith.constant dense<0.000000e+00> : vector<128xf32>
    %25 = vector.multi_reduction <add>, %23, %cst_18 [1] : vector<128x64xf32> to vector<128xf32>
    %26 = vector.shape_cast %25 : vector<128xf32> to vector<128x1xf32>
    %c0_19 = arith.constant 0 : index
    %c0_20 = arith.constant 0 : index
    %27 = vector.load %arg8[%c0_19, %c0_20] : memref<128x1xf32, #tpu.memory_space<vmem>>, vector<128x1xf32>
    tpu.vector_store %arg8[%c0_19, %c0_20], %26 {strides = array<i32>} : memref<128x1xf32, #tpu.memory_space<vmem>>, vector<128x1xf32>,
    return
  }
}

module attributes {stable_mosaic.version = 11 : i64} {
  func.func @_cam2_kernel(%arg0: i32, %arg1: memref<128x64xf32, #tpu.memory_space<vmem>>, %arg2: memref<1x1x64xf32, #tpu.memory_space<vmem>>, %arg3: memref<1x1x64xf32, #tpu.memory_space<vmem>>, %arg4: memref<64x64xf32, #tpu.memory_space<vmem>>, %arg5: memref<1x64xf32, #tpu.memory_space<vmem>>, %arg6: memref<64x64xf32, #tpu.memory_space<vmem>>, %arg7: memref<1x64xf32, #tpu.memory_space<vmem>>, %arg8: memref<1x64x64xf32, #tpu.memory_space<vmem>>, %arg9: memref<1x64x64xf32, #tpu.memory_space<vmem>>, %arg10: memref<1x1x64xf32, #tpu.memory_space<vmem>>, %arg11: memref<1x128x64xf32, #tpu.memory_space<vmem>>, %arg12: memref<1x128x1xf32, #tpu.memory_space<vmem>>) attributes {dimension_semantics = [#tpu.dimension_semantics<parallel>], iteration_bounds = array<i64: 4>, scalar_prefetch = 0 : i64, scratch_operands = 0 : i64, tpu.core_type = #tpu.core_type<tc>, window_params = [{pipeline_mode = #tpu.pipeline_mode<synchronous>, transform_indices = @transform_0, window_bounds = array<i64: 128, 64>}, {transform_indices = @transform_1, window_bounds = array<i64: 1, 1, 64>}, {transform_indices = @transform_2, window_bounds = array<i64: 1, 1, 64>}, {pipeline_mode = #tpu.pipeline_mode<synchronous>, transform_indices = @transform_3, window_bounds = array<i64: 64, 64>}, {pipeline_mode = #tpu.pipeline_mode<synchronous>, transform_indices = @transform_4, window_bounds = array<i64: 1, 64>}, {pipeline_mode = #tpu.pipeline_mode<synchronous>, transform_indices = @transform_5, window_bounds = array<i64: 64, 64>}, {pipeline_mode = #tpu.pipeline_mode<synchronous>, transform_indices = @transform_6, window_bounds = array<i64: 1, 64>}, {transform_indices = @transform_7, window_bounds = array<i64: 1, 64, 64>}, {transform_indices = @transform_8, window_bounds = array<i64: 1, 64, 64>}, {transform_indices = @transform_9, window_bounds = array<i64: 1, 1, 64>}, {transform_indices = @transform_10, window_bounds = array<i64: 1, 128, 64>}, {transform_indices = @transform_11, window_bounds = array<i64: 1, 128, 1>}]} {
    %c0 = arith.constant 0 : index
    %c0_0 = arith.constant 0 : index
    %0 = vector.load %arg1[%c0, %c0_0] : memref<128x64xf32, #tpu.memory_space<vmem>>, vector<128x64xf32>
    %c0_1 = arith.constant 0 : index
    %c0_2 = arith.constant 0 : index
    %c0_3 = arith.constant 0 : index
    %1 = vector.load %arg2[%c0_1, %c0_2, %c0_3] : memref<1x1x64xf32, #tpu.memory_space<vmem>>, vector<1x1x64xf32>
    %2 = vector.shape_cast %1 : vector<1x1x64xf32> to vector<1x64xf32>
    %3 = vector.broadcast %2 : vector<1x64xf32> to vector<128x64xf32>
    %4 = arith.mulf %0, %3 : vector<128x64xf32>
    %c0_4 = arith.constant 0 : index
    %c0_5 = arith.constant 0 : index
    %c0_6 = arith.constant 0 : index
    %5 = vector.load %arg3[%c0_4, %c0_5, %c0_6] : memref<1x1x64xf32, #tpu.memory_space<vmem>>, vector<1x1x64xf32>
    %6 = vector.shape_cast %5 : vector<1x1x64xf32> to vector<1x64xf32>
    %7 = vector.broadcast %6 : vector<1x64xf32> to vector<128x64xf32>
    %8 = arith.mulf %0, %7 : vector<128x64xf32>
    %c0_7 = arith.constant 0 : index
    %c0_8 = arith.constant 0 : index
    %9 = vector.load %arg4[%c0_7, %c0_8] : memref<64x64xf32, #tpu.memory_space<vmem>>, vector<64x64xf32>
    %cst = arith.constant dense<0.000000e+00> : vector<128x64xf32>
    %10 = tpu.matmul %4, %9, %cst {dimension_numbers = #tpu.dot_dimension_numbers<[1], [0], [0], [1], [0, 0, 1, 1], [], []>} : vector<128x64xf32>, vector<64x64xf32>, vector<128x64xf32> -> vector<128x64xf32>
    %c0_9 = arith.constant 0 : index
    %c0_10 = arith.constant 0 : index
    %11 = vector.load %arg5[%c0_9, %c0_10] : memref<1x64xf32, #tpu.memory_space<vmem>>, vector<1x64xf32>
    %12 = vector.broadcast %11 : vector<1x64xf32> to vector<128x64xf32>
    %13 = arith.addf %10, %12 : vector<128x64xf32>
    %cst_11 = arith.constant 0.000000e+00 : f32
    %14 = vector.broadcast %cst_11 : f32 to vector<128x64xf32>
    %15 = arith.cmpf oge, %13, %14 : vector<128x64xf32>
    %cst_12 = arith.constant 2.000000e-01 : f32
    %16 = vector.broadcast %cst_12 : f32 to vector<128x64xf32>
    %17 = arith.mulf %16, %13 : vector<128x64xf32>
    %18 = arith.select %15, %13, %17 : vector<128x64xi1>, vector<128x64xf32>
    %c0_13 = arith.constant 0 : index
    %c0_14 = arith.constant 0 : index
    %19 = vector.load %arg6[%c0_13, %c0_14] : memref<64x64xf32, #tpu.memory_space<vmem>>, vector<64x64xf32>
    %cst_15 = arith.constant dense<0.000000e+00> : vector<128x64xf32>
    %20 = tpu.matmul %8, %19, %cst_15 {dimension_numbers = #tpu.dot_dimension_numbers<[1], [0], [0], [1], [0, 0, 1, 1], [], []>} : vector<128x64xf32>, vector<64x64xf32>, vector<128x64xf32> -> vector<128x64xf32>
    %c0_16 = arith.constant 0 : index
    %c0_17 = arith.constant 0 : index
    %21 = vector.load %arg7[%c0_16, %c0_17] : memref<1x64xf32, #tpu.memory_space<vmem>>, vector<1x64xf32>
    %22 = vector.broadcast %21 : vector<1x64xf32> to vector<128x64xf32>
    %23 = arith.addf %20, %22 : vector<128x64xf32>
    %cst_18 = arith.constant 0.000000e+00 : f32
    %24 = vector.broadcast %cst_18 : f32 to vector<128x64xf32>
    %25 = arith.cmpf oge, %23, %24 : vector<128x64xf32>
    %cst_19 = arith.constant 2.000000e-01 : f32
    %26 = vector.broadcast %cst_19 : f32 to vector<128x64xf32>
    %27 = arith.mulf %26, %23 : vector<128x64xf32>
    %28 = arith.select %25, %23, %27 : vector<128x64xi1>, vector<128x64xf32>
    %c0_20 = arith.constant 0 : index
    %c0_21 = arith.constant 0 : index
    %c0_22 = arith.constant 0 : index
    %29 = vector.load %arg8[%c0_20, %c0_21, %c0_22] : memref<1x64x64xf32, #tpu.memory_space<vmem>>, vector<1x64x64xf32>
    %30 = vector.shape_cast %29 : vector<1x64x64xf32> to vector<64x64xf32>
    %cst_23 = arith.constant dense<0.000000e+00> : vector<128x64xf32>
    %31 = tpu.matmul %18, %30, %cst_23 {dimension_numbers = #tpu.dot_dimension_numbers<[1], [0], [0], [1], [0, 0, 1, 1], [], []>} : vector<128x64xf32>, vector<64x64xf32>, vector<128x64xf32> -> vector<128x64xf32>
    %c0_24 = arith.constant 0 : index
    %c0_25 = arith.constant 0 : index
    %c0_26 = arith.constant 0 : index
    %32 = vector.load %arg9[%c0_24, %c0_25, %c0_26] : memref<1x64x64xf32, #tpu.memory_space<vmem>>, vector<1x64x64xf32>
    %33 = vector.shape_cast %32 : vector<1x64x64xf32> to vector<64x64xf32>
    %cst_27 = arith.constant dense<0.000000e+00> : vector<128x64xf32>
    %34 = tpu.matmul %28, %33, %cst_27 {dimension_numbers = #tpu.dot_dimension_numbers<[1], [0], [0], [1], [0, 0, 1, 1], [], []>} : vector<128x64xf32>, vector<64x64xf32>, vector<128x64xf32> -> vector<128x64xf32>
    %35 = arith.addf %31, %34 : vector<128x64xf32>
    %c0_28 = arith.constant 0 : index
    %c0_29 = arith.constant 0 : index
    %c0_30 = arith.constant 0 : index
    %36 = vector.load %arg10[%c0_28, %c0_29, %c0_30] : memref<1x1x64xf32, #tpu.memory_space<vmem>>, vector<1x1x64xf32>
    %37 = vector.shape_cast %36 : vector<1x1x64xf32> to vector<1x64xf32>
    %38 = vector.broadcast %37 : vector<1x64xf32> to vector<128x64xf32>
    %39 = arith.addf %35, %38 : vector<128x64xf32>
    %cst_31 = arith.constant 0.000000e+00 : f32
    %40 = vector.broadcast %cst_31 : f32 to vector<128x64xf32>
    %41 = arith.cmpf oge, %39, %40 : vector<128x64xf32>
    %cst_32 = arith.constant 2.000000e-01 : f32
    %42 = vector.broadcast %cst_32 : f32 to vector<128x64xf32>
    %43 = arith.mulf %42, %39 : vector<128x64xf32>
    %44 = arith.select %41, %39, %43 : vector<128x64xi1>, vector<128x64xf32>
    %c0_33 = arith.constant 0 : index
    %c0_34 = arith.constant 0 : index
    %c0_35 = arith.constant 0 : index
    %45 = vector.load %arg11[%c0_33, %c0_34, %c0_35] : memref<1x128x64xf32, #tpu.memory_space<vmem>>, vector<1x128x64xf32>
    %46 = vector.shape_cast %45 : vector<1x128x64xf32> to vector<128x64xf32>
    %47 = vector.shape_cast %44 : vector<128x64xf32> to vector<1x128x64xf32>
    tpu.vector_store %arg11[%c0_33, %c0_34, %c0_35], %47 {strides = array<i32>} : memref<1x128x64xf32, #tpu.memory_space<vmem>>, vector<1x128x64xf32>,
    %cst_36 = arith.constant dense<0.000000e+00> : vector<128xf32>
    %48 = vector.multi_reduction <add>, %44, %cst_36 [1] : vector<128x64xf32> to vector<128xf32>
    %49 = vector.shape_cast %48 : vector<128xf32> to vector<128x1xf32>
    %c0_37 = arith.constant 0 : index
    %c0_38 = arith.constant 0 : index
    %c0_39 = arith.constant 0 : index
    %50 = vector.load %arg12[%c0_37, %c0_38, %c0_39] : memref<1x128x1xf32, #tpu.memory_space<vmem>>, vector<1x128x1xf32>
    %51 = vector.shape_cast %50 : vector<1x128x1xf32> to vector<128x1xf32>
    %52 = vector.shape_cast %49 : vector<128x1xf32> to vector<1x128x1xf32>
    tpu.vector_store %arg12[%c0_37, %c0_38, %c0_39], %52 {strides = array<i32>} : memref<1x128x1xf32, #tpu.memory_space<vmem>>, vector<1x128x1xf32>,
    return
  }
  func.func @transform_0(%arg0: i32) -> (i32, i32) {
    %c0_i32 = arith.constant 0 : i32
    %c0_i32_0 = arith.constant 0 : i32
    %c0_i32_1 = arith.constant 0 : i32
    return %c0_i32, %c0_i32_0 : i32, i32
  }
  func.func @transform_1(%arg0: i32) -> (i32, i32, i32) {
    %c0_i32 = arith.constant 0 : i32
    %c0_i32_0 = arith.constant 0 : i32
    %c0_i32_1 = arith.constant 0 : i32
    return %arg0, %c0_i32, %c0_i32_0 : i32, i32, i32
  }
  func.func @transform_2(%arg0: i32) -> (i32, i32, i32) {
    %c0_i32 = arith.constant 0 : i32
    %c0_i32_0 = arith.constant 0 : i32
    %c0_i32_1 = arith.constant 0 : i32
    return %arg0, %c0_i32, %c0_i32_0 : i32, i32, i32
  }
  func.func @transform_3(%arg0: i32) -> (i32, i32) {
    %c0_i32 = arith.constant 0 : i32
    %c0_i32_0 = arith.constant 0 : i32
    %c0_i32_1 = arith.constant 0 : i32
    return %c0_i32, %c0_i32_0 : i32, i32
  }
  func.func @transform_4(%arg0: i32) -> (i32, i32) {
    %c0_i32 = arith.constant 0 : i32
    %c0_i32_0 = arith.constant 0 : i32
    %c0_i32_1 = arith.constant 0 : i32
    return %c0_i32, %c0_i32_0 : i32, i32
  }
  func.func @transform_5(%arg0: i32) -> (i32, i32) {
    %c0_i32 = arith.constant 0 : i32
    %c0_i32_0 = arith.constant 0 : i32
    %c0_i32_1 = arith.constant 0 : i32
    return %c0_i32, %c0_i32_0 : i32, i32
  }
  func.func @transform_6(%arg0: i32) -> (i32, i32) {
    %c0_i32 = arith.constant 0 : i32
    %c0_i32_0 = arith.constant 0 : i32
    %c0_i32_1 = arith.constant 0 : i32
    return %c0_i32, %c0_i32_0 : i32, i32
  }
  func.func @transform_7(%arg0: i32) -> (i32, i32, i32) {
    %c0_i32 = arith.constant 0 : i32
    %c0_i32_0 = arith.constant 0 : i32
    %c0_i32_1 = arith.constant 0 : i32
    return %arg0, %c0_i32, %c0_i32_0 : i32, i32, i32
  }
  func.func @transform_8(%arg0: i32) -> (i32, i32, i32) {
    %c0_i32 = arith.constant 0 : i32
    %c0_i32_0 = arith.constant 0 : i32
    %c0_i32_1 = arith.constant 0 : i32
    return %arg0, %c0_i32, %c0_i32_0 : i32, i32, i32
  }
  func.func @transform_9(%arg0: i32) -> (i32, i32, i32) {
    %c0_i32 = arith.constant 0 : i32
    %c0_i32_0 = arith.constant 0 : i32
    %c0_i32_1 = arith.constant 0 : i32
    return %arg0, %c0_i32, %c0_i32_0 : i32, i32, i32
  }
  func.func @transform_10(%arg0: i32) -> (i32, i32, i32) {
    %c0_i32 = arith.constant 0 : i32
    %c0_i32_0 = arith.constant 0 : i32
    %c0_i32_1 = arith.constant 0 : i32
    return %arg0, %c0_i32, %c0_i32_0 : i32, i32, i32
  }
  func.func @transform_11(%arg0: i32) -> (i32, i32, i32) {
    %c0_i32 = arith.constant 0 : i32
    %c0_i32_0 = arith.constant 0 : i32
    %c0_i32_1 = arith.constant 0 : i32
    return %arg0, %c0_i32, %c0_i32_0 : i32, i32, i32
  }
}

module attributes {stable_mosaic.version = 11 : i64} {
  func.func @_head_conv_kernel(%arg0: i32, %arg1: memref<1x98x1024xf32, #tpu.memory_space<vmem>>, %arg2: memref<1x1024x1xf32, #tpu.memory_space<vmem>>, %arg3: memref<1x98x1xf32, #tpu.memory_space<vmem>>) attributes {dimension_semantics = [#tpu.dimension_semantics<parallel>], iteration_bounds = array<i64: 5>, scalar_prefetch = 0 : i64, scratch_operands = 0 : i64, tpu.core_type = #tpu.core_type<tc>, window_params = [{transform_indices = @transform_0, window_bounds = array<i64: 1, 98, 1024>}, {transform_indices = @transform_1, window_bounds = array<i64: 1, 1024, 1>}, {transform_indices = @transform_2, window_bounds = array<i64: 1, 98, 1>}]} {
    %c0 = arith.constant 0 : index
    %c0_0 = arith.constant 0 : index
    %c0_1 = arith.constant 0 : index
    %0 = vector.load %arg1[%c0, %c0_0, %c0_1] : memref<1x98x1024xf32, #tpu.memory_space<vmem>>, vector<1x98x1024xf32>
    %1 = vector.shape_cast %0 : vector<1x98x1024xf32> to vector<98x1024xf32>
    %c0_2 = arith.constant 0 : index
    %c0_3 = arith.constant 0 : index
    %c0_4 = arith.constant 0 : index
    %2 = vector.load %arg2[%c0_2, %c0_3, %c0_4] : memref<1x1024x1xf32, #tpu.memory_space<vmem>>, vector<1x1024x1xf32>
    %3 = vector.shape_cast %2 : vector<1x1024x1xf32> to vector<1024x1xf32>
    %cst = arith.constant dense<0.000000e+00> : vector<98x1xf32>
    %4 = tpu.matmul %1, %3, %cst {dimension_numbers = #tpu.dot_dimension_numbers<[1], [0], [0], [1], [0, 0, 1, 1], [], []>} : vector<98x1024xf32>, vector<1024x1xf32>, vector<98x1xf32> -> vector<98x1xf32>
    %c0_5 = arith.constant 0 : index
    %c0_6 = arith.constant 0 : index
    %c0_7 = arith.constant 0 : index
    %5 = vector.load %arg3[%c0_5, %c0_6, %c0_7] : memref<1x98x1xf32, #tpu.memory_space<vmem>>, vector<1x98x1xf32>
    %6 = vector.shape_cast %5 : vector<1x98x1xf32> to vector<98x1xf32>
    %7 = vector.shape_cast %4 : vector<98x1xf32> to vector<1x98x1xf32>
    tpu.vector_store %arg3[%c0_5, %c0_6, %c0_7], %7 {strides = array<i32>} : memref<1x98x1xf32, #tpu.memory_space<vmem>>, vector<1x98x1xf32>,
    return
  }
  func.func @transform_0(%arg0: i32) -> (i32, i32, i32) {
    %c0_i32 = arith.constant 0 : i32
    %c0_i32_0 = arith.constant 0 : i32
    %c0_i32_1 = arith.constant 0 : i32
    return %arg0, %c0_i32, %c0_i32_0 : i32, i32, i32
  }
  func.func @transform_1(%arg0: i32) -> (i32, i32, i32) {
    %c0_i32 = arith.constant 0 : i32
    %c0_i32_0 = arith.constant 0 : i32
    %c0_i32_1 = arith.constant 0 : i32
    return %arg0, %c0_i32, %c0_i32_0 : i32, i32, i32
  }
  func.func @transform_2(%arg0: i32) -> (i32, i32, i32) {
    %c0_i32 = arith.constant 0 : i32
    %c0_i32_0 = arith.constant 0 : i32
    %c0_i32_1 = arith.constant 0 : i32
    return %arg0, %c0_i32, %c0_i32_0 : i32, i32, i32
  }
}

</mosaic_0001>

<bundles_post_ra>
// kernel: discriminator_forward.7
= control target key start
LH: loop header
LB: loop body
LE: loop exit
PB: predicated region body
PF: predicated region fallthrough
CT: control target
= control target key end

     0   :  { %s2521_s12 = smov 0   ;;  %s3223_s0 = inlined_call_operand.vmem [shape: f32[2048,64], index: 0, kind: input, shape index: {}]   ;;  %s3224_s1 = inlined_call_operand.vmem [shape: f32[64,8], index: 1, kind: input, shape index: {}]   ;;  %s3225_s2 = inlined_call_operand.vmem [shape: f32[1,8], index: 2, kind: input, shape index: {}]   ;;  %s3226_s3 = inlined_call_operand.vmem [shape: f32[2048,8], index: 3, kind: output, shape index: {}]  }
   0x1 LB: > { %s1976_s13 = sadd.s32 4294967295, %s2499_s12   ;;  %p1980_p0 = scmp.ge.s32.totalorder %s2499_s12, 1  ;;  %s2499_s12 = sphi %s2521_s12, %s13_s12  }
   0x2   : > { %p138_p1 = scmp.lt.s32.totalorder %s2499_s12, 3 }
   0x4   : > { %p139_p2 = pnand %p1980_p0, %p138_p1 }
   0x5   : > { %v302_v0 = vld [vmem:[%s3224_s1] sm:$0xff] (!%p139_p2)  ;;  %v303_v1 = vld [vmem:[%s3224_s1 + $0x8] sm:$0xff] (!%p139_p2)  ;;  %v304_v2 = vld [vmem:[%s3224_s1 + $0x10] sm:$0xff] (!%p139_p2)  ;;  %s1981_s20 = sshll.u32 (!%p139_p2), %s1976_s13, 7  ;;  %vm317_vm0 = vcmask (!%p139_p2), 523264   ;;  %vm1791_vm1 = vcmask (!%p139_p2), 64512  }
   0x6   : > { %142 = sbr.rel (%p139_p2) target bundleno = 370 (0x172), region = 32  ;;  %v2460_v3 = vpack.c.bf16 (!%p139_p2), %v303_v1, %v302_v0  ;;  %v305_v4 = vld [vmem:[%s3224_s1 + $0x18] sm:$0xff] (!%p139_p2)  ;;  %p163_p3 = scmp.lt.s32.totalorder (!%p139_p2), %s1981_s20, 255  ;;  %v306_v6 = vld [vmem:[%s3224_s1 + $0x20] sm:$0xff] (!%p139_p2)  ;;  %v307_v7 = vld [vmem:[%s3224_s1 + $0x28] sm:$0xff] (!%p139_p2) }
   0x7   : > { %v2464_v5 = vpack.c.bf16 (!%p139_p2), %v305_v4, %v304_v2  ;;  %v2468_v8 = vpack.c.bf16 (!%p139_p2), %v307_v7, %v306_v6  ;;  %v308_v9 = vld [vmem:[%s3224_s1 + $0x30] sm:$0xff] (!%p139_p2)  ;;  %v309_v10 = vld [vmem:[%s3224_s1 + $0x38] sm:$0xff] (!%p139_p2) }
   0x8   : > { %2461 = vmatprep.subr.bf16.mxu0 (!%p139_p2), %v2460_v3  ;;  %2476 = vmatprep.subr.bf16.mxu1 (!%p139_p2), %v2460_v3  ;;  %v2472_v13 = vpack.c.bf16 (!%p139_p2), %v309_v10, %v308_v9 }
   0x9   : > { %2463 = vmatpush3.bf16.msra.mxu0 (!%p139_p2), %v2460_v3  ;;  %2480 = vmatpush3.bf16.msra.mxu1 (!%p139_p2), %v2460_v3 }
   0xa   : > { %2465 = vmatprep.subr.bf16.mxu0 (!%p139_p2), %v2464_v5  ;;  %2477 = vmatprep.subr.bf16.mxu1 (!%p139_p2), %v2464_v5 }
   0xd   : > { %s3228_s20 = smov (!%p163_p3, %s1981_s20), 255  ;;  %2467 = vmatpush3.bf16.msra.mxu0 %v2464_v5  ;;  %2481 = vmatpush3.bf16.msra.mxu1 %v2464_v5 }
   0xe   : > { %s1982_s27 = sshll.u32 %s3228_s20, 3  ;;  %2469 = vmatprep.subr.bf16.mxu0 %v2468_v8  ;;  %2478 = vmatprep.subr.bf16.mxu1 %v2468_v8 }
   0xf   : > { %s2561_s7 = scalar_lea.vmem %s3223_s0, %s1982_s27  ;;  %s2833_s13 = scalar_lea.vmem %s3226_s3, %s1982_s27 }
  0x10   : > { %v174_v11 = vld [vmem:[%s2561_s7] sm:$0xff]  ;;  %v175_v14 = vld [vmem:[%s2561_s7 + $0x8] sm:$0xff]  ;;  %v176_v16 = vld [vmem:[%s2561_s7 + $0x10] sm:$0xff] }
  0x11   : > { %v238_v12 = vld [vmem:[%s2561_s7 + $0x200] sm:$0xff]  ;;  %2268 = vmatprep.mubr.msk.f32.mxu0 %vm317_vm0, %v174_v11  ;;  %2471 = vmatpush3.bf16.msra.mxu0 %v2468_v8  ;;  %v239_v15 = vld [vmem:[%s2561_s7 + $0x208] sm:$0xff]  ;;  %v240_v17 = vld [vmem:[%s2561_s7 + $0x210] sm:$0xff] }
  0x12   : > { %2364 = vmatprep.mubr.msk.f32.mxu1 %vm317_vm0, %v238_v12  ;;  %2482 = vmatpush3.bf16.msra.mxu1 %v2468_v8  ;;  %v177_v18 = vld [vmem:[%s2561_s7 + $0x18] sm:$0xff]  ;;  %v178_v20 = vld [vmem:[%s2561_s7 + $0x20] sm:$0xff]  ;;  %v179_v22 = vld [vmem:[%s2561_s7 + $0x28] sm:$0xff] }
  0x13   : > { %2473 = vmatprep.subr.bf16.mxu0 %v2472_v13  ;;  %2479 = vmatprep.subr.bf16.mxu1 %v2472_v13  ;;  %v241_v19 = vld [vmem:[%s2561_s7 + $0x218] sm:$0xff]  ;;  %v242_v21 = vld [vmem:[%s2561_s7 + $0x220] sm:$0xff]  ;;  %v243_v23 = vld [vmem:[%s2561_s7 + $0x228] sm:$0xff] }
  0x14   : > { %v180_v24 = vld [vmem:[%s2561_s7 + $0x30] sm:$0xff]  ;;  %v181_v26 = vld [vmem:[%s2561_s7 + $0x38] sm:$0xff]  ;;  %v182_v28 = vld [vmem:[%s2561_s7 + $0x40] sm:$0xff] }
  0x15   : > { %2475 = vmatpush3.bf16.msra.mxu0 %v2472_v13  ;;  %v244_v25 = vld [vmem:[%s2561_s7 + $0x230] sm:$0xff]  ;;  %v245_v27 = vld [vmem:[%s2561_s7 + $0x238] sm:$0xff]  ;;  %v246_v29 = vld [vmem:[%s2561_s7 + $0x240] sm:$0xff] }
  0x16   : > { %2483 = vmatpush3.bf16.msra.mxu1 %v2472_v13  ;;  %v183_v30 = vld [vmem:[%s2561_s7 + $0x48] sm:$0xff]  ;;  %v184_v32 = vld [vmem:[%s2561_s7 + $0x50] sm:$0xff]  ;;  %v185_v34 = vld [vmem:[%s2561_s7 + $0x58] sm:$0xff] }
  0x17   : > { %v247_v31 = vld [vmem:[%s2561_s7 + $0x248] sm:$0xff]  ;;  %v248_v33 = vld [vmem:[%s2561_s7 + $0x250] sm:$0xff]  ;;  %v249_v35 = vld [vmem:[%s2561_s7 + $0x258] sm:$0xff] }
  0x18   : > { %2269 = vmatmul.mubr.msk.f32.vlgmr.msra.gmra.mrb[0].mxu0 %vm317_vm0, %v175_v14  ;;  %v186_v36 = vld [vmem:[%s2561_s7 + $0x60] sm:$0xff]  ;;  %v187_v38 = vld [vmem:[%s2561_s7 + $0x68] sm:$0xff]  ;;  %v188_v40 = vld [vmem:[%s2561_s7 + $0x70] sm:$0xff] }
  0x19   : > { %2365 = vmatmul.mubr.msk.f32.vlgmr.msra.gmra.mrb[0].mxu1 %vm317_vm0, %v239_v15  ;;  %2271 = vmatprep.mubr.msk.f32.mxu0 %vm317_vm0, %v176_v16  ;;  %v250_v37 = vld [vmem:[%s2561_s7 + $0x260] sm:$0xff]  ;;  %v251_v39 = vld [vmem:[%s2561_s7 + $0x268] sm:$0xff]  ;;  %v252_v41 = vld [vmem:[%s2561_s7 + $0x270] sm:$0xff] }
  0x1a   : > { %2367 = vmatprep.mubr.msk.f32.mxu1 %vm317_vm0, %v240_v17  ;;  %v189_v42 = vld [vmem:[%s2561_s7 + $0x78] sm:$0xff]  ;;  %v190_v44 = vld [vmem:[%s2561_s7 + $0x80] sm:$0xff]  ;;  %v191_v46 = vld [vmem:[%s2561_s7 + $0x88] sm:$0xff] }
  0x1b   : > { %v253_v43 = vld [vmem:[%s2561_s7 + $0x278] sm:$0xff]  ;;  %v254_v45 = vld [vmem:[%s2561_s7 + $0x280] sm:$0xff]  ;;  %v255_v47 = vld [vmem:[%s2561_s7 + $0x288] sm:$0xff] }
  0x1c   : > { %2272 = vmatmul.mubr.msk.f32.gmra.mrb[2].mxu0 %vm317_vm0, %v177_v18  ;;  %v192_v48 = vld [vmem:[%s2561_s7 + $0x90] sm:$0xff]  ;;  %v193_v50 = vld [vmem:[%s2561_s7 + $0x98] sm:$0xff]  ;;  %v194_v52 = vld [vmem:[%s2561_s7 + $0xa0] sm:$0xff] }
  0x1d   : > { %2368 = vmatmul.mubr.msk.f32.gmra.mrb[2].mxu1 %vm317_vm0, %v241_v19  ;;  %2274 = vmatprep.mubr.msk.f32.mxu0 %vm317_vm0, %v178_v20  ;;  %v256_v49 = vld [vmem:[%s2561_s7 + $0x290] sm:$0xff]  ;;  %v257_v51 = vld [vmem:[%s2561_s7 + $0x298] sm:$0xff]  ;;  %v258_v53 = vld [vmem:[%s2561_s7 + $0x2a0] sm:$0xff] }
  0x1e   : > { %2370 = vmatprep.mubr.msk.f32.mxu1 %vm317_vm0, %v242_v21  ;;  %v195_v54 = vld [vmem:[%s2561_s7 + $0xa8] sm:$0xff]  ;;  %v196_v56 = vld [vmem:[%s2561_s7 + $0xb0] sm:$0xff]  ;;  %v197_v58 = vld [vmem:[%s2561_s7 + $0xb8] sm:$0xff] }
  0x1f   : > { %v259_v55 = vld [vmem:[%s2561_s7 + $0x2a8] sm:$0xff]  ;;  %v260_v57 = vld [vmem:[%s2561_s7 + $0x2b0] sm:$0xff]  ;;  %v261_v59 = vld [vmem:[%s2561_s7 + $0x2b8] sm:$0xff] }
  0x20   : > { %2275 = vmatmul.mubr.msk.f32.gmra.mrb[4].mxu0 %vm317_vm0, %v179_v22  ;;  %v198_v60 = vld [vmem:[%s2561_s7 + $0xc0] sm:$0xff]  ;;  %v199_v62 = vld [vmem:[%s2561_s7 + $0xc8] sm:$0xff]  ;;  %v200_v0 = vld [vmem:[%s2561_s7 + $0xd0] sm:$0xff] }
  0x21   : > { %2371 = vmatmul.mubr.msk.f32.gmra.mrb[4].mxu1 %vm317_vm0, %v243_v23  ;;  %2277 = vmatprep.mubr.msk.f32.mxu0 %vm317_vm0, %v180_v24  ;;  %v262_v61 = vld [vmem:[%s2561_s7 + $0x2c0] sm:$0xff]  ;;  %v263_v63 = vld [vmem:[%s2561_s7 + $0x2c8] sm:$0xff]  ;;  %v264_v1 = vld [vmem:[%s2561_s7 + $0x2d0] sm:$0xff] }
  0x22   : > { %2373 = vmatprep.mubr.msk.f32.mxu1 %vm317_vm0, %v244_v25  ;;  %v201_v2 = vld [vmem:[%s2561_s7 + $0xd8] sm:$0xff]  ;;  %v202_v4 = vld [vmem:[%s2561_s7 + $0xe0] sm:$0xff]  ;;  %v203_v6 = vld [vmem:[%s2561_s7 + $0xe8] sm:$0xff] }
  0x23   : > { %v265_v3 = vld [vmem:[%s2561_s7 + $0x2d8] sm:$0xff]  ;;  %v266_v5 = vld [vmem:[%s2561_s7 + $0x2e0] sm:$0xff]  ;;  %v267_v7 = vld [vmem:[%s2561_s7 + $0x2e8] sm:$0xff] }
  0x24   : > { %2278 = vmatmul.mubr.msk.f32.gmra.mrb[6].mxu0 %vm317_vm0, %v181_v26  ;;  %v204_v8 = vld [vmem:[%s2561_s7 + $0xf0] sm:$0xff]  ;;  %v205_v10 = vld [vmem:[%s2561_s7 + $0xf8] sm:$0xff]  ;;  %v206_v12 = vld [vmem:[%s2561_s7 + $0x100] sm:$0xff] }
  0x25   : > { %2374 = vmatmul.mubr.msk.f32.gmra.mrb[6].mxu1 %vm317_vm0, %v245_v27  ;;  %2280 = vmatprep.mubr.msk.f32.mxu0 %vm317_vm0, %v182_v28  ;;  %v268_v9 = vld [vmem:[%s2561_s7 + $0x2f0] sm:$0xff]  ;;  %v269_v11 = vld [vmem:[%s2561_s7 + $0x2f8] sm:$0xff]  ;;  %v270_v13 = vld [vmem:[%s2561_s7 + $0x300] sm:$0xff] }
  0x26   : > { %2376 = vmatprep.mubr.msk.f32.mxu1 %vm317_vm0, %v246_v29  ;;  %v207_v14 = vld [vmem:[%s2561_s7 + $0x108] sm:$0xff]  ;;  %v208_v16 = vld [vmem:[%s2561_s7 + $0x110] sm:$0xff]  ;;  %v209_v18 = vld [vmem:[%s2561_s7 + $0x118] sm:$0xff] }
  0x27   : > { %v271_v15 = vld [vmem:[%s2561_s7 + $0x308] sm:$0xff]  ;;  %v272_v17 = vld [vmem:[%s2561_s7 + $0x310] sm:$0xff]  ;;  %v273_v19 = vld [vmem:[%s2561_s7 + $0x318] sm:$0xff] }
  0x28   : > { %2281 = vmatmul.mubr.msk.f32.gmra.mrb[8].mxu0 %vm317_vm0, %v183_v30  ;;  %v210_v20 = vld [vmem:[%s2561_s7 + $0x120] sm:$0xff]  ;;  %v211_v22 = vld [vmem:[%s2561_s7 + $0x128] sm:$0xff]  ;;  %v212_v24 = vld [vmem:[%s2561_s7 + $0x130] sm:$0xff] }
  0x29   : > { %2377 = vmatmul.mubr.msk.f32.gmra.mrb[8].mxu1 %vm317_vm0, %v247_v31  ;;  %2283 = vmatprep.mubr.msk.f32.mxu0 %vm317_vm0, %v184_v32  ;;  %v274_v21 = vld [vmem:[%s2561_s7 + $0x320] sm:$0xff]  ;;  %v275_v23 = vld [vmem:[%s2561_s7 + $0x328] sm:$0xff]  ;;  %v276_v25 = vld [vmem:[%s2561_s7 + $0x330] sm:$0xff] }
  0x2a   : > { %2379 = vmatprep.mubr.msk.f32.mxu1 %vm317_vm0, %v248_v33  ;;  %v213_v26 = vld [vmem:[%s2561_s7 + $0x138] sm:$0xff]  ;;  %v214_v28 = vld [vmem:[%s2561_s7 + $0x140] sm:$0xff]  ;;  %v215_v30 = vld [vmem:[%s2561_s7 + $0x148] sm:$0xff] }
  0x2b   : > { %v277_v27 = vld [vmem:[%s2561_s7 + $0x338] sm:$0xff]  ;;  %v278_v29 = vld [vmem:[%s2561_s7 + $0x340] sm:$0xff]  ;;  %v279_v31 = vld [vmem:[%s2561_s7 + $0x348] sm:$0xff] }
  0x2c   : > { %2284 = vmatmul.mubr.msk.f32.gmra.mrb[10].mxu0 %vm317_vm0, %v185_v34  ;;  %v216_v32 = vld [vmem:[%s2561_s7 + $0x150] sm:$0xff]  ;;  %v217_v34 = vld [vmem:[%s2561_s7 + $0x158] sm:$0xff] }
  0x2d   : > { %2380 = vmatmul.mubr.msk.f32.gmra.mrb[10].mxu1 %vm317_vm0, %v249_v35  ;;  %2286 = vmatprep.mubr.msk.f32.mxu0 %vm317_vm0, %v186_v36  ;;  %v280_v33 = vld [vmem:[%s2561_s7 + $0x350] sm:$0xff]  ;;  %v281_v35 = vld [vmem:[%s2561_s7 + $0x358] sm:$0xff]  ;;  %v218_v36 = vld [vmem:[%s2561_s7 + $0x160] sm:$0xff] }
  0x2e   : > { %2382 = vmatprep.mubr.msk.f32.mxu1 %vm317_vm0, %v250_v37  ;;  %v282_v37 = vld [vmem:[%s2561_s7 + $0x360] sm:$0xff] }
  0x30   : > { %2287 = vmatmul.mubr.msk.f32.gmra.mrb[12].mxu0 %vm317_vm0, %v187_v38  ;;  %v219_v38 = vld [vmem:[%s2561_s7 + $0x168] sm:$0xff] }
  0x31   : > { %2383 = vmatmul.mubr.msk.f32.gmra.mrb[12].mxu1 %vm317_vm0, %v251_v39  ;;  %2289 = vmatprep.mubr.msk.f32.mxu0 %vm317_vm0, %v188_v40  ;;  %v283_v39 = vld [vmem:[%s2561_s7 + $0x368] sm:$0xff]  ;;  %v220_v40 = vld [vmem:[%s2561_s7 + $0x170] sm:$0xff] }
  0x32   : > { %2385 = vmatprep.mubr.msk.f32.mxu1 %vm317_vm0, %v252_v41  ;;  %v284_v41 = vld [vmem:[%s2561_s7 + $0x370] sm:$0xff] }
  0x34   : > { %2290 = vmatmul.mubr.msk.f32.gmra.mrb[14].mxu0 %vm317_vm0, %v189_v42  ;;  %v221_v42 = vld [vmem:[%s2561_s7 + $0x178] sm:$0xff] }
  0x35   : > { %2386 = vmatmul.mubr.msk.f32.gmra.mrb[14].mxu1 %vm317_vm0, %v253_v43  ;;  %2292 = vmatprep.mubr.msk.f32.mxu0 %vm317_vm0, %v190_v44  ;;  %v285_v43 = vld [vmem:[%s2561_s7 + $0x378] sm:$0xff]  ;;  %v222_v44 = vld [vmem:[%s2561_s7 + $0x180] sm:$0xff] }
  0x36   : > { %2388 = vmatprep.mubr.msk.f32.mxu1 %vm317_vm0, %v254_v45  ;;  %v286_v45 = vld [vmem:[%s2561_s7 + $0x380] sm:$0xff] }
  0x38   : > { %2293 = vmatmul.mubr.msk.f32.gmra.mrb[16].mxu0 %vm317_vm0, %v191_v46  ;;  %v223_v46 = vld [vmem:[%s2561_s7 + $0x188] sm:$0xff] }
  0x39   : > { %2389 = vmatmul.mubr.msk.f32.gmra.mrb[16].mxu1 %vm317_vm0, %v255_v47  ;;  %2295 = vmatprep.mubr.msk.f32.mxu0 %vm317_vm0, %v192_v48  ;;  %v287_v47 = vld [vmem:[%s2561_s7 + $0x388] sm:$0xff]  ;;  %v224_v48 = vld [vmem:[%s2561_s7 + $0x190] sm:$0xff] }
  0x3a   : > { %2391 = vmatprep.mubr.msk.f32.mxu1 %vm317_vm0, %v256_v49  ;;  %v288_v49 = vld [vmem:[%s2561_s7 + $0x390] sm:$0xff] }
  0x3c   : > { %2296 = vmatmul.mubr.msk.f32.gmra.mrb[18].mxu0 %vm317_vm0, %v193_v50  ;;  %v225_v50 = vld [vmem:[%s2561_s7 + $0x198] sm:$0xff] }
  0x3d   : > { %2392 = vmatmul.mubr.msk.f32.gmra.mrb[18].mxu1 %vm317_vm0, %v257_v51  ;;  %2298 = vmatprep.mubr.msk.f32.mxu0 %vm317_vm0, %v194_v52  ;;  %v289_v51 = vld [vmem:[%s2561_s7 + $0x398] sm:$0xff]  ;;  %v226_v52 = vld [vmem:[%s2561_s7 + $0x1a0] sm:$0xff] }
  0x3e   : > { %2394 = vmatprep.mubr.msk.f32.mxu1 %vm317_vm0, %v258_v53  ;;  %v290_v53 = vld [vmem:[%s2561_s7 + $0x3a0] sm:$0xff] }
  0x40   : > { %2299 = vmatmul.mubr.msk.f32.gmra.mrb[20].mxu0 %vm317_vm0, %v195_v54  ;;  %v227_v54 = vld [vmem:[%s2561_s7 + $0x1a8] sm:$0xff] }
  0x41   : > { %2395 = vmatmul.mubr.msk.f32.gmra.mrb[20].mxu1 %vm317_vm0, %v259_v55  ;;  %2301 = vmatprep.mubr.msk.f32.mxu0 %vm317_vm0, %v196_v56  ;;  %v291_v55 = vld [vmem:[%s2561_s7 + $0x3a8] sm:$0xff]  ;;  %v228_v56 = vld [vmem:[%s2561_s7 + $0x1b0] sm:$0xff] }
  0x42   : > { %2397 = vmatprep.mubr.msk.f32.mxu1 %vm317_vm0, %v260_v57  ;;  %v292_v57 = vld [vmem:[%s2561_s7 + $0x3b0] sm:$0xff] }
  0x44   : > { %2302 = vmatmul.mubr.msk.f32.gmra.mrb[22].mxu0 %vm317_vm0, %v197_v58  ;;  %v229_v58 = vld [vmem:[%s2561_s7 + $0x1b8] sm:$0xff] }
  0x45   : > { %2398 = vmatmul.mubr.msk.f32.gmra.mrb[22].mxu1 %vm317_vm0, %v261_v59  ;;  %2304 = vmatprep.mubr.msk.f32.mxu0 %vm317_vm0, %v198_v60  ;;  %v293_v59 = vld [vmem:[%s2561_s7 + $0x3b8] sm:$0xff]  ;;  %v230_v60 = vld [vmem:[%s2561_s7 + $0x1c0] sm:$0xff] }
  0x46   : > { %2400 = vmatprep.mubr.msk.f32.mxu1 %vm317_vm0, %v262_v61  ;;  %v294_v61 = vld [vmem:[%s2561_s7 + $0x3c0] sm:$0xff] }
  0x48   : > { %2305 = vmatmul.mubr.msk.f32.gmra.mrb[24].mxu0 %vm317_vm0, %v199_v62  ;;  %v231_v62 = vld [vmem:[%s2561_s7 + $0x1c8] sm:$0xff] }
  0x49   : > { %2401 = vmatmul.mubr.msk.f32.gmra.mrb[24].mxu1 %vm317_vm0, %v263_v63  ;;  %2307 = vmatprep.mubr.msk.f32.mxu0 %vm317_vm0, %v200_v0  ;;  %v295_v63 = vld [vmem:[%s2561_s7 + $0x3c8] sm:$0xff]  ;;  %v232_v0 = vld [vmem:[%s2561_s7 + $0x1d0] sm:$0xff] }
  0x4a   : > { %2403 = vmatprep.mubr.msk.f32.mxu1 %vm317_vm0, %v264_v1  ;;  %v296_v1 = vld [vmem:[%s2561_s7 + $0x3d0] sm:$0xff] }
  0x4c   : > { %2308 = vmatmul.mubr.msk.f32.gmra.mrb[26].mxu0 %vm317_vm0, %v201_v2  ;;  %v233_v2 = vld [vmem:[%s2561_s7 + $0x1d8] sm:$0xff] }
  0x4d   : > { %2404 = vmatmul.mubr.msk.f32.gmra.mrb[26].mxu1 %vm317_vm0, %v265_v3  ;;  %2310 = vmatprep.mubr.msk.f32.mxu0 %vm317_vm0, %v202_v4  ;;  %v297_v3 = vld [vmem:[%s2561_s7 + $0x3d8] sm:$0xff]  ;;  %v234_v4 = vld [vmem:[%s2561_s7 + $0x1e0] sm:$0xff] }
  0x4e   : > { %2406 = vmatprep.mubr.msk.f32.mxu1 %vm317_vm0, %v266_v5  ;;  %v298_v5 = vld [vmem:[%s2561_s7 + $0x3e0] sm:$0xff] }
  0x50   : > { %2311 = vmatmul.mubr.msk.f32.gmra.mrb[28].mxu0 %vm317_vm0, %v203_v6  ;;  %v235_v6 = vld [vmem:[%s2561_s7 + $0x1e8] sm:$0xff] }
  0x51   : > { %2407 = vmatmul.mubr.msk.f32.gmra.mrb[28].mxu1 %vm317_vm0, %v267_v7  ;;  %2313 = vmatprep.mubr.msk.f32.mxu0 %vm317_vm0, %v204_v8  ;;  %v299_v7 = vld [vmem:[%s2561_s7 + $0x3e8] sm:$0xff]  ;;  %v236_v8 = vld [vmem:[%s2561_s7 + $0x1f0] sm:$0xff] }
  0x52   : > { %2409 = vmatprep.mubr.msk.f32.mxu1 %vm317_vm0, %v268_v9  ;;  %v300_v9 = vld [vmem:[%s2561_s7 + $0x3f0] sm:$0xff] }
  0x54   : > { %2314 = vmatmul.mubr.msk.f32.gmra.mrb[30].mxu0 %vm317_vm0, %v205_v10  ;;  %v237_v10 = vld [vmem:[%s2561_s7 + $0x1f8] sm:$0xff] }
  0x55   : > { %2410 = vmatmul.mubr.msk.f32.gmra.mrb[30].mxu1 %vm317_vm0, %v269_v11  ;;  %2316 = vmatprep.mubr.msk.f32.mxu0 %vm317_vm0, %v206_v12  ;;  %v301_v11 = vld [vmem:[%s2561_s7 + $0x3f8] sm:$0xff]  ;;  %v2822_v12 = vld [vmem:[%s3225_s2] ss:$0 sm:$0xff] }
  0x56   : > { %2412 = vmatprep.mubr.msk.f32.mxu1 %vm317_vm0, %v270_v13 }
  0x58   : > { %2317 = vmatmul.mubr.msk.f32.gmra.mrb[32].mxu0 %vm317_vm0, %v207_v14 }
  0x59   : > { %2413 = vmatmul.mubr.msk.f32.gmra.mrb[32].mxu1 %vm317_vm0, %v271_v15  ;;  %2319 = vmatprep.mubr.msk.f32.mxu0 %vm317_vm0, %v208_v16 }
  0x5a   : > { %2415 = vmatprep.mubr.msk.f32.mxu1 %vm317_vm0, %v272_v17 }
  0x5c   : > { %2320 = vmatmul.mubr.msk.f32.gmra.mrb[34].mxu0 %vm317_vm0, %v209_v18 }
  0x5d   : > { %2416 = vmatmul.mubr.msk.f32.gmra.mrb[34].mxu1 %vm317_vm0, %v273_v19  ;;  %2322 = vmatprep.mubr.msk.f32.mxu0 %vm317_vm0, %v210_v20 }
  0x5e   : > { %2418 = vmatprep.mubr.msk.f32.mxu1 %vm317_vm0, %v274_v21 }
  0x60   : > { %2323 = vmatmul.mubr.msk.f32.gmra.mrb[36].mxu0 %vm317_vm0, %v211_v22 }
  0x61   : > { %2419 = vmatmul.mubr.msk.f32.gmra.mrb[36].mxu1 %vm317_vm0, %v275_v23  ;;  %2325 = vmatprep.mubr.msk.f32.mxu0 %vm317_vm0, %v212_v24 }
  0x62   : > { %2421 = vmatprep.mubr.msk.f32.mxu1 %vm317_vm0, %v276_v25 }
  0x64   : > { %2326 = vmatmul.mubr.msk.f32.gmra.mrb[38].mxu0 %vm317_vm0, %v213_v26 }
  0x65   : > { %2422 = vmatmul.mubr.msk.f32.gmra.mrb[38].mxu1 %vm317_vm0, %v277_v27  ;;  %2328 = vmatprep.mubr.msk.f32.mxu0 %vm317_vm0, %v214_v28 }
  0x66   : > { %2424 = vmatprep.mubr.msk.f32.mxu1 %vm317_vm0, %v278_v29 }
  0x68   : > { %2329 = vmatmul.mubr.msk.f32.gmra.mrb[40].mxu0 %vm317_vm0, %v215_v30 }
  0x69   : > { %2425 = vmatmul.mubr.msk.f32.gmra.mrb[40].mxu1 %vm317_vm0, %v279_v31  ;;  %2331 = vmatprep.mubr.msk.f32.mxu0 %vm317_vm0, %v216_v32 }
  0x6a   : > { %2427 = vmatprep.mubr.msk.f32.mxu1 %vm317_vm0, %v280_v33 }
  0x6c   : > { %2332 = vmatmul.mubr.msk.f32.gmra.mrb[42].mxu0 %vm317_vm0, %v217_v34 }
  0x6d   : > { %2428 = vmatmul.mubr.msk.f32.gmra.mrb[42].mxu1 %vm317_vm0, %v281_v35  ;;  %2334 = vmatprep.mubr.msk.f32.mxu0 %vm317_vm0, %v218_v36 }
  0x6e   : > { %2430 = vmatprep.mubr.msk.f32.mxu1 %vm317_vm0, %v282_v37 }
  0x70   : > { %2335 = vmatmul.mubr.msk.f32.gmra.mrb[44].mxu0 %vm317_vm0, %v219_v38 }
  0x71   : > { %2431 = vmatmul.mubr.msk.f32.gmra.mrb[44].mxu1 %vm317_vm0, %v283_v39  ;;  %2337 = vmatprep.mubr.msk.f32.mxu0 %vm317_vm0, %v220_v40 }
  0x72   : > { %2433 = vmatprep.mubr.msk.f32.mxu1 %vm317_vm0, %v284_v41 }
  0x74   : > { %2338 = vmatmul.mubr.msk.f32.gmra.mrb[46].mxu0 %vm317_vm0, %v221_v42 }
  0x75   : > { %2434 = vmatmul.mubr.msk.f32.gmra.mrb[46].mxu1 %vm317_vm0, %v285_v43  ;;  %2340 = vmatprep.mubr.msk.f32.mxu0 %vm317_vm0, %v222_v44 }
  0x76   : > { %2436 = vmatprep.mubr.msk.f32.mxu1 %vm317_vm0, %v286_v45 }
  0x78   : > { %2341 = vmatmul.mubr.msk.f32.gmra.mrb[48].mxu0 %vm317_vm0, %v223_v46 }
  0x79   : > { %2437 = vmatmul.mubr.msk.f32.gmra.mrb[48].mxu1 %vm317_vm0, %v287_v47  ;;  %2343 = vmatprep.mubr.msk.f32.mxu0 %vm317_vm0, %v224_v48 }
  0x7a   : > { %2439 = vmatprep.mubr.msk.f32.mxu1 %vm317_vm0, %v288_v49 }
  0x7c   : > { %2344 = vmatmul.mubr.msk.f32.gmra.mrb[50].mxu0 %vm317_vm0, %v225_v50 }
  0x7d   : > { %2440 = vmatmul.mubr.msk.f32.gmra.mrb[50].mxu1 %vm317_vm0, %v289_v51  ;;  %2346 = vmatprep.mubr.msk.f32.mxu0 %vm317_vm0, %v226_v52 }
  0x7e   : > { %2442 = vmatprep.mubr.msk.f32.mxu1 %vm317_vm0, %v290_v53 }
  0x80   : > { %2347 = vmatmul.mubr.msk.f32.gmra.mrb[52].mxu0 %vm317_vm0, %v227_v54 }
  0x81   : > { %2443 = vmatmul.mubr.msk.f32.gmra.mrb[52].mxu1 %vm317_vm0, %v291_v55  ;;  %2349 = vmatprep.mubr.msk.f32.mxu0 %vm317_vm0, %v228_v56 }
  0x82   : > { %2445 = vmatprep.mubr.msk.f32.mxu1 %vm317_vm0, %v292_v57 }
  0x84   : > { %2350 = vmatmul.mubr.msk.f32.gmra.mrb[54].mxu0 %vm317_vm0, %v229_v58 }
  0x85   : > { %2446 = vmatmul.mubr.msk.f32.gmra.mrb[54].mxu1 %vm317_vm0, %v293_v59  ;;  %2352 = vmatprep.mubr.msk.f32.mxu0 %vm317_vm0, %v230_v60 }
  0x86   : > { %2448 = vmatprep.mubr.msk.f32.mxu1 %vm317_vm0, %v294_v61 }
  0x88   : > { %2353 = vmatmul.mubr.msk.f32.gmra.mrb[56].mxu0 %vm317_vm0, %v231_v62 }
  0x89   : > { %2449 = vmatmul.mubr.msk.f32.gmra.mrb[56].mxu1 %vm317_vm0, %v295_v63  ;;  %2355 = vmatprep.mubr.msk.f32.mxu0 %vm317_vm0, %v232_v0 }
  0x8a   : > { %2451 = vmatprep.mubr.msk.f32.mxu1 %vm317_vm0, %v296_v1 }
  0x8c   : > { %2356 = vmatmul.mubr.msk.f32.gmra.mrb[58].mxu0 %vm317_vm0, %v233_v2 }
  0x8d   : > { %2452 = vmatmul.mubr.msk.f32.gmra.mrb[58].mxu1 %vm317_vm0, %v297_v3  ;;  %2358 = vmatprep.mubr.msk.f32.mxu0 %vm317_vm0, %v234_v4 }
  0x8e   : > { %2454 = vmatprep.mubr.msk.f32.mxu1 %vm317_vm0, %v298_v5 }
  0x90   : > { %2359 = vmatmul.mubr.msk.f32.gmra.mrb[60].mxu0 %vm317_vm0, %v235_v6 }
  0x91   : > { %2455 = vmatmul.mubr.msk.f32.gmra.mrb[60].mxu1 %vm317_vm0, %v299_v7  ;;  %2361 = vmatprep.mubr.msk.f32.mxu0 %vm317_vm0, %v236_v8 }
  0x92   : > { %2457 = vmatprep.mubr.msk.f32.mxu1 %vm317_vm0, %v300_v9 }
  0x94   : > { %2362 = vmatmul.mubr.msk.f32.gmra.mrb[62].mxu0 %vm317_vm0, %v237_v10 }
  0x95   : > { %2458 = vmatmul.mubr.msk.f32.gmra.mrb[62].mxu1 %vm317_vm0, %v301_v11 }
  0xeb   : > { %v2270_v13 = vpop.f32.mrb[0].mxu0 }
  0xec   : > { %v2366_v14 = vpop.f32.mrb[0].mxu1  ;;  %v774_v15 = vadd.f32 %v2270_v13, %v2822_v12  ;;  %v768_v17 = vpop.f32.mrb[1].mxu0 }
  0xed   : > { %v1094_v16 = vadd.f32 %v2366_v14, %v2822_v12  ;;  %v1088_v18 = vpop.f32.mrb[1].mxu1  ;;  %v769_v19 = vadd.f32 %v2822_v12, %v768_v17 }
  0xee   : > { %v1089_v20 = vadd.f32 %v2822_v12, %v1088_v18  ;;  %vm1408_vm2 = vcmp.ge.f32.partialorder %v774_v15, 0.0  ;;  %v1536_v21 = vmul.f32 0.2, %v774_v15 }
  0xef   : > { %vm1472_vm3 = vcmp.ge.f32.partialorder %v1094_v16, 0.0  ;;  %v1600_v22 = vmul.f32 0.2, %v1094_v16  ;;  %vm1407_vm4 = vcmp.ge.f32.partialorder %v769_v19, 0.0  ;;  %v1535_v23 = vmul.f32 0.2, %v769_v19 }
  0xf0   : > { %vm1471_vm5 = vcmp.ge.f32.partialorder %v1089_v20, 0.0  ;;  %v1599_v24 = vmul.f32 0.2, %v1089_v20  ;;  %v1664_v25 = vsel %vm1408_vm2, %v774_v15, %v1536_v21  ;;  %v2273_v27 = vpop.f32.mrb[2].mxu0  ;;  %v2369_v28 = vpop.f32.mrb[2].mxu1 }
  0xf1   : > { %v1728_v26 = vsel %vm1472_vm3, %v1094_v16, %v1600_v22  ;;  %1793 = vst.msk [vmem:[%s2833_s13 + $0x8] sm:$0xff] %vm1791_vm1, %v1664_v25  ;;  %v1663_v29 = vsel %vm1407_vm4, %v769_v19, %v1535_v23  ;;  %v784_v31 = vadd.f32 %v2273_v27, %v2822_v12  ;;  %v1104_v32 = vadd.f32 %v2369_v28, %v2822_v12  ;;  %v778_v33 = vpop.f32.mrb[3].mxu0  ;;  %v1098_v34 = vpop.f32.mrb[3].mxu1 }
  0xf2   : > { %1857 = vst.msk [vmem:[%s2833_s13 + $0x208] sm:$0xff] %vm1791_vm1, %v1728_v26  ;;  %v1727_v30 = vsel %vm1471_vm5, %v1089_v20, %v1599_v24  ;;  %1792 = vst.msk [vmem:[%s2833_s13] sm:$0xff] %vm1791_vm1, %v1663_v29  ;;  %v779_v35 = vadd.f32 %v2822_v12, %v778_v33  ;;  %v1099_v36 = vadd.f32 %v2822_v12, %v1098_v34 }
  0xf3   : > { %1856 = vst.msk [vmem:[%s2833_s13 + $0x200] sm:$0xff] %vm1791_vm1, %v1727_v30  ;;  %vm1410_vm6 = vcmp.ge.f32.partialorder %v784_v31, 0.0  ;;  %v1538_v37 = vmul.f32 0.2, %v784_v31  ;;  %vm1474_vm7 = vcmp.ge.f32.partialorder %v1104_v32, 0.0  ;;  %v2276_v43 = vpop.f32.mrb[4].mxu0 }
  0xf4   : > { %v1602_v38 = vmul.f32 0.2, %v1104_v32  ;;  %vm1409_vm8 = vcmp.ge.f32.partialorder %v779_v35, 0.0  ;;  %v1537_v39 = vmul.f32 0.2, %v779_v35  ;;  %vm1473_vm9 = vcmp.ge.f32.partialorder %v1099_v36, 0.0 }
  0xf5   : > { %v1601_v40 = vmul.f32 0.2, %v1099_v36  ;;  %v1666_v41 = vsel %vm1410_vm6, %v784_v31, %v1538_v37  ;;  %v2372_v44 = vpop.f32.mrb[4].mxu1  ;;  %v794_v47 = vadd.f32 %v2276_v43, %v2822_v12  ;;  %v788_v49 = vpop.f32.mrb[5].mxu0 }
  0xf6   : > { %v1730_v42 = vsel %vm1474_vm7, %v1104_v32, %v1602_v38  ;;  %1795 = vst.msk [vmem:[%s2833_s13 + $0x18] sm:$0xff] %vm1791_vm1, %v1666_v41  ;;  %v1665_v45 = vsel %vm1409_vm8, %v779_v35, %v1537_v39  ;;  %v1114_v48 = vadd.f32 %v2372_v44, %v2822_v12  ;;  %v1108_v50 = vpop.f32.mrb[5].mxu1  ;;  %v789_v51 = vadd.f32 %v2822_v12, %v788_v49 }
  0xf7   : > { %1859 = vst.msk [vmem:[%s2833_s13 + $0x218] sm:$0xff] %vm1791_vm1, %v1730_v42  ;;  %v1729_v46 = vsel %vm1473_vm9, %v1099_v36, %v1601_v40  ;;  %1794 = vst.msk [vmem:[%s2833_s13 + $0x10] sm:$0xff] %vm1791_vm1, %v1665_v45  ;;  %v1109_v52 = vadd.f32 %v2822_v12, %v1108_v50  ;;  %v2279_v53 = vpop.f32.mrb[6].mxu0  ;;  %vm1412_vm10 = vcmp.ge.f32.partialorder %v794_v47, 0.0  ;;  %v1540_v55 = vmul.f32 0.2, %v794_v47 }
  0xf8   : > { %1858 = vst.msk [vmem:[%s2833_s13 + $0x210] sm:$0xff] %vm1791_vm1, %v1729_v46  ;;  %v2375_v54 = vpop.f32.mrb[6].mxu1  ;;  %vm1476_vm11 = vcmp.ge.f32.partialorder %v1114_v48, 0.0  ;;  %v1604_v56 = vmul.f32 0.2, %v1114_v48  ;;  %vm1411_vm12 = vcmp.ge.f32.partialorder %v789_v51, 0.0  ;;  %v804_v61 = vadd.f32 %v2279_v53, %v2822_v12 }
  0xf9   : > { %v1539_v57 = vmul.f32 0.2, %v789_v51  ;;  %vm1475_vm13 = vcmp.ge.f32.partialorder %v1109_v52, 0.0  ;;  %v1603_v58 = vmul.f32 0.2, %v1109_v52  ;;  %v1668_v59 = vsel %vm1412_vm10, %v794_v47, %v1540_v55  ;;  %v798_v63 = vpop.f32.mrb[7].mxu0 }
  0xfa   : > { %v1732_v60 = vsel %vm1476_vm11, %v1114_v48, %v1604_v56  ;;  %v1124_v62 = vadd.f32 %v2375_v54, %v2822_v12  ;;  %v1118_v0 = vpop.f32.mrb[7].mxu1  ;;  %1797 = vst.msk [vmem:[%s2833_s13 + $0x28] sm:$0xff] %vm1791_vm1, %v1668_v59  ;;  %v799_v3 = vadd.f32 %v2822_v12, %v798_v63  ;;  %vm1414_vm14 = vcmp.ge.f32.partialorder %v804_v61, 0.0 }
  0xfb   : > { %1861 = vst.msk [vmem:[%s2833_s13 + $0x228] sm:$0xff] %vm1791_vm1, %v1732_v60  ;;  %v1667_v1 = vsel %vm1411_vm12, %v789_v51, %v1539_v57  ;;  %v1731_v2 = vsel %vm1475_vm13, %v1109_v52, %v1603_v58  ;;  %v1119_v4 = vadd.f32 %v2822_v12, %v1118_v0  ;;  %v2282_v5 = vpop.f32.mrb[8].mxu0  ;;  %v1542_v7 = vmul.f32 0.2, %v804_v61 }
  0xfc   : > { %v2378_v6 = vpop.f32.mrb[8].mxu1  ;;  %1796 = vst.msk [vmem:[%s2833_s13 + $0x20] sm:$0xff] %vm1791_vm1, %v1667_v1  ;;  %1860 = vst.msk [vmem:[%s2833_s13 + $0x220] sm:$0xff] %vm1791_vm1, %v1731_v2  ;;  %vm1478_vm15 = vcmp.ge.f32.partialorder %v1124_v62, 0.0  ;;  %v1606_v8 = vmul.f32 0.2, %v1124_v62  ;;  %v814_v14 = vadd.f32 %v2282_v5, %v2822_v12 }
  0xfd   : > { %vm1413_vm0 = vcmp.ge.f32.partialorder %v799_v3, 0.0  ;;  %v1541_v9 = vmul.f32 0.2, %v799_v3  ;;  %vm1477_vm2 = vcmp.ge.f32.partialorder %v1119_v4, 0.0  ;;  %v1605_v10 = vmul.f32 0.2, %v1119_v4 }
  0xfe   : > { %v1670_v11 = vsel %vm1414_vm14, %v804_v61, %v1542_v7  ;;  %v1734_v13 = vsel %vm1478_vm15, %v1124_v62, %v1606_v8  ;;  %v1134_v15 = vadd.f32 %v2378_v6, %v2822_v12  ;;  %v808_v16 = vpop.f32.mrb[9].mxu0  ;;  %v1128_v17 = vpop.f32.mrb[9].mxu1  ;;  %vm1416_vm3 = vcmp.ge.f32.partialorder %v814_v14, 0.0 }
  0xff   : > { %1799 = vst.msk [vmem:[%s2833_s13 + $0x38] sm:$0xff] %vm1791_vm1, %v1670_v11  ;;  %1863 = vst.msk [vmem:[%s2833_s13 + $0x238] sm:$0xff] %vm1791_vm1, %v1734_v13  ;;  %v1669_v18 = vsel %vm1413_vm0, %v799_v3, %v1541_v9  ;;  %v1733_v19 = vsel %vm1477_vm2, %v1119_v4, %v1605_v10  ;;  %v809_v20 = vadd.f32 %v2822_v12, %v808_v16  ;;  %v2285_v22 = vpop.f32.mrb[10].mxu0  ;;  %v1544_v24 = vmul.f32 0.2, %v814_v14 }
 0x100   : > { %v1129_v21 = vadd.f32 %v2822_v12, %v1128_v17  ;;  %v2381_v23 = vpop.f32.mrb[10].mxu1  ;;  %1798 = vst.msk [vmem:[%s2833_s13 + $0x30] sm:$0xff] %vm1791_vm1, %v1669_v18  ;;  %1862 = vst.msk [vmem:[%s2833_s13 + $0x230] sm:$0xff] %vm1791_vm1, %v1733_v19  ;;  %vm1480_vm4 = vcmp.ge.f32.partialorder %v1134_v15, 0.0  ;;  %v1608_v25 = vmul.f32 0.2, %v1134_v15  ;;  %v824_v30 = vadd.f32 %v2285_v22, %v2822_v12 }
 0x101   : > { %vm1415_vm5 = vcmp.ge.f32.partialorder %v809_v20, 0.0  ;;  %v1543_v26 = vmul.f32 0.2, %v809_v20  ;;  %v1672_v28 = vsel %vm1416_vm3, %v814_v14, %v1544_v24  ;;  %v1144_v31 = vadd.f32 %v2381_v23, %v2822_v12  ;;  %v818_v32 = vpop.f32.mrb[11].mxu0  ;;  %v1138_v33 = vpop.f32.mrb[11].mxu1 }
 0x102   : > { %vm1479_vm6 = vcmp.ge.f32.partialorder %v1129_v21, 0.0  ;;  %v1607_v27 = vmul.f32 0.2, %v1129_v21  ;;  %v1736_v29 = vsel %vm1480_vm4, %v1134_v15, %v1608_v25  ;;  %1801 = vst.msk [vmem:[%s2833_s13 + $0x48] sm:$0xff] %vm1791_vm1, %v1672_v28  ;;  %v819_v36 = vadd.f32 %v2822_v12, %v818_v32 }
 0x103   : > { %1865 = vst.msk [vmem:[%s2833_s13 + $0x248] sm:$0xff] %vm1791_vm1, %v1736_v29  ;;  %v1671_v34 = vsel %vm1415_vm5, %v809_v20, %v1543_v26  ;;  %v1139_v37 = vadd.f32 %v2822_v12, %v1138_v33  ;;  %v2288_v38 = vpop.f32.mrb[12].mxu0  ;;  %vm1418_vm7 = vcmp.ge.f32.partialorder %v824_v30, 0.0  ;;  %v1546_v40 = vmul.f32 0.2, %v824_v30 }
 0x104   : > { %v1735_v35 = vsel %vm1479_vm6, %v1129_v21, %v1607_v27  ;;  %v2384_v39 = vpop.f32.mrb[12].mxu1  ;;  %1800 = vst.msk [vmem:[%s2833_s13 + $0x40] sm:$0xff] %vm1791_vm1, %v1671_v34  ;;  %vm1482_vm8 = vcmp.ge.f32.partialorder %v1144_v31, 0.0  ;;  %v1610_v41 = vmul.f32 0.2, %v1144_v31  ;;  %vm1417_vm9 = vcmp.ge.f32.partialorder %v819_v36, 0.0 }
 0x105   : > { %1864 = vst.msk [vmem:[%s2833_s13 + $0x240] sm:$0xff] %vm1791_vm1, %v1735_v35  ;;  %v1545_v42 = vmul.f32 0.2, %v819_v36  ;;  %vm1481_vm10 = vcmp.ge.f32.partialorder %v1139_v37, 0.0  ;;  %v1609_v43 = vmul.f32 0.2, %v1139_v37  ;;  %v1674_v44 = vsel %vm1418_vm7, %v824_v30, %v1546_v40 }
 0x106   : > { %v1738_v45 = vsel %vm1482_vm8, %v1144_v31, %v1610_v41  ;;  %v834_v46 = vadd.f32 %v2288_v38, %v2822_v12  ;;  %v1154_v47 = vadd.f32 %v2384_v39, %v2822_v12  ;;  %v828_v48 = vpop.f32.mrb[13].mxu0  ;;  %v1148_v49 = vpop.f32.mrb[13].mxu1  ;;  %1803 = vst.msk [vmem:[%s2833_s13 + $0x58] sm:$0xff] %vm1791_vm1, %v1674_v44 }
 0x107   : > { %1867 = vst.msk [vmem:[%s2833_s13 + $0x258] sm:$0xff] %vm1791_vm1, %v1738_v45  ;;  %v1673_v50 = vsel %vm1417_vm9, %v819_v36, %v1545_v42  ;;  %v1737_v51 = vsel %vm1481_vm10, %v1139_v37, %v1609_v43  ;;  %v829_v52 = vadd.f32 %v2822_v12, %v828_v48  ;;  %v1149_v53 = vadd.f32 %v2822_v12, %v1148_v49  ;;  %v2291_v54 = vpop.f32.mrb[14].mxu0 }
 0x108   : > { %v2387_v55 = vpop.f32.mrb[14].mxu1  ;;  %1802 = vst.msk [vmem:[%s2833_s13 + $0x50] sm:$0xff] %vm1791_vm1, %v1673_v50  ;;  %1866 = vst.msk [vmem:[%s2833_s13 + $0x250] sm:$0xff] %vm1791_vm1, %v1737_v51  ;;  %vm1420_vm11 = vcmp.ge.f32.partialorder %v834_v46, 0.0  ;;  %v1548_v56 = vmul.f32 0.2, %v834_v46  ;;  %v844_v62 = vadd.f32 %v2291_v54, %v2822_v12 }
 0x109   : > { %vm1484_vm12 = vcmp.ge.f32.partialorder %v1154_v47, 0.0  ;;  %v1612_v57 = vmul.f32 0.2, %v1154_v47  ;;  %vm1419_vm13 = vcmp.ge.f32.partialorder %v829_v52, 0.0  ;;  %v1547_v58 = vmul.f32 0.2, %v829_v52 }
 0x10a   : > { %vm1483_vm14 = vcmp.ge.f32.partialorder %v1149_v53, 0.0  ;;  %v1611_v59 = vmul.f32 0.2, %v1149_v53  ;;  %v1676_v60 = vsel %vm1420_vm11, %v834_v46, %v1548_v56  ;;  %v1164_v63 = vadd.f32 %v2387_v55, %v2822_v12  ;;  %v838_v0 = vpop.f32.mrb[15].mxu0  ;;  %v1158_v1 = vpop.f32.mrb[15].mxu1 }
 0x10b   : > { %v1740_v61 = vsel %vm1484_vm12, %v1154_v47, %v1612_v57  ;;  %1805 = vst.msk [vmem:[%s2833_s13 + $0x68] sm:$0xff] %vm1791_vm1, %v1676_v60  ;;  %v1675_v2 = vsel %vm1419_vm13, %v829_v52, %v1547_v58  ;;  %v839_v4 = vadd.f32 %v2822_v12, %v838_v0  ;;  %v1159_v5 = vadd.f32 %v2822_v12, %v1158_v1  ;;  %v2294_v6 = vpop.f32.mrb[16].mxu0 }
 0x10c   : > { %1869 = vst.msk [vmem:[%s2833_s13 + $0x268] sm:$0xff] %vm1791_vm1, %v1740_v61  ;;  %v1739_v3 = vsel %vm1483_vm14, %v1149_v53, %v1611_v59  ;;  %v2390_v7 = vpop.f32.mrb[16].mxu1  ;;  %1804 = vst.msk [vmem:[%s2833_s13 + $0x60] sm:$0xff] %vm1791_vm1, %v1675_v2  ;;  %vm1422_vm15 = vcmp.ge.f32.partialorder %v844_v62, 0.0  ;;  %v1550_v8 = vmul.f32 0.2, %v844_v62  ;;  %v854_v15 = vadd.f32 %v2294_v6, %v2822_v12 }
 0x10d   : > { %1868 = vst.msk [vmem:[%s2833_s13 + $0x260] sm:$0xff] %vm1791_vm1, %v1739_v3  ;;  %vm1486_vm0 = vcmp.ge.f32.partialorder %v1164_v63, 0.0  ;;  %v1614_v9 = vmul.f32 0.2, %v1164_v63  ;;  %vm1421_vm2 = vcmp.ge.f32.partialorder %v839_v4, 0.0  ;;  %vm1485_vm3 = vcmp.ge.f32.partialorder %v1159_v5, 0.0 }
 0x10e   : > { %v1549_v10 = vmul.f32 0.2, %v839_v4  ;;  %v1613_v11 = vmul.f32 0.2, %v1159_v5  ;;  %v1678_v13 = vsel %vm1422_vm15, %v844_v62, %v1550_v8  ;;  %v1174_v16 = vadd.f32 %v2390_v7, %v2822_v12  ;;  %v848_v17 = vpop.f32.mrb[17].mxu0  ;;  %v1168_v18 = vpop.f32.mrb[17].mxu1 }
 0x10f   : > { %v1742_v14 = vsel %vm1486_vm0, %v1164_v63, %v1614_v9  ;;  %1807 = vst.msk [vmem:[%s2833_s13 + $0x78] sm:$0xff] %vm1791_vm1, %v1678_v13  ;;  %v849_v21 = vadd.f32 %v2822_v12, %v848_v17  ;;  %v1169_v22 = vadd.f32 %v2822_v12, %v1168_v18  ;;  %v2297_v23 = vpop.f32.mrb[18].mxu0  ;;  %vm1424_vm4 = vcmp.ge.f32.partialorder %v854_v15, 0.0 }
 0x110   : > { %1871 = vst.msk [vmem:[%s2833_s13 + $0x278] sm:$0xff] %vm1791_vm1, %v1742_v14  ;;  %v1677_v19 = vsel %vm1421_vm2, %v839_v4, %v1549_v10  ;;  %v1741_v20 = vsel %vm1485_vm3, %v1159_v5, %v1613_v11  ;;  %v2393_v24 = vpop.f32.mrb[18].mxu1  ;;  %v1552_v25 = vmul.f32 0.2, %v854_v15  ;;  %vm1488_vm5 = vcmp.ge.f32.partialorder %v1174_v16, 0.0  ;;  %v858_v33 = vpop.f32.mrb[19].mxu0 }
 0x111   : > { %1806 = vst.msk [vmem:[%s2833_s13 + $0x70] sm:$0xff] %vm1791_vm1, %v1677_v19  ;;  %1870 = vst.msk [vmem:[%s2833_s13 + $0x270] sm:$0xff] %vm1791_vm1, %v1741_v20  ;;  %v1616_v26 = vmul.f32 0.2, %v1174_v16  ;;  %vm1423_vm6 = vcmp.ge.f32.partialorder %v849_v21, 0.0  ;;  %vm1487_vm7 = vcmp.ge.f32.partialorder %v1169_v22, 0.0  ;;  %v864_v31 = vadd.f32 %v2297_v23, %v2822_v12 }
 0x112   : > { %v1551_v27 = vmul.f32 0.2, %v849_v21  ;;  %v1615_v28 = vmul.f32 0.2, %v1169_v22  ;;  %v1680_v29 = vsel %vm1424_vm4, %v854_v15, %v1552_v25  ;;  %v1184_v32 = vadd.f32 %v2393_v24, %v2822_v12  ;;  %v1178_v34 = vpop.f32.mrb[19].mxu1 }
 0x113   : > { %v1744_v30 = vsel %vm1488_vm5, %v1174_v16, %v1616_v26  ;;  %1809 = vst.msk [vmem:[%s2833_s13 + $0x88] sm:$0xff] %vm1791_vm1, %v1680_v29  ;;  %v859_v37 = vadd.f32 %v2822_v12, %v858_v33  ;;  %v1179_v38 = vadd.f32 %v2822_v12, %v1178_v34  ;;  %v2300_v39 = vpop.f32.mrb[20].mxu0  ;;  %vm1426_vm8 = vcmp.ge.f32.partialorder %v864_v31, 0.0 }
 0x114   : > { %1873 = vst.msk [vmem:[%s2833_s13 + $0x288] sm:$0xff] %vm1791_vm1, %v1744_v30  ;;  %v1679_v35 = vsel %vm1423_vm6, %v849_v21, %v1551_v27  ;;  %v1743_v36 = vsel %vm1487_vm7, %v1169_v22, %v1615_v28  ;;  %v2396_v40 = vpop.f32.mrb[20].mxu1  ;;  %v1554_v41 = vmul.f32 0.2, %v864_v31  ;;  %vm1490_vm9 = vcmp.ge.f32.partialorder %v1184_v32, 0.0  ;;  %v868_v49 = vpop.f32.mrb[21].mxu0 }
 0x115   : > { %1808 = vst.msk [vmem:[%s2833_s13 + $0x80] sm:$0xff] %vm1791_vm1, %v1679_v35  ;;  %1872 = vst.msk [vmem:[%s2833_s13 + $0x280] sm:$0xff] %vm1791_vm1, %v1743_v36  ;;  %v1618_v42 = vmul.f32 0.2, %v1184_v32  ;;  %vm1425_vm10 = vcmp.ge.f32.partialorder %v859_v37, 0.0  ;;  %vm1489_vm11 = vcmp.ge.f32.partialorder %v1179_v38, 0.0  ;;  %v874_v47 = vadd.f32 %v2300_v39, %v2822_v12 }
 0x116   : > { %v1553_v43 = vmul.f32 0.2, %v859_v37  ;;  %v1617_v44 = vmul.f32 0.2, %v1179_v38  ;;  %v1682_v45 = vsel %vm1426_vm8, %v864_v31, %v1554_v41  ;;  %v1194_v48 = vadd.f32 %v2396_v40, %v2822_v12  ;;  %v1188_v50 = vpop.f32.mrb[21].mxu1 }
 0x117   : > { %v1746_v46 = vsel %vm1490_vm9, %v1184_v32, %v1618_v42  ;;  %1811 = vst.msk [vmem:[%s2833_s13 + $0x98] sm:$0xff] %vm1791_vm1, %v1682_v45  ;;  %v869_v53 = vadd.f32 %v2822_v12, %v868_v49  ;;  %v1189_v54 = vadd.f32 %v2822_v12, %v1188_v50  ;;  %v2303_v55 = vpop.f32.mrb[22].mxu0  ;;  %vm1428_vm12 = vcmp.ge.f32.partialorder %v874_v47, 0.0 }
 0x118   : > { %1875 = vst.msk [vmem:[%s2833_s13 + $0x298] sm:$0xff] %vm1791_vm1, %v1746_v46  ;;  %v1681_v51 = vsel %vm1425_vm10, %v859_v37, %v1553_v43  ;;  %v1745_v52 = vsel %vm1489_vm11, %v1179_v38, %v1617_v44  ;;  %v2399_v56 = vpop.f32.mrb[22].mxu1  ;;  %v1556_v57 = vmul.f32 0.2, %v874_v47  ;;  %vm1492_vm13 = vcmp.ge.f32.partialorder %v1194_v48, 0.0  ;;  %v878_v1 = vpop.f32.mrb[23].mxu0 }
 0x119   : > { %1810 = vst.msk [vmem:[%s2833_s13 + $0x90] sm:$0xff] %vm1791_vm1, %v1681_v51  ;;  %1874 = vst.msk [vmem:[%s2833_s13 + $0x290] sm:$0xff] %vm1791_vm1, %v1745_v52  ;;  %v1620_v58 = vmul.f32 0.2, %v1194_v48  ;;  %vm1427_vm14 = vcmp.ge.f32.partialorder %v869_v53, 0.0  ;;  %vm1491_vm15 = vcmp.ge.f32.partialorder %v1189_v54, 0.0  ;;  %v884_v63 = vadd.f32 %v2303_v55, %v2822_v12 }
 0x11a   : > { %v1555_v59 = vmul.f32 0.2, %v869_v53  ;;  %v1619_v60 = vmul.f32 0.2, %v1189_v54  ;;  %v1684_v61 = vsel %vm1428_vm12, %v874_v47, %v1556_v57  ;;  %v1204_v0 = vadd.f32 %v2399_v56, %v2822_v12  ;;  %v1198_v2 = vpop.f32.mrb[23].mxu1 }
 0x11b   : > { %v1748_v62 = vsel %vm1492_vm13, %v1194_v48, %v1620_v58  ;;  %1813 = vst.msk [vmem:[%s2833_s13 + $0xa8] sm:$0xff] %vm1791_vm1, %v1684_v61  ;;  %v879_v5 = vadd.f32 %v2822_v12, %v878_v1  ;;  %v1199_v6 = vadd.f32 %v2822_v12, %v1198_v2  ;;  %v2306_v7 = vpop.f32.mrb[24].mxu0  ;;  %vm1430_vm0 = vcmp.ge.f32.partialorder %v884_v63, 0.0 }
 0x11c   : > { %1877 = vst.msk [vmem:[%s2833_s13 + $0x2a8] sm:$0xff] %vm1791_vm1, %v1748_v62  ;;  %v1683_v3 = vsel %vm1427_vm14, %v869_v53, %v1555_v59  ;;  %v1747_v4 = vsel %vm1491_vm15, %v1189_v54, %v1619_v60  ;;  %v2402_v8 = vpop.f32.mrb[24].mxu1  ;;  %v1558_v9 = vmul.f32 0.2, %v884_v63  ;;  %vm1494_vm2 = vcmp.ge.f32.partialorder %v1204_v0, 0.0  ;;  %v888_v18 = vpop.f32.mrb[25].mxu0 }
 0x11d   : > { %1812 = vst.msk [vmem:[%s2833_s13 + $0xa0] sm:$0xff] %vm1791_vm1, %v1683_v3  ;;  %1876 = vst.msk [vmem:[%s2833_s13 + $0x2a0] sm:$0xff] %vm1791_vm1, %v1747_v4  ;;  %v1622_v10 = vmul.f32 0.2, %v1204_v0  ;;  %vm1429_vm3 = vcmp.ge.f32.partialorder %v879_v5, 0.0  ;;  %vm1493_vm4 = vcmp.ge.f32.partialorder %v1199_v6, 0.0  ;;  %v894_v16 = vadd.f32 %v2306_v7, %v2822_v12 }
 0x11e   : > { %v1557_v11 = vmul.f32 0.2, %v879_v5  ;;  %v1621_v13 = vmul.f32 0.2, %v1199_v6  ;;  %v1686_v14 = vsel %vm1430_vm0, %v884_v63, %v1558_v9  ;;  %v1214_v17 = vadd.f32 %v2402_v8, %v2822_v12  ;;  %v1208_v19 = vpop.f32.mrb[25].mxu1 }
 0x11f   : > { %v1750_v15 = vsel %vm1494_vm2, %v1204_v0, %v1622_v10  ;;  %1815 = vst.msk [vmem:[%s2833_s13 + $0xb8] sm:$0xff] %vm1791_vm1, %v1686_v14  ;;  %v889_v22 = vadd.f32 %v2822_v12, %v888_v18  ;;  %v1209_v23 = vadd.f32 %v2822_v12, %v1208_v19  ;;  %v2309_v24 = vpop.f32.mrb[26].mxu0  ;;  %vm1432_vm5 = vcmp.ge.f32.partialorder %v894_v16, 0.0 }
 0x120   : > { %1879 = vst.msk [vmem:[%s2833_s13 + $0x2b8] sm:$0xff] %vm1791_vm1, %v1750_v15  ;;  %v1685_v20 = vsel %vm1429_vm3, %v879_v5, %v1557_v11  ;;  %v1749_v21 = vsel %vm1493_vm4, %v1199_v6, %v1621_v13  ;;  %v2405_v25 = vpop.f32.mrb[26].mxu1  ;;  %v1560_v26 = vmul.f32 0.2, %v894_v16  ;;  %vm1496_vm6 = vcmp.ge.f32.partialorder %v1214_v17, 0.0  ;;  %v898_v34 = vpop.f32.mrb[27].mxu0 }
 0x121   : > { %1814 = vst.msk [vmem:[%s2833_s13 + $0xb0] sm:$0xff] %vm1791_vm1, %v1685_v20  ;;  %1878 = vst.msk [vmem:[%s2833_s13 + $0x2b0] sm:$0xff] %vm1791_vm1, %v1749_v21  ;;  %v1624_v27 = vmul.f32 0.2, %v1214_v17  ;;  %vm1431_vm7 = vcmp.ge.f32.partialorder %v889_v22, 0.0  ;;  %vm1495_vm8 = vcmp.ge.f32.partialorder %v1209_v23, 0.0  ;;  %v904_v32 = vadd.f32 %v2309_v24, %v2822_v12 }
 0x122   : > { %v1559_v28 = vmul.f32 0.2, %v889_v22  ;;  %v1623_v29 = vmul.f32 0.2, %v1209_v23  ;;  %v1688_v30 = vsel %vm1432_vm5, %v894_v16, %v1560_v26  ;;  %v1224_v33 = vadd.f32 %v2405_v25, %v2822_v12  ;;  %v1218_v35 = vpop.f32.mrb[27].mxu1 }
 0x123   : > { %v1752_v31 = vsel %vm1496_vm6, %v1214_v17, %v1624_v27  ;;  %1817 = vst.msk [vmem:[%s2833_s13 + $0xc8] sm:$0xff] %vm1791_vm1, %v1688_v30  ;;  %v899_v38 = vadd.f32 %v2822_v12, %v898_v34  ;;  %v1219_v39 = vadd.f32 %v2822_v12, %v1218_v35  ;;  %v2312_v40 = vpop.f32.mrb[28].mxu0  ;;  %vm1434_vm9 = vcmp.ge.f32.partialorder %v904_v32, 0.0 }
 0x124   : > { %1881 = vst.msk [vmem:[%s2833_s13 + $0x2c8] sm:$0xff] %vm1791_vm1, %v1752_v31  ;;  %v1687_v36 = vsel %vm1431_vm7, %v889_v22, %v1559_v28  ;;  %v1751_v37 = vsel %vm1495_vm8, %v1209_v23, %v1623_v29  ;;  %v2408_v41 = vpop.f32.mrb[28].mxu1  ;;  %v1562_v42 = vmul.f32 0.2, %v904_v32  ;;  %vm1498_vm10 = vcmp.ge.f32.partialorder %v1224_v33, 0.0  ;;  %v908_v50 = vpop.f32.mrb[29].mxu0 }
 0x125   : > { %1816 = vst.msk [vmem:[%s2833_s13 + $0xc0] sm:$0xff] %vm1791_vm1, %v1687_v36  ;;  %1880 = vst.msk [vmem:[%s2833_s13 + $0x2c0] sm:$0xff] %vm1791_vm1, %v1751_v37  ;;  %v1626_v43 = vmul.f32 0.2, %v1224_v33  ;;  %vm1433_vm11 = vcmp.ge.f32.partialorder %v899_v38, 0.0  ;;  %vm1497_vm12 = vcmp.ge.f32.partialorder %v1219_v39, 0.0  ;;  %v914_v48 = vadd.f32 %v2312_v40, %v2822_v12 }
 0x126   : > { %v1561_v44 = vmul.f32 0.2, %v899_v38  ;;  %v1625_v45 = vmul.f32 0.2, %v1219_v39  ;;  %v1690_v46 = vsel %vm1434_vm9, %v904_v32, %v1562_v42  ;;  %v1234_v49 = vadd.f32 %v2408_v41, %v2822_v12  ;;  %v1228_v51 = vpop.f32.mrb[29].mxu1 }
 0x127   : > { %v1754_v47 = vsel %vm1498_vm10, %v1224_v33, %v1626_v43  ;;  %1819 = vst.msk [vmem:[%s2833_s13 + $0xd8] sm:$0xff] %vm1791_vm1, %v1690_v46  ;;  %v909_v54 = vadd.f32 %v2822_v12, %v908_v50  ;;  %v1229_v55 = vadd.f32 %v2822_v12, %v1228_v51  ;;  %v2315_v56 = vpop.f32.mrb[30].mxu0  ;;  %vm1436_vm13 = vcmp.ge.f32.partialorder %v914_v48, 0.0 }
 0x128   : > { %1883 = vst.msk [vmem:[%s2833_s13 + $0x2d8] sm:$0xff] %vm1791_vm1, %v1754_v47  ;;  %v1689_v52 = vsel %vm1433_vm11, %v899_v38, %v1561_v44  ;;  %v1753_v53 = vsel %vm1497_vm12, %v1219_v39, %v1625_v45  ;;  %v2411_v57 = vpop.f32.mrb[30].mxu1  ;;  %v1564_v58 = vmul.f32 0.2, %v914_v48  ;;  %vm1500_vm14 = vcmp.ge.f32.partialorder %v1234_v49, 0.0  ;;  %v918_v2 = vpop.f32.mrb[31].mxu0 }
 0x129   : > { %1818 = vst.msk [vmem:[%s2833_s13 + $0xd0] sm:$0xff] %vm1791_vm1, %v1689_v52  ;;  %1882 = vst.msk [vmem:[%s2833_s13 + $0x2d0] sm:$0xff] %vm1791_vm1, %v1753_v53  ;;  %v1628_v59 = vmul.f32 0.2, %v1234_v49  ;;  %vm1435_vm15 = vcmp.ge.f32.partialorder %v909_v54, 0.0  ;;  %vm1499_vm0 = vcmp.ge.f32.partialorder %v1229_v55, 0.0  ;;  %v924_v0 = vadd.f32 %v2315_v56, %v2822_v12 }
 0x12a   : > { %v1563_v60 = vmul.f32 0.2, %v909_v54  ;;  %v1627_v61 = vmul.f32 0.2, %v1229_v55  ;;  %v1692_v62 = vsel %vm1436_vm13, %v914_v48, %v1564_v58  ;;  %v1244_v1 = vadd.f32 %v2411_v57, %v2822_v12  ;;  %v1238_v3 = vpop.f32.mrb[31].mxu1 }
 0x12b   : > { %v1756_v63 = vsel %vm1500_vm14, %v1234_v49, %v1628_v59  ;;  %1821 = vst.msk [vmem:[%s2833_s13 + $0xe8] sm:$0xff] %vm1791_vm1, %v1692_v62  ;;  %v919_v6 = vadd.f32 %v2822_v12, %v918_v2  ;;  %v1239_v7 = vadd.f32 %v2822_v12, %v1238_v3  ;;  %v2318_v8 = vpop.f32.mrb[32].mxu0  ;;  %vm1438_vm2 = vcmp.ge.f32.partialorder %v924_v0, 0.0 }
 0x12c   : > { %1885 = vst.msk [vmem:[%s2833_s13 + $0x2e8] sm:$0xff] %vm1791_vm1, %v1756_v63  ;;  %v1691_v4 = vsel %vm1435_vm15, %v909_v54, %v1563_v60  ;;  %v1755_v5 = vsel %vm1499_vm0, %v1229_v55, %v1627_v61  ;;  %v2414_v9 = vpop.f32.mrb[32].mxu1  ;;  %v1566_v10 = vmul.f32 0.2, %v924_v0  ;;  %vm1502_vm3 = vcmp.ge.f32.partialorder %v1244_v1, 0.0  ;;  %v928_v19 = vpop.f32.mrb[33].mxu0 }
 0x12d   : > { %1820 = vst.msk [vmem:[%s2833_s13 + $0xe0] sm:$0xff] %vm1791_vm1, %v1691_v4  ;;  %1884 = vst.msk [vmem:[%s2833_s13 + $0x2e0] sm:$0xff] %vm1791_vm1, %v1755_v5  ;;  %v1630_v11 = vmul.f32 0.2, %v1244_v1  ;;  %vm1437_vm4 = vcmp.ge.f32.partialorder %v919_v6, 0.0  ;;  %vm1501_vm5 = vcmp.ge.f32.partialorder %v1239_v7, 0.0  ;;  %v934_v17 = vadd.f32 %v2318_v8, %v2822_v12 }
 0x12e   : > { %v1565_v13 = vmul.f32 0.2, %v919_v6  ;;  %v1629_v14 = vmul.f32 0.2, %v1239_v7  ;;  %v1694_v15 = vsel %vm1438_vm2, %v924_v0, %v1566_v10  ;;  %v1254_v18 = vadd.f32 %v2414_v9, %v2822_v12  ;;  %v1248_v20 = vpop.f32.mrb[33].mxu1 }
 0x12f   : > { %v1758_v16 = vsel %vm1502_vm3, %v1244_v1, %v1630_v11  ;;  %1823 = vst.msk [vmem:[%s2833_s13 + $0xf8] sm:$0xff] %vm1791_vm1, %v1694_v15  ;;  %v929_v23 = vadd.f32 %v2822_v12, %v928_v19  ;;  %v1249_v24 = vadd.f32 %v2822_v12, %v1248_v20  ;;  %v2321_v25 = vpop.f32.mrb[34].mxu0  ;;  %vm1440_vm6 = vcmp.ge.f32.partialorder %v934_v17, 0.0 }
 0x130   : > { %1887 = vst.msk [vmem:[%s2833_s13 + $0x2f8] sm:$0xff] %vm1791_vm1, %v1758_v16  ;;  %v1693_v21 = vsel %vm1437_vm4, %v919_v6, %v1565_v13  ;;  %v1757_v22 = vsel %vm1501_vm5, %v1239_v7, %v1629_v14  ;;  %v2417_v26 = vpop.f32.mrb[34].mxu1  ;;  %v1568_v27 = vmul.f32 0.2, %v934_v17  ;;  %vm1504_vm7 = vcmp.ge.f32.partialorder %v1254_v18, 0.0  ;;  %v938_v35 = vpop.f32.mrb[35].mxu0 }
 0x131   : > { %1822 = vst.msk [vmem:[%s2833_s13 + $0xf0] sm:$0xff] %vm1791_vm1, %v1693_v21  ;;  %1886 = vst.msk [vmem:[%s2833_s13 + $0x2f0] sm:$0xff] %vm1791_vm1, %v1757_v22  ;;  %v1632_v28 = vmul.f32 0.2, %v1254_v18  ;;  %vm1439_vm8 = vcmp.ge.f32.partialorder %v929_v23, 0.0  ;;  %vm1503_vm9 = vcmp.ge.f32.partialorder %v1249_v24, 0.0  ;;  %v944_v33 = vadd.f32 %v2321_v25, %v2822_v12 }
 0x132   : > { %v1567_v29 = vmul.f32 0.2, %v929_v23  ;;  %v1631_v30 = vmul.f32 0.2, %v1249_v24  ;;  %v1696_v31 = vsel %vm1440_vm6, %v934_v17, %v1568_v27  ;;  %v1264_v34 = vadd.f32 %v2417_v26, %v2822_v12  ;;  %v1258_v36 = vpop.f32.mrb[35].mxu1 }
 0x133   : > { %v1760_v32 = vsel %vm1504_vm7, %v1254_v18, %v1632_v28  ;;  %1825 = vst.msk [vmem:[%s2833_s13 + $0x108] sm:$0xff] %vm1791_vm1, %v1696_v31  ;;  %v939_v39 = vadd.f32 %v2822_v12, %v938_v35  ;;  %v1259_v40 = vadd.f32 %v2822_v12, %v1258_v36  ;;  %v2324_v41 = vpop.f32.mrb[36].mxu0  ;;  %vm1442_vm10 = vcmp.ge.f32.partialorder %v944_v33, 0.0 }
 0x134   : > { %1889 = vst.msk [vmem:[%s2833_s13 + $0x308] sm:$0xff] %vm1791_vm1, %v1760_v32  ;;  %v1695_v37 = vsel %vm1439_vm8, %v929_v23, %v1567_v29  ;;  %v1759_v38 = vsel %vm1503_vm9, %v1249_v24, %v1631_v30  ;;  %v2420_v42 = vpop.f32.mrb[36].mxu1  ;;  %v1570_v43 = vmul.f32 0.2, %v944_v33  ;;  %vm1506_vm11 = vcmp.ge.f32.partialorder %v1264_v34, 0.0  ;;  %v948_v51 = vpop.f32.mrb[37].mxu0 }
 0x135   : > { %1824 = vst.msk [vmem:[%s2833_s13 + $0x100] sm:$0xff] %vm1791_vm1, %v1695_v37  ;;  %1888 = vst.msk [vmem:[%s2833_s13 + $0x300] sm:$0xff] %vm1791_vm1, %v1759_v38  ;;  %v1634_v44 = vmul.f32 0.2, %v1264_v34  ;;  %vm1441_vm12 = vcmp.ge.f32.partialorder %v939_v39, 0.0  ;;  %vm1505_vm13 = vcmp.ge.f32.partialorder %v1259_v40, 0.0  ;;  %v954_v49 = vadd.f32 %v2324_v41, %v2822_v12 }
 0x136   : > { %v1569_v45 = vmul.f32 0.2, %v939_v39  ;;  %v1633_v46 = vmul.f32 0.2, %v1259_v40  ;;  %v1698_v47 = vsel %vm1442_vm10, %v944_v33, %v1570_v43  ;;  %v1274_v50 = vadd.f32 %v2420_v42, %v2822_v12  ;;  %v1268_v52 = vpop.f32.mrb[37].mxu1 }
 0x137   : > { %v1762_v48 = vsel %vm1506_vm11, %v1264_v34, %v1634_v44  ;;  %1827 = vst.msk [vmem:[%s2833_s13 + $0x118] sm:$0xff] %vm1791_vm1, %v1698_v47  ;;  %v949_v55 = vadd.f32 %v2822_v12, %v948_v51  ;;  %v1269_v56 = vadd.f32 %v2822_v12, %v1268_v52  ;;  %v2327_v57 = vpop.f32.mrb[38].mxu0  ;;  %vm1444_vm14 = vcmp.ge.f32.partialorder %v954_v49, 0.0  ;;  %v3085_v41 = vld [vmem:[%s3225_s2] ss:$0 sm:$0xff] }
 0x138   : > { %1891 = vst.msk [vmem:[%s2833_s13 + $0x318] sm:$0xff] %vm1791_vm1, %v1762_v48  ;;  %v1697_v53 = vsel %vm1441_vm12, %v939_v39, %v1569_v45  ;;  %v1761_v54 = vsel %vm1505_vm13, %v1259_v40, %v1633_v46  ;;  %v2423_v58 = vpop.f32.mrb[38].mxu1  ;;  %v1572_v59 = vmul.f32 0.2, %v954_v49  ;;  %vm1508_vm15 = vcmp.ge.f32.partialorder %v1274_v50, 0.0  ;;  %v958_v3 = vpop.f32.mrb[39].mxu0 }
 0x139   : > { %1826 = vst.msk [vmem:[%s2833_s13 + $0x110] sm:$0xff] %vm1791_vm1, %v1697_v53  ;;  %1890 = vst.msk [vmem:[%s2833_s13 + $0x310] sm:$0xff] %vm1791_vm1, %v1761_v54  ;;  %v1636_v60 = vmul.f32 0.2, %v1274_v50  ;;  %vm1443_vm0 = vcmp.ge.f32.partialorder %v949_v55, 0.0  ;;  %vm1507_vm2 = vcmp.ge.f32.partialorder %v1269_v56, 0.0  ;;  %v964_v1 = vadd.f32 %v2327_v57, %v2822_v12 }
 0x13a   : > { %v1571_v61 = vmul.f32 0.2, %v949_v55  ;;  %v1635_v62 = vmul.f32 0.2, %v1269_v56  ;;  %v1700_v63 = vsel %vm1444_vm14, %v954_v49, %v1572_v59  ;;  %v1284_v2 = vadd.f32 %v2423_v58, %v2822_v12  ;;  %v1278_v4 = vpop.f32.mrb[39].mxu1 }
 0x13b   : > { %v1764_v0 = vsel %vm1508_vm15, %v1274_v50, %v1636_v60  ;;  %1829 = vst.msk [vmem:[%s2833_s13 + $0x128] sm:$0xff] %vm1791_vm1, %v1700_v63  ;;  %v959_v7 = vadd.f32 %v2822_v12, %v958_v3  ;;  %v1279_v8 = vadd.f32 %v2822_v12, %v1278_v4  ;;  %v2330_v9 = vpop.f32.mrb[40].mxu0  ;;  %vm1446_vm3 = vcmp.ge.f32.partialorder %v964_v1, 0.0 }
 0x13c   : > { %1893 = vst.msk [vmem:[%s2833_s13 + $0x328] sm:$0xff] %vm1791_vm1, %v1764_v0  ;;  %v1699_v5 = vsel %vm1443_vm0, %v949_v55, %v1571_v61  ;;  %v1763_v6 = vsel %vm1507_vm2, %v1269_v56, %v1635_v62  ;;  %v2426_v10 = vpop.f32.mrb[40].mxu1  ;;  %v1574_v11 = vmul.f32 0.2, %v964_v1  ;;  %vm1510_vm4 = vcmp.ge.f32.partialorder %v1284_v2, 0.0  ;;  %v968_v20 = vpop.f32.mrb[41].mxu0 }
 0x13d   : > { %1828 = vst.msk [vmem:[%s2833_s13 + $0x120] sm:$0xff] %vm1791_vm1, %v1699_v5  ;;  %1892 = vst.msk [vmem:[%s2833_s13 + $0x320] sm:$0xff] %vm1791_vm1, %v1763_v6  ;;  %v1638_v13 = vmul.f32 0.2, %v1284_v2  ;;  %vm1445_vm5 = vcmp.ge.f32.partialorder %v959_v7, 0.0  ;;  %vm1509_vm6 = vcmp.ge.f32.partialorder %v1279_v8, 0.0  ;;  %v974_v18 = vadd.f32 %v2330_v9, %v2822_v12 }
 0x13e   : > { %v1573_v14 = vmul.f32 0.2, %v959_v7  ;;  %v1637_v15 = vmul.f32 0.2, %v1279_v8  ;;  %v1702_v16 = vsel %vm1446_vm3, %v964_v1, %v1574_v11  ;;  %v1294_v19 = vadd.f32 %v2426_v10, %v2822_v12  ;;  %v1288_v21 = vpop.f32.mrb[41].mxu1 }
 0x13f   : > { %v1766_v17 = vsel %vm1510_vm4, %v1284_v2, %v1638_v13  ;;  %1831 = vst.msk [vmem:[%s2833_s13 + $0x138] sm:$0xff] %vm1791_vm1, %v1702_v16  ;;  %v969_v24 = vadd.f32 %v2822_v12, %v968_v20  ;;  %v1289_v25 = vadd.f32 %v2822_v12, %v1288_v21  ;;  %v2333_v26 = vpop.f32.mrb[42].mxu0  ;;  %vm1448_vm7 = vcmp.ge.f32.partialorder %v974_v18, 0.0 }
 0x140   : > { %1895 = vst.msk [vmem:[%s2833_s13 + $0x338] sm:$0xff] %vm1791_vm1, %v1766_v17  ;;  %v1701_v22 = vsel %vm1445_vm5, %v959_v7, %v1573_v14  ;;  %v1765_v23 = vsel %vm1509_vm6, %v1279_v8, %v1637_v15  ;;  %v2429_v27 = vpop.f32.mrb[42].mxu1  ;;  %v1576_v28 = vmul.f32 0.2, %v974_v18  ;;  %vm1512_vm8 = vcmp.ge.f32.partialorder %v1294_v19, 0.0  ;;  %v978_v36 = vpop.f32.mrb[43].mxu0 }
 0x141   : > { %1830 = vst.msk [vmem:[%s2833_s13 + $0x130] sm:$0xff] %vm1791_vm1, %v1701_v22  ;;  %1894 = vst.msk [vmem:[%s2833_s13 + $0x330] sm:$0xff] %vm1791_vm1, %v1765_v23  ;;  %v1640_v29 = vmul.f32 0.2, %v1294_v19  ;;  %vm1447_vm9 = vcmp.ge.f32.partialorder %v969_v24, 0.0  ;;  %vm1511_vm10 = vcmp.ge.f32.partialorder %v1289_v25, 0.0  ;;  %v984_v34 = vadd.f32 %v2333_v26, %v2822_v12 }
 0x142   : > { %v1575_v30 = vmul.f32 0.2, %v969_v24  ;;  %v1639_v31 = vmul.f32 0.2, %v1289_v25  ;;  %v1704_v32 = vsel %vm1448_vm7, %v974_v18, %v1576_v28  ;;  %v1304_v35 = vadd.f32 %v2429_v27, %v2822_v12  ;;  %v1298_v37 = vpop.f32.mrb[43].mxu1 }
 0x143   : > { %v1768_v33 = vsel %vm1512_vm8, %v1294_v19, %v1640_v29  ;;  %1833 = vst.msk [vmem:[%s2833_s13 + $0x148] sm:$0xff] %vm1791_vm1, %v1704_v32  ;;  %v979_v40 = vadd.f32 %v2822_v12, %v978_v36  ;;  %v1299_v42 = vadd.f32 %v3085_v41, %v1298_v37  ;;  %v2336_v43 = vpop.f32.mrb[44].mxu0  ;;  %vm1450_vm11 = vcmp.ge.f32.partialorder %v984_v34, 0.0 }
 0x144   : > { %1897 = vst.msk [vmem:[%s2833_s13 + $0x348] sm:$0xff] %vm1791_vm1, %v1768_v33  ;;  %v1703_v38 = vsel %vm1447_vm9, %v969_v24, %v1575_v30  ;;  %v1767_v39 = vsel %vm1511_vm10, %v1289_v25, %v1639_v31  ;;  %v2432_v44 = vpop.f32.mrb[44].mxu1  ;;  %v1578_v45 = vmul.f32 0.2, %v984_v34  ;;  %vm1514_vm12 = vcmp.ge.f32.partialorder %v1304_v35, 0.0  ;;  %v988_v52 = vpop.f32.mrb[45].mxu0 }
 0x145   : > { %1832 = vst.msk [vmem:[%s2833_s13 + $0x140] sm:$0xff] %vm1791_vm1, %v1703_v38  ;;  %1896 = vst.msk [vmem:[%s2833_s13 + $0x340] sm:$0xff] %vm1791_vm1, %v1767_v39  ;;  %v1642_v46 = vmul.f32 0.2, %v1304_v35  ;;  %vm1449_vm13 = vcmp.ge.f32.partialorder %v979_v40, 0.0  ;;  %vm1513_vm14 = vcmp.ge.f32.partialorder %v1299_v42, 0.0  ;;  %v994_v50 = vadd.f32 %v3085_v41, %v2336_v43 }
 0x146   : > { %v1577_v12 = vmul.f32 0.2, %v979_v40  ;;  %v1641_v47 = vmul.f32 0.2, %v1299_v42  ;;  %v1706_v48 = vsel %vm1450_vm11, %v984_v34, %v1578_v45  ;;  %v1314_v51 = vadd.f32 %v3085_v41, %v2432_v44  ;;  %v1308_v53 = vpop.f32.mrb[45].mxu1 }
 0x147   : > { %v1770_v49 = vsel %vm1514_vm12, %v1304_v35, %v1642_v46  ;;  %1835 = vst.msk [vmem:[%s2833_s13 + $0x158] sm:$0xff] %vm1791_vm1, %v1706_v48  ;;  %v989_v56 = vadd.f32 %v3085_v41, %v988_v52  ;;  %v1309_v57 = vadd.f32 %v3085_v41, %v1308_v53  ;;  %v2339_v58 = vpop.f32.mrb[46].mxu0  ;;  %vm1452_vm15 = vcmp.ge.f32.partialorder %v994_v50, 0.0 }
 0x148   : > { %1899 = vst.msk [vmem:[%s2833_s13 + $0x358] sm:$0xff] %vm1791_vm1, %v1770_v49  ;;  %v1705_v54 = vsel %vm1449_vm13, %v979_v40, %v1577_v12  ;;  %v1769_v55 = vsel %vm1513_vm14, %v1299_v42, %v1641_v47  ;;  %v2435_v59 = vpop.f32.mrb[46].mxu1  ;;  %v1580_v60 = vmul.f32 0.2, %v994_v50  ;;  %vm1516_vm0 = vcmp.ge.f32.partialorder %v1314_v51, 0.0  ;;  %v998_v4 = vpop.f32.mrb[47].mxu0 }
 0x149   : > { %1834 = vst.msk [vmem:[%s2833_s13 + $0x150] sm:$0xff] %vm1791_vm1, %v1705_v54  ;;  %1898 = vst.msk [vmem:[%s2833_s13 + $0x350] sm:$0xff] %vm1791_vm1, %v1769_v55  ;;  %v1644_v61 = vmul.f32 0.2, %v1314_v51  ;;  %vm1451_vm2 = vcmp.ge.f32.partialorder %v989_v56, 0.0  ;;  %vm1515_vm3 = vcmp.ge.f32.partialorder %v1309_v57, 0.0  ;;  %v1004_v2 = vadd.f32 %v3085_v41, %v2339_v58 }
 0x14a   : > { %v1579_v62 = vmul.f32 0.2, %v989_v56  ;;  %v1643_v63 = vmul.f32 0.2, %v1309_v57  ;;  %v1708_v0 = vsel %vm1452_vm15, %v994_v50, %v1580_v60  ;;  %v1324_v3 = vadd.f32 %v3085_v41, %v2435_v59  ;;  %v1318_v5 = vpop.f32.mrb[47].mxu1 }
 0x14b   : > { %v1772_v1 = vsel %vm1516_vm0, %v1314_v51, %v1644_v61  ;;  %1837 = vst.msk [vmem:[%s2833_s13 + $0x168] sm:$0xff] %vm1791_vm1, %v1708_v0  ;;  %v999_v8 = vadd.f32 %v3085_v41, %v998_v4  ;;  %v1319_v9 = vadd.f32 %v3085_v41, %v1318_v5  ;;  %v2342_v10 = vpop.f32.mrb[48].mxu0  ;;  %vm1454_vm4 = vcmp.ge.f32.partialorder %v1004_v2, 0.0 }
 0x14c   : > { %1901 = vst.msk [vmem:[%s2833_s13 + $0x368] sm:$0xff] %vm1791_vm1, %v1772_v1  ;;  %v1707_v6 = vsel %vm1451_vm2, %v989_v56, %v1579_v62  ;;  %v1771_v7 = vsel %vm1515_vm3, %v1309_v57, %v1643_v63  ;;  %v2438_v11 = vpop.f32.mrb[48].mxu1  ;;  %v1582_v13 = vmul.f32 0.2, %v1004_v2  ;;  %vm1518_vm5 = vcmp.ge.f32.partialorder %v1324_v3, 0.0  ;;  %v1008_v21 = vpop.f32.mrb[49].mxu0 }
 0x14d   : > { %1836 = vst.msk [vmem:[%s2833_s13 + $0x160] sm:$0xff] %vm1791_vm1, %v1707_v6  ;;  %1900 = vst.msk [vmem:[%s2833_s13 + $0x360] sm:$0xff] %vm1791_vm1, %v1771_v7  ;;  %v1646_v14 = vmul.f32 0.2, %v1324_v3  ;;  %vm1453_vm6 = vcmp.ge.f32.partialorder %v999_v8, 0.0  ;;  %vm1517_vm7 = vcmp.ge.f32.partialorder %v1319_v9, 0.0  ;;  %v1014_v19 = vadd.f32 %v3085_v41, %v2342_v10 }
 0x14e   : > { %v1581_v15 = vmul.f32 0.2, %v999_v8  ;;  %v1645_v16 = vmul.f32 0.2, %v1319_v9  ;;  %v1710_v17 = vsel %vm1454_vm4, %v1004_v2, %v1582_v13  ;;  %v1334_v20 = vadd.f32 %v3085_v41, %v2438_v11  ;;  %v1328_v22 = vpop.f32.mrb[49].mxu1 }
 0x14f   : > { %v1774_v18 = vsel %vm1518_vm5, %v1324_v3, %v1646_v14  ;;  %1839 = vst.msk [vmem:[%s2833_s13 + $0x178] sm:$0xff] %vm1791_vm1, %v1710_v17  ;;  %v1009_v25 = vadd.f32 %v3085_v41, %v1008_v21  ;;  %v1329_v26 = vadd.f32 %v3085_v41, %v1328_v22  ;;  %v2345_v27 = vpop.f32.mrb[50].mxu0  ;;  %vm1456_vm8 = vcmp.ge.f32.partialorder %v1014_v19, 0.0 }
 0x150   : > { %1903 = vst.msk [vmem:[%s2833_s13 + $0x378] sm:$0xff] %vm1791_vm1, %v1774_v18  ;;  %v1709_v23 = vsel %vm1453_vm6, %v999_v8, %v1581_v15  ;;  %v1773_v24 = vsel %vm1517_vm7, %v1319_v9, %v1645_v16  ;;  %v2441_v28 = vpop.f32.mrb[50].mxu1  ;;  %v1584_v29 = vmul.f32 0.2, %v1014_v19  ;;  %vm1520_vm9 = vcmp.ge.f32.partialorder %v1334_v20, 0.0  ;;  %v1018_v37 = vpop.f32.mrb[51].mxu0 }
 0x151   : > { %1838 = vst.msk [vmem:[%s2833_s13 + $0x170] sm:$0xff] %vm1791_vm1, %v1709_v23  ;;  %1902 = vst.msk [vmem:[%s2833_s13 + $0x370] sm:$0xff] %vm1791_vm1, %v1773_v24  ;;  %v1648_v30 = vmul.f32 0.2, %v1334_v20  ;;  %vm1455_vm10 = vcmp.ge.f32.partialorder %v1009_v25, 0.0  ;;  %vm1519_vm11 = vcmp.ge.f32.partialorder %v1329_v26, 0.0  ;;  %v1024_v35 = vadd.f32 %v3085_v41, %v2345_v27 }
 0x152   : > { %v1583_v31 = vmul.f32 0.2, %v1009_v25  ;;  %v1647_v32 = vmul.f32 0.2, %v1329_v26  ;;  %v1712_v33 = vsel %vm1456_vm8, %v1014_v19, %v1584_v29  ;;  %v1344_v36 = vadd.f32 %v3085_v41, %v2441_v28  ;;  %v1338_v38 = vpop.f32.mrb[51].mxu1 }
 0x153   : > { %v1776_v34 = vsel %vm1520_vm9, %v1334_v20, %v1648_v30  ;;  %1841 = vst.msk [vmem:[%s2833_s13 + $0x188] sm:$0xff] %vm1791_vm1, %v1712_v33  ;;  %v1019_v42 = vadd.f32 %v3085_v41, %v1018_v37  ;;  %v1339_v43 = vadd.f32 %v3085_v41, %v1338_v38  ;;  %v2348_v44 = vpop.f32.mrb[52].mxu0  ;;  %vm1458_vm12 = vcmp.ge.f32.partialorder %v1024_v35, 0.0 }
 0x154   : > { %1905 = vst.msk [vmem:[%s2833_s13 + $0x388] sm:$0xff] %vm1791_vm1, %v1776_v34  ;;  %v1711_v39 = vsel %vm1455_vm10, %v1009_v25, %v1583_v31  ;;  %v1775_v40 = vsel %vm1519_vm11, %v1329_v26, %v1647_v32  ;;  %v2444_v45 = vpop.f32.mrb[52].mxu1  ;;  %v1586_v46 = vmul.f32 0.2, %v1024_v35  ;;  %vm1522_vm13 = vcmp.ge.f32.partialorder %v1344_v36, 0.0  ;;  %v1028_v53 = vpop.f32.mrb[53].mxu0 }
 0x155   : > { %1840 = vst.msk [vmem:[%s2833_s13 + $0x180] sm:$0xff] %vm1791_vm1, %v1711_v39  ;;  %1904 = vst.msk [vmem:[%s2833_s13 + $0x380] sm:$0xff] %vm1791_vm1, %v1775_v40  ;;  %v1650_v12 = vmul.f32 0.2, %v1344_v36  ;;  %vm1457_vm14 = vcmp.ge.f32.partialorder %v1019_v42, 0.0  ;;  %vm1521_vm15 = vcmp.ge.f32.partialorder %v1339_v43, 0.0  ;;  %v1034_v51 = vadd.f32 %v3085_v41, %v2348_v44 }
 0x156   : > { %v1585_v47 = vmul.f32 0.2, %v1019_v42  ;;  %v1649_v48 = vmul.f32 0.2, %v1339_v43  ;;  %v1714_v49 = vsel %vm1458_vm12, %v1024_v35, %v1586_v46  ;;  %v1354_v52 = vadd.f32 %v3085_v41, %v2444_v45  ;;  %v1348_v54 = vpop.f32.mrb[53].mxu1 }
 0x157   : > { %v1778_v50 = vsel %vm1522_vm13, %v1344_v36, %v1650_v12  ;;  %1843 = vst.msk [vmem:[%s2833_s13 + $0x198] sm:$0xff] %vm1791_vm1, %v1714_v49  ;;  %v1029_v57 = vadd.f32 %v3085_v41, %v1028_v53  ;;  %v1349_v58 = vadd.f32 %v3085_v41, %v1348_v54  ;;  %v2351_v59 = vpop.f32.mrb[54].mxu0  ;;  %vm1460_vm0 = vcmp.ge.f32.partialorder %v1034_v51, 0.0 }
 0x158   : > { %1907 = vst.msk [vmem:[%s2833_s13 + $0x398] sm:$0xff] %vm1791_vm1, %v1778_v50  ;;  %v1713_v55 = vsel %vm1457_vm14, %v1019_v42, %v1585_v47  ;;  %v1777_v56 = vsel %vm1521_vm15, %v1339_v43, %v1649_v48  ;;  %v2447_v60 = vpop.f32.mrb[54].mxu1  ;;  %v1588_v61 = vmul.f32 0.2, %v1034_v51  ;;  %vm1524_vm2 = vcmp.ge.f32.partialorder %v1354_v52, 0.0  ;;  %v1038_v5 = vpop.f32.mrb[55].mxu0 }
 0x159   : > { %1842 = vst.msk [vmem:[%s2833_s13 + $0x190] sm:$0xff] %vm1791_vm1, %v1713_v55  ;;  %1906 = vst.msk [vmem:[%s2833_s13 + $0x390] sm:$0xff] %vm1791_vm1, %v1777_v56  ;;  %v1652_v62 = vmul.f32 0.2, %v1354_v52  ;;  %vm1459_vm3 = vcmp.ge.f32.partialorder %v1029_v57, 0.0  ;;  %vm1523_vm4 = vcmp.ge.f32.partialorder %v1349_v58, 0.0  ;;  %v1044_v3 = vadd.f32 %v3085_v41, %v2351_v59 }
 0x15a   : > { %v1587_v63 = vmul.f32 0.2, %v1029_v57  ;;  %v1651_v0 = vmul.f32 0.2, %v1349_v58  ;;  %v1716_v1 = vsel %vm1460_vm0, %v1034_v51, %v1588_v61  ;;  %v1364_v4 = vadd.f32 %v3085_v41, %v2447_v60  ;;  %v1358_v6 = vpop.f32.mrb[55].mxu1 }
 0x15b   : > { %v1780_v2 = vsel %vm1524_vm2, %v1354_v52, %v1652_v62  ;;  %1845 = vst.msk [vmem:[%s2833_s13 + $0x1a8] sm:$0xff] %vm1791_vm1, %v1716_v1  ;;  %v1039_v9 = vadd.f32 %v3085_v41, %v1038_v5  ;;  %v1359_v10 = vadd.f32 %v3085_v41, %v1358_v6  ;;  %v2354_v11 = vpop.f32.mrb[56].mxu0  ;;  %vm1462_vm5 = vcmp.ge.f32.partialorder %v1044_v3, 0.0 }
 0x15c   : > { %1909 = vst.msk [vmem:[%s2833_s13 + $0x3a8] sm:$0xff] %vm1791_vm1, %v1780_v2  ;;  %v1715_v7 = vsel %vm1459_vm3, %v1029_v57, %v1587_v63  ;;  %v1779_v8 = vsel %vm1523_vm4, %v1349_v58, %v1651_v0  ;;  %v2450_v13 = vpop.f32.mrb[56].mxu1  ;;  %v1590_v14 = vmul.f32 0.2, %v1044_v3  ;;  %vm1526_vm6 = vcmp.ge.f32.partialorder %v1364_v4, 0.0  ;;  %v1048_v22 = vpop.f32.mrb[57].mxu0 }
 0x15d   : > { %1844 = vst.msk [vmem:[%s2833_s13 + $0x1a0] sm:$0xff] %vm1791_vm1, %v1715_v7  ;;  %1908 = vst.msk [vmem:[%s2833_s13 + $0x3a0] sm:$0xff] %vm1791_vm1, %v1779_v8  ;;  %v1654_v15 = vmul.f32 0.2, %v1364_v4  ;;  %vm1461_vm7 = vcmp.ge.f32.partialorder %v1039_v9, 0.0  ;;  %vm1525_vm8 = vcmp.ge.f32.partialorder %v1359_v10, 0.0  ;;  %v1054_v20 = vadd.f32 %v3085_v41, %v2354_v11 }
 0x15e   : > { %v1589_v16 = vmul.f32 0.2, %v1039_v9  ;;  %v1653_v17 = vmul.f32 0.2, %v1359_v10  ;;  %v1718_v18 = vsel %vm1462_vm5, %v1044_v3, %v1590_v14  ;;  %v1374_v21 = vadd.f32 %v3085_v41, %v2450_v13  ;;  %v1368_v23 = vpop.f32.mrb[57].mxu1 }
 0x15f   : > { %v1782_v19 = vsel %vm1526_vm6, %v1364_v4, %v1654_v15  ;;  %1847 = vst.msk [vmem:[%s2833_s13 + $0x1b8] sm:$0xff] %vm1791_vm1, %v1718_v18  ;;  %v1049_v26 = vadd.f32 %v3085_v41, %v1048_v22  ;;  %v1369_v27 = vadd.f32 %v3085_v41, %v1368_v23  ;;  %v2357_v28 = vpop.f32.mrb[58].mxu0  ;;  %vm1464_vm9 = vcmp.ge.f32.partialorder %v1054_v20, 0.0 }
 0x160   : > { %1911 = vst.msk [vmem:[%s2833_s13 + $0x3b8] sm:$0xff] %vm1791_vm1, %v1782_v19  ;;  %v1717_v24 = vsel %vm1461_vm7, %v1039_v9, %v1589_v16  ;;  %v1781_v25 = vsel %vm1525_vm8, %v1359_v10, %v1653_v17  ;;  %v2453_v29 = vpop.f32.mrb[58].mxu1  ;;  %v1592_v30 = vmul.f32 0.2, %v1054_v20  ;;  %vm1528_vm10 = vcmp.ge.f32.partialorder %v1374_v21, 0.0  ;;  %v1058_v38 = vpop.f32.mrb[59].mxu0 }
 0x161   : > { %1846 = vst.msk [vmem:[%s2833_s13 + $0x1b0] sm:$0xff] %vm1791_vm1, %v1717_v24  ;;  %1910 = vst.msk [vmem:[%s2833_s13 + $0x3b0] sm:$0xff] %vm1791_vm1, %v1781_v25  ;;  %v1656_v31 = vmul.f32 0.2, %v1374_v21  ;;  %vm1463_vm11 = vcmp.ge.f32.partialorder %v1049_v26, 0.0  ;;  %vm1527_vm12 = vcmp.ge.f32.partialorder %v1369_v27, 0.0  ;;  %v1064_v36 = vadd.f32 %v3085_v41, %v2357_v28 }
 0x162   : > { %v1591_v32 = vmul.f32 0.2, %v1049_v26  ;;  %v1655_v33 = vmul.f32 0.2, %v1369_v27  ;;  %v1720_v34 = vsel %vm1464_vm9, %v1054_v20, %v1592_v30  ;;  %v1384_v37 = vadd.f32 %v3085_v41, %v2453_v29  ;;  %v1378_v39 = vpop.f32.mrb[59].mxu1 }
 0x163   : > { %v1784_v35 = vsel %vm1528_vm10, %v1374_v21, %v1656_v31  ;;  %1849 = vst.msk [vmem:[%s2833_s13 + $0x1c8] sm:$0xff] %vm1791_vm1, %v1720_v34  ;;  %v1059_v43 = vadd.f32 %v3085_v41, %v1058_v38  ;;  %v1379_v44 = vadd.f32 %v3085_v41, %v1378_v39  ;;  %v2360_v45 = vpop.f32.mrb[60].mxu0  ;;  %vm1466_vm13 = vcmp.ge.f32.partialorder %v1064_v36, 0.0 }
 0x164   : > { %1913 = vst.msk [vmem:[%s2833_s13 + $0x3c8] sm:$0xff] %vm1791_vm1, %v1784_v35  ;;  %v1719_v40 = vsel %vm1463_vm11, %v1049_v26, %v1591_v32  ;;  %v1783_v42 = vsel %vm1527_vm12, %v1369_v27, %v1655_v33  ;;  %v2456_v46 = vpop.f32.mrb[60].mxu1  ;;  %v1594_v12 = vmul.f32 0.2, %v1064_v36  ;;  %vm1530_vm14 = vcmp.ge.f32.partialorder %v1384_v37, 0.0  ;;  %v1068_v54 = vpop.f32.mrb[61].mxu0 }
 0x165   : > { %1848 = vst.msk [vmem:[%s2833_s13 + $0x1c0] sm:$0xff] %vm1791_vm1, %v1719_v40  ;;  %1912 = vst.msk [vmem:[%s2833_s13 + $0x3c0] sm:$0xff] %vm1791_vm1, %v1783_v42  ;;  %v1658_v47 = vmul.f32 0.2, %v1384_v37  ;;  %vm1465_vm15 = vcmp.ge.f32.partialorder %v1059_v43, 0.0  ;;  %vm1529_vm0 = vcmp.ge.f32.partialorder %v1379_v44, 0.0  ;;  %v1074_v52 = vadd.f32 %v3085_v41, %v2360_v45 }
 0x166   : > { %v1593_v48 = vmul.f32 0.2, %v1059_v43  ;;  %v1657_v49 = vmul.f32 0.2, %v1379_v44  ;;  %v1722_v50 = vsel %vm1466_vm13, %v1064_v36, %v1594_v12  ;;  %v1394_v53 = vadd.f32 %v3085_v41, %v2456_v46  ;;  %v1388_v55 = vpop.f32.mrb[61].mxu1 }
 0x167   : > { %v1786_v51 = vsel %vm1530_vm14, %v1384_v37, %v1658_v47  ;;  %1851 = vst.msk [vmem:[%s2833_s13 + $0x1d8] sm:$0xff] %vm1791_vm1, %v1722_v50  ;;  %v1069_v58 = vadd.f32 %v3085_v41, %v1068_v54  ;;  %v1389_v59 = vadd.f32 %v3085_v41, %v1388_v55  ;;  %v2363_v60 = vpop.f32.mrb[62].mxu0  ;;  %vm1468_vm2 = vcmp.ge.f32.partialorder %v1074_v52, 0.0 }
 0x168   : > { %1915 = vst.msk [vmem:[%s2833_s13 + $0x3d8] sm:$0xff] %vm1791_vm1, %v1786_v51  ;;  %v1721_v56 = vsel %vm1465_vm15, %v1059_v43, %v1593_v48  ;;  %v1785_v57 = vsel %vm1529_vm0, %v1379_v44, %v1657_v49  ;;  %v2459_v61 = vpop.f32.mrb[62].mxu1  ;;  %v1596_v62 = vmul.f32 0.2, %v1074_v52  ;;  %vm1532_vm3 = vcmp.ge.f32.partialorder %v1394_v53, 0.0  ;;  %v1078_v6 = vpop.f32.mrb[63].mxu0 }
 0x169   : > { %1850 = vst.msk [vmem:[%s2833_s13 + $0x1d0] sm:$0xff] %vm1791_vm1, %v1721_v56  ;;  %1914 = vst.msk [vmem:[%s2833_s13 + $0x3d0] sm:$0xff] %vm1791_vm1, %v1785_v57  ;;  %v1660_v63 = vmul.f32 0.2, %v1394_v53  ;;  %vm1467_vm4 = vcmp.ge.f32.partialorder %v1069_v58, 0.0  ;;  %vm1531_vm5 = vcmp.ge.f32.partialorder %v1389_v59, 0.0  ;;  %v1084_v4 = vadd.f32 %v3085_v41, %v2363_v60 }
 0x16a   : > { %v1595_v0 = vmul.f32 0.2, %v1069_v58  ;;  %v1659_v1 = vmul.f32 0.2, %v1389_v59  ;;  %v1724_v2 = vsel %vm1468_vm2, %v1074_v52, %v1596_v62  ;;  %v1404_v5 = vadd.f32 %v3085_v41, %v2459_v61  ;;  %v1398_v7 = vpop.f32.mrb[63].mxu1 }
 0x16b   : > { %v1788_v3 = vsel %vm1532_vm3, %v1394_v53, %v1660_v63  ;;  %1853 = vst.msk [vmem:[%s2833_s13 + $0x1e8] sm:$0xff] %vm1791_vm1, %v1724_v2  ;;  %v1079_v10 = vadd.f32 %v3085_v41, %v1078_v6  ;;  %v1399_v11 = vadd.f32 %v3085_v41, %v1398_v7  ;;  %vm1470_vm6 = vcmp.ge.f32.partialorder %v1084_v4, 0.0 }
 0x16c   : > { %1917 = vst.msk [vmem:[%s2833_s13 + $0x3e8] sm:$0xff] %vm1791_vm1, %v1788_v3  ;;  %v1723_v8 = vsel %vm1467_vm4, %v1069_v58, %v1595_v0  ;;  %v1787_v9 = vsel %vm1531_vm5, %v1389_v59, %v1659_v1  ;;  %v1598_v13 = vmul.f32 0.2, %v1084_v4  ;;  %vm1534_vm7 = vcmp.ge.f32.partialorder %v1404_v5, 0.0 }
 0x16d   : > { %1852 = vst.msk [vmem:[%s2833_s13 + $0x1e0] sm:$0xff] %vm1791_vm1, %v1723_v8  ;;  %1916 = vst.msk [vmem:[%s2833_s13 + $0x3e0] sm:$0xff] %vm1791_vm1, %v1787_v9  ;;  %v1662_v14 = vmul.f32 0.2, %v1404_v5  ;;  %vm1469_vm8 = vcmp.ge.f32.partialorder %v1079_v10, 0.0  ;;  %vm1533_vm9 = vcmp.ge.f32.partialorder %v1399_v11, 0.0 }
 0x16e   : > { %v1597_v15 = vmul.f32 0.2, %v1079_v10  ;;  %v1661_v16 = vmul.f32 0.2, %v1399_v11  ;;  %v1726_v17 = vsel %vm1470_vm6, %v1084_v4, %v1598_v13 }
 0x16f   : > { %v1790_v18 = vsel %vm1534_vm7, %v1404_v5, %v1662_v14  ;;  %1855 = vst.msk [vmem:[%s2833_s13 + $0x1f8] sm:$0xff] %vm1791_vm1, %v1726_v17 }
 0x170   : > { %1919 = vst.msk [vmem:[%s2833_s13 + $0x3f8] sm:$0xff] %vm1791_vm1, %v1790_v18  ;;  %v1725_v41 = vsel %vm1469_vm8, %v1079_v10, %v1597_v15  ;;  %v1789_v19 = vsel %vm1533_vm9, %v1399_v11, %v1661_v16 }
 0x171   : > { %1854 = vst.msk [vmem:[%s2833_s13 + $0x1f0] sm:$0xff] %vm1791_vm1, %v1725_v41  ;;  %1918 = vst.msk [vmem:[%s2833_s13 + $0x3f0] sm:$0xff] %vm1791_vm1, %v1789_v19 }
 0x172 PF: > { %s13_s12 = sadd.s32 1, %s2499_s12  }
 0x173   : > { %p10_p4 = scmp.ge.s32.totalorder %s13_s12, 4  }
 0x175   :  { %12 = sbr.rel (!%p10_p4) target bundleno = 1 (0x1), region = 62 }

// kernel: discriminator_forward.8
= control target key start
LH: loop header
LB: loop body
LE: loop exit
PB: predicated region body
PF: predicated region fallthrough
CT: control target
= control target key end

     0   :  { %vm678_vm0 = vcmask 130048   ;;  %s1589_s1 = inlined_call_operand.vmem [shape: f32[128,16], index: 1, kind: input, shape index: {}]   ;;  %s1590_s0 = inlined_call_operand.vmem [shape: f32[512,128], index: 0, kind: input, shape index: {}]   ;;  %s1591_s2 = inlined_call_operand.vmem [shape: f32[1,16], index: 2, kind: input, shape index: {}]   ;;  %s1592_s3 = inlined_call_operand.vmem [shape: f32[512,16], index: 3, kind: output, shape index: {}]  }
   0x1   :  { %v78_v0 = vld [vmem:[%s1589_s1] sm:$0xff]  ;;  %v79_v1 = vld [vmem:[%s1589_s1 + $0x8] sm:$0xff]  ;;  %v80_v2 = vld [vmem:[%s1589_s1 + $0x10] sm:$0xff] }
   0x2   :  { %v956_v3 = vpack.c.bf16 %v79_v1, %v78_v0  ;;  %v81_v4 = vld [vmem:[%s1589_s1 + $0x18] sm:$0xff]  ;;  %v82_v6 = vld [vmem:[%s1589_s1 + $0x20] sm:$0xff]  ;;  %v83_v7 = vld [vmem:[%s1589_s1 + $0x28] sm:$0xff] }
   0x3   :  { %v960_v5 = vpack.c.bf16 %v81_v4, %v80_v2  ;;  %v964_v8 = vpack.c.bf16 %v83_v7, %v82_v6  ;;  %v14_v9 = vld [vmem:[%s1590_s0] sm:$0xff]  ;;  %v84_v11 = vld [vmem:[%s1589_s1 + $0x30] sm:$0xff]  ;;  %v85_v12 = vld [vmem:[%s1589_s1 + $0x38] sm:$0xff] }
   0x4   :  { %957 = vmatprep.subr.bf16.mxu0 %v956_v3  ;;  %988 = vmatprep.subr.bf16.mxu1 %v956_v3  ;;  %v46_v10 = vld [vmem:[%s1590_s0 + $0x100] sm:$0xff]  ;;  %v968_v13 = vpack.c.bf16 %v85_v12, %v84_v11  ;;  %v87_v15 = vld [vmem:[%s1589_s1 + $0x48] sm:$0xff]  ;;  %v88_v17 = vld [vmem:[%s1589_s1 + $0x50] sm:$0xff] }
   0x5   :  { %959 = vmatpush3.bf16.msra.mxu0 %v956_v3  ;;  %996 = vmatpush3.bf16.msra.mxu1 %v956_v3  ;;  %v86_v14 = vld [vmem:[%s1589_s1 + $0x40] sm:$0xff]  ;;  %v89_v18 = vld [vmem:[%s1589_s1 + $0x58] sm:$0xff]  ;;  %v91_v21 = vld [vmem:[%s1589_s1 + $0x68] sm:$0xff] }
   0x6   :  { %961 = vmatprep.subr.bf16.mxu0 %v960_v5  ;;  %989 = vmatprep.subr.bf16.mxu1 %v960_v5  ;;  %v972_v16 = vpack.c.bf16 %v87_v15, %v86_v14  ;;  %v976_v19 = vpack.c.bf16 %v89_v18, %v88_v17  ;;  %v90_v20 = vld [vmem:[%s1589_s1 + $0x60] sm:$0xff]  ;;  %v92_v23 = vld [vmem:[%s1589_s1 + $0x70] sm:$0xff]  ;;  %v93_v24 = vld [vmem:[%s1589_s1 + $0x78] sm:$0xff] }
   0x7   :  { %860 = vmatprep.mubr.f32.mxu0 %v14_v9  ;;  %908 = vmatprep.mubr.f32.mxu1 %v46_v10  ;;  %v980_v22 = vpack.c.bf16 %v91_v21, %v90_v20  ;;  %v984_v25 = vpack.c.bf16 %v93_v24, %v92_v23  ;;  %v15_v26 = vld [vmem:[%s1590_s0 + $0x8] sm:$0xff]  ;;  %v16_v28 = vld [vmem:[%s1590_s0 + $0x10] sm:$0xff]  ;;  %v17_v30 = vld [vmem:[%s1590_s0 + $0x18] sm:$0xff] }
   0x8   :  { %v47_v27 = vld [vmem:[%s1590_s0 + $0x108] sm:$0xff]  ;;  %v48_v29 = vld [vmem:[%s1590_s0 + $0x110] sm:$0xff]  ;;  %v49_v31 = vld [vmem:[%s1590_s0 + $0x118] sm:$0xff] }
   0x9   :  { %963 = vmatpush3.bf16.msra.mxu0 %v960_v5  ;;  %997 = vmatpush3.bf16.msra.mxu1 %v960_v5  ;;  %v18_v32 = vld [vmem:[%s1590_s0 + $0x20] sm:$0xff]  ;;  %v19_v34 = vld [vmem:[%s1590_s0 + $0x28] sm:$0xff]  ;;  %v20_v36 = vld [vmem:[%s1590_s0 + $0x30] sm:$0xff] }
   0xa   :  { %965 = vmatprep.subr.bf16.mxu0 %v964_v8  ;;  %990 = vmatprep.subr.bf16.mxu1 %v964_v8  ;;  %v50_v33 = vld [vmem:[%s1590_s0 + $0x120] sm:$0xff]  ;;  %v51_v35 = vld [vmem:[%s1590_s0 + $0x128] sm:$0xff]  ;;  %v52_v37 = vld [vmem:[%s1590_s0 + $0x130] sm:$0xff] }
   0xb   :  { %v21_v38 = vld [vmem:[%s1590_s0 + $0x38] sm:$0xff]  ;;  %v22_v40 = vld [vmem:[%s1590_s0 + $0x40] sm:$0xff]  ;;  %v23_v42 = vld [vmem:[%s1590_s0 + $0x48] sm:$0xff] }
   0xc   :  { %v53_v39 = vld [vmem:[%s1590_s0 + $0x138] sm:$0xff]  ;;  %v54_v41 = vld [vmem:[%s1590_s0 + $0x140] sm:$0xff]  ;;  %v55_v43 = vld [vmem:[%s1590_s0 + $0x148] sm:$0xff] }
   0xd   :  { %967 = vmatpush3.bf16.msra.mxu0 %v964_v8  ;;  %998 = vmatpush3.bf16.msra.mxu1 %v964_v8  ;;  %v24_v44 = vld [vmem:[%s1590_s0 + $0x50] sm:$0xff]  ;;  %v25_v46 = vld [vmem:[%s1590_s0 + $0x58] sm:$0xff]  ;;  %v26_v48 = vld [vmem:[%s1590_s0 + $0x60] sm:$0xff] }
   0xe   :  { %969 = vmatprep.subr.bf16.mxu0 %v968_v13  ;;  %991 = vmatprep.subr.bf16.mxu1 %v968_v13  ;;  %v56_v45 = vld [vmem:[%s1590_s0 + $0x150] sm:$0xff]  ;;  %v57_v47 = vld [vmem:[%s1590_s0 + $0x158] sm:$0xff]  ;;  %v58_v49 = vld [vmem:[%s1590_s0 + $0x160] sm:$0xff] }
   0xf   :  { %v27_v50 = vld [vmem:[%s1590_s0 + $0x68] sm:$0xff]  ;;  %v28_v52 = vld [vmem:[%s1590_s0 + $0x70] sm:$0xff]  ;;  %v29_v54 = vld [vmem:[%s1590_s0 + $0x78] sm:$0xff] }
  0x10   :  { %v59_v51 = vld [vmem:[%s1590_s0 + $0x168] sm:$0xff]  ;;  %v60_v53 = vld [vmem:[%s1590_s0 + $0x170] sm:$0xff]  ;;  %v61_v55 = vld [vmem:[%s1590_s0 + $0x178] sm:$0xff] }
  0x11   :  { %971 = vmatpush3.bf16.msra.mxu0 %v968_v13  ;;  %999 = vmatpush3.bf16.msra.mxu1 %v968_v13  ;;  %v30_v56 = vld [vmem:[%s1590_s0 + $0x80] sm:$0xff]  ;;  %v31_v58 = vld [vmem:[%s1590_s0 + $0x88] sm:$0xff]  ;;  %v32_v60 = vld [vmem:[%s1590_s0 + $0x90] sm:$0xff] }
  0x12   :  { %973 = vmatprep.subr.bf16.mxu0 %v972_v16  ;;  %992 = vmatprep.subr.bf16.mxu1 %v972_v16  ;;  %v62_v57 = vld [vmem:[%s1590_s0 + $0x180] sm:$0xff]  ;;  %v63_v59 = vld [vmem:[%s1590_s0 + $0x188] sm:$0xff]  ;;  %v64_v61 = vld [vmem:[%s1590_s0 + $0x190] sm:$0xff] }
  0x13   :  { %v33_v62 = vld [vmem:[%s1590_s0 + $0x98] sm:$0xff]  ;;  %v34_v0 = vld [vmem:[%s1590_s0 + $0xa0] sm:$0xff]  ;;  %v35_v2 = vld [vmem:[%s1590_s0 + $0xa8] sm:$0xff] }
  0x14   :  { %v65_v63 = vld [vmem:[%s1590_s0 + $0x198] sm:$0xff]  ;;  %v66_v1 = vld [vmem:[%s1590_s0 + $0x1a0] sm:$0xff]  ;;  %v67_v3 = vld [vmem:[%s1590_s0 + $0x1a8] sm:$0xff] }
  0x15   :  { %975 = vmatpush3.bf16.msra.mxu0 %v972_v16  ;;  %1000 = vmatpush3.bf16.msra.mxu1 %v972_v16  ;;  %v36_v4 = vld [vmem:[%s1590_s0 + $0xb0] sm:$0xff]  ;;  %v37_v6 = vld [vmem:[%s1590_s0 + $0xb8] sm:$0xff]  ;;  %v38_v8 = vld [vmem:[%s1590_s0 + $0xc0] sm:$0xff] }
  0x16   :  { %977 = vmatprep.subr.bf16.mxu0 %v976_v19  ;;  %993 = vmatprep.subr.bf16.mxu1 %v976_v19  ;;  %v68_v5 = vld [vmem:[%s1590_s0 + $0x1b0] sm:$0xff]  ;;  %v69_v7 = vld [vmem:[%s1590_s0 + $0x1b8] sm:$0xff]  ;;  %v70_v9 = vld [vmem:[%s1590_s0 + $0x1c0] sm:$0xff] }
  0x17   :  { %v39_v10 = vld [vmem:[%s1590_s0 + $0xc8] sm:$0xff]  ;;  %v40_v12 = vld [vmem:[%s1590_s0 + $0xd0] sm:$0xff]  ;;  %v41_v14 = vld [vmem:[%s1590_s0 + $0xd8] sm:$0xff] }
  0x18   :  { %v71_v11 = vld [vmem:[%s1590_s0 + $0x1c8] sm:$0xff]  ;;  %v72_v13 = vld [vmem:[%s1590_s0 + $0x1d0] sm:$0xff]  ;;  %v73_v15 = vld [vmem:[%s1590_s0 + $0x1d8] sm:$0xff] }
  0x19   :  { %979 = vmatpush3.bf16.msra.mxu0 %v976_v19  ;;  %1001 = vmatpush3.bf16.msra.mxu1 %v976_v19  ;;  %v42_v16 = vld [vmem:[%s1590_s0 + $0xe0] sm:$0xff]  ;;  %v43_v18 = vld [vmem:[%s1590_s0 + $0xe8] sm:$0xff]  ;;  %v44_v20 = vld [vmem:[%s1590_s0 + $0xf0] sm:$0xff] }
  0x1a   :  { %981 = vmatprep.subr.bf16.mxu0 %v980_v22  ;;  %994 = vmatprep.subr.bf16.mxu1 %v980_v22  ;;  %v74_v17 = vld [vmem:[%s1590_s0 + $0x1e0] sm:$0xff]  ;;  %v75_v19 = vld [vmem:[%s1590_s0 + $0x1e8] sm:$0xff]  ;;  %v76_v21 = vld [vmem:[%s1590_s0 + $0x1f0] sm:$0xff] }
  0x1b   :  { %v77_v23 = vld [vmem:[%s1590_s0 + $0x1f8] sm:$0xff]  ;;  %v1267_v24 = vld [vmem:[%s1591_s2] ss:$0 sm:$0xff] }
  0x1d   :  { %983 = vmatpush3.bf16.msra.mxu0 %v980_v22  ;;  %1002 = vmatpush3.bf16.msra.mxu1 %v980_v22  ;;  %v45_v22 = vld [vmem:[%s1590_s0 + $0xf8] sm:$0xff] }
  0x1e   :  { %985 = vmatprep.subr.bf16.mxu0 %v984_v25  ;;  %995 = vmatprep.subr.bf16.mxu1 %v984_v25 }
  0x21   :  { %987 = vmatpush3.bf16.msra.mxu0 %v984_v25  ;;  %1003 = vmatpush3.bf16.msra.mxu1 %v984_v25 }
  0x24   :  { %861 = vmatmul.mubr.f32.vlgmr.msra.gmra.mrb[0].mxu0 %v15_v26  ;;  %909 = vmatmul.mubr.f32.vlgmr.msra.gmra.mrb[0].mxu1 %v47_v27 }
  0x25   :  { %863 = vmatprep.mubr.f32.mxu0 %v16_v28  ;;  %911 = vmatprep.mubr.f32.mxu1 %v48_v29 }
  0x28   :  { %864 = vmatmul.mubr.f32.gmra.mrb[2].mxu0 %v17_v30  ;;  %912 = vmatmul.mubr.f32.gmra.mrb[2].mxu1 %v49_v31 }
  0x29   :  { %866 = vmatprep.mubr.f32.mxu0 %v18_v32  ;;  %914 = vmatprep.mubr.f32.mxu1 %v50_v33 }
  0x2c   :  { %867 = vmatmul.mubr.f32.gmra.mrb[4].mxu0 %v19_v34  ;;  %915 = vmatmul.mubr.f32.gmra.mrb[4].mxu1 %v51_v35 }
  0x2d   :  { %869 = vmatprep.mubr.f32.mxu0 %v20_v36  ;;  %917 = vmatprep.mubr.f32.mxu1 %v52_v37 }
  0x30   :  { %870 = vmatmul.mubr.f32.gmra.mrb[6].mxu0 %v21_v38  ;;  %918 = vmatmul.mubr.f32.gmra.mrb[6].mxu1 %v53_v39 }
  0x31   :  { %872 = vmatprep.mubr.f32.mxu0 %v22_v40  ;;  %920 = vmatprep.mubr.f32.mxu1 %v54_v41 }
  0x34   :  { %873 = vmatmul.mubr.f32.gmra.mrb[8].mxu0 %v23_v42  ;;  %921 = vmatmul.mubr.f32.gmra.mrb[8].mxu1 %v55_v43 }
  0x35   :  { %875 = vmatprep.mubr.f32.mxu0 %v24_v44  ;;  %923 = vmatprep.mubr.f32.mxu1 %v56_v45 }
  0x38   :  { %876 = vmatmul.mubr.f32.gmra.mrb[10].mxu0 %v25_v46  ;;  %924 = vmatmul.mubr.f32.gmra.mrb[10].mxu1 %v57_v47 }
  0x39   :  { %878 = vmatprep.mubr.f32.mxu0 %v26_v48  ;;  %926 = vmatprep.mubr.f32.mxu1 %v58_v49 }
  0x3c   :  { %879 = vmatmul.mubr.f32.gmra.mrb[12].mxu0 %v27_v50  ;;  %927 = vmatmul.mubr.f32.gmra.mrb[12].mxu1 %v59_v51 }
  0x3d   :  { %881 = vmatprep.mubr.f32.mxu0 %v28_v52  ;;  %929 = vmatprep.mubr.f32.mxu1 %v60_v53 }
  0x40   :  { %882 = vmatmul.mubr.f32.gmra.mrb[14].mxu0 %v29_v54  ;;  %930 = vmatmul.mubr.f32.gmra.mrb[14].mxu1 %v61_v55 }
  0x41   :  { %884 = vmatprep.mubr.f32.mxu0 %v30_v56  ;;  %932 = vmatprep.mubr.f32.mxu1 %v62_v57 }
  0x44   :  { %885 = vmatmul.mubr.f32.gmra.mrb[16].mxu0 %v31_v58  ;;  %933 = vmatmul.mubr.f32.gmra.mrb[16].mxu1 %v63_v59 }
  0x45   :  { %887 = vmatprep.mubr.f32.mxu0 %v32_v60  ;;  %935 = vmatprep.mubr.f32.mxu1 %v64_v61 }
  0x48   :  { %888 = vmatmul.mubr.f32.gmra.mrb[18].mxu0 %v33_v62  ;;  %936 = vmatmul.mubr.f32.gmra.mrb[18].mxu1 %v65_v63 }
  0x49   :  { %890 = vmatprep.mubr.f32.mxu0 %v34_v0  ;;  %938 = vmatprep.mubr.f32.mxu1 %v66_v1 }
  0x4c   :  { %891 = vmatmul.mubr.f32.gmra.mrb[20].mxu0 %v35_v2  ;;  %939 = vmatmul.mubr.f32.gmra.mrb[20].mxu1 %v67_v3 }
  0x4d   :  { %893 = vmatprep.mubr.f32.mxu0 %v36_v4  ;;  %941 = vmatprep.mubr.f32.mxu1 %v68_v5 }
  0x50   :  { %894 = vmatmul.mubr.f32.gmra.mrb[22].mxu0 %v37_v6  ;;  %942 = vmatmul.mubr.f32.gmra.mrb[22].mxu1 %v69_v7 }
  0x51   :  { %896 = vmatprep.mubr.f32.mxu0 %v38_v8  ;;  %944 = vmatprep.mubr.f32.mxu1 %v70_v9 }
  0x54   :  { %897 = vmatmul.mubr.f32.gmra.mrb[24].mxu0 %v39_v10  ;;  %945 = vmatmul.mubr.f32.gmra.mrb[24].mxu1 %v71_v11 }
  0x55   :  { %899 = vmatprep.mubr.f32.mxu0 %v40_v12  ;;  %947 = vmatprep.mubr.f32.mxu1 %v72_v13 }
  0x58   :  { %900 = vmatmul.mubr.f32.gmra.mrb[26].mxu0 %v41_v14  ;;  %948 = vmatmul.mubr.f32.gmra.mrb[26].mxu1 %v73_v15 }
  0x59   :  { %902 = vmatprep.mubr.f32.mxu0 %v42_v16  ;;  %950 = vmatprep.mubr.f32.mxu1 %v74_v17 }
  0x5c   :  { %903 = vmatmul.mubr.f32.gmra.mrb[28].mxu0 %v43_v18  ;;  %951 = vmatmul.mubr.f32.gmra.mrb[28].mxu1 %v75_v19 }
  0x5d   :  { %905 = vmatprep.mubr.f32.mxu0 %v44_v20  ;;  %953 = vmatprep.mubr.f32.mxu1 %v76_v21 }
  0x60   :  { %906 = vmatmul.mubr.f32.gmra.mrb[30].mxu0 %v45_v22  ;;  %954 = vmatmul.mubr.f32.gmra.mrb[30].mxu1 %v77_v23 }
  0xf7   :  { %v862_v25 = vpop.f32.mrb[0].mxu0  ;;  %v910_v26 = vpop.f32.mrb[0].mxu1 }
  0xf8   :  { %v173_v27 = vadd.f32 %v862_v25, %v1267_v24  ;;  %v333_v28 = vadd.f32 %v910_v26, %v1267_v24  ;;  %v167_v29 = vpop.f32.mrb[1].mxu0  ;;  %v327_v30 = vpop.f32.mrb[1].mxu1 }
  0xf9   :  { %v168_v31 = vadd.f32 %v1267_v24, %v167_v29  ;;  %v328_v32 = vadd.f32 %v1267_v24, %v327_v30 }
  0xfa   :  { %vm487_vm1 = vcmp.ge.f32.partialorder %v173_v27, 0.0  ;;  %v551_v33 = vmul.f32 0.2, %v173_v27  ;;  %vm519_vm2 = vcmp.ge.f32.partialorder %v333_v28, 0.0  ;;  %v583_v34 = vmul.f32 0.2, %v333_v28 }
  0xfb   :  { %vm486_vm3 = vcmp.ge.f32.partialorder %v168_v31, 0.0  ;;  %v550_v35 = vmul.f32 0.2, %v168_v31  ;;  %vm518_vm4 = vcmp.ge.f32.partialorder %v328_v32, 0.0  ;;  %v582_v36 = vmul.f32 0.2, %v328_v32 }
  0xfc   :  { %v615_v37 = vsel %vm487_vm1, %v173_v27, %v551_v33  ;;  %v647_v38 = vsel %vm519_vm2, %v333_v28, %v583_v34  ;;  %v865_v39 = vpop.f32.mrb[2].mxu0  ;;  %v913_v40 = vpop.f32.mrb[2].mxu1 }
  0xfd   :  { %680 = vst.msk [vmem:[%s1592_s3 + $0x8] sm:$0xff] %vm678_vm0, %v615_v37  ;;  %712 = vst.msk [vmem:[%s1592_s3 + $0x108] sm:$0xff] %vm678_vm0, %v647_v38  ;;  %v614_v41 = vsel %vm486_vm3, %v168_v31, %v550_v35  ;;  %v646_v42 = vsel %vm518_vm4, %v328_v32, %v582_v36  ;;  %v183_v43 = vadd.f32 %v865_v39, %v1267_v24  ;;  %v177_v45 = vpop.f32.mrb[3].mxu0  ;;  %v337_v46 = vpop.f32.mrb[3].mxu1 }
  0xfe   :  { %v343_v44 = vadd.f32 %v913_v40, %v1267_v24  ;;  %679 = vst.msk [vmem:[%s1592_s3] sm:$0xff] %vm678_vm0, %v614_v41  ;;  %711 = vst.msk [vmem:[%s1592_s3 + $0x100] sm:$0xff] %vm678_vm0, %v646_v42  ;;  %v178_v47 = vadd.f32 %v1267_v24, %v177_v45  ;;  %v338_v48 = vadd.f32 %v1267_v24, %v337_v46 }
  0xff   :  { %vm489_vm5 = vcmp.ge.f32.partialorder %v183_v43, 0.0  ;;  %v553_v49 = vmul.f32 0.2, %v183_v43  ;;  %v868_v55 = vpop.f32.mrb[4].mxu0  ;;  %v916_v56 = vpop.f32.mrb[4].mxu1 }
 0x100   :  { %vm521_vm6 = vcmp.ge.f32.partialorder %v343_v44, 0.0  ;;  %v585_v50 = vmul.f32 0.2, %v343_v44  ;;  %vm488_vm7 = vcmp.ge.f32.partialorder %v178_v47, 0.0  ;;  %v552_v51 = vmul.f32 0.2, %v178_v47 }
 0x101   :  { %vm520_vm8 = vcmp.ge.f32.partialorder %v338_v48, 0.0  ;;  %v584_v52 = vmul.f32 0.2, %v338_v48  ;;  %v617_v53 = vsel %vm489_vm5, %v183_v43, %v553_v49  ;;  %v193_v59 = vadd.f32 %v868_v55, %v1267_v24  ;;  %v187_v61 = vpop.f32.mrb[5].mxu0  ;;  %v347_v62 = vpop.f32.mrb[5].mxu1 }
 0x102   :  { %v649_v54 = vsel %vm521_vm6, %v343_v44, %v585_v50  ;;  %682 = vst.msk [vmem:[%s1592_s3 + $0x18] sm:$0xff] %vm678_vm0, %v617_v53  ;;  %v616_v57 = vsel %vm488_vm7, %v178_v47, %v552_v51  ;;  %v353_v60 = vadd.f32 %v916_v56, %v1267_v24  ;;  %v188_v63 = vadd.f32 %v1267_v24, %v187_v61 }
 0x103   :  { %714 = vst.msk [vmem:[%s1592_s3 + $0x118] sm:$0xff] %vm678_vm0, %v649_v54  ;;  %v648_v58 = vsel %vm520_vm8, %v338_v48, %v584_v52  ;;  %681 = vst.msk [vmem:[%s1592_s3 + $0x10] sm:$0xff] %vm678_vm0, %v616_v57  ;;  %v348_v0 = vadd.f32 %v1267_v24, %v347_v62  ;;  %v871_v1 = vpop.f32.mrb[6].mxu0  ;;  %v919_v2 = vpop.f32.mrb[6].mxu1  ;;  %vm491_vm9 = vcmp.ge.f32.partialorder %v193_v59, 0.0 }
 0x104   :  { %713 = vst.msk [vmem:[%s1592_s3 + $0x110] sm:$0xff] %vm678_vm0, %v648_v58  ;;  %v555_v3 = vmul.f32 0.2, %v193_v59  ;;  %vm523_vm10 = vcmp.ge.f32.partialorder %v353_v60, 0.0  ;;  %v587_v4 = vmul.f32 0.2, %v353_v60  ;;  %v203_v9 = vadd.f32 %v871_v1, %v1267_v24 }
 0x105   :  { %vm490_vm11 = vcmp.ge.f32.partialorder %v188_v63, 0.0  ;;  %v554_v5 = vmul.f32 0.2, %v188_v63  ;;  %vm522_vm12 = vcmp.ge.f32.partialorder %v348_v0, 0.0  ;;  %v586_v6 = vmul.f32 0.2, %v348_v0 }
 0x106   :  { %v619_v7 = vsel %vm491_vm9, %v193_v59, %v555_v3  ;;  %v651_v8 = vsel %vm523_vm10, %v353_v60, %v587_v4  ;;  %v363_v10 = vadd.f32 %v919_v2, %v1267_v24  ;;  %v197_v11 = vpop.f32.mrb[7].mxu0  ;;  %v357_v12 = vpop.f32.mrb[7].mxu1  ;;  %vm493_vm13 = vcmp.ge.f32.partialorder %v203_v9, 0.0 }
 0x107   :  { %684 = vst.msk [vmem:[%s1592_s3 + $0x28] sm:$0xff] %vm678_vm0, %v619_v7  ;;  %716 = vst.msk [vmem:[%s1592_s3 + $0x128] sm:$0xff] %vm678_vm0, %v651_v8  ;;  %v618_v13 = vsel %vm490_vm11, %v188_v63, %v554_v5  ;;  %v650_v14 = vsel %vm522_vm12, %v348_v0, %v586_v6  ;;  %v198_v15 = vadd.f32 %v1267_v24, %v197_v11  ;;  %v874_v17 = vpop.f32.mrb[8].mxu0  ;;  %v922_v18 = vpop.f32.mrb[8].mxu1  ;;  %v557_v19 = vmul.f32 0.2, %v203_v9 }
 0x108   :  { %v358_v16 = vadd.f32 %v1267_v24, %v357_v12  ;;  %683 = vst.msk [vmem:[%s1592_s3 + $0x20] sm:$0xff] %vm678_vm0, %v618_v13  ;;  %715 = vst.msk [vmem:[%s1592_s3 + $0x120] sm:$0xff] %vm678_vm0, %v650_v14  ;;  %vm525_vm14 = vcmp.ge.f32.partialorder %v363_v10, 0.0  ;;  %v589_v20 = vmul.f32 0.2, %v363_v10  ;;  %v213_v26 = vadd.f32 %v874_v17, %v1267_v24  ;;  %v207_v28 = vpop.f32.mrb[9].mxu0 }
 0x109   :  { %vm492_vm15 = vcmp.ge.f32.partialorder %v198_v15, 0.0  ;;  %v556_v21 = vmul.f32 0.2, %v198_v15  ;;  %v621_v23 = vsel %vm493_vm13, %v203_v9, %v557_v19  ;;  %v373_v27 = vadd.f32 %v922_v18, %v1267_v24  ;;  %v367_v29 = vpop.f32.mrb[9].mxu1 }
 0x10a   :  { %vm524_vm1 = vcmp.ge.f32.partialorder %v358_v16, 0.0  ;;  %v588_v22 = vmul.f32 0.2, %v358_v16  ;;  %v653_v25 = vsel %vm525_vm14, %v363_v10, %v589_v20  ;;  %686 = vst.msk [vmem:[%s1592_s3 + $0x38] sm:$0xff] %vm678_vm0, %v621_v23  ;;  %v208_v32 = vadd.f32 %v1267_v24, %v207_v28 }
 0x10b   :  { %718 = vst.msk [vmem:[%s1592_s3 + $0x138] sm:$0xff] %vm678_vm0, %v653_v25  ;;  %v620_v30 = vsel %vm492_vm15, %v198_v15, %v556_v21  ;;  %v368_v33 = vadd.f32 %v1267_v24, %v367_v29  ;;  %v877_v34 = vpop.f32.mrb[10].mxu0  ;;  %v925_v35 = vpop.f32.mrb[10].mxu1  ;;  %vm495_vm2 = vcmp.ge.f32.partialorder %v213_v26, 0.0  ;;  %v559_v36 = vmul.f32 0.2, %v213_v26 }
 0x10c   :  { %v652_v31 = vsel %vm524_vm1, %v358_v16, %v588_v22  ;;  %685 = vst.msk [vmem:[%s1592_s3 + $0x30] sm:$0xff] %vm678_vm0, %v620_v30  ;;  %vm527_vm3 = vcmp.ge.f32.partialorder %v373_v27, 0.0  ;;  %v591_v37 = vmul.f32 0.2, %v373_v27  ;;  %vm494_vm4 = vcmp.ge.f32.partialorder %v208_v32, 0.0  ;;  %v217_v44 = vpop.f32.mrb[11].mxu0 }
 0x10d   :  { %717 = vst.msk [vmem:[%s1592_s3 + $0x130] sm:$0xff] %vm678_vm0, %v652_v31  ;;  %v558_v38 = vmul.f32 0.2, %v208_v32  ;;  %vm526_vm5 = vcmp.ge.f32.partialorder %v368_v33, 0.0  ;;  %v590_v39 = vmul.f32 0.2, %v368_v33  ;;  %v623_v40 = vsel %vm495_vm2, %v213_v26, %v559_v36 }
 0x10e   :  { %v655_v41 = vsel %vm527_vm3, %v373_v27, %v591_v37  ;;  %v223_v42 = vadd.f32 %v877_v34, %v1267_v24  ;;  %v383_v43 = vadd.f32 %v925_v35, %v1267_v24  ;;  %v377_v45 = vpop.f32.mrb[11].mxu1  ;;  %688 = vst.msk [vmem:[%s1592_s3 + $0x48] sm:$0xff] %vm678_vm0, %v623_v40  ;;  %v218_v48 = vadd.f32 %v1267_v24, %v217_v44 }
 0x10f   :  { %720 = vst.msk [vmem:[%s1592_s3 + $0x148] sm:$0xff] %vm678_vm0, %v655_v41  ;;  %v622_v46 = vsel %vm494_vm4, %v208_v32, %v558_v38  ;;  %v654_v47 = vsel %vm526_vm5, %v368_v33, %v590_v39  ;;  %v378_v49 = vadd.f32 %v1267_v24, %v377_v45  ;;  %v880_v50 = vpop.f32.mrb[12].mxu0  ;;  %v928_v51 = vpop.f32.mrb[12].mxu1 }
 0x110   :  { %687 = vst.msk [vmem:[%s1592_s3 + $0x40] sm:$0xff] %vm678_vm0, %v622_v46  ;;  %719 = vst.msk [vmem:[%s1592_s3 + $0x140] sm:$0xff] %vm678_vm0, %v654_v47  ;;  %vm497_vm6 = vcmp.ge.f32.partialorder %v223_v42, 0.0  ;;  %v561_v52 = vmul.f32 0.2, %v223_v42  ;;  %vm529_vm7 = vcmp.ge.f32.partialorder %v383_v43, 0.0  ;;  %v233_v58 = vadd.f32 %v880_v50, %v1267_v24 }
 0x111   :  { %v593_v53 = vmul.f32 0.2, %v383_v43  ;;  %vm496_vm8 = vcmp.ge.f32.partialorder %v218_v48, 0.0  ;;  %v560_v54 = vmul.f32 0.2, %v218_v48  ;;  %vm528_vm9 = vcmp.ge.f32.partialorder %v378_v49, 0.0 }
 0x112   :  { %v592_v55 = vmul.f32 0.2, %v378_v49  ;;  %v625_v56 = vsel %vm497_vm6, %v223_v42, %v561_v52  ;;  %v393_v59 = vadd.f32 %v928_v51, %v1267_v24  ;;  %v227_v60 = vpop.f32.mrb[13].mxu0  ;;  %v387_v61 = vpop.f32.mrb[13].mxu1  ;;  %vm499_vm10 = vcmp.ge.f32.partialorder %v233_v58, 0.0 }
 0x113   :  { %v657_v57 = vsel %vm529_vm7, %v383_v43, %v593_v53  ;;  %690 = vst.msk [vmem:[%s1592_s3 + $0x58] sm:$0xff] %vm678_vm0, %v625_v56  ;;  %v624_v62 = vsel %vm496_vm8, %v218_v48, %v560_v54  ;;  %v228_v0 = vadd.f32 %v1267_v24, %v227_v60  ;;  %v388_v1 = vadd.f32 %v1267_v24, %v387_v61  ;;  %v883_v2 = vpop.f32.mrb[14].mxu0  ;;  %v931_v3 = vpop.f32.mrb[14].mxu1 }
 0x114   :  { %722 = vst.msk [vmem:[%s1592_s3 + $0x158] sm:$0xff] %vm678_vm0, %v657_v57  ;;  %v656_v63 = vsel %vm528_vm9, %v378_v49, %v592_v55  ;;  %689 = vst.msk [vmem:[%s1592_s3 + $0x50] sm:$0xff] %vm678_vm0, %v624_v62  ;;  %v563_v4 = vmul.f32 0.2, %v233_v58  ;;  %vm531_vm11 = vcmp.ge.f32.partialorder %v393_v59, 0.0  ;;  %v243_v10 = vadd.f32 %v883_v2, %v1267_v24  ;;  %v237_v12 = vpop.f32.mrb[15].mxu0 }
 0x115   :  { %721 = vst.msk [vmem:[%s1592_s3 + $0x150] sm:$0xff] %vm678_vm0, %v656_v63  ;;  %v595_v5 = vmul.f32 0.2, %v393_v59  ;;  %vm498_vm12 = vcmp.ge.f32.partialorder %v228_v0, 0.0  ;;  %v562_v6 = vmul.f32 0.2, %v228_v0  ;;  %v403_v11 = vadd.f32 %v931_v3, %v1267_v24 }
 0x116   :  { %vm530_vm13 = vcmp.ge.f32.partialorder %v388_v1, 0.0  ;;  %v594_v7 = vmul.f32 0.2, %v388_v1  ;;  %v627_v8 = vsel %vm499_vm10, %v233_v58, %v563_v4  ;;  %v397_v13 = vpop.f32.mrb[15].mxu1  ;;  %v238_v16 = vadd.f32 %v1267_v24, %v237_v12 }
 0x117   :  { %v659_v9 = vsel %vm531_vm11, %v393_v59, %v595_v5  ;;  %692 = vst.msk [vmem:[%s1592_s3 + $0x68] sm:$0xff] %vm678_vm0, %v627_v8  ;;  %v626_v14 = vsel %vm498_vm12, %v228_v0, %v562_v6  ;;  %v398_v17 = vadd.f32 %v1267_v24, %v397_v13  ;;  %v886_v18 = vpop.f32.mrb[16].mxu0  ;;  %v934_v19 = vpop.f32.mrb[16].mxu1  ;;  %vm501_vm14 = vcmp.ge.f32.partialorder %v243_v10, 0.0 }
 0x118   :  { %724 = vst.msk [vmem:[%s1592_s3 + $0x168] sm:$0xff] %vm678_vm0, %v659_v9  ;;  %v658_v15 = vsel %vm530_vm13, %v388_v1, %v594_v7  ;;  %691 = vst.msk [vmem:[%s1592_s3 + $0x60] sm:$0xff] %vm678_vm0, %v626_v14  ;;  %v565_v20 = vmul.f32 0.2, %v243_v10  ;;  %vm533_vm15 = vcmp.ge.f32.partialorder %v403_v11, 0.0  ;;  %vm500_vm1 = vcmp.ge.f32.partialorder %v238_v16, 0.0 }
 0x119   :  { %723 = vst.msk [vmem:[%s1592_s3 + $0x160] sm:$0xff] %vm678_vm0, %v658_v15  ;;  %v597_v21 = vmul.f32 0.2, %v403_v11  ;;  %v564_v22 = vmul.f32 0.2, %v238_v16  ;;  %vm532_vm2 = vcmp.ge.f32.partialorder %v398_v17, 0.0  ;;  %v253_v27 = vadd.f32 %v886_v18, %v1267_v24 }
 0x11a   :  { %v596_v23 = vmul.f32 0.2, %v398_v17  ;;  %v629_v25 = vsel %vm501_vm14, %v243_v10, %v565_v20  ;;  %v413_v28 = vadd.f32 %v934_v19, %v1267_v24  ;;  %v247_v29 = vpop.f32.mrb[17].mxu0  ;;  %v407_v30 = vpop.f32.mrb[17].mxu1 }
 0x11b   :  { %v661_v26 = vsel %vm533_vm15, %v403_v11, %v597_v21  ;;  %694 = vst.msk [vmem:[%s1592_s3 + $0x78] sm:$0xff] %vm678_vm0, %v629_v25  ;;  %v628_v31 = vsel %vm500_vm1, %v238_v16, %v564_v22  ;;  %v248_v33 = vadd.f32 %v1267_v24, %v247_v29  ;;  %v408_v34 = vadd.f32 %v1267_v24, %v407_v30  ;;  %v889_v35 = vpop.f32.mrb[18].mxu0  ;;  %v937_v36 = vpop.f32.mrb[18].mxu1 }
 0x11c   :  { %726 = vst.msk [vmem:[%s1592_s3 + $0x178] sm:$0xff] %vm678_vm0, %v661_v26  ;;  %v660_v32 = vsel %vm532_vm2, %v398_v17, %v596_v23  ;;  %693 = vst.msk [vmem:[%s1592_s3 + $0x70] sm:$0xff] %vm678_vm0, %v628_v31  ;;  %vm503_vm3 = vcmp.ge.f32.partialorder %v253_v27, 0.0  ;;  %v567_v37 = vmul.f32 0.2, %v253_v27  ;;  %vm535_vm4 = vcmp.ge.f32.partialorder %v413_v28, 0.0 }
 0x11d   :  { %725 = vst.msk [vmem:[%s1592_s3 + $0x170] sm:$0xff] %vm678_vm0, %v660_v32  ;;  %v599_v38 = vmul.f32 0.2, %v413_v28  ;;  %vm502_vm5 = vcmp.ge.f32.partialorder %v248_v33, 0.0  ;;  %v566_v39 = vmul.f32 0.2, %v248_v33  ;;  %v263_v43 = vadd.f32 %v889_v35, %v1267_v24 }
 0x11e   :  { %vm534_vm6 = vcmp.ge.f32.partialorder %v408_v34, 0.0  ;;  %v598_v40 = vmul.f32 0.2, %v408_v34  ;;  %v631_v41 = vsel %vm503_vm3, %v253_v27, %v567_v37  ;;  %v423_v44 = vadd.f32 %v937_v36, %v1267_v24  ;;  %v257_v45 = vpop.f32.mrb[19].mxu0  ;;  %v417_v46 = vpop.f32.mrb[19].mxu1 }
 0x11f   :  { %v663_v42 = vsel %vm535_vm4, %v413_v28, %v599_v38  ;;  %696 = vst.msk [vmem:[%s1592_s3 + $0x88] sm:$0xff] %vm678_vm0, %v631_v41  ;;  %v630_v47 = vsel %vm502_vm5, %v248_v33, %v566_v39  ;;  %v258_v49 = vadd.f32 %v1267_v24, %v257_v45  ;;  %v418_v50 = vadd.f32 %v1267_v24, %v417_v46  ;;  %v892_v51 = vpop.f32.mrb[20].mxu0  ;;  %v940_v52 = vpop.f32.mrb[20].mxu1 }
 0x120   :  { %728 = vst.msk [vmem:[%s1592_s3 + $0x188] sm:$0xff] %vm678_vm0, %v663_v42  ;;  %v662_v48 = vsel %vm534_vm6, %v408_v34, %v598_v40  ;;  %695 = vst.msk [vmem:[%s1592_s3 + $0x80] sm:$0xff] %vm678_vm0, %v630_v47  ;;  %vm505_vm7 = vcmp.ge.f32.partialorder %v263_v43, 0.0  ;;  %v569_v53 = vmul.f32 0.2, %v263_v43  ;;  %vm537_vm8 = vcmp.ge.f32.partialorder %v423_v44, 0.0 }
 0x121   :  { %727 = vst.msk [vmem:[%s1592_s3 + $0x180] sm:$0xff] %vm678_vm0, %v662_v48  ;;  %v601_v54 = vmul.f32 0.2, %v423_v44  ;;  %vm504_vm9 = vcmp.ge.f32.partialorder %v258_v49, 0.0  ;;  %v568_v55 = vmul.f32 0.2, %v258_v49  ;;  %v273_v59 = vadd.f32 %v892_v51, %v1267_v24 }
 0x122   :  { %vm536_vm10 = vcmp.ge.f32.partialorder %v418_v50, 0.0  ;;  %v600_v56 = vmul.f32 0.2, %v418_v50  ;;  %v633_v57 = vsel %vm505_vm7, %v263_v43, %v569_v53  ;;  %v433_v60 = vadd.f32 %v940_v52, %v1267_v24  ;;  %v267_v61 = vpop.f32.mrb[21].mxu0  ;;  %v427_v62 = vpop.f32.mrb[21].mxu1 }
 0x123   :  { %v665_v58 = vsel %vm537_vm8, %v423_v44, %v601_v54  ;;  %698 = vst.msk [vmem:[%s1592_s3 + $0x98] sm:$0xff] %vm678_vm0, %v633_v57  ;;  %v632_v63 = vsel %vm504_vm9, %v258_v49, %v568_v55  ;;  %v268_v1 = vadd.f32 %v1267_v24, %v267_v61  ;;  %v428_v2 = vadd.f32 %v1267_v24, %v427_v62  ;;  %v895_v3 = vpop.f32.mrb[22].mxu0  ;;  %v943_v4 = vpop.f32.mrb[22].mxu1 }
 0x124   :  { %730 = vst.msk [vmem:[%s1592_s3 + $0x198] sm:$0xff] %vm678_vm0, %v665_v58  ;;  %v664_v0 = vsel %vm536_vm10, %v418_v50, %v600_v56  ;;  %697 = vst.msk [vmem:[%s1592_s3 + $0x90] sm:$0xff] %vm678_vm0, %v632_v63  ;;  %vm507_vm11 = vcmp.ge.f32.partialorder %v273_v59, 0.0  ;;  %v571_v5 = vmul.f32 0.2, %v273_v59  ;;  %vm539_vm12 = vcmp.ge.f32.partialorder %v433_v60, 0.0 }
 0x125   :  { %729 = vst.msk [vmem:[%s1592_s3 + $0x190] sm:$0xff] %vm678_vm0, %v664_v0  ;;  %v603_v6 = vmul.f32 0.2, %v433_v60  ;;  %vm506_vm13 = vcmp.ge.f32.partialorder %v268_v1, 0.0  ;;  %v570_v7 = vmul.f32 0.2, %v268_v1  ;;  %v283_v11 = vadd.f32 %v895_v3, %v1267_v24 }
 0x126   :  { %vm538_vm14 = vcmp.ge.f32.partialorder %v428_v2, 0.0  ;;  %v602_v8 = vmul.f32 0.2, %v428_v2  ;;  %v635_v9 = vsel %vm507_vm11, %v273_v59, %v571_v5  ;;  %v443_v12 = vadd.f32 %v943_v4, %v1267_v24  ;;  %v277_v13 = vpop.f32.mrb[23].mxu0  ;;  %v437_v14 = vpop.f32.mrb[23].mxu1 }
 0x127   :  { %v667_v10 = vsel %vm539_vm12, %v433_v60, %v603_v6  ;;  %700 = vst.msk [vmem:[%s1592_s3 + $0xa8] sm:$0xff] %vm678_vm0, %v635_v9  ;;  %v634_v15 = vsel %vm506_vm13, %v268_v1, %v570_v7  ;;  %v278_v17 = vadd.f32 %v1267_v24, %v277_v13  ;;  %v438_v18 = vadd.f32 %v1267_v24, %v437_v14  ;;  %v898_v19 = vpop.f32.mrb[24].mxu0  ;;  %v946_v20 = vpop.f32.mrb[24].mxu1 }
 0x128   :  { %732 = vst.msk [vmem:[%s1592_s3 + $0x1a8] sm:$0xff] %vm678_vm0, %v667_v10  ;;  %v666_v16 = vsel %vm538_vm14, %v428_v2, %v602_v8  ;;  %699 = vst.msk [vmem:[%s1592_s3 + $0xa0] sm:$0xff] %vm678_vm0, %v634_v15  ;;  %vm509_vm15 = vcmp.ge.f32.partialorder %v283_v11, 0.0  ;;  %v573_v21 = vmul.f32 0.2, %v283_v11  ;;  %vm541_vm1 = vcmp.ge.f32.partialorder %v443_v12, 0.0 }
 0x129   :  { %731 = vst.msk [vmem:[%s1592_s3 + $0x1a0] sm:$0xff] %vm678_vm0, %v666_v16  ;;  %v605_v22 = vmul.f32 0.2, %v443_v12  ;;  %vm508_vm2 = vcmp.ge.f32.partialorder %v278_v17, 0.0  ;;  %v572_v23 = vmul.f32 0.2, %v278_v17  ;;  %v293_v28 = vadd.f32 %v898_v19, %v1267_v24 }
 0x12a   :  { %vm540_vm3 = vcmp.ge.f32.partialorder %v438_v18, 0.0  ;;  %v604_v25 = vmul.f32 0.2, %v438_v18  ;;  %v637_v26 = vsel %vm509_vm15, %v283_v11, %v573_v21  ;;  %v453_v29 = vadd.f32 %v946_v20, %v1267_v24  ;;  %v287_v30 = vpop.f32.mrb[25].mxu0  ;;  %v447_v31 = vpop.f32.mrb[25].mxu1 }
 0x12b   :  { %v669_v27 = vsel %vm541_vm1, %v443_v12, %v605_v22  ;;  %702 = vst.msk [vmem:[%s1592_s3 + $0xb8] sm:$0xff] %vm678_vm0, %v637_v26  ;;  %v636_v32 = vsel %vm508_vm2, %v278_v17, %v572_v23  ;;  %v288_v34 = vadd.f32 %v1267_v24, %v287_v30  ;;  %v448_v35 = vadd.f32 %v1267_v24, %v447_v31  ;;  %v901_v36 = vpop.f32.mrb[26].mxu0  ;;  %v949_v37 = vpop.f32.mrb[26].mxu1 }
 0x12c   :  { %734 = vst.msk [vmem:[%s1592_s3 + $0x1b8] sm:$0xff] %vm678_vm0, %v669_v27  ;;  %v668_v33 = vsel %vm540_vm3, %v438_v18, %v604_v25  ;;  %701 = vst.msk [vmem:[%s1592_s3 + $0xb0] sm:$0xff] %vm678_vm0, %v636_v32  ;;  %vm511_vm4 = vcmp.ge.f32.partialorder %v293_v28, 0.0  ;;  %v575_v38 = vmul.f32 0.2, %v293_v28  ;;  %vm543_vm5 = vcmp.ge.f32.partialorder %v453_v29, 0.0 }
 0x12d   :  { %733 = vst.msk [vmem:[%s1592_s3 + $0x1b0] sm:$0xff] %vm678_vm0, %v668_v33  ;;  %v607_v39 = vmul.f32 0.2, %v453_v29  ;;  %vm510_vm6 = vcmp.ge.f32.partialorder %v288_v34, 0.0  ;;  %v574_v40 = vmul.f32 0.2, %v288_v34  ;;  %v303_v44 = vadd.f32 %v901_v36, %v1267_v24 }
 0x12e   :  { %vm542_vm7 = vcmp.ge.f32.partialorder %v448_v35, 0.0  ;;  %v606_v41 = vmul.f32 0.2, %v448_v35  ;;  %v639_v42 = vsel %vm511_vm4, %v293_v28, %v575_v38  ;;  %v463_v45 = vadd.f32 %v949_v37, %v1267_v24  ;;  %v297_v46 = vpop.f32.mrb[27].mxu0  ;;  %v457_v47 = vpop.f32.mrb[27].mxu1 }
 0x12f   :  { %v671_v43 = vsel %vm543_vm5, %v453_v29, %v607_v39  ;;  %704 = vst.msk [vmem:[%s1592_s3 + $0xc8] sm:$0xff] %vm678_vm0, %v639_v42  ;;  %v638_v48 = vsel %vm510_vm6, %v288_v34, %v574_v40  ;;  %v298_v50 = vadd.f32 %v1267_v24, %v297_v46  ;;  %v458_v51 = vadd.f32 %v1267_v24, %v457_v47  ;;  %v904_v52 = vpop.f32.mrb[28].mxu0  ;;  %v952_v53 = vpop.f32.mrb[28].mxu1 }
 0x130   :  { %736 = vst.msk [vmem:[%s1592_s3 + $0x1c8] sm:$0xff] %vm678_vm0, %v671_v43  ;;  %v670_v49 = vsel %vm542_vm7, %v448_v35, %v606_v41  ;;  %703 = vst.msk [vmem:[%s1592_s3 + $0xc0] sm:$0xff] %vm678_vm0, %v638_v48  ;;  %vm513_vm8 = vcmp.ge.f32.partialorder %v303_v44, 0.0  ;;  %v577_v54 = vmul.f32 0.2, %v303_v44  ;;  %vm545_vm9 = vcmp.ge.f32.partialorder %v463_v45, 0.0 }
 0x131   :  { %735 = vst.msk [vmem:[%s1592_s3 + $0x1c0] sm:$0xff] %vm678_vm0, %v670_v49  ;;  %v609_v55 = vmul.f32 0.2, %v463_v45  ;;  %vm512_vm10 = vcmp.ge.f32.partialorder %v298_v50, 0.0  ;;  %v576_v56 = vmul.f32 0.2, %v298_v50  ;;  %v313_v60 = vadd.f32 %v904_v52, %v1267_v24 }
 0x132   :  { %vm544_vm11 = vcmp.ge.f32.partialorder %v458_v51, 0.0  ;;  %v608_v57 = vmul.f32 0.2, %v458_v51  ;;  %v641_v58 = vsel %vm513_vm8, %v303_v44, %v577_v54  ;;  %v473_v61 = vadd.f32 %v952_v53, %v1267_v24  ;;  %v307_v62 = vpop.f32.mrb[29].mxu0  ;;  %v467_v63 = vpop.f32.mrb[29].mxu1 }
 0x133   :  { %v673_v59 = vsel %vm545_vm9, %v463_v45, %v609_v55  ;;  %706 = vst.msk [vmem:[%s1592_s3 + $0xd8] sm:$0xff] %vm678_vm0, %v641_v58  ;;  %v640_v0 = vsel %vm512_vm10, %v298_v50, %v576_v56  ;;  %v308_v2 = vadd.f32 %v1267_v24, %v307_v62  ;;  %v468_v3 = vadd.f32 %v1267_v24, %v467_v63  ;;  %v907_v4 = vpop.f32.mrb[30].mxu0  ;;  %v955_v5 = vpop.f32.mrb[30].mxu1 }
 0x134   :  { %738 = vst.msk [vmem:[%s1592_s3 + $0x1d8] sm:$0xff] %vm678_vm0, %v673_v59  ;;  %v672_v1 = vsel %vm544_vm11, %v458_v51, %v608_v57  ;;  %705 = vst.msk [vmem:[%s1592_s3 + $0xd0] sm:$0xff] %vm678_vm0, %v640_v0  ;;  %vm515_vm12 = vcmp.ge.f32.partialorder %v313_v60, 0.0  ;;  %v579_v6 = vmul.f32 0.2, %v313_v60  ;;  %vm547_vm13 = vcmp.ge.f32.partialorder %v473_v61, 0.0 }
 0x135   :  { %737 = vst.msk [vmem:[%s1592_s3 + $0x1d0] sm:$0xff] %vm678_vm0, %v672_v1  ;;  %v611_v7 = vmul.f32 0.2, %v473_v61  ;;  %vm514_vm14 = vcmp.ge.f32.partialorder %v308_v2, 0.0  ;;  %v578_v8 = vmul.f32 0.2, %v308_v2  ;;  %v323_v12 = vadd.f32 %v907_v4, %v1267_v24 }
 0x136   :  { %vm546_vm15 = vcmp.ge.f32.partialorder %v468_v3, 0.0  ;;  %v610_v9 = vmul.f32 0.2, %v468_v3  ;;  %v643_v10 = vsel %vm515_vm12, %v313_v60, %v579_v6  ;;  %v483_v13 = vadd.f32 %v955_v5, %v1267_v24  ;;  %v317_v14 = vpop.f32.mrb[31].mxu0  ;;  %v477_v15 = vpop.f32.mrb[31].mxu1 }
 0x137   :  { %v675_v11 = vsel %vm547_vm13, %v473_v61, %v611_v7  ;;  %708 = vst.msk [vmem:[%s1592_s3 + $0xe8] sm:$0xff] %vm678_vm0, %v643_v10  ;;  %v642_v16 = vsel %vm514_vm14, %v308_v2, %v578_v8  ;;  %v318_v18 = vadd.f32 %v1267_v24, %v317_v14  ;;  %v478_v19 = vadd.f32 %v1267_v24, %v477_v15 }
 0x138   :  { %740 = vst.msk [vmem:[%s1592_s3 + $0x1e8] sm:$0xff] %vm678_vm0, %v675_v11  ;;  %v674_v17 = vsel %vm546_vm15, %v468_v3, %v610_v9  ;;  %707 = vst.msk [vmem:[%s1592_s3 + $0xe0] sm:$0xff] %vm678_vm0, %v642_v16  ;;  %vm517_vm1 = vcmp.ge.f32.partialorder %v323_v12, 0.0  ;;  %v581_v20 = vmul.f32 0.2, %v323_v12  ;;  %vm549_vm2 = vcmp.ge.f32.partialorder %v483_v13, 0.0 }
 0x139   :  { %739 = vst.msk [vmem:[%s1592_s3 + $0x1e0] sm:$0xff] %vm678_vm0, %v674_v17  ;;  %v613_v21 = vmul.f32 0.2, %v483_v13  ;;  %vm516_vm3 = vcmp.ge.f32.partialorder %v318_v18, 0.0  ;;  %v580_v22 = vmul.f32 0.2, %v318_v18 }
 0x13a   :  { %vm548_vm4 = vcmp.ge.f32.partialorder %v478_v19, 0.0  ;;  %v612_v23 = vmul.f32 0.2, %v478_v19  ;;  %v645_v25 = vsel %vm517_vm1, %v323_v12, %v581_v20 }
 0x13b   :  { %v677_v24 = vsel %vm549_vm2, %v483_v13, %v613_v21  ;;  %710 = vst.msk [vmem:[%s1592_s3 + $0xf8] sm:$0xff] %vm678_vm0, %v645_v25  ;;  %v644_v26 = vsel %vm516_vm3, %v318_v18, %v580_v22 }
 0x13c   :  { %742 = vst.msk [vmem:[%s1592_s3 + $0x1f8] sm:$0xff] %vm678_vm0, %v677_v24  ;;  %v676_v27 = vsel %vm548_vm4, %v478_v19, %v612_v23  ;;  %709 = vst.msk [vmem:[%s1592_s3 + $0xf0] sm:$0xff] %vm678_vm0, %v644_v26 }
 0x13d   :  { %741 = vst.msk [vmem:[%s1592_s3 + $0x1f0] sm:$0xff] %vm678_vm0, %v676_v27 }

// kernel: discriminator_forward.9
= control target key start
LH: loop header
LB: loop body
LE: loop exit
PB: predicated region body
PF: predicated region fallthrough
CT: control target
= control target key end

     0   :  { %vm278_vm0 = vcmask 261120   ;;  %s725_s1 = inlined_call_operand.vmem [shape: f32[256,32], index: 1, kind: input, shape index: {}]   ;;  %s726_s0 = inlined_call_operand.vmem [shape: f32[128,256], index: 0, kind: input, shape index: {}]   ;;  %s727_s2 = inlined_call_operand.vmem [shape: f32[1,32], index: 2, kind: input, shape index: {}]   ;;  %s728_s3 = inlined_call_operand.vmem [shape: f32[128,32], index: 3, kind: output, shape index: {}]  }
   0x1   :  { %v62_v0 = vld [vmem:[%s725_s1 + $0x80] sm:$0xff]  ;;  %v63_v1 = vld [vmem:[%s725_s1 + $0x88] sm:$0xff]  ;;  %v64_v5 = vld [vmem:[%s725_s1 + $0x90] sm:$0xff] }
   0x2   :  { %v46_v2 = vld [vmem:[%s725_s1] sm:$0xff]  ;;  %v380_v3 = vpack.c.bf16 %v63_v1, %v62_v0  ;;  %v47_v4 = vld [vmem:[%s725_s1 + $0x8] sm:$0xff]  ;;  %v65_v6 = vld [vmem:[%s725_s1 + $0x98] sm:$0xff] }
   0x3   :  { %v382_v7 = vpack.c.bf16 %v47_v4, %v46_v2  ;;  %v384_v8 = vpack.c.bf16 %v65_v6, %v64_v5  ;;  %v48_v9 = vld [vmem:[%s725_s1 + $0x10] sm:$0xff]  ;;  %v49_v10 = vld [vmem:[%s725_s1 + $0x18] sm:$0xff]  ;;  %v66_v11 = vld [vmem:[%s725_s1 + $0xa0] sm:$0xff] }
   0x4   :  { %381 = vmatprep.subr.bf16.mxu0 %v380_v3  ;;  %412 = vmatprep.subr.bf16.mxu1 %v380_v3  ;;  %v67_v12 = vld [vmem:[%s725_s1 + $0xa8] sm:$0xff]  ;;  %v386_v13 = vpack.c.bf16 %v49_v10, %v48_v9  ;;  %v50_v15 = vld [vmem:[%s725_s1 + $0x20] sm:$0xff]  ;;  %v68_v17 = vld [vmem:[%s725_s1 + $0xb0] sm:$0xff] }
   0x5   :  { %383 = vmatpush3.bf16.msra.mxu0 %v382_v7  ;;  %420 = vmatpush3.bf16.msra.mxu1 %v382_v7  ;;  %v388_v14 = vpack.c.bf16 %v67_v12, %v66_v11  ;;  %v51_v16 = vld [vmem:[%s725_s1 + $0x28] sm:$0xff]  ;;  %v69_v18 = vld [vmem:[%s725_s1 + $0xb8] sm:$0xff]  ;;  %v52_v21 = vld [vmem:[%s725_s1 + $0x30] sm:$0xff] }
   0x6   :  { %385 = vmatprep.subr.bf16.mxu0 %v384_v8  ;;  %413 = vmatprep.subr.bf16.mxu1 %v384_v8  ;;  %v390_v19 = vpack.c.bf16 %v51_v16, %v50_v15  ;;  %v392_v20 = vpack.c.bf16 %v69_v18, %v68_v17  ;;  %v53_v22 = vld [vmem:[%s725_s1 + $0x38] sm:$0xff]  ;;  %v70_v23 = vld [vmem:[%s725_s1 + $0xc0] sm:$0xff]  ;;  %v71_v24 = vld [vmem:[%s725_s1 + $0xc8] sm:$0xff] }
   0x7   :  { %v15_v25 = vld [vmem:[%s726_s0 + $0x8] sm:$0xff]  ;;  %v394_v27 = vpack.c.bf16 %v53_v22, %v52_v21  ;;  %v396_v28 = vpack.c.bf16 %v71_v24, %v70_v23  ;;  %v54_v29 = vld [vmem:[%s725_s1 + $0x40] sm:$0xff]  ;;  %v72_v31 = vld [vmem:[%s725_s1 + $0xd0] sm:$0xff] }
   0x8   :  { %149 = vmatprep.mubr.f32.mxu0 %v15_v25  ;;  %v31_v26 = vld [vmem:[%s726_s0 + $0x88] sm:$0xff]  ;;  %v73_v32 = vld [vmem:[%s725_s1 + $0xd8] sm:$0xff]  ;;  %v56_v35 = vld [vmem:[%s725_s1 + $0x50] sm:$0xff] }
   0x9   :  { %387 = vmatpush3.bf16.msra.mxu0 %v386_v13  ;;  %421 = vmatpush3.bf16.msra.mxu1 %v386_v13  ;;  %v55_v30 = vld [vmem:[%s725_s1 + $0x48] sm:$0xff]  ;;  %v400_v34 = vpack.c.bf16 %v73_v32, %v72_v31  ;;  %v57_v36 = vld [vmem:[%s725_s1 + $0x58] sm:$0xff]  ;;  %v74_v37 = vld [vmem:[%s725_s1 + $0xe0] sm:$0xff] }
   0xa   :  { %389 = vmatprep.subr.bf16.mxu0 %v388_v14  ;;  %414 = vmatprep.subr.bf16.mxu1 %v388_v14  ;;  %v398_v33 = vpack.c.bf16 %v55_v30, %v54_v29  ;;  %v75_v38 = vld [vmem:[%s725_s1 + $0xe8] sm:$0xff]  ;;  %v402_v39 = vpack.c.bf16 %v57_v36, %v56_v35  ;;  %v58_v41 = vld [vmem:[%s725_s1 + $0x60] sm:$0xff]  ;;  %v76_v43 = vld [vmem:[%s725_s1 + $0xf0] sm:$0xff] }
   0xb   :  { %189 = vmatprep.mubr.f32.mxu1 %v31_v26  ;;  %v404_v40 = vpack.c.bf16 %v75_v38, %v74_v37  ;;  %v59_v42 = vld [vmem:[%s725_s1 + $0x68] sm:$0xff]  ;;  %v77_v44 = vld [vmem:[%s725_s1 + $0xf8] sm:$0xff]  ;;  %v60_v47 = vld [vmem:[%s725_s1 + $0x70] sm:$0xff] }
   0xc   :  { %v406_v45 = vpack.c.bf16 %v59_v42, %v58_v41  ;;  %v408_v46 = vpack.c.bf16 %v77_v44, %v76_v43  ;;  %v61_v48 = vld [vmem:[%s725_s1 + $0x78] sm:$0xff]  ;;  %v14_v50 = vld [vmem:[%s726_s0] sm:$0xff]  ;;  %v16_v54 = vld [vmem:[%s726_s0 + $0x10] sm:$0xff] }
   0xd   :  { %391 = vmatpush3.bf16.msra.mxu0 %v390_v19  ;;  %422 = vmatpush3.bf16.msra.mxu1 %v390_v19  ;;  %v410_v49 = vpack.c.bf16 %v61_v48, %v60_v47  ;;  %v30_v51 = vld [vmem:[%s726_s0 + $0x80] sm:$0xff]  ;;  %v17_v52 = vld [vmem:[%s726_s0 + $0x18] sm:$0xff]  ;;  %v32_v55 = vld [vmem:[%s726_s0 + $0x90] sm:$0xff] }
   0xe   :  { %393 = vmatprep.subr.bf16.mxu0 %v392_v20  ;;  %415 = vmatprep.subr.bf16.mxu1 %v392_v20  ;;  %v33_v53 = vld [vmem:[%s726_s0 + $0x98] sm:$0xff]  ;;  %v19_v56 = vld [vmem:[%s726_s0 + $0x28] sm:$0xff]  ;;  %v18_v58 = vld [vmem:[%s726_s0 + $0x20] sm:$0xff] }
   0xf   :  { %v35_v57 = vld [vmem:[%s726_s0 + $0xa8] sm:$0xff]  ;;  %v34_v59 = vld [vmem:[%s726_s0 + $0xa0] sm:$0xff]  ;;  %v21_v60 = vld [vmem:[%s726_s0 + $0x38] sm:$0xff] }
  0x10   :  { %v37_v61 = vld [vmem:[%s726_s0 + $0xb8] sm:$0xff]  ;;  %v20_v62 = vld [vmem:[%s726_s0 + $0x30] sm:$0xff]  ;;  %v23_v0 = vld [vmem:[%s726_s0 + $0x48] sm:$0xff] }
  0x11   :  { %395 = vmatpush3.bf16.msra.mxu0 %v394_v27  ;;  %423 = vmatpush3.bf16.msra.mxu1 %v394_v27  ;;  %v36_v63 = vld [vmem:[%s726_s0 + $0xb0] sm:$0xff]  ;;  %v39_v1 = vld [vmem:[%s726_s0 + $0xc8] sm:$0xff]  ;;  %v22_v2 = vld [vmem:[%s726_s0 + $0x40] sm:$0xff] }
  0x12   :  { %397 = vmatprep.subr.bf16.mxu0 %v396_v28  ;;  %416 = vmatprep.subr.bf16.mxu1 %v396_v28  ;;  %v38_v3 = vld [vmem:[%s726_s0 + $0xc0] sm:$0xff]  ;;  %v25_v4 = vld [vmem:[%s726_s0 + $0x58] sm:$0xff]  ;;  %v24_v6 = vld [vmem:[%s726_s0 + $0x50] sm:$0xff] }
  0x13   :  { %v41_v5 = vld [vmem:[%s726_s0 + $0xd8] sm:$0xff]  ;;  %v40_v7 = vld [vmem:[%s726_s0 + $0xd0] sm:$0xff]  ;;  %v27_v8 = vld [vmem:[%s726_s0 + $0x68] sm:$0xff] }
  0x14   :  { %v43_v9 = vld [vmem:[%s726_s0 + $0xe8] sm:$0xff]  ;;  %v26_v10 = vld [vmem:[%s726_s0 + $0x60] sm:$0xff]  ;;  %v29_v12 = vld [vmem:[%s726_s0 + $0x78] sm:$0xff] }
  0x15   :  { %399 = vmatpush3.bf16.msra.mxu0 %v398_v33  ;;  %424 = vmatpush3.bf16.msra.mxu1 %v398_v33  ;;  %v42_v11 = vld [vmem:[%s726_s0 + $0xe0] sm:$0xff]  ;;  %v45_v13 = vld [vmem:[%s726_s0 + $0xf8] sm:$0xff]  ;;  %v28_v14 = vld [vmem:[%s726_s0 + $0x70] sm:$0xff] }
  0x16   :  { %401 = vmatprep.subr.bf16.mxu0 %v400_v34  ;;  %417 = vmatprep.subr.bf16.mxu1 %v400_v34  ;;  %v44_v15 = vld [vmem:[%s726_s0 + $0xf0] sm:$0xff]  ;;  %v643_v18 = vld [vmem:[%s727_s2] ss:$0 sm:$0xff] }
  0x19   :  { %403 = vmatpush3.bf16.msra.mxu0 %v402_v39  ;;  %425 = vmatpush3.bf16.msra.mxu1 %v402_v39 }
  0x1a   :  { %405 = vmatprep.subr.bf16.mxu0 %v404_v40  ;;  %418 = vmatprep.subr.bf16.mxu1 %v404_v40 }
  0x1d   :  { %407 = vmatpush3.bf16.msra.mxu0 %v406_v45  ;;  %426 = vmatpush3.bf16.msra.mxu1 %v406_v45 }
  0x1e   :  { %409 = vmatprep.subr.bf16.mxu0 %v408_v46  ;;  %419 = vmatprep.subr.bf16.mxu1 %v408_v46 }
  0x21   :  { %411 = vmatpush3.bf16.msra.mxu0 %v410_v49  ;;  %427 = vmatpush3.bf16.msra.mxu1 %v410_v49 }
  0x24   :  { %150 = vmatmul.mubr.f32.vlgmr.msra.gmra.mrb[0].mxu0 %v14_v50  ;;  %190 = vmatmul.mubr.f32.vlgmr.msra.gmra.mrb[0].mxu1 %v30_v51 }
  0x25   :  { %154 = vmatprep.mubr.f32.mxu0 %v17_v52  ;;  %194 = vmatprep.mubr.f32.mxu1 %v33_v53 }
  0x28   :  { %155 = vmatmul.mubr.f32.gmra.mrb[2].mxu0 %v16_v54  ;;  %195 = vmatmul.mubr.f32.gmra.mrb[2].mxu1 %v32_v55 }
  0x29   :  { %159 = vmatprep.mubr.f32.mxu0 %v19_v56  ;;  %199 = vmatprep.mubr.f32.mxu1 %v35_v57 }
  0x2c   :  { %160 = vmatmul.mubr.f32.gmra.mrb[4].mxu0 %v18_v58  ;;  %200 = vmatmul.mubr.f32.gmra.mrb[4].mxu1 %v34_v59 }
  0x2d   :  { %164 = vmatprep.mubr.f32.mxu0 %v21_v60  ;;  %204 = vmatprep.mubr.f32.mxu1 %v37_v61 }
  0x30   :  { %165 = vmatmul.mubr.f32.gmra.mrb[6].mxu0 %v20_v62  ;;  %205 = vmatmul.mubr.f32.gmra.mrb[6].mxu1 %v36_v63 }
  0x31   :  { %169 = vmatprep.mubr.f32.mxu0 %v23_v0  ;;  %209 = vmatprep.mubr.f32.mxu1 %v39_v1 }
  0x34   :  { %170 = vmatmul.mubr.f32.gmra.mrb[8].mxu0 %v22_v2  ;;  %210 = vmatmul.mubr.f32.gmra.mrb[8].mxu1 %v38_v3 }
  0x35   :  { %174 = vmatprep.mubr.f32.mxu0 %v25_v4  ;;  %214 = vmatprep.mubr.f32.mxu1 %v41_v5 }
  0x38   :  { %175 = vmatmul.mubr.f32.gmra.mrb[10].mxu0 %v24_v6  ;;  %215 = vmatmul.mubr.f32.gmra.mrb[10].mxu1 %v40_v7 }
  0x39   :  { %179 = vmatprep.mubr.f32.mxu0 %v27_v8  ;;  %219 = vmatprep.mubr.f32.mxu1 %v43_v9 }
  0x3c   :  { %180 = vmatmul.mubr.f32.gmra.mrb[12].mxu0 %v26_v10  ;;  %220 = vmatmul.mubr.f32.gmra.mrb[12].mxu1 %v42_v11 }
  0x3d   :  { %184 = vmatprep.mubr.f32.mxu0 %v29_v12  ;;  %224 = vmatprep.mubr.f32.mxu1 %v45_v13 }
  0x40   :  { %185 = vmatmul.mubr.f32.gmra.mrb[14].mxu0 %v28_v14  ;;  %225 = vmatmul.mubr.f32.gmra.mrb[14].mxu1 %v44_v15 }
  0xf7   :  { %v332_v16 = vpop.f32.mrb[0].mxu0  ;;  %v356_v17 = vpop.f32.mrb[0].mxu1 }
  0xf8   :  { %v333_v19 = vpop.f32.mrb[1].mxu0  ;;  %v357_v20 = vpop.f32.mrb[1].mxu1 }
  0xf9   :  { %v334_v21 = vadd.f32 %v333_v19, %v332_v16  ;;  %v358_v22 = vadd.f32 %v357_v20, %v356_v17 }
  0xfb   :  { %v152_v23 = vadd.f32 %v334_v21, %v643_v18  ;;  %v192_v24 = vadd.f32 %v358_v22, %v643_v18  ;;  %v335_v25 = vpop.f32.mrb[2].mxu0  ;;  %v359_v26 = vpop.f32.mrb[2].mxu1 }
  0xfc   :  { %v336_v27 = vpop.f32.mrb[3].mxu0  ;;  %v360_v28 = vpop.f32.mrb[3].mxu1 }
  0xfd   :  { %vm230_vm1 = vcmp.ge.f32.partialorder %v152_v23, 0.0  ;;  %v246_v29 = vmul.f32 0.2, %v152_v23  ;;  %vm238_vm2 = vcmp.ge.f32.partialorder %v192_v24, 0.0  ;;  %v254_v30 = vmul.f32 0.2, %v192_v24 }
  0xfe   :  { %v337_v31 = vadd.f32 %v336_v27, %v335_v25  ;;  %v361_v32 = vadd.f32 %v360_v28, %v359_v26 }
  0xff   :  { %v262_v33 = vsel %vm230_vm1, %v152_v23, %v246_v29  ;;  %v270_v34 = vsel %vm238_vm2, %v192_v24, %v254_v30  ;;  %v338_v35 = vpop.f32.mrb[4].mxu0  ;;  %v362_v36 = vpop.f32.mrb[4].mxu1 }
 0x100   :  { %279 = vst.msk [vmem:[%s728_s3] sm:$0xff] %vm278_vm0, %v262_v33  ;;  %287 = vst.msk [vmem:[%s728_s3 + $0x40] sm:$0xff] %vm278_vm0, %v270_v34  ;;  %v157_v37 = vadd.f32 %v337_v31, %v643_v18  ;;  %v197_v38 = vadd.f32 %v361_v32, %v643_v18  ;;  %v339_v39 = vpop.f32.mrb[5].mxu0  ;;  %v363_v40 = vpop.f32.mrb[5].mxu1 }
 0x101   :  { %v340_v41 = vadd.f32 %v339_v39, %v338_v35  ;;  %v364_v42 = vadd.f32 %v363_v40, %v362_v36 }
 0x102   :  { %vm231_vm3 = vcmp.ge.f32.partialorder %v157_v37, 0.0  ;;  %v247_v43 = vmul.f32 0.2, %v157_v37  ;;  %vm239_vm4 = vcmp.ge.f32.partialorder %v197_v38, 0.0  ;;  %v255_v44 = vmul.f32 0.2, %v197_v38 }
 0x103   :  { %v162_v45 = vadd.f32 %v340_v41, %v643_v18  ;;  %v202_v46 = vadd.f32 %v364_v42, %v643_v18  ;;  %v341_v47 = vpop.f32.mrb[6].mxu0  ;;  %v365_v48 = vpop.f32.mrb[6].mxu1 }
 0x104   :  { %v263_v49 = vsel %vm231_vm3, %v157_v37, %v247_v43  ;;  %v271_v50 = vsel %vm239_vm4, %v197_v38, %v255_v44  ;;  %v342_v51 = vpop.f32.mrb[7].mxu0  ;;  %v366_v52 = vpop.f32.mrb[7].mxu1 }
 0x105   :  { %280 = vst.msk [vmem:[%s728_s3 + $0x8] sm:$0xff] %vm278_vm0, %v263_v49  ;;  %288 = vst.msk [vmem:[%s728_s3 + $0x48] sm:$0xff] %vm278_vm0, %v271_v50  ;;  %vm232_vm5 = vcmp.ge.f32.partialorder %v162_v45, 0.0  ;;  %v248_v53 = vmul.f32 0.2, %v162_v45  ;;  %vm240_vm6 = vcmp.ge.f32.partialorder %v202_v46, 0.0  ;;  %v343_v55 = vadd.f32 %v342_v51, %v341_v47 }
 0x106   :  { %v256_v54 = vmul.f32 0.2, %v202_v46  ;;  %v367_v56 = vadd.f32 %v366_v52, %v365_v48 }
 0x107   :  { %v264_v57 = vsel %vm232_vm5, %v162_v45, %v248_v53  ;;  %v344_v59 = vpop.f32.mrb[8].mxu0  ;;  %v368_v60 = vpop.f32.mrb[8].mxu1  ;;  %v167_v61 = vadd.f32 %v343_v55, %v643_v18 }
 0x108   :  { %v272_v58 = vsel %vm240_vm6, %v202_v46, %v256_v54  ;;  %281 = vst.msk [vmem:[%s728_s3 + $0x10] sm:$0xff] %vm278_vm0, %v264_v57  ;;  %v207_v62 = vadd.f32 %v367_v56, %v643_v18  ;;  %v345_v63 = vpop.f32.mrb[9].mxu0  ;;  %v369_v0 = vpop.f32.mrb[9].mxu1 }
 0x109   :  { %289 = vst.msk [vmem:[%s728_s3 + $0x50] sm:$0xff] %vm278_vm0, %v272_v58  ;;  %v346_v1 = vadd.f32 %v345_v63, %v344_v59  ;;  %v370_v2 = vadd.f32 %v369_v0, %v368_v60  ;;  %vm233_vm7 = vcmp.ge.f32.partialorder %v167_v61, 0.0  ;;  %v249_v3 = vmul.f32 0.2, %v167_v61 }
 0x10a   :  { %vm241_vm8 = vcmp.ge.f32.partialorder %v207_v62, 0.0  ;;  %v257_v4 = vmul.f32 0.2, %v207_v62 }
 0x10b   :  { %v172_v5 = vadd.f32 %v346_v1, %v643_v18  ;;  %v212_v6 = vadd.f32 %v370_v2, %v643_v18  ;;  %v347_v7 = vpop.f32.mrb[10].mxu0  ;;  %v371_v8 = vpop.f32.mrb[10].mxu1  ;;  %v265_v9 = vsel %vm233_vm7, %v167_v61, %v249_v3 }
 0x10c   :  { %v273_v10 = vsel %vm241_vm8, %v207_v62, %v257_v4  ;;  %v348_v11 = vpop.f32.mrb[11].mxu0  ;;  %v372_v12 = vpop.f32.mrb[11].mxu1  ;;  %282 = vst.msk [vmem:[%s728_s3 + $0x18] sm:$0xff] %vm278_vm0, %v265_v9 }
 0x10d   :  { %290 = vst.msk [vmem:[%s728_s3 + $0x58] sm:$0xff] %vm278_vm0, %v273_v10  ;;  %vm234_vm9 = vcmp.ge.f32.partialorder %v172_v5, 0.0  ;;  %v250_v13 = vmul.f32 0.2, %v172_v5  ;;  %vm242_vm10 = vcmp.ge.f32.partialorder %v212_v6, 0.0  ;;  %v349_v15 = vadd.f32 %v348_v11, %v347_v7 }
 0x10e   :  { %v258_v14 = vmul.f32 0.2, %v212_v6  ;;  %v373_v16 = vadd.f32 %v372_v12, %v371_v8 }
 0x10f   :  { %v266_v17 = vsel %vm234_vm9, %v172_v5, %v250_v13  ;;  %v350_v20 = vpop.f32.mrb[12].mxu0  ;;  %v374_v21 = vpop.f32.mrb[12].mxu1  ;;  %v177_v22 = vadd.f32 %v349_v15, %v643_v18 }
 0x110   :  { %v274_v19 = vsel %vm242_vm10, %v212_v6, %v258_v14  ;;  %283 = vst.msk [vmem:[%s728_s3 + $0x20] sm:$0xff] %vm278_vm0, %v266_v17  ;;  %v217_v23 = vadd.f32 %v373_v16, %v643_v18  ;;  %v351_v24 = vpop.f32.mrb[13].mxu0  ;;  %v375_v25 = vpop.f32.mrb[13].mxu1 }
 0x111   :  { %291 = vst.msk [vmem:[%s728_s3 + $0x60] sm:$0xff] %vm278_vm0, %v274_v19  ;;  %v352_v26 = vadd.f32 %v351_v24, %v350_v20  ;;  %v376_v27 = vadd.f32 %v375_v25, %v374_v21  ;;  %vm235_vm11 = vcmp.ge.f32.partialorder %v177_v22, 0.0  ;;  %v251_v28 = vmul.f32 0.2, %v177_v22 }
 0x112   :  { %vm243_vm12 = vcmp.ge.f32.partialorder %v217_v23, 0.0  ;;  %v259_v29 = vmul.f32 0.2, %v217_v23 }
 0x113   :  { %v182_v30 = vadd.f32 %v352_v26, %v643_v18  ;;  %v222_v31 = vadd.f32 %v376_v27, %v643_v18  ;;  %v353_v32 = vpop.f32.mrb[14].mxu0  ;;  %v377_v33 = vpop.f32.mrb[14].mxu1  ;;  %v267_v34 = vsel %vm235_vm11, %v177_v22, %v251_v28 }
 0x114   :  { %v275_v35 = vsel %vm243_vm12, %v217_v23, %v259_v29  ;;  %v354_v36 = vpop.f32.mrb[15].mxu0  ;;  %v378_v37 = vpop.f32.mrb[15].mxu1  ;;  %284 = vst.msk [vmem:[%s728_s3 + $0x28] sm:$0xff] %vm278_vm0, %v267_v34 }
 0x115   :  { %292 = vst.msk [vmem:[%s728_s3 + $0x68] sm:$0xff] %vm278_vm0, %v275_v35  ;;  %vm236_vm13 = vcmp.ge.f32.partialorder %v182_v30, 0.0  ;;  %v252_v38 = vmul.f32 0.2, %v182_v30  ;;  %vm244_vm14 = vcmp.ge.f32.partialorder %v222_v31, 0.0  ;;  %v355_v40 = vadd.f32 %v354_v36, %v353_v32 }
 0x116   :  { %v260_v39 = vmul.f32 0.2, %v222_v31  ;;  %v379_v41 = vadd.f32 %v378_v37, %v377_v33 }
 0x117   :  { %v268_v42 = vsel %vm236_vm13, %v182_v30, %v252_v38  ;;  %v187_v44 = vadd.f32 %v355_v40, %v643_v18 }
 0x118   :  { %v276_v43 = vsel %vm244_vm14, %v222_v31, %v260_v39  ;;  %285 = vst.msk [vmem:[%s728_s3 + $0x30] sm:$0xff] %vm278_vm0, %v268_v42  ;;  %v227_v45 = vadd.f32 %v379_v41, %v643_v18 }
 0x119   :  { %293 = vst.msk [vmem:[%s728_s3 + $0x70] sm:$0xff] %vm278_vm0, %v276_v43  ;;  %vm237_vm15 = vcmp.ge.f32.partialorder %v187_v44, 0.0  ;;  %v253_v46 = vmul.f32 0.2, %v187_v44 }
 0x11a   :  { %vm245_vm1 = vcmp.ge.f32.partialorder %v227_v45, 0.0  ;;  %v261_v47 = vmul.f32 0.2, %v227_v45 }
 0x11b   :  { %v269_v48 = vsel %vm237_vm15, %v187_v44, %v253_v46 }
 0x11c   :  { %v277_v49 = vsel %vm245_vm1, %v227_v45, %v261_v47  ;;  %286 = vst.msk [vmem:[%s728_s3 + $0x38] sm:$0xff] %vm278_vm0, %v269_v48 }
 0x11d   :  { %294 = vst.msk [vmem:[%s728_s3 + $0x78] sm:$0xff] %vm278_vm0, %v277_v49 }

// kernel: discriminator_forward.10
= control target key start
LH: loop header
LB: loop body
LE: loop exit
PB: predicated region body
PF: predicated region fallthrough
CT: control target
= control target key end

     0   :  { %vm109_vm0 = vcmask 261120   ;;  %vm496_vm2 = vcmask 523264   ;;  %vm593_vm12 = vcmask 516096   ;;  %s1408_s1 = inlined_call_operand.vmem [shape: f32[288,64], index: 1, kind: input, shape index: {}]   ;;  %s1409_s0 = inlined_call_operand.vmem [shape: f32[128,288], index: 0, kind: input, shape index: {}]   ;;  %s1410_s2 = inlined_call_operand.vmem [shape: f32[1,64], index: 2, kind: input, shape index: {}]   ;;  %s1411_s3 = inlined_call_operand.vmem [shape: f32[128,64], index: 3, kind: output, shape index: {0}]   ;;  %s1412_s5 = inlined_call_operand.vmem [shape: f32[2,64], index: 5, kind: output, shape index: {2}]   ;;  %s1413_s6 = inlined_call_operand.vmem [shape: f32[2,64], index: 6, kind: output, shape index: {3}]   ;;  %s1414_s4 = inlined_call_operand.vmem [shape: f32[128,1], index: 4, kind: output, shape index: {1}]  }
   0x1   :  { %v82_v0 = vld [vmem:[%s1408_s1 + $0x80] sm:$0xff]  ;;  %v83_v1 = vld [vmem:[%s1408_s1 + $0x88] sm:$0xff]  ;;  %v84_v5 = vld [vmem:[%s1408_s1 + $0x90] sm:$0xff] }
   0x2   :  { %v66_v2 = vld [vmem:[%s1408_s1] sm:$0xff]  ;;  %v819_v3 = vpack.c.bf16 %v83_v1, %v82_v0  ;;  %v67_v4 = vld [vmem:[%s1408_s1 + $0x8] sm:$0xff]  ;;  %v85_v6 = vld [vmem:[%s1408_s1 + $0x98] sm:$0xff] }
   0x3   :  { %v821_v7 = vpack.c.bf16 %v67_v4, %v66_v2  ;;  %v823_v8 = vpack.c.bf16 %v85_v6, %v84_v5  ;;  %v68_v9 = vld [vmem:[%s1408_s1 + $0x10] sm:$0xff]  ;;  %v69_v10 = vld [vmem:[%s1408_s1 + $0x18] sm:$0xff]  ;;  %v86_v11 = vld [vmem:[%s1408_s1 + $0xa0] sm:$0xff] }
   0x4   :  { %820 = vmatprep.subr.bf16.mxu0 %v819_v3  ;;  %859 = vmatprep.subr.bf16.mxu1 %v819_v3  ;;  %v87_v12 = vld [vmem:[%s1408_s1 + $0xa8] sm:$0xff]  ;;  %v825_v13 = vpack.c.bf16 %v69_v10, %v68_v9  ;;  %v70_v15 = vld [vmem:[%s1408_s1 + $0x20] sm:$0xff]  ;;  %v88_v17 = vld [vmem:[%s1408_s1 + $0xb0] sm:$0xff] }
   0x5   :  { %822 = vmatpush3.bf16.msra.mxu0 %v821_v7  ;;  %867 = vmatpush3.bf16.msra.mxu1 %v821_v7  ;;  %v827_v14 = vpack.c.bf16 %v87_v12, %v86_v11  ;;  %v71_v16 = vld [vmem:[%s1408_s1 + $0x28] sm:$0xff]  ;;  %v89_v18 = vld [vmem:[%s1408_s1 + $0xb8] sm:$0xff]  ;;  %v72_v21 = vld [vmem:[%s1408_s1 + $0x30] sm:$0xff] }
   0x6   :  { %824 = vmatprep.subr.bf16.mxu0 %v823_v8  ;;  %860 = vmatprep.subr.bf16.mxu1 %v823_v8  ;;  %v829_v19 = vpack.c.bf16 %v71_v16, %v70_v15  ;;  %v831_v20 = vpack.c.bf16 %v89_v18, %v88_v17  ;;  %v73_v22 = vld [vmem:[%s1408_s1 + $0x38] sm:$0xff]  ;;  %v90_v23 = vld [vmem:[%s1408_s1 + $0xc0] sm:$0xff]  ;;  %v91_v24 = vld [vmem:[%s1408_s1 + $0xc8] sm:$0xff] }
   0x7   :  { %v19_v25 = vld [vmem:[%s1409_s0 + $0x8] sm:$0xff]  ;;  %v833_v27 = vpack.c.bf16 %v73_v22, %v72_v21  ;;  %v835_v28 = vpack.c.bf16 %v91_v24, %v90_v23  ;;  %v74_v29 = vld [vmem:[%s1408_s1 + $0x40] sm:$0xff]  ;;  %v92_v31 = vld [vmem:[%s1408_s1 + $0xd0] sm:$0xff] }
   0x8   :  { %222 = vmatprep.mubr.f32.mxu0 %v19_v25  ;;  %v55_v26 = vld [vmem:[%s1409_s0 + $0x128] sm:$0xff]  ;;  %v93_v32 = vld [vmem:[%s1408_s1 + $0xd8] sm:$0xff]  ;;  %v76_v35 = vld [vmem:[%s1408_s1 + $0x50] sm:$0xff] }
   0x9   :  { %826 = vmatpush3.bf16.msra.mxu0 %v825_v13  ;;  %868 = vmatpush3.bf16.msra.mxu1 %v825_v13  ;;  %v75_v30 = vld [vmem:[%s1408_s1 + $0x48] sm:$0xff]  ;;  %v839_v34 = vpack.c.bf16 %v93_v32, %v92_v31  ;;  %v77_v36 = vld [vmem:[%s1408_s1 + $0x58] sm:$0xff]  ;;  %v94_v37 = vld [vmem:[%s1408_s1 + $0xe0] sm:$0xff] }
   0xa   :  { %828 = vmatprep.subr.bf16.mxu0 %v827_v14  ;;  %861 = vmatprep.subr.bf16.mxu1 %v827_v14  ;;  %v837_v33 = vpack.c.bf16 %v75_v30, %v74_v29  ;;  %v95_v38 = vld [vmem:[%s1408_s1 + $0xe8] sm:$0xff]  ;;  %v841_v39 = vpack.c.bf16 %v77_v36, %v76_v35  ;;  %v78_v41 = vld [vmem:[%s1408_s1 + $0x60] sm:$0xff]  ;;  %v96_v43 = vld [vmem:[%s1408_s1 + $0xf0] sm:$0xff] }
   0xb   :  { %282 = vmatprep.mubr.f32.mxu1 %v55_v26  ;;  %v843_v40 = vpack.c.bf16 %v95_v38, %v94_v37  ;;  %v79_v42 = vld [vmem:[%s1408_s1 + $0x68] sm:$0xff]  ;;  %v97_v44 = vld [vmem:[%s1408_s1 + $0xf8] sm:$0xff]  ;;  %v80_v47 = vld [vmem:[%s1408_s1 + $0x70] sm:$0xff] }
   0xc   :  { %v845_v45 = vpack.c.bf16 %v79_v42, %v78_v41  ;;  %v847_v46 = vpack.c.bf16 %v97_v44, %v96_v43  ;;  %v81_v48 = vld [vmem:[%s1408_s1 + $0x78] sm:$0xff]  ;;  %v98_v49 = vld [vmem:[%s1408_s1 + $0x100] sm:$0xff]  ;;  %v99_v50 = vld [vmem:[%s1408_s1 + $0x108] sm:$0xff] }
   0xd   :  { %830 = vmatpush3.bf16.msra.mxu0 %v829_v19  ;;  %869 = vmatpush3.bf16.msra.mxu1 %v829_v19  ;;  %v849_v51 = vpack.c.bf16 %v81_v48, %v80_v47  ;;  %v851_v52 = vpack.c.bf16 %v99_v50, %v98_v49  ;;  %v100_v53 = vld [vmem:[%s1408_s1 + $0x110] sm:$0xff]  ;;  %v101_v54 = vld [vmem:[%s1408_s1 + $0x118] sm:$0xff]  ;;  %v18_v55 = vld [vmem:[%s1409_s0] sm:$0xff] }
   0xe   :  { %832 = vmatprep.subr.bf16.mxu0 %v831_v20  ;;  %862 = vmatprep.subr.bf16.mxu1 %v831_v20  ;;  %v54_v56 = vld [vmem:[%s1409_s0 + $0x120] sm:$0xff]  ;;  %v855_v58 = vpack.c.bf16 %v101_v54, %v100_v53  ;;  %v21_v60 = vld [vmem:[%s1409_s0 + $0x18] sm:$0xff]  ;;  %v24_v0 = vld [vmem:[%s1409_s0 + $0x30] sm:$0xff] }
   0xf   :  { %v22_v57 = vld [vmem:[%s1409_s0 + $0x20] sm:$0xff]  ;;  %v57_v61 = vld [vmem:[%s1409_s0 + $0x138] sm:$0xff]  ;;  %v60_v1 = vld [vmem:[%s1409_s0 + $0x150] sm:$0xff] }
  0x10   :  { %v58_v59 = vld [vmem:[%s1409_s0 + $0x140] sm:$0xff]  ;;  %v25_v62 = vld [vmem:[%s1409_s0 + $0x38] sm:$0xff]  ;;  %v28_v2 = vld [vmem:[%s1409_s0 + $0x50] sm:$0xff] }
  0x11   :  { %834 = vmatpush3.bf16.msra.mxu0 %v833_v27  ;;  %870 = vmatpush3.bf16.msra.mxu1 %v833_v27  ;;  %v61_v63 = vld [vmem:[%s1409_s0 + $0x158] sm:$0xff]  ;;  %v64_v3 = vld [vmem:[%s1409_s0 + $0x170] sm:$0xff]  ;;  %v27_v4 = vld [vmem:[%s1409_s0 + $0x48] sm:$0xff] }
  0x12   :  { %836 = vmatprep.subr.bf16.mxu0 %v835_v28  ;;  %863 = vmatprep.subr.bf16.mxu1 %v835_v28  ;;  %v63_v5 = vld [vmem:[%s1409_s0 + $0x168] sm:$0xff]  ;;  %v20_v7 = vld [vmem:[%s1409_s0 + $0x10] sm:$0xff]  ;;  %v30_v8 = vld [vmem:[%s1409_s0 + $0x60] sm:$0xff] }
  0x13   :  { %v31_v6 = vld [vmem:[%s1409_s0 + $0x68] sm:$0xff]  ;;  %v34_v10 = vld [vmem:[%s1409_s0 + $0x80] sm:$0xff]  ;;  %v33_v12 = vld [vmem:[%s1409_s0 + $0x78] sm:$0xff] }
  0x14   :  { %v23_v9 = vld [vmem:[%s1409_s0 + $0x28] sm:$0xff]  ;;  %v26_v11 = vld [vmem:[%s1409_s0 + $0x40] sm:$0xff]  ;;  %v29_v13 = vld [vmem:[%s1409_s0 + $0x58] sm:$0xff] }
  0x15   :  { %838 = vmatpush3.bf16.msra.mxu0 %v837_v33  ;;  %871 = vmatpush3.bf16.msra.mxu1 %v837_v33  ;;  %v37_v14 = vld [vmem:[%s1409_s0 + $0x98] sm:$0xff]  ;;  %v32_v15 = vld [vmem:[%s1409_s0 + $0x70] sm:$0xff]  ;;  %v35_v17 = vld [vmem:[%s1409_s0 + $0x88] sm:$0xff] }
  0x16   :  { %840 = vmatprep.subr.bf16.mxu0 %v839_v34  ;;  %864 = vmatprep.subr.bf16.mxu1 %v839_v34  ;;  %v36_v16 = vld [vmem:[%s1409_s0 + $0x90] sm:$0xff]  ;;  %v38_v19 = vld [vmem:[%s1409_s0 + $0xa0] sm:$0xff]  ;;  %v39_v20 = vld [vmem:[%s1409_s0 + $0xa8] sm:$0xff] }
  0x17   :  { %v40_v18 = vld [vmem:[%s1409_s0 + $0xb0] sm:$0xff]  ;;  %v41_v21 = vld [vmem:[%s1409_s0 + $0xb8] sm:$0xff]  ;;  %v43_v22 = vld [vmem:[%s1409_s0 + $0xc8] sm:$0xff] }
  0x18   :  { %v44_v23 = vld [vmem:[%s1409_s0 + $0xd0] sm:$0xff]  ;;  %v42_v24 = vld [vmem:[%s1409_s0 + $0xc0] sm:$0xff]  ;;  %v47_v25 = vld [vmem:[%s1409_s0 + $0xe8] sm:$0xff] }
  0x19   :  { %842 = vmatpush3.bf16.msra.mxu0 %v841_v39  ;;  %872 = vmatpush3.bf16.msra.mxu1 %v841_v39  ;;  %v46_v26 = vld [vmem:[%s1409_s0 + $0xe0] sm:$0xff]  ;;  %v45_v28 = vld [vmem:[%s1409_s0 + $0xd8] sm:$0xff]  ;;  %v56_v31 = vld [vmem:[%s1409_s0 + $0x130] sm:$0xff] }
  0x1a   :  { %844 = vmatprep.subr.bf16.mxu0 %v843_v40  ;;  %865 = vmatprep.subr.bf16.mxu1 %v843_v40  ;;  %v50_v27 = vld [vmem:[%s1409_s0 + $0x100] sm:$0xff]  ;;  %v53_v29 = vld [vmem:[%s1409_s0 + $0x118] sm:$0xff]  ;;  %v48_v32 = vld [vmem:[%s1409_s0 + $0xf0] sm:$0xff] }
  0x1b   :  { %v49_v30 = vld [vmem:[%s1409_s0 + $0xf8] sm:$0xff]  ;;  %v59_v33 = vld [vmem:[%s1409_s0 + $0x148] sm:$0xff]  ;;  %v52_v34 = vld [vmem:[%s1409_s0 + $0x110] sm:$0xff] }
  0x1c   :  { %v62_v35 = vld [vmem:[%s1409_s0 + $0x160] sm:$0xff]  ;;  %v51_v36 = vld [vmem:[%s1409_s0 + $0x108] sm:$0xff]  ;;  %v65_v37 = vld [vmem:[%s1409_s0 + $0x178] sm:$0xff] }
  0x1d   :  { %846 = vmatpush3.bf16.msra.mxu0 %v845_v45  ;;  %873 = vmatpush3.bf16.msra.mxu1 %v845_v45 }
  0x1e   :  { %848 = vmatprep.subr.bf16.mxu0 %v847_v46  ;;  %866 = vmatprep.subr.bf16.mxu1 %v847_v46 }
  0x21   :  { %850 = vmatpush3.bf16.msra.mxu0 %v849_v51  ;;  %874 = vmatpush3.bf16.msra.mxu1 %v849_v51 }
  0x22   :  { %852 = vmatprep.subr.bf16.mxu1 %v851_v52 }
  0x24   :  { %223 = vmatmul.mubr.f32.vlgmr.msra.gmra.mrb[0].mxu0 %v18_v55  ;;  %283 = vmatmul.mubr.f32.vlgmr.msra.gmra.mrb[0].mxu1 %v54_v56 }
  0x25   :  { %854 = vmatpush3.bf16.msra.mxu1 %v851_v52  ;;  %227 = vmatprep.mubr.f32.mxu0 %v22_v57 }
  0x26   :  { %287 = vmatprep.mubr.f32.mxu1 %v58_v59  ;;  %856 = vmatprep.subr.bf16.mxu1 %v855_v58 }
  0x28   :  { %228 = vmatmul.mubr.f32.gmra.mrb[2].mxu0 %v21_v60  ;;  %288 = vmatmul.mubr.f32.gmra.mrb[2].mxu1 %v57_v61  ;;  %v1187_v60 = vld [vmem:[%s1410_s2] ss:$0 sm:$0xff] }
  0x29   :  { %232 = vmatprep.mubr.f32.mxu0 %v25_v62  ;;  %292 = vmatprep.mubr.f32.mxu1 %v61_v63 }
  0x2a   :  { %858 = vmatpush3.bf16.msra.mxu1 %v855_v58 }
  0x2c   :  { %233 = vmatmul.mubr.f32.gmra.mrb[4].mxu0 %v24_v0  ;;  %293 = vmatmul.mubr.f32.gmra.mrb[4].mxu1 %v60_v1 }
  0x2d   :  { %237 = vmatprep.mubr.f32.mxu0 %v28_v2  ;;  %297 = vmatprep.mubr.f32.mxu1 %v64_v3 }
  0x30   :  { %238 = vmatmul.mubr.f32.gmra.mrb[6].mxu0 %v27_v4  ;;  %298 = vmatmul.mubr.f32.gmra.mrb[6].mxu1 %v63_v5 }
  0x31   :  { %242 = vmatprep.mubr.f32.mxu0 %v31_v6  ;;  %795 = vmatprep.mubr.msk.f32.mxu1 %vm109_vm0, %v20_v7 }
  0x34   :  { %243 = vmatmul.mubr.f32.gmra.mrb[8].mxu0 %v30_v8  ;;  %796 = vmatmul.mubr.msk.f32.vlgmr.msra.gmra.mrb[8].mxu1 %vm109_vm0, %v23_v9 }
  0x35   :  { %247 = vmatprep.mubr.f32.mxu0 %v34_v10  ;;  %798 = vmatprep.mubr.msk.f32.mxu1 %vm109_vm0, %v26_v11 }
  0x38   :  { %248 = vmatmul.mubr.f32.gmra.mrb[10].mxu0 %v33_v12  ;;  %799 = vmatmul.mubr.msk.f32.gmra.mrb[10].mxu1 %vm109_vm0, %v29_v13 }
  0x39   :  { %252 = vmatprep.mubr.f32.mxu0 %v37_v14  ;;  %801 = vmatprep.mubr.msk.f32.mxu1 %vm109_vm0, %v32_v15 }
  0x3c   :  { %253 = vmatmul.mubr.f32.gmra.mrb[12].mxu0 %v36_v16  ;;  %802 = vmatmul.mubr.msk.f32.gmra.mrb[12].mxu1 %vm109_vm0, %v35_v17 }
  0x3d   :  { %257 = vmatprep.mubr.f32.mxu0 %v40_v18  ;;  %804 = vmatprep.mubr.msk.f32.mxu1 %vm109_vm0, %v38_v19 }
  0x40   :  { %258 = vmatmul.mubr.f32.gmra.mrb[14].mxu0 %v39_v20  ;;  %805 = vmatmul.mubr.msk.f32.gmra.mrb[14].mxu1 %vm109_vm0, %v41_v21 }
  0x41   :  { %262 = vmatprep.mubr.f32.mxu0 %v43_v22  ;;  %807 = vmatprep.mubr.msk.f32.mxu1 %vm109_vm0, %v44_v23 }
  0x44   :  { %263 = vmatmul.mubr.f32.gmra.mrb[16].mxu0 %v42_v24  ;;  %808 = vmatmul.mubr.msk.f32.gmra.mrb[16].mxu1 %vm109_vm0, %v47_v25 }
  0x45   :  { %267 = vmatprep.mubr.f32.mxu0 %v46_v26  ;;  %810 = vmatprep.mubr.msk.f32.mxu1 %vm109_vm0, %v50_v27 }
  0x48   :  { %268 = vmatmul.mubr.f32.gmra.mrb[18].mxu0 %v45_v28  ;;  %811 = vmatmul.mubr.msk.f32.gmra.mrb[18].mxu1 %vm109_vm0, %v53_v29 }
  0x49   :  { %272 = vmatprep.mubr.f32.mxu0 %v49_v30  ;;  %813 = vmatprep.mubr.msk.f32.mxu1 %vm109_vm0, %v56_v31 }
  0x4c   :  { %273 = vmatmul.mubr.f32.gmra.mrb[20].mxu0 %v48_v32  ;;  %814 = vmatmul.mubr.msk.f32.gmra.mrb[20].mxu1 %vm109_vm0, %v59_v33 }
  0x4d   :  { %277 = vmatprep.mubr.f32.mxu0 %v52_v34  ;;  %816 = vmatprep.mubr.msk.f32.mxu1 %vm109_vm0, %v62_v35 }
  0x50   :  { %278 = vmatmul.mubr.f32.gmra.mrb[22].mxu0 %v51_v36  ;;  %817 = vmatmul.mubr.msk.f32.gmra.mrb[22].mxu1 %vm109_vm0, %v65_v37 }
  0xf7   :  { %v719_v38 = vpop.f32.mrb[0].mxu0  ;;  %v755_v39 = vpop.f32.mrb[0].mxu1 }
  0xf8   :  { %v720_v40 = vpop.f32.mrb[1].mxu0  ;;  %v756_v41 = vpop.f32.mrb[1].mxu1 }
  0xf9   :  { %v721_v42 = vadd.f32 %v720_v40, %v719_v38  ;;  %v1178_v43 = vadd.f32 %v756_v41, %v755_v39 }
  0xfb   :  { %v722_v44 = vpop.f32.mrb[2].mxu0  ;;  %v758_v45 = vpop.f32.mrb[2].mxu1  ;;  %v225_v2 = vadd.f32 %v721_v42, %v1187_v60 }
  0xfc   :  { %v723_v46 = vpop.f32.mrb[3].mxu0  ;;  %v759_v47 = vpop.f32.mrb[3].mxu1 }
  0xfd   :  { %v724_v48 = vadd.f32 %v723_v46, %v722_v44  ;;  %v1180_v49 = vadd.f32 %v759_v47, %v758_v45 }
  0xff   :  { %v725_v50 = vpop.f32.mrb[4].mxu0  ;;  %v761_v51 = vpop.f32.mrb[4].mxu1  ;;  %v230_v63 = vadd.f32 %v724_v48, %v1187_v60 }
 0x100   :  { %v726_v52 = vpop.f32.mrb[5].mxu0  ;;  %v762_v53 = vpop.f32.mrb[5].mxu1 }
 0x101   :  { %v727_v54 = vadd.f32 %v726_v52, %v725_v50  ;;  %v1182_v55 = vadd.f32 %v762_v53, %v761_v51 }
 0x103   :  { %v728_v56 = vpop.f32.mrb[6].mxu0  ;;  %v764_v57 = vpop.f32.mrb[6].mxu1  ;;  %v235_v13 = vadd.f32 %v727_v54, %v1187_v60 }
 0x104   :  { %v729_v58 = vpop.f32.mrb[7].mxu0  ;;  %v765_v59 = vpop.f32.mrb[7].mxu1 }
 0x105   :  { %v730_v61 = vadd.f32 %v729_v58, %v728_v56  ;;  %v1189_v62 = vadd.f32 %v765_v59, %v764_v57 }
 0x107   :  { %v731_v0 = vpop.f32.mrb[8].mxu0  ;;  %v797_v1 = vpop.f32.mrb[8].mxu1  ;;  %v240_v9 = vadd.f32 %v730_v61, %v1187_v60 }
 0x108   :  { %v375_v3 = vadd.f32 %v797_v1, %v230_v63  ;;  %v732_v4 = vpop.f32.mrb[9].mxu0  ;;  %v369_v5 = vpop.f32.mrb[9].mxu1 }
 0x109   :  { %v733_v6 = vadd.f32 %v732_v4, %v731_v0  ;;  %v370_v7 = vadd.f32 %v369_v5, %v225_v2 }
 0x10a   :  { %v465_v8 = vmul.f32 0.2, %v375_v3  ;;  %vm449_vm1 = vcmp.ge.f32.partialorder %v375_v3, 0.0 }
 0x10b   :  { %v464_v10 = vmul.f32 0.2, %v370_v7  ;;  %v734_v11 = vpop.f32.mrb[10].mxu0  ;;  %v800_v12 = vpop.f32.mrb[10].mxu1  ;;  %vm448_vm3 = vcmp.ge.f32.partialorder %v370_v7, 0.0  ;;  %v245_v27 = vadd.f32 %v733_v6, %v1187_v60 }
 0x10c   :  { %v385_v14 = vadd.f32 %v800_v12, %v240_v9  ;;  %v735_v15 = vpop.f32.mrb[11].mxu0  ;;  %v379_v16 = vpop.f32.mrb[11].mxu1  ;;  %v481_v17 = vsel %vm449_vm1, %v375_v3, %v465_v8  ;;  %v285_v12 = vadd.f32 %v1178_v43, %v1187_v60  ;;  %v290_v43 = vadd.f32 %v1180_v49, %v1187_v60 }
 0x10d   :  { %v736_v18 = vadd.f32 %v735_v15, %v734_v11  ;;  %v380_v19 = vadd.f32 %v379_v16, %v235_v13  ;;  %v516_v20 = vsel %vm496_vm2, %v481_v17, 0.0  ;;  %498 = vst.msk [vmem:[%s1411_s3 + $0x8] sm:$0xff] %vm496_vm2, %v481_v17  ;;  %v480_v22 = vsel %vm448_vm3, %v370_v7, %v464_v10 }
 0x10e   :  { %v467_v21 = vmul.f32 0.2, %v385_v14  ;;  %517 = vadd.xlane.f32.xlu0 %v516_v20  ;;  %vm451_vm4 = vcmp.ge.f32.partialorder %v385_v14, 0.0  ;;  %v513_v28 = vsel %vm496_vm2, %v480_v22, 0.0  ;;  %497 = vst.msk [vmem:[%s1411_s3] sm:$0xff] %vm496_vm2, %v480_v22  ;;  %v595_v52 = vsel %vm496_vm2, %v480_v22, -inf }
 0x10f   :  { %v466_v23 = vmul.f32 0.2, %v380_v19  ;;  %v737_v24 = vpop.f32.mrb[12].mxu0  ;;  %v250_v25 = vadd.f32 %v736_v18, %v1187_v60  ;;  %v803_v26 = vpop.f32.mrb[12].mxu1  ;;  %v578_v32 = vadd.f32 %v516_v20, %v513_v28  ;;  %vm450_vm5 = vcmp.ge.f32.partialorder %v380_v19, 0.0 }
 0x110   :  { %v738_v29 = vpop.f32.mrb[13].mxu0  ;;  %v389_v30 = vpop.f32.mrb[13].mxu1  ;;  %v1207_v31 = vsel %vm451_vm4, %v385_v14, %v467_v21  ;;  %v596_v1 = vsel %vm496_vm2, %v481_v17, -inf }
 0x111   :  { %v395_v33 = vadd.f32 %v803_v26, %v250_v25  ;;  %v739_v34 = vadd.f32 %v738_v29, %v737_v24  ;;  %v390_v35 = vadd.f32 %v389_v30, %v245_v27  ;;  %v522_v36 = vsel %vm496_vm2, %v1207_v31, 0.0  ;;  %500 = vst.msk [vmem:[%s1411_s3 + $0x18] sm:$0xff] %vm496_vm2, %v1207_v31 }
 0x112   :  { %523 = vadd.xlane.f32.xlu1 %v522_v36  ;;  %514 = vadd.xlane.f32.xlu0 %v513_v28  ;;  %v482_v37 = vsel %vm450_vm5, %v380_v19, %v466_v23  ;;  %v598_v27 = vsel %vm496_vm2, %v1207_v31, -inf  ;;  %v300_v29 = vadd.f32 %v1189_v62, %v1187_v60  ;;  %v295_v30 = vadd.f32 %v1182_v55, %v1187_v60 }
 0x113   :  { %v469_v38 = vmul.f32 0.2, %v395_v33  ;;  %v468_v39 = vmul.f32 0.2, %v390_v35  ;;  %v740_v40 = vpop.f32.mrb[14].mxu0  ;;  %v806_v41 = vpop.f32.mrb[14].mxu1  ;;  %v255_v42 = vadd.f32 %v739_v34, %v1187_v60 }
 0x114   :  { %499 = vst.msk [vmem:[%s1411_s3 + $0x10] sm:$0xff] %vm496_vm2, %v482_v37  ;;  %v741_v44 = vpop.f32.mrb[15].mxu0  ;;  %v399_v45 = vpop.f32.mrb[15].mxu1  ;;  %v519_v46 = vsel %vm496_vm2, %v482_v37, 0.0  ;;  %vm452_vm6 = vcmp.ge.f32.partialorder %v390_v35, 0.0  ;;  %vm453_vm7 = vcmp.ge.f32.partialorder %v395_v33, 0.0 }
 0x115   :  { %v742_v47 = vadd.f32 %v741_v44, %v740_v40  ;;  %v400_v48 = vadd.f32 %v399_v45, %v255_v42  ;;  %v579_v50 = vadd.f32 %v578_v32, %v519_v46  ;;  %v484_v51 = vsel %vm452_vm6, %v390_v35, %v468_v39 }
 0x116   :  { %520 = vadd.xlane.f32.xlu1 %v519_v46  ;;  %501 = vst.msk [vmem:[%s1411_s3 + $0x20] sm:$0xff] %vm496_vm2, %v484_v51  ;;  %v525_v53 = vsel %vm496_vm2, %v484_v51, 0.0  ;;  %v599_v54 = vsel %vm496_vm2, %v484_v51, -inf  ;;  %v485_v56 = vsel %vm453_vm7, %v395_v33, %v469_v38  ;;  %v597_v10 = vsel %vm496_vm2, %v482_v37, -inf }
 0x117   :  { %v260_v57 = vadd.f32 %v742_v47, %v1187_v60  ;;  %v470_v58 = vmul.f32 0.2, %v400_v48  ;;  %v743_v59 = vpop.f32.mrb[16].mxu0  ;;  %v809_v61 = vpop.f32.mrb[16].mxu1  ;;  %v600_v63 = vmax.f32 %v595_v52, %v599_v54  ;;  %526 = vadd.xlane.f32.xlu0 %v525_v53  ;;  %v580_v0 = vadd.f32 %v579_v50, %v522_v36  ;;  %502 = vst.msk [vmem:[%s1411_s3 + $0x28] sm:$0xff] %vm496_vm2, %v485_v56 }
 0x118   :  { %v744_v2 = vpop.f32.mrb[17].mxu0  ;;  %v409_v3 = vpop.f32.mrb[17].mxu1  ;;  %v528_v4 = vsel %vm496_vm2, %v485_v56, 0.0  ;;  %v601_v5 = vsel %vm496_vm2, %v485_v56, -inf  ;;  %vm454_vm8 = vcmp.ge.f32.partialorder %v400_v48, 0.0 }
 0x119   :  { %v405_v6 = vadd.f32 %v806_v41, %v260_v57  ;;  %v581_v7 = vadd.f32 %v580_v0, %v525_v53  ;;  %v745_v8 = vadd.f32 %v744_v2, %v743_v59  ;;  %v602_v9 = vmax.f32 %v596_v1, %v601_v5 }
 0x11a   :  { %529 = vadd.xlane.f32.xlu1 %v528_v4  ;;  %v486_v11 = vsel %vm454_vm8, %v400_v48, %v470_v58 }
 0x11b   :  { %v265_v13 = vadd.f32 %v745_v8, %v1187_v60  ;;  %v582_v14 = vadd.f32 %v581_v7, %v528_v4  ;;  %v607_v15 = vmax.f32 %v600_v63, %v602_v9  ;;  %v746_v16 = vpop.f32.mrb[18].mxu0  ;;  %v1241_v17 = vpop.f32.mrb[18].mxu1  ;;  %503 = vst.msk [vmem:[%s1411_s3 + $0x30] sm:$0xff] %vm496_vm2, %v486_v11  ;;  %v531_v18 = vsel %vm496_vm2, %v486_v11, 0.0 }
 0x11c   :  { %v603_v19 = vsel %vm496_vm2, %v486_v11, -inf  ;;  %532 = vadd.xlane.f32.xlu0 %v531_v18  ;;  %v747_v20 = vpop.f32.mrb[19].mxu0  ;;  %v419_v21 = vpop.f32.mrb[19].mxu1  ;;  %vm455_vm9 = vcmp.ge.f32.partialorder %v405_v6, 0.0  ;;  %v471_v22 = vmul.f32 0.2, %v405_v6 }
 0x11d   :  { %v410_v23 = vadd.f32 %v409_v3, %v265_v13  ;;  %v604_v24 = vmax.f32 %v597_v10, %v603_v19  ;;  %v583_v25 = vadd.f32 %v582_v14, %v531_v18  ;;  %v748_v26 = vadd.f32 %v747_v20, %v746_v16 }
 0x11e   :  { %v487_v28 = vsel %vm455_vm9, %v405_v6, %v471_v22 }
 0x11f   :  { %v472_v32 = vmul.f32 0.2, %v410_v23  ;;  %v270_v33 = vadd.f32 %v748_v26, %v1187_v60  ;;  %v749_v49 = vpop.f32.mrb[20].mxu0  ;;  %v815_v34 = vpop.f32.mrb[20].mxu1  ;;  %504 = vst.msk [vmem:[%s1411_s3 + $0x38] sm:$0xff] %vm496_vm2, %v487_v28  ;;  %v534_v35 = vsel %vm496_vm2, %v487_v28, 0.0 }
 0x120   :  { %v605_v31 = vsel %vm496_vm2, %v487_v28, -inf  ;;  %v435_v36 = vadd.f32 %v815_v34, %v290_v43  ;;  %535 = vadd.xlane.f32.xlu1 %v534_v35  ;;  %v584_v62 = vadd.f32 %v583_v25, %v534_v35  ;;  %v750_v38 = vpop.f32.mrb[21].mxu0  ;;  %v429_v55 = vpop.f32.mrb[21].mxu1  ;;  %vm456_vm10 = vcmp.ge.f32.partialorder %v410_v23, 0.0 }
 0x121   :  { %v606_v37 = vmax.f32 %v598_v27, %v605_v31  ;;  %v415_v39 = vadd.f32 %v809_v61, %v270_v33  ;;  %v751_v40 = vadd.f32 %v750_v38, %v749_v49  ;;  %v430_v41 = vadd.f32 %v429_v55, %v285_v12 }
 0x122   :  { %v488_v42 = vsel %vm456_vm10, %v410_v23, %v472_v32  ;;  %v477_v44 = vmul.f32 0.2, %v435_v36  ;;  %v585_v46 = vrot.slane %v584_v62, 4  ;;  %vm461_vm11 = vcmp.ge.f32.partialorder %v435_v36, 0.0 }
 0x123   :  { %v608_v45 = vmax.f32 %v604_v24, %v606_v37  ;;  %505 = vst.msk [vmem:[%s1411_s3 + $0x40] sm:$0xff] %vm496_vm2, %v488_v42  ;;  %v537_v47 = vsel %vm496_vm2, %v488_v42, 0.0  ;;  %v275_v48 = vadd.f32 %v751_v40, %v1187_v60  ;;  %v476_v50 = vmul.f32 0.2, %v430_v41  ;;  %v752_v51 = vpop.f32.mrb[22].mxu0  ;;  %v818_v52 = vpop.f32.mrb[22].mxu1 }
 0x124   :  { %v632_v53 = vsel %vm496_vm2, %v488_v42, -inf  ;;  %538 = vadd.xlane.f32.xlu0 %v537_v47  ;;  %v586_v54 = vadd.f32 %v585_v46, %v584_v62  ;;  %v1271_v57 = vadd.f32 %v818_v52, %v300_v29  ;;  %v753_v58 = vpop.f32.mrb[23].mxu0  ;;  %v439_v59 = vpop.f32.mrb[23].mxu1  ;;  %v493_v61 = vsel %vm461_vm11, %v435_v36, %v477_v44 }
 0x125   :  { %v609_v56 = vmax.f32 %v607_v15, %v608_v45  ;;  %v420_v63 = vadd.f32 %v419_v21, %v275_v48  ;;  %v754_v0 = vadd.f32 %v753_v58, %v752_v51  ;;  %v440_v1 = vadd.f32 %v439_v59, %v295_v30  ;;  %510 = vst.msk [vmem:[%s1411_s3 + $0x68] sm:$0xff] %vm496_vm2, %v493_v61 }
 0x126   :  { %v1278_v2 = vsel %vm496_vm2, %v493_v61, 0.0  ;;  %v587_v3 = vrot.slane %v586_v54, 2  ;;  %v479_v5 = vmul.f32 0.2, %v1271_v57  ;;  %v638_v6 = vsel %vm496_vm2, %v493_v61, -inf }
 0x127   :  { %v610_v4 = vrot.slane %v609_v56, 4  ;;  %553 = vadd.xlane.f32.xlu1 %v1278_v2  ;;  %v280_v7 = vadd.f32 %v754_v0, %v1187_v60  ;;  %v478_v8 = vmul.f32 0.2, %v440_v1  ;;  %vm460_vm13 = vcmp.ge.f32.partialorder %v430_v41, 0.0 }
 0x128   :  { %vm457_vm14 = vcmp.ge.f32.partialorder %v415_v39, 0.0  ;;  %v588_v9 = vadd.f32 %v587_v3, %v586_v54  ;;  %v492_v11 = vsel %vm460_vm13, %v430_v41, %v476_v50  ;;  %v473_v12 = vmul.f32 0.2, %v415_v39 }
 0x129   :  { %v611_v10 = vmax.f32 %v609_v56, %v610_v4  ;;  %v425_v13 = vadd.f32 %v1241_v17, %v280_v7  ;;  %509 = vst.msk [vmem:[%s1411_s3 + $0x60] sm:$0xff] %vm496_vm2, %v492_v11  ;;  %v549_v14 = vsel %vm496_vm2, %v492_v11, 0.0  ;;  %v636_v15 = vsel %vm496_vm2, %v492_v11, -inf }
 0x12a   :  { %vm458_vm15 = vcmp.ge.f32.partialorder %v420_v63, 0.0  ;;  %v589_v60 = vrot.slane %v588_v9, 1  ;;  %v637_v18 = vmax.f32 %v632_v53, %v636_v15  ;;  %550 = vadd.xlane.f32.xlu0 %v549_v14  ;;  %v489_v19 = vsel %vm457_vm14, %v415_v39, %v473_v12 }
 0x12b   :  { %v612_v16 = vrot.slane %v611_v10, 2  ;;  %506 = vst.msk [vmem:[%s1411_s3 + $0x48] sm:$0xff] %vm496_vm2, %v489_v19  ;;  %v540_v17 = vsel %vm496_vm2, %v489_v19, 0.0  ;;  %v633_v20 = vsel %vm496_vm2, %v489_v19, -inf  ;;  %v474_v21 = vmul.f32 0.2, %v420_v63 }
 0x12c   :  { %vm459_vm0 = vcmp.ge.f32.partialorder %v425_v13, 0.0  ;;  %v590_v43 = vadd.f32 %v589_v60, %v588_v9  ;;  %v617_v23 = vadd.f32 %v540_v17, %v537_v47  ;;  %v639_v24 = vmax.f32 %v633_v20, %v638_v6  ;;  %541 = vadd.xlane.f32.xlu1 %v540_v17 }
 0x12d   :  { %v613_v22 = vmax.f32 %v611_v10, %v612_v16  ;;  %v490_v25 = vsel %vm458_vm15, %v420_v63, %v474_v21  ;;  %v475_v26 = vmul.f32 0.2, %v425_v13  ;;  %vm462_vm1 = vcmp.ge.f32.partialorder %v440_v1, 0.0 }
 0x12e   :  { %vm463_vm3 = vcmp.ge.f32.partialorder %v1271_v57, 0.0  ;;  %v592_v27 = vmul.f32 0.015625, %v590_v43  ;;  %v644_v29 = vmax.f32 %v637_v18, %v639_v24  ;;  %507 = vst.msk [vmem:[%s1411_s3 + $0x50] sm:$0xff] %vm496_vm2, %v490_v25  ;;  %v543_v30 = vsel %vm496_vm2, %v490_v25, 0.0 }
 0x12f   :  { %v614_v28 = vrot.slane %v613_v22, 1  ;;  %v618_v32 = vadd.f32 %v617_v23, %v543_v30  ;;  %v634_v33 = vsel %vm496_vm2, %v490_v25, -inf  ;;  %544 = vadd.xlane.f32.xlu0 %v543_v30  ;;  %v491_v49 = vsel %vm459_vm0, %v425_v13, %v475_v26 }
 0x130   :  { %v494_v34 = vsel %vm462_vm1, %v440_v1, %v478_v8  ;;  %594 = vst.msk [vmem:[%s1412_s5] sm:$0x1] %vm593_vm12, %v592_v27  ;;  %v546_v31 = vsel %vm496_vm2, %v491_v49, 0.0  ;;  %v635_v36 = vsel %vm496_vm2, %v491_v49, -inf  ;;  %v495_v38 = vsel %vm463_vm3, %v1271_v57, %v479_v5 }
 0x131   :  { %v615_v35 = vmax.f32 %v613_v22, %v614_v28  ;;  %508 = vst.msk [vmem:[%s1411_s3 + $0x58] sm:$0xff] %vm496_vm2, %v491_v49  ;;  %511 = vst.msk [vmem:[%s1411_s3 + $0x70] sm:$0xff] %vm496_vm2, %v494_v34  ;;  %v619_v37 = vadd.f32 %v618_v32, %v546_v31  ;;  %547 = vadd.xlane.f32.xlu1 %v546_v31  ;;  %v640_v62 = vsel %vm496_vm2, %v494_v34, -inf  ;;  %v555_v55 = vsel %vm496_vm2, %v494_v34, 0.0 }
 0x132   :  { %v641_v39 = vmax.f32 %v634_v33, %v640_v62  ;;  %512 = vst.msk [vmem:[%s1411_s3 + $0x78] sm:$0xff] %vm496_vm2, %v495_v38  ;;  %v642_v40 = vsel %vm496_vm2, %v495_v38, -inf  ;;  %v558_v44 = vsel %vm496_vm2, %v495_v38, 0.0  ;;  %vm561_vm2 = vcmask 7168  }
 0x133   :  { %616 = vst.msk [vmem:[%s1413_s6] sm:$0x1] %vm593_vm12, %v615_v35  ;;  %v620_v41 = vadd.f32 %v619_v37, %v549_v14  ;;  %556 = vadd.xlane.f32.xlu0 %v555_v55  ;;  %v643_v42 = vmax.f32 %v635_v36, %v642_v40 }
 0x135   :  { %v621_v45 = vadd.f32 %v620_v41, %v1278_v2  ;;  %v645_v46 = vmax.f32 %v641_v39, %v643_v42  ;;  %559 = vadd.xlane.f32.xlu1 %v558_v44 }
 0x137   :  { %v622_v47 = vadd.f32 %v621_v45, %v555_v55  ;;  %v646_v48 = vmax.f32 %v644_v29, %v645_v46 }
 0x139   :  { %v623_v50 = vadd.f32 %v622_v47, %v558_v44  ;;  %v647_v51 = vrot.slane %v646_v48, 4 }
 0x13b   :  { %v624_v52 = vrot.slane %v623_v50, 4  ;;  %v648_v53 = vmax.f32 %v646_v48, %v647_v51 }
 0x13d   :  { %v625_v54 = vadd.f32 %v624_v52, %v623_v50  ;;  %v649_v56 = vrot.slane %v648_v53, 2 }
 0x13f   :  { %v626_v57 = vrot.slane %v625_v54, 2  ;;  %v650_v58 = vmax.f32 %v648_v53, %v649_v56 }
 0x141   :  { %v627_v59 = vadd.f32 %v626_v57, %v625_v54  ;;  %v651_v61 = vrot.slane %v650_v58, 1 }
 0x143   :  { %v628_v63 = vrot.slane %v627_v59, 1  ;;  %v652_v0 = vmax.f32 %v650_v58, %v651_v61 }
 0x145   :  { %v629_v1 = vadd.f32 %v628_v63, %v627_v59  ;;  %653 = vst.msk [vmem:[%s1413_s6 + $0x1] sm:$0x1] %vm593_vm12, %v652_v0 }
 0x147   :  { %v630_v2 = vmul.f32 0.015625, %v629_v1 }
 0x149   :  { %631 = vst.msk [vmem:[%s1412_s5 + $0x1] sm:$0x1] %vm593_vm12, %v630_v2 }
 0x19b   :  { %v518_v3 = vpop.xlane.xlu0 %517 }
 0x19c   :  { %563 = vst.msk [vmem:[%s1414_s4 + $0x8] sm:$0xff] %vm561_vm2, %v518_v3 }
 0x19f   :  { %v524_v4 = vpop.xlane.xlu1 %523  ;;  %v515_v5 = vpop.xlane.xlu0 %514 }
 0x1a0   :  { %565 = vst.msk [vmem:[%s1414_s4 + $0x18] sm:$0xff] %vm561_vm2, %v524_v4  ;;  %562 = vst.msk [vmem:[%s1414_s4] sm:$0xff] %vm561_vm2, %v515_v5 }
 0x1a3   :  { %v521_v6 = vpop.xlane.xlu1 %520 }
 0x1a4   :  { %564 = vst.msk [vmem:[%s1414_s4 + $0x10] sm:$0xff] %vm561_vm2, %v521_v6  ;;  %v527_v7 = vpop.xlane.xlu0 %526 }
 0x1a5   :  { %566 = vst.msk [vmem:[%s1414_s4 + $0x20] sm:$0xff] %vm561_vm2, %v527_v7 }
 0x1a7   :  { %v530_v8 = vpop.xlane.xlu1 %529 }
 0x1a8   :  { %567 = vst.msk [vmem:[%s1414_s4 + $0x28] sm:$0xff] %vm561_vm2, %v530_v8 }
 0x1a9   :  { %v533_v9 = vpop.xlane.xlu0 %532 }
 0x1aa   :  { %568 = vst.msk [vmem:[%s1414_s4 + $0x30] sm:$0xff] %vm561_vm2, %v533_v9 }
 0x1ad   :  { %v536_v10 = vpop.xlane.xlu1 %535 }
 0x1ae   :  { %569 = vst.msk [vmem:[%s1414_s4 + $0x38] sm:$0xff] %vm561_vm2, %v536_v10 }
 0x1b1   :  { %v539_v11 = vpop.xlane.xlu0 %538 }
 0x1b2   :  { %570 = vst.msk [vmem:[%s1414_s4 + $0x40] sm:$0xff] %vm561_vm2, %v539_v11 }
 0x1b4   :  { %v554_v12 = vpop.xlane.xlu1 %553 }
 0x1b5   :  { %575 = vst.msk [vmem:[%s1414_s4 + $0x68] sm:$0xff] %vm561_vm2, %v554_v12 }
 0x1b7   :  { %v551_v13 = vpop.xlane.xlu0 %550 }
 0x1b8   :  { %574 = vst.msk [vmem:[%s1414_s4 + $0x60] sm:$0xff] %vm561_vm2, %v551_v13 }
 0x1b9   :  { %v542_v14 = vpop.xlane.xlu1 %541 }
 0x1ba   :  { %571 = vst.msk [vmem:[%s1414_s4 + $0x48] sm:$0xff] %vm561_vm2, %v542_v14 }
 0x1bc   :  { %v545_v15 = vpop.xlane.xlu0 %544 }
 0x1bd   :  { %572 = vst.msk [vmem:[%s1414_s4 + $0x50] sm:$0xff] %vm561_vm2, %v545_v15 }
 0x1be   :  { %v548_v60 = vpop.xlane.xlu1 %547 }
 0x1bf   :  { %573 = vst.msk [vmem:[%s1414_s4 + $0x58] sm:$0xff] %vm561_vm2, %v548_v60 }
 0x1c0   :  { %v557_v16 = vpop.xlane.xlu0 %556 }
 0x1c1   :  { %576 = vst.msk [vmem:[%s1414_s4 + $0x70] sm:$0xff] %vm561_vm2, %v557_v16 }
 0x1c2   :  { %v560_v18 = vpop.xlane.xlu1 %559 }
 0x1c3   :  { %577 = vst.msk [vmem:[%s1414_s4 + $0x78] sm:$0xff] %vm561_vm2, %v560_v18 }

// kernel: squeeze.22
= control target key start
LH: loop header
LB: loop body
LE: loop exit
PB: predicated region body
PF: predicated region fallthrough
CT: control target
= control target key end

     0   :  { %s207_s0 = inlined_call_operand.vmem [shape: f32[128], index: 0, kind: input, shape index: {}]   ;;  %s208_s1 = inlined_call_operand.hbm [shape: f32[2,8,8], index: 1, kind: output, shape index: {}]  }
   0x1   :  { %v5_v0 = vld [vmem:[%s207_s0] sm:$0x1] }
   0x2   :  { %6 = vst [vmem:[#allocation2] sm:$0x1] %v5_v0 }
   0x3   :  { %2 = vsyncpa [#allocation1], 0  ;;  %s150_s0 = smov 120   ;;  %s151_s8 = smov 104   ;;  %vm8_vm0 = vcmask 64512  }
   0x4   :  { %s152_s9 = smov 112   ;;  %s153_s10 = smov 96  }
   0x5   :  { %s154_s11 = smov 88   ;;  %s155_s12 = smov 80  }
   0x6   :  { %s156_s13 = smov 72   ;;  %s157_s14 = smov 64  }
   0x7   :  { %s158_s15 = smov 56   ;;  %s159_s16 = smov 48  }
   0x8   :  { %s160_s17 = smov 40   ;;  %s161_s18 = smov 32  }
   0x9   :  { %v10_v1 = vld [vmem:[#allocation2] sm:$0x1]   ;;  %s162_s19 = smov 24   ;;  %s163_s20 = smov 16  }
   0xa   :  { %v22_v2 = vld [vmem:[#allocation2] sm:$0x1]   ;;  %11 = vrot.lane.b32.xlu0 %v10_v1, %s150_s0  ;;  %s164_s21 = smov 8   ;;  %s165_s22 = smov [#allocation0]  }
   0xb   :  { %23 = vrot.lane.b32.xlu1 %v22_v2, %s151_s8  ;;  %v16_v3 = vld [vmem:[#allocation2] sm:$0x1]   ;;  %s104_s23 = sshll.u32 %s165_s22, 4  ;;  %s105_s23 = int_to_ptr.vmem [resolvable:$true] %s104_s23 }
   0xc   :  { %v28_v4 = vld [vmem:[#allocation2] sm:$0x1]   ;;  %s126_s24 = scalar_lea.vmem %s105_s23, 256  ;;  %p131_p1 = scmp.lt.s32.totalorder %s105_s23, %s105_s23 }
   0xd   :  { %v34_v5 = vld [vmem:[#allocation2] sm:$0x1]   ;;  %p127_p0 = scmp.ne.s32.totalorder %s105_s23, %s126_s24  ;;  %p132_p2 = scmp.lt.s32.totalorder %s126_s24, %s126_s24 }
   0xe   :  { %17 = vrot.lane.b32.xlu0 %v16_v3, %s152_s9  ;;  %v40_v6 = vld [vmem:[#allocation2] sm:$0x1]  }
   0xf   :  { %29 = vrot.lane.b32.xlu1 %v28_v4, %s153_s10  ;;  %v46_v7 = vld [vmem:[#allocation2] sm:$0x1]   ;;  %p133_p3 = por %p132_p2, %p131_p1 }
  0x10   :  { %v52_v8 = vld [vmem:[#allocation2] sm:$0x1]  }
  0x11   :  { %v58_v9 = vld [vmem:[#allocation2] sm:$0x1]   ;;  %p134_p4 = pnand %p133_p3, %p127_p0 }
  0x12   :  { %35 = vrot.lane.b32.xlu0 %v34_v5, %s154_s11  ;;  %v64_v10 = vld [vmem:[#allocation2] sm:$0x1]  }
  0x13   :  { %41 = vrot.lane.b32.xlu1 %v40_v6, %s155_s12  ;;  %v7_v11 = vld [vmem:[#allocation2] sm:$0x1]  }
  0x14   :  { %9 = vst.msk [vmem:[#allocation0] sm:$0x1] %vm8_vm0, %v7_v11   ;;  %v70_v12 = vld [vmem:[#allocation2] sm:$0x1]  }
  0x15   :  { %v76_v13 = vld [vmem:[#allocation2] sm:$0x1]  }
  0x16   :  { %47 = vrot.lane.b32.xlu0 %v46_v7, %s156_s13  ;;  %v82_v14 = vld [vmem:[#allocation2] sm:$0x1]  }
  0x17   :  { %53 = vrot.lane.b32.xlu1 %v52_v8, %s157_s14  ;;  %v88_v15 = vld [vmem:[#allocation2] sm:$0x1]  }
  0x18   :  { %v94_v16 = vld [vmem:[#allocation2] sm:$0x1]  }
  0x1a   :  { %59 = vrot.lane.b32.xlu0 %v58_v9, %s158_s15 }
  0x1b   :  { %65 = vrot.lane.b32.xlu1 %v64_v10, %s159_s16 }
  0x1e   :  { %71 = vrot.lane.b32.xlu0 %v70_v12, %s160_s17 }
  0x1f   :  { %77 = vrot.lane.b32.xlu1 %v76_v13, %s161_s18 }
  0x22   :  { %83 = vrot.lane.b32.xlu0 %v82_v14, %s162_s19 }
  0x23   :  { %89 = vrot.lane.b32.xlu1 %v88_v15, %s163_s20 }
  0x26   :  { %95 = vrot.lane.b32.xlu0 %v94_v16, %s164_s21 }
  0x7c   :  { %v12_v17 = vpop.permute.xlu0 %11  }
  0x7d   :  { %v24_v18 = vpop.permute.xlu1 %23   ;;  %15 = vst.msk [vmem:[#allocation0 + $0x1] sm:$0x1] %vm8_vm0, %v12_v17  }
  0x7e   :  { %27 = vst.msk [vmem:[#allocation0 + $0x3] sm:$0x1] %vm8_vm0, %v24_v18  }
  0x80   :  { %v18_v19 = vpop.permute.xlu0 %17  }
  0x81   :  { %v30_v20 = vpop.permute.xlu1 %29   ;;  %21 = vst.msk [vmem:[#allocation0 + $0x2] sm:$0x1] %vm8_vm0, %v18_v19  }
  0x82   :  { %33 = vst.msk [vmem:[#allocation0 + $0x4] sm:$0x1] %vm8_vm0, %v30_v20  }
  0x84   :  { %v36_v21 = vpop.permute.xlu0 %35  }
  0x85   :  { %v42_v22 = vpop.permute.xlu1 %41   ;;  %39 = vst.msk [vmem:[#allocation0 + $0x5] sm:$0x1] %vm8_vm0, %v36_v21  }
  0x86   :  { %45 = vst.msk [vmem:[#allocation0 + $0x6] sm:$0x1] %vm8_vm0, %v42_v22  }
  0x88   :  { %v48_v23 = vpop.permute.xlu0 %47  }
  0x89   :  { %v54_v24 = vpop.permute.xlu1 %53   ;;  %51 = vst.msk [vmem:[#allocation0 + $0x7] sm:$0x1] %vm8_vm0, %v48_v23  }
  0x8a   :  { %57 = vst.msk [vmem:[#allocation0 + $0x8] sm:$0x1] %vm8_vm0, %v54_v24  }
  0x8c   :  { %v60_v25 = vpop.permute.xlu0 %59  }
  0x8d   :  { %v66_v26 = vpop.permute.xlu1 %65   ;;  %63 = vst.msk [vmem:[#allocation0 + $0x9] sm:$0x1] %vm8_vm0, %v60_v25  }
  0x8e   :  { %69 = vst.msk [vmem:[#allocation0 + $0xa] sm:$0x1] %vm8_vm0, %v66_v26  }
  0x90   :  { %v72_v27 = vpop.permute.xlu0 %71  }
  0x91   :  { %v78_v28 = vpop.permute.xlu1 %77   ;;  %75 = vst.msk [vmem:[#allocation0 + $0xb] sm:$0x1] %vm8_vm0, %v72_v27  }
  0x92   :  { %81 = vst.msk [vmem:[#allocation0 + $0xc] sm:$0x1] %vm8_vm0, %v78_v28  }
  0x94   :  { %v84_v29 = vpop.permute.xlu0 %83  }
  0x95   :  { %v90_v30 = vpop.permute.xlu1 %89   ;;  %87 = vst.msk [vmem:[#allocation0 + $0xd] sm:$0x1] %vm8_vm0, %v84_v29  }
  0x96   :  { %93 = vst.msk [vmem:[#allocation0 + $0xe] sm:$0x1] %vm8_vm0, %v90_v30  }
  0x98   :  { %v96_v31 = vpop.permute.xlu0 %95  }
  0x99   :  { %99 = vst.msk [vmem:[#allocation0 + $0xf] sm:$0x1] %vm8_vm0, %v96_v31  }
  0x9a   :  { %137 = shalt.err (!%p134_p4)
}
  0x9b   :  { %s138_s27 = scalar_lea.hbm %s208_s1, 256 }
  0x9c   :  { %p139_p5 = scmp.ne.s32.totalorder %s208_s1, %s138_s27  ;;  %p142_p6 = scmp.lt.u32.totalorder %s138_s27, %s208_s1 }
  0x9e   :  { %p144_p7 = pnand %p142_p6, %p139_p5 }
  0xa0   :  { %147 = shalt.err (!%p144_p7)
}
  0xa1   :  { %107 = dma.vmem_to_hbm [thread:$0]  %s105_s23, 256, %s208_s1, [#allocation1]  }
  0xa2   :  { %148 = dma.done.wait [#allocation1], 256  }
  0xa3   :  { %149 = vsyncadd [#allocation1], 4294967040 }
  0xa4   :  { %109 = vsyncpa [#allocation1], 1 }

// kernel: discriminator_forward.11
= control target key start
LH: loop header
LB: loop body
LE: loop exit
PB: predicated region body
PF: predicated region fallthrough
CT: control target
= control target key end

     0   :  { %v911_v3 = vmov 0   ;;  %vm108_vm0 = vcmask 523264   ;;  %s1393_s4 = inlined_call_operand.vmem [shape: f32[64,64], index: 4, kind: input, shape index: {}]   ;;  %s1394_s3 = inlined_call_operand.vmem [shape: f32[64,64], index: 3, kind: input, shape index: {}]   ;;  %s1395_s6 = inlined_call_operand.<no memory space> [shape: f32[1,1], index: 6, kind: input, shape index: {}]   ;;  %s1396_s0 = inlined_call_operand.vmem [shape: f32[128,64], index: 0, kind: input, shape index: {}]   ;;  %s1397_s2 = inlined_call_operand.vmem [shape: f32[1,64], index: 2, kind: input, shape index: {}]   ;;  %s1398_s1 = inlined_call_operand.vmem [shape: f32[1,64], index: 1, kind: input, shape index: {}]   ;;  %s1399_s5 = inlined_call_operand.vmem [shape: f32[1,64], index: 5, kind: input, shape index: {}]   ;;  %s1400_s7 = inlined_call_operand.vmem [shape: f32[128,64], index: 7, kind: output, shape index: {0}]   ;;  %s1401_s8 = inlined_call_operand.vmem [shape: f32[128,1], index: 8, kind: output, shape index: {1}]  }
   0x1   :  { %v100_v0 = vld [vmem:[%s1393_s4] sm:$0xff]  ;;  %v101_v1 = vld [vmem:[%s1393_s4 + $0x8] sm:$0xff]  ;;  %910 = vset.pattern.permute.xlu0 %v911_v3  ;;  %v14_v4 = vstv %s1395_s6  ;;  %v102_v7 = vld [vmem:[%s1393_s4 + $0x10] sm:$0xff] }
   0x2   :  { %v92_v2 = vld [vmem:[%s1394_s3] sm:$0xff]  ;;  %v861_v5 = vpack.c.bf16 %v101_v1, %v100_v0  ;;  %v93_v6 = vld [vmem:[%s1394_s3 + $0x8] sm:$0xff]  ;;  %v103_v8 = vld [vmem:[%s1393_s4 + $0x18] sm:$0xff]  ;;  %15 = vst [vmem:[#allocation2] sm:$0x1] %v14_v4 }
   0x3   :  { %v877_v9 = vpack.c.bf16 %v93_v6, %v92_v2  ;;  %v865_v10 = vpack.c.bf16 %v103_v8, %v102_v7  ;;  %v94_v11 = vld [vmem:[%s1394_s3 + $0x10] sm:$0xff]  ;;  %v95_v12 = vld [vmem:[%s1394_s3 + $0x18] sm:$0xff]  ;;  %v104_v13 = vld [vmem:[%s1393_s4 + $0x20] sm:$0xff] }
   0x4   :  { %862 = vmatprep.subr.bf16.mxu1 %v861_v5  ;;  %v881_v14 = vpack.c.bf16 %v95_v12, %v94_v11  ;;  %v105_v15 = vld [vmem:[%s1393_s4 + $0x28] sm:$0xff]  ;;  %v96_v16 = vld [vmem:[%s1394_s3 + $0x20] sm:$0xff]  ;;  %v106_v22 = vld [vmem:[%s1393_s4 + $0x30] sm:$0xff] }
   0x5   :  { %v97_v17 = vld [vmem:[%s1394_s3 + $0x28] sm:$0xff]  ;;  %878 = vmatprep.subr.bf16.mxu0 %v877_v9  ;;  %864 = vmatpush3.bf16.msra.mxu1 %v861_v5  ;;  %v869_v18 = vpack.c.bf16 %v105_v15, %v104_v13  ;;  %v999_v19 = vld [vmem:[%s1396_s0] sm:$0xff]  ;;  %v107_v23 = vld [vmem:[%s1393_s4 + $0x38] sm:$0xff] }
   0x6   :  { %880 = vmatpush3.bf16.msra.mxu0 %v877_v9  ;;  %866 = vmatprep.subr.bf16.mxu1 %v865_v10  ;;  %v1004_v20 = vld [vmem:[%s1397_s2] ss:$0 sm:$0xff]  ;;  %v885_v21 = vpack.c.bf16 %v97_v17, %v96_v16  ;;  %v98_v26 = vld [vmem:[%s1394_s3 + $0x30] sm:$0xff]  ;;  %v99_v27 = vld [vmem:[%s1394_s3 + $0x38] sm:$0xff]  ;;  %v873_v29 = vpack.c.bf16 %v107_v23, %v106_v22 }
   0x7   :  { %882 = vmatprep.subr.bf16.mxu0 %v881_v14  ;;  %v76_v24 = vmul.f32 %v1004_v20, %v999_v19  ;;  %v1017_v25 = vld [vmem:[%s1398_s1] ss:$0 sm:$0xff]  ;;  %v889_v30 = vpack.c.bf16 %v99_v27, %v98_v26  ;;  %v1032_v31 = vld [vmem:[%s1396_s0 + $0x8] sm:$0xff]  ;;  %v1037_v33 = vld [vmem:[%s1396_s0 + $0x10] sm:$0xff] }
   0x8   :  { %v53_v28 = vmul.f32 %v1017_v25, %v999_v19  ;;  %v77_v34 = vmul.f32 %v1004_v20, %v1032_v31  ;;  %v54_v35 = vmul.f32 %v1017_v25, %v1032_v31  ;;  %v78_v36 = vmul.f32 %v1004_v20, %v1037_v33  ;;  %v1048_v37 = vld [vmem:[%s1396_s0 + $0x18] sm:$0xff]  ;;  %v1055_v39 = vld [vmem:[%s1396_s0 + $0x20] sm:$0xff]  ;;  %v1069_v43 = vld [vmem:[%s1396_s0 + $0x28] sm:$0xff] }
   0x9   :  { %868 = vmatpush3.bf16.msra.mxu1 %v865_v10  ;;  %797 = vmatprep.mubr.msk.f32.mxu1 %vm108_vm0, %v76_v24  ;;  %v732_v32 = vld [vmem:[#allocation2] ss:$0 sm:$0xff]  ;;  %v55_v38 = vmul.f32 %v1017_v25, %v1037_v33  ;;  %v79_v40 = vmul.f32 %v1004_v20, %v1048_v37  ;;  %v56_v41 = vmul.f32 %v1017_v25, %v1048_v37  ;;  %v1077_v45 = vld [vmem:[%s1396_s0 + $0x30] sm:$0xff]  ;;  %v1091_v49 = vld [vmem:[%s1396_s0 + $0x38] sm:$0xff] }
   0xa   :  { %884 = vmatpush3.bf16.msra.mxu0 %v881_v14  ;;  %870 = vmatprep.subr.bf16.mxu1 %v869_v18  ;;  %v80_v42 = vmul.f32 %v1004_v20, %v1055_v39  ;;  %v57_v44 = vmul.f32 %v1017_v25, %v1055_v39  ;;  %v81_v46 = vmul.f32 %v1004_v20, %v1069_v43  ;;  %v1099_v51 = vld [vmem:[%s1396_s0 + $0x40] sm:$0xff]  ;;  %v1113_v55 = vld [vmem:[%s1396_s0 + $0x48] sm:$0xff]  ;;  %v1121_v57 = vld [vmem:[%s1396_s0 + $0x50] sm:$0xff] }
   0xb   :  { %886 = vmatprep.subr.bf16.mxu0 %v885_v21  ;;  %837 = vmatprep.mubr.msk.f32.mxu0 %vm108_vm0, %v53_v28  ;;  %v58_v47 = vmul.f32 %v1017_v25, %v1069_v43  ;;  %v82_v48 = vmul.f32 %v1004_v20, %v1077_v45  ;;  %v59_v50 = vmul.f32 %v1017_v25, %v1077_v45  ;;  %v1135_v61 = vld [vmem:[%s1396_s0 + $0x58] sm:$0xff]  ;;  %v1143_v63 = vld [vmem:[%s1396_s0 + $0x60] sm:$0xff]  ;;  %v1157_v3 = vld [vmem:[%s1396_s0 + $0x68] sm:$0xff] }
   0xc   :  { %573 = vperm.xlu0 %910, %v732_v32   ;;  %v83_v52 = vmul.f32 %v1004_v20, %v1091_v49  ;;  %v60_v53 = vmul.f32 %v1017_v25, %v1091_v49  ;;  %v84_v54 = vmul.f32 %v1004_v20, %v1099_v51  ;;  %v61_v56 = vmul.f32 %v1017_v25, %v1099_v51  ;;  %v1165_v5 = vld [vmem:[%s1396_s0 + $0x70] sm:$0xff]  ;;  %v1179_v9 = vld [vmem:[%s1396_s0 + $0x78] sm:$0xff]  ;;  %v1197_v15 = vld [vmem:[%s1399_s5] ss:$0 sm:$0xff] }
   0xd   :  { %872 = vmatpush3.bf16.msra.mxu1 %v869_v18  ;;  %v85_v58 = vmul.f32 %v1004_v20, %v1113_v55  ;;  %v62_v59 = vmul.f32 %v1017_v25, %v1113_v55  ;;  %v86_v60 = vmul.f32 %v1004_v20, %v1121_v57  ;;  %v63_v62 = vmul.f32 %v1017_v25, %v1121_v57 }
   0xe   :  { %888 = vmatpush3.bf16.msra.mxu0 %v885_v21  ;;  %874 = vmatprep.subr.bf16.mxu1 %v873_v29  ;;  %v87_v0 = vmul.f32 %v1004_v20, %v1135_v61  ;;  %v64_v1 = vmul.f32 %v1017_v25, %v1135_v61  ;;  %v88_v2 = vmul.f32 %v1004_v20, %v1143_v63 }
   0xf   :  { %890 = vmatprep.subr.bf16.mxu0 %v889_v30  ;;  %v65_v4 = vmul.f32 %v1017_v25, %v1143_v63  ;;  %v89_v6 = vmul.f32 %v1004_v20, %v1157_v3  ;;  %v66_v7 = vmul.f32 %v1017_v25, %v1157_v3  ;;  %v90_v8 = vmul.f32 %v1004_v20, %v1165_v5 }
  0x10   :  { %v67_v10 = vmul.f32 %v1017_v25, %v1165_v5  ;;  %v91_v11 = vmul.f32 %v1004_v20, %v1179_v9  ;;  %v68_v12 = vmul.f32 %v1017_v25, %v1179_v9 }
  0x11   :  { %876 = vmatpush3.bf16.msra.mxu1 %v873_v29 }
  0x12   :  { %892 = vmatpush3.bf16.msra.mxu0 %v889_v30 }
  0x14   :  { %798 = vmatmul.mubr.msk.f32.vlgmr.msra.gmra.mrb[0].mxu1 %vm108_vm0, %v77_v34 }
  0x15   :  { %838 = vmatmul.mubr.msk.f32.vlgmr.msra.gmra.mrb[0].mxu0 %vm108_vm0, %v54_v35  ;;  %800 = vmatprep.mubr.msk.f32.mxu1 %vm108_vm0, %v78_v36 }
  0x16   :  { %840 = vmatprep.mubr.msk.f32.mxu0 %vm108_vm0, %v55_v38 }
  0x18   :  { %801 = vmatmul.mubr.msk.f32.gmra.mrb[2].mxu1 %vm108_vm0, %v79_v40 }
  0x19   :  { %841 = vmatmul.mubr.msk.f32.gmra.mrb[2].mxu0 %vm108_vm0, %v56_v41  ;;  %803 = vmatprep.mubr.msk.f32.mxu1 %vm108_vm0, %v80_v42 }
  0x1a   :  { %843 = vmatprep.mubr.msk.f32.mxu0 %vm108_vm0, %v57_v44 }
  0x1c   :  { %804 = vmatmul.mubr.msk.f32.gmra.mrb[4].mxu1 %vm108_vm0, %v81_v46 }
  0x1d   :  { %844 = vmatmul.mubr.msk.f32.gmra.mrb[4].mxu0 %vm108_vm0, %v58_v47  ;;  %806 = vmatprep.mubr.msk.f32.mxu1 %vm108_vm0, %v82_v48 }
  0x1e   :  { %846 = vmatprep.mubr.msk.f32.mxu0 %vm108_vm0, %v59_v50 }
  0x20   :  { %807 = vmatmul.mubr.msk.f32.gmra.mrb[6].mxu1 %vm108_vm0, %v83_v52 }
  0x21   :  { %847 = vmatmul.mubr.msk.f32.gmra.mrb[6].mxu0 %vm108_vm0, %v60_v53  ;;  %809 = vmatprep.mubr.msk.f32.mxu1 %vm108_vm0, %v84_v54 }
  0x22   :  { %849 = vmatprep.mubr.msk.f32.mxu0 %vm108_vm0, %v61_v56 }
  0x24   :  { %810 = vmatmul.mubr.msk.f32.gmra.mrb[8].mxu1 %vm108_vm0, %v85_v58 }
  0x25   :  { %850 = vmatmul.mubr.msk.f32.gmra.mrb[8].mxu0 %vm108_vm0, %v62_v59  ;;  %812 = vmatprep.mubr.msk.f32.mxu1 %vm108_vm0, %v86_v60 }
  0x26   :  { %852 = vmatprep.mubr.msk.f32.mxu0 %vm108_vm0, %v63_v62 }
  0x28   :  { %813 = vmatmul.mubr.msk.f32.gmra.mrb[10].mxu1 %vm108_vm0, %v87_v0 }
  0x29   :  { %853 = vmatmul.mubr.msk.f32.gmra.mrb[10].mxu0 %vm108_vm0, %v64_v1  ;;  %815 = vmatprep.mubr.msk.f32.mxu1 %vm108_vm0, %v88_v2 }
  0x2a   :  { %855 = vmatprep.mubr.msk.f32.mxu0 %vm108_vm0, %v65_v4 }
  0x2c   :  { %816 = vmatmul.mubr.msk.f32.gmra.mrb[12].mxu1 %vm108_vm0, %v89_v6 }
  0x2d   :  { %856 = vmatmul.mubr.msk.f32.gmra.mrb[12].mxu0 %vm108_vm0, %v66_v7  ;;  %818 = vmatprep.mubr.msk.f32.mxu1 %vm108_vm0, %v90_v8 }
  0x2e   :  { %858 = vmatprep.mubr.msk.f32.mxu0 %vm108_vm0, %v67_v10 }
  0x30   :  { %819 = vmatmul.mubr.msk.f32.gmra.mrb[14].mxu1 %vm108_vm0, %v91_v11 }
  0x31   :  { %859 = vmatmul.mubr.msk.f32.gmra.mrb[14].mxu0 %vm108_vm0, %v68_v12 }
  0x8b   :  { %v1201_v29 = vpop.permute.xlu0 %573 }
  0xe7   :  { %v799_v13 = vpop.f32.mrb[0].mxu1 }
  0xe8   :  { %v839_v14 = vpop.f32.mrb[0].mxu0  ;;  %v223_v16 = vpop.f32.mrb[1].mxu1 }
  0xe9   :  { %v422_v17 = vadd.f32 %v839_v14, %v799_v13  ;;  %v416_v18 = vpop.f32.mrb[1].mxu0 }
  0xea   :  { %v417_v20 = vadd.f32 %v416_v18, %v223_v16 }
  0xeb   :  { %v503_v21 = vadd.f32 %v1197_v15, %v422_v17  ;;  %v802_v22 = vpop.f32.mrb[2].mxu1 }
  0xec   :  { %v502_v23 = vadd.f32 %v1197_v15, %v417_v20  ;;  %v842_v24 = vpop.f32.mrb[2].mxu0  ;;  %v233_v25 = vpop.f32.mrb[3].mxu1 }
  0xed   :  { %v535_v26 = vmul.f32 0.2, %v503_v21  ;;  %v432_v27 = vadd.f32 %v842_v24, %v802_v22  ;;  %v426_v28 = vpop.f32.mrb[3].mxu0  ;;  %vm519_vm1 = vcmp.ge.f32.partialorder %v503_v21, 0.0 }
  0xee   :  { %vm518_vm2 = vcmp.ge.f32.partialorder %v502_v23, 0.0  ;;  %v534_v30 = vmul.f32 0.2, %v502_v23  ;;  %v427_v32 = vadd.f32 %v426_v28, %v233_v25 }
  0xef   :  { %v505_v34 = vadd.f32 %v1197_v15, %v432_v27  ;;  %v805_v35 = vpop.f32.mrb[4].mxu1  ;;  %v551_v36 = vsel %vm519_vm1, %v503_v21, %v535_v26 }
  0xf0   :  { %v504_v38 = vadd.f32 %v1197_v15, %v427_v32  ;;  %v845_v40 = vpop.f32.mrb[4].mxu0  ;;  %v243_v41 = vpop.f32.mrb[5].mxu1  ;;  %v577_v42 = vmul.f32 %v1201_v29, %v551_v36  ;;  %v550_v44 = vsel %vm518_vm2, %v502_v23, %v534_v30  ;;  %vm672_vm2 = vcmask 7168  }
  0xf1   :  { %vm521_vm3 = vcmp.ge.f32.partialorder %v505_v34, 0.0  ;;  %v537_v46 = vmul.f32 0.2, %v505_v34  ;;  %v442_v47 = vadd.f32 %v845_v40, %v805_v35  ;;  %v436_v48 = vpop.f32.mrb[5].mxu0  ;;  %v576_v50 = vmul.f32 %v1201_v29, %v550_v44 }
  0xf2   :  { %vm520_vm4 = vcmp.ge.f32.partialorder %v504_v38, 0.0  ;;  %v536_v52 = vmul.f32 0.2, %v504_v38  ;;  %v437_v53 = vadd.f32 %v436_v48, %v243_v41  ;;  %v593_v54 = vadd.f32 %v577_v42, %v1032_v31 }
  0xf3   :  { %v507_v56 = vadd.f32 %v1197_v15, %v442_v47  ;;  %v808_v58 = vpop.f32.mrb[6].mxu1  ;;  %v592_v59 = vadd.f32 %v576_v50, %v999_v19  ;;  %v553_v60 = vsel %vm521_vm3, %v505_v34, %v537_v46 }
  0xf4   :  { %v506_v62 = vadd.f32 %v1197_v15, %v437_v53  ;;  %v848_v0 = vpop.f32.mrb[6].mxu0  ;;  %v253_v1 = vpop.f32.mrb[7].mxu1  ;;  %v627_v2 = vsel %vm108_vm0, %v593_v54, 0.0  ;;  %609 = vst.msk [vmem:[%s1400_s7 + $0x8] sm:$0xff] %vm108_vm0, %v593_v54  ;;  %v579_v4 = vmul.f32 %v1201_v29, %v553_v60  ;;  %v552_v31 = vsel %vm520_vm4, %v504_v38, %v536_v52 }
  0xf5   :  { %vm523_vm5 = vcmp.ge.f32.partialorder %v507_v56, 0.0  ;;  %v539_v6 = vmul.f32 0.2, %v507_v56  ;;  %v452_v7 = vadd.f32 %v848_v0, %v808_v58  ;;  %628 = vadd.xlane.f32.xlu1 %v627_v2  ;;  %v446_v19 = vpop.f32.mrb[7].mxu0  ;;  %v624_v8 = vsel %vm108_vm0, %v592_v59, 0.0  ;;  %608 = vst.msk [vmem:[%s1400_s7] sm:$0xff] %vm108_vm0, %v592_v59 }
  0xf6   :  { %vm522_vm6 = vcmp.ge.f32.partialorder %v506_v62, 0.0  ;;  %v538_v10 = vmul.f32 0.2, %v506_v62  ;;  %v447_v11 = vadd.f32 %v446_v19, %v253_v1  ;;  %625 = vadd.xlane.f32.xlu0 %v624_v8  ;;  %v595_v12 = vadd.f32 %v579_v4, %v1048_v37 }
  0xf7   :  { %v509_v13 = vadd.f32 %v1197_v15, %v452_v7  ;;  %v811_v14 = vpop.f32.mrb[8].mxu1  ;;  %v578_v16 = vmul.f32 %v1201_v29, %v552_v31  ;;  %v555_v17 = vsel %vm523_vm5, %v507_v56, %v539_v6 }
  0xf8   :  { %v508_v18 = vadd.f32 %v1197_v15, %v447_v11  ;;  %v851_v20 = vpop.f32.mrb[8].mxu0  ;;  %v263_v21 = vpop.f32.mrb[9].mxu1  ;;  %v633_v22 = vsel %vm108_vm0, %v595_v12, 0.0  ;;  %611 = vst.msk [vmem:[%s1400_s7 + $0x18] sm:$0xff] %vm108_vm0, %v595_v12  ;;  %v581_v23 = vmul.f32 %v1201_v29, %v555_v17  ;;  %v554_v37 = vsel %vm522_vm6, %v506_v62, %v538_v10 }
  0xf9   :  { %vm525_vm7 = vcmp.ge.f32.partialorder %v509_v13, 0.0  ;;  %v541_v24 = vmul.f32 0.2, %v509_v13  ;;  %v462_v25 = vadd.f32 %v851_v20, %v811_v14  ;;  %634 = vadd.xlane.f32.xlu1 %v633_v22  ;;  %v456_v26 = vpop.f32.mrb[9].mxu0  ;;  %v594_v27 = vadd.f32 %v578_v16, %v1037_v33 }
  0xfa   :  { %vm524_vm8 = vcmp.ge.f32.partialorder %v508_v18, 0.0  ;;  %v540_v28 = vmul.f32 0.2, %v508_v18  ;;  %v457_v30 = vadd.f32 %v456_v26, %v263_v21  ;;  %v597_v32 = vadd.f32 %v581_v23, %v1069_v43 }
  0xfb   :  { %v511_v34 = vadd.f32 %v1197_v15, %v462_v25  ;;  %v814_v35 = vpop.f32.mrb[10].mxu1  ;;  %610 = vst.msk [vmem:[%s1400_s7 + $0x10] sm:$0xff] %vm108_vm0, %v594_v27  ;;  %v580_v36 = vmul.f32 %v1201_v29, %v554_v37  ;;  %v557_v38 = vsel %vm525_vm7, %v509_v13, %v541_v24  ;;  %v630_v42 = vsel %vm108_vm0, %v594_v27, 0.0 }
  0xfc   :  { %v510_v40 = vadd.f32 %v1197_v15, %v457_v30  ;;  %v854_v41 = vpop.f32.mrb[10].mxu0  ;;  %v273_v33 = vpop.f32.mrb[11].mxu1  ;;  %613 = vst.msk [vmem:[%s1400_s7 + $0x28] sm:$0xff] %vm108_vm0, %v597_v32  ;;  %v583_v43 = vmul.f32 %v1201_v29, %v557_v38  ;;  %v556_v44 = vsel %vm524_vm8, %v508_v18, %v540_v28  ;;  %v639_v1 = vsel %vm108_vm0, %v597_v32, 0.0 }
  0xfd   :  { %vm527_vm9 = vcmp.ge.f32.partialorder %v511_v34, 0.0  ;;  %v543_v46 = vmul.f32 0.2, %v511_v34  ;;  %v472_v47 = vadd.f32 %v854_v41, %v814_v35  ;;  %v466_v48 = vpop.f32.mrb[11].mxu0  ;;  %631 = vadd.xlane.f32.xlu1 %v630_v42  ;;  %v596_v50 = vadd.f32 %v580_v36, %v1055_v39 }
  0xfe   :  { %vm526_vm10 = vcmp.ge.f32.partialorder %v510_v40, 0.0  ;;  %v542_v52 = vmul.f32 0.2, %v510_v40  ;;  %v467_v53 = vadd.f32 %v466_v48, %v273_v33  ;;  %v599_v54 = vadd.f32 %v583_v43, %v1091_v49 }
  0xff   :  { %v513_v56 = vadd.f32 %v1197_v15, %v472_v47  ;;  %v817_v58 = vpop.f32.mrb[12].mxu1  ;;  %612 = vst.msk [vmem:[%s1400_s7 + $0x20] sm:$0xff] %vm108_vm0, %v596_v50  ;;  %v582_v59 = vmul.f32 %v1201_v29, %v556_v44  ;;  %v559_v60 = vsel %vm527_vm9, %v511_v34, %v543_v46  ;;  %v636_v18 = vsel %vm108_vm0, %v596_v50, 0.0 }
 0x100   :  { %v512_v62 = vadd.f32 %v1197_v15, %v467_v53  ;;  %v857_v0 = vpop.f32.mrb[12].mxu0  ;;  %v283_v39 = vpop.f32.mrb[13].mxu1  ;;  %615 = vst.msk [vmem:[%s1400_s7 + $0x38] sm:$0xff] %vm108_vm0, %v599_v54  ;;  %v585_v49 = vmul.f32 %v1201_v29, %v559_v60  ;;  %v558_v2 = vsel %vm526_vm10, %v510_v40, %v542_v52  ;;  %v645_v35 = vsel %vm108_vm0, %v599_v54, 0.0 }
 0x101   :  { %vm529_vm11 = vcmp.ge.f32.partialorder %v513_v56, 0.0  ;;  %v545_v4 = vmul.f32 0.2, %v513_v56  ;;  %v482_v31 = vadd.f32 %v857_v0, %v817_v58  ;;  %v476_v6 = vpop.f32.mrb[13].mxu0  ;;  %640 = vadd.xlane.f32.xlu1 %v639_v1  ;;  %v598_v7 = vadd.f32 %v582_v59, %v1077_v45 }
 0x102   :  { %vm528_vm12 = vcmp.ge.f32.partialorder %v512_v62, 0.0  ;;  %v544_v19 = vmul.f32 0.2, %v512_v62  ;;  %v477_v8 = vadd.f32 %v476_v6, %v283_v39  ;;  %v601_v10 = vadd.f32 %v585_v49, %v1113_v55 }
 0x103   :  { %v515_v11 = vadd.f32 %v1197_v15, %v482_v31  ;;  %v820_v12 = vpop.f32.mrb[14].mxu1  ;;  %614 = vst.msk [vmem:[%s1400_s7 + $0x30] sm:$0xff] %vm108_vm0, %v598_v7  ;;  %v584_v13 = vmul.f32 %v1201_v29, %v558_v2  ;;  %v561_v14 = vsel %vm529_vm11, %v513_v56, %v545_v4  ;;  %v642_v42 = vsel %vm108_vm0, %v598_v7, 0.0 }
 0x104   :  { %v514_v16 = vadd.f32 %v1197_v15, %v477_v8  ;;  %v860_v17 = vpop.f32.mrb[14].mxu0  ;;  %v293_v45 = vpop.f32.mrb[15].mxu1  ;;  %v560_v20 = vsel %vm528_vm12, %v512_v62, %v544_v19  ;;  %617 = vst.msk [vmem:[%s1400_s7 + $0x48] sm:$0xff] %vm108_vm0, %v601_v10  ;;  %v587_v55 = vmul.f32 %v1201_v29, %v561_v14  ;;  %v651_v48 = vsel %vm108_vm0, %v601_v10, 0.0 }
 0x105   :  { %vm531_vm13 = vcmp.ge.f32.partialorder %v515_v11, 0.0  ;;  %v547_v21 = vmul.f32 0.2, %v515_v11  ;;  %v492_v22 = vadd.f32 %v860_v17, %v820_v12  ;;  %v486_v23 = vpop.f32.mrb[15].mxu0  ;;  %637 = vadd.xlane.f32.xlu1 %v636_v18  ;;  %v586_v37 = vmul.f32 %v1201_v29, %v560_v20 }
 0x106   :  { %vm530_vm14 = vcmp.ge.f32.partialorder %v514_v16, 0.0  ;;  %v546_v24 = vmul.f32 0.2, %v514_v16  ;;  %v487_v25 = vadd.f32 %v486_v23, %v293_v45  ;;  %v600_v26 = vadd.f32 %v584_v13, %v1099_v51 }
 0x107   :  { %v517_v27 = vadd.f32 %v1197_v15, %v492_v22  ;;  %v602_v28 = vadd.f32 %v586_v37, %v1121_v57  ;;  %v603_v30 = vadd.f32 %v587_v55, %v1135_v61  ;;  %v563_v32 = vsel %vm531_vm13, %v515_v11, %v547_v21 }
 0x108   :  { %v516_v34 = vadd.f32 %v1197_v15, %v487_v25  ;;  %v562_v36 = vsel %vm530_vm14, %v514_v16, %v546_v24  ;;  %616 = vst.msk [vmem:[%s1400_s7 + $0x40] sm:$0xff] %vm108_vm0, %v600_v26  ;;  %v589_v38 = vmul.f32 %v1201_v29, %v563_v32 }
 0x109   :  { %vm533_vm15 = vcmp.ge.f32.partialorder %v517_v27, 0.0  ;;  %v549_v51 = vmul.f32 0.2, %v517_v27  ;;  %646 = vadd.xlane.f32.xlu1 %v645_v35  ;;  %618 = vst.msk [vmem:[%s1400_s7 + $0x50] sm:$0xff] %vm108_vm0, %v602_v28  ;;  %v654_v57 = vsel %vm108_vm0, %v602_v28, 0.0  ;;  %v588_v61 = vmul.f32 %v1201_v29, %v562_v36  ;;  %619 = vst.msk [vmem:[%s1400_s7 + $0x58] sm:$0xff] %vm108_vm0, %v603_v30 }
 0x10a   :  { %vm532_vm1 = vcmp.ge.f32.partialorder %v516_v34, 0.0  ;;  %v548_v15 = vmul.f32 0.2, %v516_v34  ;;  %655 = vadd.xlane.f32.xlu0 %v654_v57  ;;  %v605_v40 = vadd.f32 %v589_v38, %v1157_v3 }
 0x10b   :  { %v604_v41 = vadd.f32 %v588_v61, %v1143_v63  ;;  %v565_v33 = vsel %vm533_vm15, %v517_v27, %v549_v51 }
 0x10c   :  { %v564_v43 = vsel %vm532_vm1, %v516_v34, %v548_v15  ;;  %621 = vst.msk [vmem:[%s1400_s7 + $0x68] sm:$0xff] %vm108_vm0, %v605_v40  ;;  %v591_v44 = vmul.f32 %v1201_v29, %v565_v33  ;;  %v663_v50 = vsel %vm108_vm0, %v605_v40, 0.0 }
 0x10d   :  { %643 = vadd.xlane.f32.xlu1 %v642_v42  ;;  %620 = vst.msk [vmem:[%s1400_s7 + $0x60] sm:$0xff] %vm108_vm0, %v604_v41  ;;  %v660_v3 = vsel %vm108_vm0, %v604_v41, 0.0  ;;  %v590_v63 = vmul.f32 %v1201_v29, %v564_v43 }
 0x10e   :  { %661 = vadd.xlane.f32.xlu0 %v660_v3  ;;  %v607_v46 = vadd.f32 %v591_v44, %v1179_v9  ;;  %v648_v9 = vsel %vm108_vm0, %v600_v26, 0.0 }
 0x10f   :  { %v606_v47 = vadd.f32 %v590_v63, %v1165_v5  ;;  %v657_v5 = vsel %vm108_vm0, %v603_v30, 0.0 }
 0x110   :  { %623 = vst.msk [vmem:[%s1400_s7 + $0x78] sm:$0xff] %vm108_vm0, %v607_v46  ;;  %v669_v52 = vsel %vm108_vm0, %v607_v46, 0.0 }
 0x111   :  { %652 = vadd.xlane.f32.xlu1 %v651_v48  ;;  %622 = vst.msk [vmem:[%s1400_s7 + $0x70] sm:$0xff] %vm108_vm0, %v606_v47  ;;  %v666_v29 = vsel %vm108_vm0, %v606_v47, 0.0 }
 0x112   :  { %667 = vadd.xlane.f32.xlu0 %v666_v29 }
 0x115   :  { %649 = vadd.xlane.f32.xlu1 %v648_v9 }
 0x119   :  { %658 = vadd.xlane.f32.xlu1 %v657_v5 }
 0x11d   :  { %664 = vadd.xlane.f32.xlu1 %v663_v50 }
 0x121   :  { %670 = vadd.xlane.f32.xlu1 %v669_v52 }
 0x182   :  { %v629_v53 = vpop.xlane.xlu1 %628 }
 0x183   :  { %674 = vst.msk [vmem:[%s1401_s8 + $0x8] sm:$0xff] %vm672_vm2, %v629_v53  ;;  %v626_v54 = vpop.xlane.xlu0 %625 }
 0x184   :  { %673 = vst.msk [vmem:[%s1401_s8] sm:$0xff] %vm672_vm2, %v626_v54 }
 0x186   :  { %v635_v56 = vpop.xlane.xlu1 %634 }
 0x187   :  { %676 = vst.msk [vmem:[%s1401_s8 + $0x18] sm:$0xff] %vm672_vm2, %v635_v56 }
 0x18a   :  { %v632_v58 = vpop.xlane.xlu1 %631 }
 0x18b   :  { %675 = vst.msk [vmem:[%s1401_s8 + $0x10] sm:$0xff] %vm672_vm2, %v632_v58 }
 0x18e   :  { %v641_v59 = vpop.xlane.xlu1 %640 }
 0x18f   :  { %678 = vst.msk [vmem:[%s1401_s8 + $0x28] sm:$0xff] %vm672_vm2, %v641_v59 }
 0x192   :  { %v638_v60 = vpop.xlane.xlu1 %637 }
 0x193   :  { %677 = vst.msk [vmem:[%s1401_s8 + $0x20] sm:$0xff] %vm672_vm2, %v638_v60 }
 0x196   :  { %v647_v62 = vpop.xlane.xlu1 %646 }
 0x197   :  { %680 = vst.msk [vmem:[%s1401_s8 + $0x38] sm:$0xff] %vm672_vm2, %v647_v62  ;;  %v656_v0 = vpop.xlane.xlu0 %655 }
 0x198   :  { %683 = vst.msk [vmem:[%s1401_s8 + $0x50] sm:$0xff] %vm672_vm2, %v656_v0 }
 0x19a   :  { %v644_v39 = vpop.xlane.xlu1 %643 }
 0x19b   :  { %679 = vst.msk [vmem:[%s1401_s8 + $0x30] sm:$0xff] %vm672_vm2, %v644_v39  ;;  %v662_v1 = vpop.xlane.xlu0 %661 }
 0x19c   :  { %685 = vst.msk [vmem:[%s1401_s8 + $0x60] sm:$0xff] %vm672_vm2, %v662_v1 }
 0x19e   :  { %v653_v49 = vpop.xlane.xlu1 %652 }
 0x19f   :  { %682 = vst.msk [vmem:[%s1401_s8 + $0x48] sm:$0xff] %vm672_vm2, %v653_v49  ;;  %v668_v2 = vpop.xlane.xlu0 %667 }
 0x1a0   :  { %687 = vst.msk [vmem:[%s1401_s8 + $0x70] sm:$0xff] %vm672_vm2, %v668_v2 }
 0x1a2   :  { %v650_v4 = vpop.xlane.xlu1 %649 }
 0x1a3   :  { %681 = vst.msk [vmem:[%s1401_s8 + $0x40] sm:$0xff] %vm672_vm2, %v650_v4 }
 0x1a6   :  { %v659_v31 = vpop.xlane.xlu1 %658 }
 0x1a7   :  { %684 = vst.msk [vmem:[%s1401_s8 + $0x58] sm:$0xff] %vm672_vm2, %v659_v31 }
 0x1aa   :  { %v665_v6 = vpop.xlane.xlu1 %664 }
 0x1ab   :  { %686 = vst.msk [vmem:[%s1401_s8 + $0x68] sm:$0xff] %vm672_vm2, %v665_v6 }
 0x1ae   :  { %v671_v7 = vpop.xlane.xlu1 %670 }
 0x1af   :  { %688 = vst.msk [vmem:[%s1401_s8 + $0x78] sm:$0xff] %vm672_vm2, %v671_v7 }

// kernel: discriminator_forward.12
= control target key start
LH: loop header
LB: loop body
LE: loop exit
PB: predicated region body
PF: predicated region fallthrough
CT: control target
= control target key end

     0   :  { %s2218_s17 = smov 0   ;;  %s2661_s0 = inlined_call_operand.vmem [shape: f32[128,64], index: 0, kind: input, shape index: {}]   ;;  %s2662_s1 = inlined_call_operand.vmem [shape: f32[4,1,64], index: 1, kind: input, shape index: {}]   ;;  %s2663_s2 = inlined_call_operand.vmem [shape: f32[4,1,64], index: 2, kind: input, shape index: {}]   ;;  %s2664_s3 = inlined_call_operand.vmem [shape: f32[64,64], index: 3, kind: input, shape index: {}]   ;;  %s2665_s4 = inlined_call_operand.vmem [shape: f32[1,64], index: 4, kind: input, shape index: {}]   ;;  %s2666_s5 = inlined_call_operand.vmem [shape: f32[64,64], index: 5, kind: input, shape index: {}]   ;;  %s2667_s6 = inlined_call_operand.vmem [shape: f32[1,64], index: 6, kind: input, shape index: {}]   ;;  %s2668_s7 = inlined_call_operand.vmem [shape: f32[4,64,64], index: 7, kind: input, shape index: {}]   ;;  %s2669_s8 = inlined_call_operand.vmem [shape: f32[4,64,64], index: 8, kind: input, shape index: {}]   ;;  %s2670_s9 = inlined_call_operand.vmem [shape: f32[4,1,64], index: 9, kind: input, shape index: {}]   ;;  %s2671_s10 = inlined_call_operand.vmem [shape: f32[4,128,64], index: 10, kind: output, shape index: {0}]   ;;  %s2672_s11 = inlined_call_operand.vmem [shape: f32[4,128,1], index: 11, kind: output, shape index: {1}]  }
   0x1 LB: > { %s1718_s18 = sadd.s32 4294967295, %s2156_s17   ;;  %p1722_p0 = scmp.ge.s32.totalorder %s2156_s17, 1  ;;  %s2156_s17 = sphi %s2218_s17, %s22_s17  }
   0x2   : > { %p374_p1 = scmp.lt.s32.totalorder %s2156_s17, 5 }
   0x4   : > { %p375_p2 = pnand %p1722_p0, %p374_p1 }
   0x5   : > { %v524_v0 = vld [vmem:[%s2664_s3] sm:$0xff] (!%p375_p2)  ;;  %v525_v1 = vld [vmem:[%s2664_s3 + $0x8] sm:$0xff] (!%p375_p2)  ;;  %v526_v2 = vld [vmem:[%s2664_s3 + $0x10] sm:$0xff] (!%p375_p2)  ;;  %p433_p3 = scmp.lt.s32.totalorder (!%p375_p2), %s1718_s18, 3  ;;  %vm539_vm0 = vcmask (!%p375_p2), 523264  }
   0x6   : > { %378 = sbr.rel (%p375_p2) target bundleno = 700 (0x2bc), region = 60  ;;  %v2062_v3 = vpack.c.bf16 (!%p375_p2), %v525_v1, %v524_v0  ;;  %v527_v4 = vld [vmem:[%s2664_s3 + $0x18] sm:$0xff] (!%p375_p2)  ;;  %v528_v6 = vld [vmem:[%s2664_s3 + $0x20] sm:$0xff] (!%p375_p2)  ;;  %v529_v7 = vld [vmem:[%s2664_s3 + $0x28] sm:$0xff] (!%p375_p2) }
   0x7   : > { %v2066_v5 = vpack.c.bf16 (!%p375_p2), %v527_v4, %v526_v2  ;;  %v2249_v8 = vld [vmem:[%s2661_s0] sm:$0xff] (!%p375_p2)  ;;  %v2070_v9 = vpack.c.bf16 (!%p375_p2), %v529_v7, %v528_v6  ;;  %v530_v11 = vld [vmem:[%s2664_s3 + $0x30] sm:$0xff] (!%p375_p2)  ;;  %v531_v12 = vld [vmem:[%s2664_s3 + $0x38] sm:$0xff] (!%p375_p2) }
   0x8   : > { %2063 = vmatprep.subr.bf16.mxu1 (!%p375_p2), %v2062_v3  ;;  %v2074_v14 = vpack.c.bf16 (!%p375_p2), %v531_v12, %v530_v11  ;;  %v781_v15 = vld [vmem:[%s2666_s5] sm:$0xff] (!%p375_p2)  ;;  %v782_v16 = vld [vmem:[%s2666_s5 + $0x8] sm:$0xff] (!%p375_p2)  ;;  %v2280_v19 = vld [vmem:[%s2661_s0 + $0x10] sm:$0xff] (!%p375_p2) }
   0x9   : > { %2065 = vmatpush3.bf16.msra.mxu1 (!%p375_p2), %v2062_v3  ;;  %v2275_v17 = vld [vmem:[%s2661_s0 + $0x8] sm:$0xff] (!%p375_p2)  ;;  %v2078_v18 = vpack.c.bf16 (!%p375_p2), %v782_v16, %v781_v15  ;;  %v783_v20 = vld [vmem:[%s2666_s5 + $0x10] sm:$0xff] (!%p375_p2)  ;;  %v784_v21 = vld [vmem:[%s2666_s5 + $0x18] sm:$0xff] (!%p375_p2) }
   0xa   : > { %2067 = vmatprep.subr.bf16.mxu1 (!%p375_p2), %v2066_v5  ;;  %v2295_v24 = vld [vmem:[%s2661_s0 + $0x18] sm:$0xff] (!%p375_p2)  ;;  %v2300_v25 = vld [vmem:[%s2661_s0 + $0x20] sm:$0xff] (!%p375_p2)  ;;  %v2082_v26 = vpack.c.bf16 (!%p375_p2), %v784_v21, %v783_v20  ;;  %v786_v28 = vld [vmem:[%s2666_s5 + $0x28] sm:$0xff] (!%p375_p2) }
   0xb   : > { %v785_v27 = vld [vmem:[%s2666_s5 + $0x20] sm:$0xff] (!%p375_p2)  ;;  %v467_v31 = vld [vmem:[%s2661_s0 + $0x28] sm:$0xff] (!%p375_p2)  ;;  %v468_v32 = vld [vmem:[%s2661_s0 + $0x30] sm:$0xff] (!%p375_p2) }
   0xc   : > { %v2086_v33 = vpack.c.bf16 (!%p375_p2), %v786_v28, %v785_v27  ;;  %v787_v34 = vld [vmem:[%s2666_s5 + $0x30] sm:$0xff] (!%p375_p2)  ;;  %v788_v35 = vld [vmem:[%s2666_s5 + $0x38] sm:$0xff] (!%p375_p2)  ;;  %v470_v39 = vld [vmem:[%s2661_s0 + $0x40] sm:$0xff] (!%p375_p2) }
   0xd   : > { %s2674_s18 = smov (!%p433_p3, %s1718_s18), 3  ;;  %2069 = vmatpush3.bf16.msra.mxu1 %v2066_v5  ;;  %v469_v38 = vld [vmem:[%s2661_s0 + $0x38] sm:$0xff]  ;;  %v2090_v40 = vpack.c.bf16 %v788_v35, %v787_v34  ;;  %v471_v43 = vld [vmem:[%s2661_s0 + $0x48] sm:$0xff]  ;;  %v472_v44 = vld [vmem:[%s2661_s0 + $0x50] sm:$0xff] }
   0xe   : > { %s435_s16 = scalar_lea.vmem %s2662_s1, %s2674_s18  ;;  %2071 = vmatprep.subr.bf16.mxu1 %v2070_v9  ;;  %v473_v47 = vld [vmem:[%s2661_s0 + $0x58] sm:$0xff]  ;;  %v474_v48 = vld [vmem:[%s2661_s0 + $0x60] sm:$0xff]  ;;  %v475_v51 = vld [vmem:[%s2661_s0 + $0x68] sm:$0xff]  ;;  %s1802_s21 = sshll.u32 %s2674_s18, 6 }
   0xf   : > { %v2255_v10 = vld [vmem:[%s435_s16] ss:$0 sm:$0xff]  ;;  %v476_v52 = vld [vmem:[%s2661_s0 + $0x70] sm:$0xff]  ;;  %s438_s16 = scalar_lea.vmem %s2663_s2, %s2674_s18  ;;  %v477_v55 = vld [vmem:[%s2661_s0 + $0x78] sm:$0xff]  ;;  %s448_s24 = scalar_lea.vmem %s2669_s8, %s1802_s21 }
  0x10   : > { %v485_v13 = vmul.f32 %v2255_v10, %v2249_v8  ;;  %v486_v22 = vmul.f32 %v2255_v10, %v2275_v17  ;;  %v487_v23 = vmul.f32 %v2255_v10, %v2280_v19  ;;  %v488_v29 = vmul.f32 %v2255_v10, %v2295_v24  ;;  %v1732_v56 = vld [vmem:[%s438_s16] ss:$0 sm:$0xff]  ;;  %v1046_v11 = vld [vmem:[%s448_s24 + $0x8] sm:$0xff]  ;;  %v1052_v20 = vld [vmem:[%s448_s24 + $0x38] sm:$0xff]  ;;  %s2409_s27 = scalar_lea.vmem %s2668_s7, %s1802_s21  ;;  %s451_s15 = scalar_lea.vmem %s2670_s9, %s2674_s18 }
  0x11   : > { %2073 = vmatpush3.bf16.msra.mxu1 %v2070_v9  ;;  %v489_v30 = vmul.f32 %v2255_v10, %v2300_v25  ;;  %v490_v36 = vmul.f32 %v2255_v10, %v467_v31  ;;  %v491_v37 = vmul.f32 %v2255_v10, %v468_v32  ;;  %v492_v41 = vmul.f32 %v2255_v10, %v469_v38  ;;  %v1049_v16 = vld [vmem:[%s448_s24 + $0x20] sm:$0xff]  ;;  %s1804_s16 = sshll.u32 %s2674_s18, 7 }
  0x12   : > { %1918 = vmatprep.mubr.msk.f32.mxu1 %vm539_vm0, %v485_v13  ;;  %2075 = vmatprep.subr.bf16.mxu1 %v2074_v14  ;;  %v493_v42 = vmul.f32 %v2255_v10, %v470_v39  ;;  %v494_v45 = vmul.f32 %v2255_v10, %v471_v43  ;;  %v495_v46 = vmul.f32 %v2255_v10, %v472_v44  ;;  %v1047_v13 = vld [vmem:[%s448_s24 + $0x10] sm:$0xff]  ;;  %s2555_s21 = scalar_lea.vmem %s2671_s10, %s1804_s16 }
  0x13   : > { %v496_v49 = vmul.f32 %v2255_v10, %v473_v47  ;;  %v497_v50 = vmul.f32 %v2255_v10, %v474_v48  ;;  %v498_v53 = vmul.f32 %v2255_v10, %v475_v51  ;;  %v499_v54 = vmul.f32 %v2255_v10, %v476_v52 }
  0x14   : > { %v500_v57 = vmul.f32 %v2255_v10, %v477_v55  ;;  %v508_v58 = vmul.f32 %v1732_v56, %v2249_v8  ;;  %v509_v59 = vmul.f32 %v1732_v56, %v2275_v17  ;;  %v510_v60 = vmul.f32 %v1732_v56, %v2280_v19  ;;  %v1045_v10 = vld [vmem:[%s448_s24] sm:$0xff]  ;;  %v1050_v17 = vld [vmem:[%s448_s24 + $0x28] sm:$0xff]  ;;  %v1051_v19 = vld [vmem:[%s448_s24 + $0x30] sm:$0xff] }
  0x15   : > { %2077 = vmatpush3.bf16.msra.mxu1 %v2074_v14  ;;  %v511_v61 = vmul.f32 %v1732_v56, %v2295_v24  ;;  %v512_v62 = vmul.f32 %v1732_v56, %v2300_v25  ;;  %v513_v63 = vmul.f32 %v1732_v56, %v467_v31  ;;  %v514_v0 = vmul.f32 %v1732_v56, %v468_v32  ;;  %v1048_v14 = vld [vmem:[%s448_s24 + $0x18] sm:$0xff]  ;;  %s2624_s24 = scalar_lea.vmem %s2672_s11, %s1804_s16 }
  0x16   : > { %2079 = vmatprep.subr.bf16.mxu1 %v2078_v18  ;;  %v515_v1 = vmul.f32 %v1732_v56, %v469_v38  ;;  %v516_v2 = vmul.f32 %v1732_v56, %v470_v39  ;;  %v517_v3 = vmul.f32 %v1732_v56, %v471_v43  ;;  %v518_v4 = vmul.f32 %v1732_v56, %v472_v44 }
  0x17   : > { %v519_v5 = vmul.f32 %v1732_v56, %v473_v47  ;;  %v520_v6 = vmul.f32 %v1732_v56, %v474_v48  ;;  %v521_v7 = vmul.f32 %v1732_v56, %v475_v51  ;;  %v522_v8 = vmul.f32 %v1732_v56, %v476_v52  ;;  %v1039_v47 = vld [vmem:[%s2409_s27 + $0x10] sm:$0xff]  ;;  %v1040_v48 = vld [vmem:[%s2409_s27 + $0x18] sm:$0xff] }
  0x18   : > { %1919 = vmatmul.mubr.msk.f32.vlgmr.msra.gmra.mrb[0].mxu1 %vm539_vm0, %v486_v22  ;;  %v523_v9 = vmul.f32 %v1732_v56, %v477_v55  ;;  %v2094_v12 = vpack.c.bf16 %v1046_v11, %v1045_v10  ;;  %v2098_v15 = vpack.c.bf16 %v1048_v14, %v1047_v13  ;;  %v2106_v21 = vpack.c.bf16 %v1052_v20, %v1051_v19  ;;  %v1037_v22 = vld [vmem:[%s2409_s27] sm:$0xff] }
  0x19   : > { %2081 = vmatpush3.bf16.msra.mxu1 %v2078_v18  ;;  %1921 = vmatprep.mubr.msk.f32.mxu1 %vm539_vm0, %v487_v23  ;;  %v2102_v18 = vpack.c.bf16 %v1050_v17, %v1049_v16  ;;  %v1038_v23 = vld [vmem:[%s2409_s27 + $0x8] sm:$0xff]  ;;  %v2114_v55 = vpack.c.bf16 %v1040_v48, %v1039_v47  ;;  %v2479_v47 = vld [vmem:[%s2665_s4] ss:$0 sm:$0xff] }
  0x1a   : > { %2083 = vmatprep.subr.bf16.mxu1 %v2082_v26  ;;  %2095 = vmatprep.subr.bf16.mxu0 %v2094_v12  ;;  %v2110_v24 = vpack.c.bf16 %v1038_v23, %v1037_v22 }
  0x1b   : > { %2097 = vmatpush3.bf16.msra.mxu0 %v2094_v12 }
  0x1c   : > { %1922 = vmatmul.mubr.msk.f32.gmra.mrb[2].mxu1 %vm539_vm0, %v488_v29  ;;  %2099 = vmatprep.subr.bf16.mxu0 %v2098_v15 }
  0x1d   : > { %1924 = vmatprep.mubr.msk.f32.mxu1 %vm539_vm0, %v489_v30  ;;  %2085 = vmatpush3.bf16.msra.mxu1 %v2082_v26 }
  0x1e   : > { %2087 = vmatprep.subr.bf16.mxu1 %v2086_v33 }
  0x1f   : > { %2101 = vmatpush3.bf16.msra.mxu0 %v2098_v15 }
  0x20   : > { %1925 = vmatmul.mubr.msk.f32.gmra.mrb[4].mxu1 %vm539_vm0, %v490_v36  ;;  %2103 = vmatprep.subr.bf16.mxu0 %v2102_v18 }
  0x21   : > { %1927 = vmatprep.mubr.msk.f32.mxu1 %vm539_vm0, %v491_v37  ;;  %2089 = vmatpush3.bf16.msra.mxu1 %v2086_v33 }
  0x22   : > { %2091 = vmatprep.subr.bf16.mxu1 %v2090_v40 }
  0x23   : > { %2105 = vmatpush3.bf16.msra.mxu0 %v2102_v18 }
  0x24   : > { %1928 = vmatmul.mubr.msk.f32.gmra.mrb[6].mxu1 %vm539_vm0, %v492_v41  ;;  %2107 = vmatprep.subr.bf16.mxu0 %v2106_v21  ;;  %v2448_v41 = vld [vmem:[%s2667_s6] ss:$0 sm:$0xff] }
  0x25   : > { %1930 = vmatprep.mubr.msk.f32.mxu1 %vm539_vm0, %v493_v42  ;;  %2093 = vmatpush3.bf16.msra.mxu1 %v2090_v40 }
  0x27   : > { %2109 = vmatpush3.bf16.msra.mxu0 %v2106_v21 }
  0x28   : > { %1931 = vmatmul.mubr.msk.f32.gmra.mrb[8].mxu1 %vm539_vm0, %v494_v45  ;;  %2111 = vmatprep.subr.bf16.mxu0 %v2110_v24 }
  0x29   : > { %1933 = vmatprep.mubr.msk.f32.mxu1 %vm539_vm0, %v495_v46 }
  0x2c   : > { %1934 = vmatmul.mubr.msk.f32.gmra.mrb[10].mxu1 %vm539_vm0, %v496_v49 }
  0x2d   : > { %1936 = vmatprep.mubr.msk.f32.mxu1 %vm539_vm0, %v497_v50 }
  0x30   : > { %1937 = vmatmul.mubr.msk.f32.gmra.mrb[12].mxu1 %vm539_vm0, %v498_v53 }
  0x31   : > { %1939 = vmatprep.mubr.msk.f32.mxu1 %vm539_vm0, %v499_v54 }
  0x34   : > { %1940 = vmatmul.mubr.msk.f32.gmra.mrb[14].mxu1 %vm539_vm0, %v500_v57 }
  0x35   : > { %1958 = vmatprep.mubr.msk.f32.mxu1 %vm539_vm0, %v508_v58  ;;  %v1041_v58 = vld [vmem:[%s2409_s27 + $0x20] sm:$0xff] }
  0x38   : > { %1959 = vmatmul.mubr.msk.f32.vlgmr.msra.gmra.mrb[16].mxu1 %vm539_vm0, %v509_v59  ;;  %v1042_v59 = vld [vmem:[%s2409_s27 + $0x28] sm:$0xff] }
  0x39   : > { %1961 = vmatprep.mubr.msk.f32.mxu1 %vm539_vm0, %v510_v60 }
  0x3c   : > { %1962 = vmatmul.mubr.msk.f32.gmra.mrb[18].mxu1 %vm539_vm0, %v511_v61 }
  0x3d   : > { %1964 = vmatprep.mubr.msk.f32.mxu1 %vm539_vm0, %v512_v62 }
  0x40   : > { %1965 = vmatmul.mubr.msk.f32.gmra.mrb[20].mxu1 %vm539_vm0, %v513_v63 }
  0x41   : > { %1967 = vmatprep.mubr.msk.f32.mxu1 %vm539_vm0, %v514_v0 }
  0x44   : > { %1968 = vmatmul.mubr.msk.f32.gmra.mrb[22].mxu1 %vm539_vm0, %v515_v1 }
  0x45   : > { %1970 = vmatprep.mubr.msk.f32.mxu1 %vm539_vm0, %v516_v2  ;;  %v2118_v2 = vpack.c.bf16 %v1042_v59, %v1041_v58 }
  0x48   : > { %1971 = vmatmul.mubr.msk.f32.gmra.mrb[24].mxu1 %vm539_vm0, %v517_v3 }
  0x49   : > { %1973 = vmatprep.mubr.msk.f32.mxu1 %vm539_vm0, %v518_v4 }
  0x4c   : > { %1974 = vmatmul.mubr.msk.f32.gmra.mrb[26].mxu1 %vm539_vm0, %v519_v5  ;;  %v1043_v5 = vld [vmem:[%s2409_s27 + $0x30] sm:$0xff] }
  0x4d   : > { %1976 = vmatprep.mubr.msk.f32.mxu1 %vm539_vm0, %v520_v6  ;;  %v1044_v6 = vld [vmem:[%s2409_s27 + $0x38] sm:$0xff] }
  0x4e   : > { %v2122_v13 = vpack.c.bf16 %v1044_v6, %v1043_v5 }
  0x50   : > { %1977 = vmatmul.mubr.msk.f32.gmra.mrb[28].mxu1 %vm539_vm0, %v521_v7 }
  0x51   : > { %1979 = vmatprep.mubr.msk.f32.mxu1 %vm539_vm0, %v522_v8 }
  0x54   : > { %1980 = vmatmul.mubr.msk.f32.gmra.mrb[30].mxu1 %vm539_vm0, %v523_v9 }
  0xeb   : > { %v2413_v25 = vpop.f32.mrb[0].mxu1 }
  0xec   : > { %v2415_v26 = vpop.f32.mrb[1].mxu1 }
  0xef   : > { %v2417_v27 = vpop.f32.mrb[2].mxu1 }
  0xf0   : > { %v2419_v28 = vpop.f32.mrb[3].mxu1 }
  0xf3   : > { %v2421_v29 = vpop.f32.mrb[4].mxu1 }
  0xf4   : > { %v2423_v30 = vpop.f32.mrb[5].mxu1 }
  0xf7   : > { %v2425_v31 = vpop.f32.mrb[6].mxu1 }
  0xf8   : > { %v2427_v32 = vpop.f32.mrb[7].mxu1 }
  0xfb   : > { %v2429_v33 = vpop.f32.mrb[8].mxu1 }
  0xfc   : > { %v2431_v34 = vpop.f32.mrb[9].mxu1 }
  0xff   : > { %v2433_v35 = vpop.f32.mrb[10].mxu1 }
 0x100   : > { %v2435_v36 = vpop.f32.mrb[11].mxu1 }
 0x103   : > { %v2437_v37 = vpop.f32.mrb[12].mxu1 }
 0x104   : > { %v2439_v38 = vpop.f32.mrb[13].mxu1 }
 0x107   : > { %v2441_v39 = vpop.f32.mrb[14].mxu1 }
 0x108   : > { %v2443_v40 = vpop.f32.mrb[15].mxu1 }
 0x10b   : > { %v1960_v42 = vpop.f32.mrb[16].mxu1 }
 0x10c   : > { %v916_v43 = vadd.f32 %v1960_v42, %v2448_v41  ;;  %v910_v44 = vpop.f32.mrb[17].mxu1 }
 0x10d   : > { %v911_v45 = vadd.f32 %v2448_v41, %v910_v44 }
 0x10e   : > { %v1006_v46 = vmul.f32 0.2, %v916_v43  ;;  %vm990_vm1 = vcmp.ge.f32.partialorder %v916_v43, 0.0 }
 0x10f   : > { %v1963_v49 = vpop.f32.mrb[18].mxu1  ;;  %vm989_vm2 = vcmp.ge.f32.partialorder %v911_v45, 0.0  ;;  %v1005_v50 = vmul.f32 0.2, %v911_v45 }
 0x110   : > { %v926_v51 = vadd.f32 %v1963_v49, %v2448_v41  ;;  %v920_v52 = vpop.f32.mrb[19].mxu1  ;;  %v1022_v57 = vsel %vm990_vm1, %v916_v43, %v1006_v46 }
 0x111   : > { %v921_v53 = vadd.f32 %v2448_v41, %v920_v52  ;;  %v1021_v54 = vsel %vm989_vm2, %v911_v45, %v1005_v50 }
 0x112   : > { %v1008_v56 = vmul.f32 0.2, %v926_v51  ;;  %1998 = vmatprep.mubr.msk.f32.mxu0 %vm539_vm0, %v1021_v54  ;;  %vm992_vm3 = vcmp.ge.f32.partialorder %v926_v51, 0.0 }
 0x113   : > { %vm991_vm4 = vcmp.ge.f32.partialorder %v921_v53, 0.0  ;;  %v1007_v60 = vmul.f32 0.2, %v921_v53  ;;  %v1966_v61 = vpop.f32.mrb[20].mxu1  ;;  %1999 = vmatmul.mubr.msk.f32.vlgmr.msra.gmra.mrb[0].mxu0 %vm539_vm0, %v1022_v57 }
 0x114   : > { %v936_v62 = vadd.f32 %v1966_v61, %v2448_v41  ;;  %v930_v63 = vpop.f32.mrb[21].mxu1  ;;  %2113 = vmatpush3.bf16.msra.mxu0 %v2110_v24  ;;  %v1024_v4 = vsel %vm992_vm3, %v926_v51, %v1008_v56  ;;  %v655_v56 = vadd.f32 %v2479_v47, %v2415_v26 }
 0x115   : > { %v931_v0 = vadd.f32 %v2448_v41, %v930_v63  ;;  %v1023_v1 = vsel %vm991_vm4, %v921_v53, %v1007_v60  ;;  %2115 = vmatprep.subr.bf16.mxu0 %v2114_v55 }
 0x116   : > { %v1010_v3 = vmul.f32 0.2, %v936_v62  ;;  %2001 = vmatprep.mubr.msk.f32.mxu0 %vm539_vm0, %v1023_v1  ;;  %vm994_vm5 = vcmp.ge.f32.partialorder %v936_v62, 0.0  ;;  %v660_v1 = vadd.f32 %v2413_v25, %v2479_v47  ;;  %v749_v26 = vmul.f32 0.2, %v655_v56 }
 0x117   : > { %vm993_vm6 = vcmp.ge.f32.partialorder %v931_v0, 0.0  ;;  %v1009_v7 = vmul.f32 0.2, %v931_v0  ;;  %v1969_v8 = vpop.f32.mrb[22].mxu1  ;;  %2002 = vmatmul.mubr.msk.f32.gmra.mrb[2].mxu0 %vm539_vm0, %v1024_v4  ;;  %v665_v4 = vadd.f32 %v2479_v47, %v2419_v28  ;;  %vm733_vm2 = vcmp.ge.f32.partialorder %v655_v56, 0.0 }
 0x118   : > { %v946_v9 = vadd.f32 %v1969_v8, %v2448_v41  ;;  %v940_v10 = vpop.f32.mrb[23].mxu1  ;;  %2117 = vmatpush3.bf16.msra.mxu0 %v2114_v55  ;;  %v1026_v15 = vsel %vm994_vm5, %v936_v62, %v1010_v3  ;;  %vm734_vm3 = vcmp.ge.f32.partialorder %v660_v1, 0.0  ;;  %v765_v28 = vsel %vm733_vm2, %v655_v56, %v749_v26 }
 0x119   : > { %v941_v11 = vadd.f32 %v2448_v41, %v940_v10  ;;  %v1025_v12 = vsel %vm993_vm6, %v931_v0, %v1009_v7  ;;  %2119 = vmatprep.subr.bf16.mxu0 %v2118_v2  ;;  %v670_v7 = vadd.f32 %v2417_v27, %v2479_v47  ;;  %v751_v8 = vmul.f32 0.2, %v665_v4 }
 0x11a   : > { %v1012_v14 = vmul.f32 0.2, %v946_v9  ;;  %2004 = vmatprep.mubr.msk.f32.mxu0 %vm539_vm0, %v1025_v12  ;;  %vm996_vm7 = vcmp.ge.f32.partialorder %v946_v9, 0.0  ;;  %vm735_vm4 = vcmp.ge.f32.partialorder %v665_v4, 0.0  ;;  %v680_v12 = vadd.f32 %v2421_v29, %v2479_v47 }
 0x11b   : > { %vm995_vm8 = vcmp.ge.f32.partialorder %v941_v11, 0.0  ;;  %v1011_v16 = vmul.f32 0.2, %v941_v11  ;;  %v1972_v17 = vpop.f32.mrb[24].mxu1  ;;  %2005 = vmatmul.mubr.msk.f32.gmra.mrb[4].mxu0 %vm539_vm0, %v1026_v15  ;;  %vm736_vm5 = vcmp.ge.f32.partialorder %v670_v7, 0.0  ;;  %v690_v15 = vadd.f32 %v2425_v31, %v2479_v47 }
 0x11c   : > { %v956_v18 = vadd.f32 %v1972_v17, %v2448_v41  ;;  %v950_v19 = vpop.f32.mrb[25].mxu1  ;;  %2121 = vmatpush3.bf16.msra.mxu0 %v2118_v2  ;;  %v1028_v23 = vsel %vm996_vm7, %v946_v9, %v1012_v14  ;;  %v675_v9 = vadd.f32 %v2479_v47, %v2423_v30  ;;  %v767_v14 = vsel %vm735_vm4, %v665_v4, %v751_v8 }
 0x11d   : > { %v951_v20 = vadd.f32 %v2448_v41, %v950_v19  ;;  %v1027_v21 = vsel %vm995_vm8, %v941_v11, %v1011_v16  ;;  %2123 = vmatprep.subr.bf16.mxu0 %v2122_v13  ;;  %v752_v11 = vmul.f32 0.2, %v670_v7  ;;  %v754_v30 = vmul.f32 0.2, %v680_v12 }
 0x11e   : > { %v1014_v22 = vmul.f32 0.2, %v956_v18  ;;  %2007 = vmatprep.mubr.msk.f32.mxu0 %vm539_vm0, %v1027_v21  ;;  %vm998_vm9 = vcmp.ge.f32.partialorder %v956_v18, 0.0  ;;  %v753_v27 = vmul.f32 0.2, %v675_v9  ;;  %vm737_vm6 = vcmp.ge.f32.partialorder %v675_v9, 0.0 }
 0x11f   : > { %vm997_vm10 = vcmp.ge.f32.partialorder %v951_v20, 0.0  ;;  %v1013_v24 = vmul.f32 0.2, %v951_v20  ;;  %v1975_v42 = vpop.f32.mrb[26].mxu1  ;;  %2008 = vmatmul.mubr.msk.f32.gmra.mrb[6].mxu0 %vm539_vm0, %v1028_v23  ;;  %v768_v16 = vsel %vm736_vm5, %v670_v7, %v752_v11  ;;  %vm738_vm7 = vcmp.ge.f32.partialorder %v680_v12, 0.0 }
 0x120   : > { %v966_v43 = vadd.f32 %v1975_v42, %v2448_v41  ;;  %v960_v44 = vpop.f32.mrb[27].mxu1  ;;  %2125 = vmatpush3.bf16.msra.mxu0 %v2122_v13  ;;  %v1030_v49 = vsel %vm998_vm9, %v956_v18, %v1014_v22  ;;  %v685_v13 = vadd.f32 %v2479_v47, %v2427_v32  ;;  %v695_v29 = vadd.f32 %v2479_v47, %v2431_v34 }
 0x121   : > { %v961_v45 = vadd.f32 %v2448_v41, %v960_v44  ;;  %v1029_v46 = vsel %vm997_vm10, %v951_v20, %v1013_v24  ;;  %v769_v18 = vsel %vm737_vm6, %v675_v9, %v753_v27  ;;  %v756_v32 = vmul.f32 0.2, %v690_v15 }
 0x122   : > { %v1016_v48 = vmul.f32 0.2, %v966_v43  ;;  %2010 = vmatprep.mubr.msk.f32.mxu0 %vm539_vm0, %v1029_v46  ;;  %vm1000_vm11 = vcmp.ge.f32.partialorder %v966_v43, 0.0  ;;  %v755_v17 = vmul.f32 0.2, %v685_v13  ;;  %vm739_vm8 = vcmp.ge.f32.partialorder %v685_v13, 0.0 }
 0x123   : > { %vm999_vm12 = vcmp.ge.f32.partialorder %v961_v45, 0.0  ;;  %v1015_v50 = vmul.f32 0.2, %v961_v45  ;;  %v1978_v51 = vpop.f32.mrb[28].mxu1  ;;  %2011 = vmatmul.mubr.msk.f32.gmra.mrb[8].mxu0 %vm539_vm0, %v1030_v49  ;;  %v700_v19 = vadd.f32 %v2429_v33, %v2479_v47  ;;  %v770_v20 = vsel %vm738_vm7, %v680_v12, %v754_v30 }
 0x124   : > { %v976_v52 = vadd.f32 %v1978_v51, %v2448_v41  ;;  %v970_v53 = vpop.f32.mrb[29].mxu1  ;;  %v1032_v58 = vsel %vm1000_vm11, %v966_v43, %v1016_v48  ;;  %vm740_vm9 = vcmp.ge.f32.partialorder %v690_v15, 0.0  ;;  %v757_v21 = vmul.f32 0.2, %v695_v29 }
 0x125   : > { %v971_v54 = vadd.f32 %v2448_v41, %v970_v53  ;;  %v1031_v55 = vsel %vm999_vm12, %v961_v45, %v1015_v50  ;;  %v705_v31 = vadd.f32 %v2479_v47, %v2435_v36  ;;  %v771_v22 = vsel %vm739_vm8, %v685_v13, %v755_v17 }
 0x126   : > { %v1018_v57 = vmul.f32 0.2, %v976_v52  ;;  %2013 = vmatprep.mubr.msk.f32.mxu0 %vm539_vm0, %v1031_v55  ;;  %vm1002_vm13 = vcmp.ge.f32.partialorder %v976_v52, 0.0  ;;  %vm741_vm10 = vcmp.ge.f32.partialorder %v695_v29, 0.0  ;;  %v758_v34 = vmul.f32 0.2, %v700_v19 }
 0x127   : > { %vm1001_vm14 = vcmp.ge.f32.partialorder %v971_v54, 0.0  ;;  %v1017_v59 = vmul.f32 0.2, %v971_v54  ;;  %v1981_v60 = vpop.f32.mrb[30].mxu1  ;;  %2014 = vmatmul.mubr.msk.f32.gmra.mrb[10].mxu0 %vm539_vm0, %v1032_v58  ;;  %v710_v23 = vadd.f32 %v2433_v35, %v2479_v47  ;;  %v772_v24 = vsel %vm740_vm9, %v690_v15, %v756_v32 }
 0x128   : > { %v986_v61 = vadd.f32 %v1981_v60, %v2448_v41  ;;  %v980_v62 = vpop.f32.mrb[31].mxu1  ;;  %v1034_v3 = vsel %vm1002_vm13, %v976_v52, %v1018_v57  ;;  %vm742_vm11 = vcmp.ge.f32.partialorder %v700_v19, 0.0  ;;  %v759_v42 = vmul.f32 0.2, %v705_v31 }
 0x129   : > { %v981_v63 = vadd.f32 %v2448_v41, %v980_v62  ;;  %v1033_v0 = vsel %vm1001_vm14, %v971_v54, %v1017_v59  ;;  %v750_v41 = vmul.f32 0.2, %v660_v1  ;;  %v715_v33 = vadd.f32 %v2479_v47, %v2439_v38 }
 0x12a   : > { %v1020_v2 = vmul.f32 0.2, %v986_v61  ;;  %2016 = vmatprep.mubr.msk.f32.mxu0 %vm539_vm0, %v1033_v0  ;;  %vm1004_vm15 = vcmp.ge.f32.partialorder %v986_v61, 0.0  ;;  %v773_v43 = vsel %vm741_vm10, %v695_v29, %v757_v21  ;;  %vm743_vm12 = vcmp.ge.f32.partialorder %v705_v31, 0.0 }
 0x12b   : > { %vm1003_vm1 = vcmp.ge.f32.partialorder %v981_v63, 0.0  ;;  %v1019_v5 = vmul.f32 0.2, %v981_v63  ;;  %2017 = vmatmul.mubr.msk.f32.gmra.mrb[12].mxu0 %vm539_vm0, %v1034_v3  ;;  %v766_v10 = vsel %vm734_vm3, %v660_v1, %v750_v41  ;;  %v760_v36 = vmul.f32 0.2, %v710_v23 }
 0x12c   : > { %v1036_v25 = vsel %vm1004_vm15, %v986_v61, %v1020_v2  ;;  %v720_v44 = vadd.f32 %v2437_v37, %v2479_v47  ;;  %v774_v45 = vsel %vm742_vm11, %v700_v19, %v758_v34  ;;  %vm744_vm13 = vcmp.ge.f32.partialorder %v710_v23, 0.0 }
 0x12d   : > { %v1035_v6 = vsel %vm1003_vm1, %v981_v63, %v1019_v5  ;;  %v761_v46 = vmul.f32 0.2, %v715_v33  ;;  %v725_v35 = vadd.f32 %v2479_v47, %v2443_v40  ;;  %v775_v48 = vsel %vm743_vm12, %v705_v31, %v759_v42 }
 0x12e   : > { %2019 = vmatprep.mubr.msk.f32.mxu0 %vm539_vm0, %v1035_v6  ;;  %vm745_vm14 = vcmp.ge.f32.partialorder %v715_v33, 0.0  ;;  %v762_v38 = vmul.f32 0.2, %v720_v44  ;;  %v730_v49 = vadd.f32 %v2441_v39, %v2479_v47  ;;  %v776_v50 = vsel %vm744_vm13, %v710_v23, %v760_v36  ;;  %v2545_v47 = vld [vmem:[%s451_s15] ss:$0 sm:$0xff] }
 0x12f   : > { %2020 = vmatmul.mubr.msk.f32.gmra.mrb[14].mxu0 %vm539_vm0, %v1036_v25  ;;  %vm746_vm15 = vcmp.ge.f32.partialorder %v720_v44, 0.0  ;;  %v763_v37 = vmul.f32 0.2, %v725_v35  ;;  %v777_v51 = vsel %vm745_vm14, %v715_v33, %v761_v46  ;;  %vm747_vm1 = vcmp.ge.f32.partialorder %v725_v35, 0.0 }
 0x130   : > { %2038 = vmatprep.mubr.msk.f32.mxu0 %vm539_vm0, %v765_v28  ;;  %v764_v40 = vmul.f32 0.2, %v730_v49  ;;  %v778_v52 = vsel %vm746_vm15, %v720_v44, %v762_v38  ;;  %vm748_vm2 = vcmp.ge.f32.partialorder %v730_v49, 0.0 }
 0x131   : > { %v779_v53 = vsel %vm747_vm1, %v725_v35, %v763_v37 }
 0x132   : > { %v780_v39 = vsel %vm748_vm2, %v730_v49, %v764_v40 }
 0x133   : > { %2039 = vmatmul.mubr.msk.f32.vlgmr.msra.gmra.mrb[0].mxu0 %vm539_vm0, %v766_v10 }
 0x134   : > { %2041 = vmatprep.mubr.msk.f32.mxu0 %vm539_vm0, %v767_v14 }
 0x137   : > { %2042 = vmatmul.mubr.msk.f32.gmra.mrb[2].mxu0 %vm539_vm0, %v768_v16 }
 0x138   : > { %2044 = vmatprep.mubr.msk.f32.mxu0 %vm539_vm0, %v769_v18 }
 0x13b   : > { %2045 = vmatmul.mubr.msk.f32.gmra.mrb[4].mxu0 %vm539_vm0, %v770_v20 }
 0x13c   : > { %2047 = vmatprep.mubr.msk.f32.mxu0 %vm539_vm0, %v771_v22 }
 0x13f   : > { %2048 = vmatmul.mubr.msk.f32.gmra.mrb[6].mxu0 %vm539_vm0, %v772_v24 }
 0x140   : > { %2050 = vmatprep.mubr.msk.f32.mxu0 %vm539_vm0, %v773_v43 }
 0x143   : > { %2051 = vmatmul.mubr.msk.f32.gmra.mrb[8].mxu0 %vm539_vm0, %v774_v45 }
 0x144   : > { %2053 = vmatprep.mubr.msk.f32.mxu0 %vm539_vm0, %v775_v48 }
 0x147   : > { %2054 = vmatmul.mubr.msk.f32.gmra.mrb[10].mxu0 %vm539_vm0, %v776_v50 }
 0x148   : > { %2056 = vmatprep.mubr.msk.f32.mxu0 %vm539_vm0, %v777_v51 }
 0x14b   : > { %2057 = vmatmul.mubr.msk.f32.gmra.mrb[12].mxu0 %vm539_vm0, %v778_v52 }
 0x14c   : > { %2059 = vmatprep.mubr.msk.f32.mxu0 %vm539_vm0, %v779_v53 }
 0x14f   : > { %2060 = vmatmul.mubr.msk.f32.gmra.mrb[14].mxu0 %vm539_vm0, %v780_v39 }
 0x206   : > { %v2040_v54 = vpop.f32.mrb[0].mxu0 }
 0x207   : > { %v1447_v55 = vadd.f32 %v2040_v54, %v2545_v47  ;;  %v1360_v56 = vpop.f32.mrb[1].mxu0 }
 0x208   : > { %v1446_v57 = vadd.f32 %v2545_v47, %v1360_v56 }
 0x209   : > { %v1479_v58 = vmul.f32 0.2, %v1447_v55  ;;  %vm1463_vm3 = vcmp.ge.f32.partialorder %v1447_v55, 0.0 }
 0x20a   : > { %v1478_v59 = vmul.f32 0.2, %v1446_v57  ;;  %v2043_v60 = vpop.f32.mrb[2].mxu0  ;;  %vm1462_vm4 = vcmp.ge.f32.partialorder %v1446_v57, 0.0 }
 0x20b   : > { %v1449_v61 = vadd.f32 %v2043_v60, %v2545_v47  ;;  %v1370_v62 = vpop.f32.mrb[3].mxu0  ;;  %v1495_v63 = vsel %vm1463_vm3, %v1447_v55, %v1479_v58 }
 0x20c   : > { %v1448_v0 = vadd.f32 %v2545_v47, %v1370_v62  ;;  %v1529_v1 = vsel %vm539_vm0, %v1495_v63, 0.0  ;;  %1511 = vst.msk [vmem:[%s2555_s21 + $0x8] sm:$0xff] %vm539_vm0, %v1495_v63  ;;  %v1494_v26 = vsel %vm1462_vm4, %v1446_v57, %v1478_v59  ;;  %vm1574_vm4 = vcmask 7168  }
 0x20d   : > { %v1481_v2 = vmul.f32 0.2, %v1449_v61  ;;  %1530 = vadd.xlane.f32.xlu0 %v1529_v1  ;;  %1510 = vst.msk [vmem:[%s2555_s21] sm:$0xff] %vm539_vm0, %v1494_v26  ;;  %vm1465_vm5 = vcmp.ge.f32.partialorder %v1449_v61, 0.0  ;;  %v1526_v25 = vsel %vm539_vm0, %v1494_v26, 0.0 }
 0x20e   : > { %v1480_v3 = vmul.f32 0.2, %v1448_v0  ;;  %v2046_v4 = vpop.f32.mrb[4].mxu0  ;;  %vm1464_vm6 = vcmp.ge.f32.partialorder %v1448_v0, 0.0 }
 0x20f   : > { %v1451_v5 = vadd.f32 %v2046_v4, %v2545_v47  ;;  %v1380_v6 = vpop.f32.mrb[5].mxu0  ;;  %v1497_v41 = vsel %vm1465_vm5, %v1449_v61, %v1481_v2 }
 0x210   : > { %v1450_v7 = vadd.f32 %v2545_v47, %v1380_v6  ;;  %v1535_v8 = vsel %vm539_vm0, %v1497_v41, 0.0  ;;  %1513 = vst.msk [vmem:[%s2555_s21 + $0x18] sm:$0xff] %vm539_vm0, %v1497_v41  ;;  %v1496_v9 = vsel %vm1464_vm6, %v1448_v0, %v1480_v3 }
 0x211   : > { %v1483_v28 = vmul.f32 0.2, %v1451_v5  ;;  %1527 = vadd.xlane.f32.xlu0 %v1526_v25  ;;  %1536 = vadd.xlane.f32.xlu1 %v1535_v8  ;;  %1512 = vst.msk [vmem:[%s2555_s21 + $0x10] sm:$0xff] %vm539_vm0, %v1496_v9  ;;  %vm1467_vm7 = vcmp.ge.f32.partialorder %v1451_v5, 0.0  ;;  %v1532_v30 = vsel %vm539_vm0, %v1496_v9, 0.0 }
 0x212   : > { %v1482_v10 = vmul.f32 0.2, %v1450_v7  ;;  %v2049_v11 = vpop.f32.mrb[6].mxu0  ;;  %vm1466_vm8 = vcmp.ge.f32.partialorder %v1450_v7, 0.0 }
 0x213   : > { %v1453_v12 = vadd.f32 %v2049_v11, %v2545_v47  ;;  %v1390_v27 = vpop.f32.mrb[7].mxu0  ;;  %v1499_v13 = vsel %vm1467_vm7, %v1451_v5, %v1483_v28 }
 0x214   : > { %v1452_v14 = vadd.f32 %v2545_v47, %v1390_v27  ;;  %v1498_v15 = vsel %vm1466_vm8, %v1450_v7, %v1482_v10  ;;  %1515 = vst.msk [vmem:[%s2555_s21 + $0x28] sm:$0xff] %vm539_vm0, %v1499_v13  ;;  %v1541_v31 = vsel %vm539_vm0, %v1499_v13, 0.0 }
 0x215   : > { %v1485_v16 = vmul.f32 0.2, %v1453_v12  ;;  %1533 = vadd.xlane.f32.xlu1 %v1532_v30  ;;  %v1538_v17 = vsel %vm539_vm0, %v1498_v15, 0.0  ;;  %1514 = vst.msk [vmem:[%s2555_s21 + $0x20] sm:$0xff] %vm539_vm0, %v1498_v15  ;;  %vm1469_vm9 = vcmp.ge.f32.partialorder %v1453_v12, 0.0 }
 0x216   : > { %v1484_v29 = vmul.f32 0.2, %v1452_v14  ;;  %1539 = vadd.xlane.f32.xlu0 %v1538_v17  ;;  %v2052_v18 = vpop.f32.mrb[8].mxu0  ;;  %vm1468_vm10 = vcmp.ge.f32.partialorder %v1452_v14, 0.0 }
 0x217   : > { %v1455_v32 = vadd.f32 %v2052_v18, %v2545_v47  ;;  %v1400_v19 = vpop.f32.mrb[9].mxu0  ;;  %v1501_v20 = vsel %vm1469_vm9, %v1453_v12, %v1485_v16 }
 0x218   : > { %v1454_v21 = vadd.f32 %v2545_v47, %v1400_v19  ;;  %v1500_v22 = vsel %vm1468_vm10, %v1452_v14, %v1484_v29  ;;  %1517 = vst.msk [vmem:[%s2555_s21 + $0x38] sm:$0xff] %vm539_vm0, %v1501_v20  ;;  %v1547_v45 = vsel %vm539_vm0, %v1501_v20, 0.0 }
 0x219   : > { %v1487_v34 = vmul.f32 0.2, %v1455_v32  ;;  %1542 = vadd.xlane.f32.xlu1 %v1541_v31  ;;  %v1544_v23 = vsel %vm539_vm0, %v1500_v22, 0.0  ;;  %1516 = vst.msk [vmem:[%s2555_s21 + $0x30] sm:$0xff] %vm539_vm0, %v1500_v22  ;;  %vm1471_vm11 = vcmp.ge.f32.partialorder %v1455_v32, 0.0 }
 0x21a   : > { %v1486_v24 = vmul.f32 0.2, %v1454_v21  ;;  %1545 = vadd.xlane.f32.xlu0 %v1544_v23  ;;  %v2055_v42 = vpop.f32.mrb[10].mxu0  ;;  %vm1470_vm12 = vcmp.ge.f32.partialorder %v1454_v21, 0.0 }
 0x21b   : > { %v1457_v33 = vadd.f32 %v2055_v42, %v2545_v47  ;;  %v1410_v43 = vpop.f32.mrb[11].mxu0  ;;  %v1503_v36 = vsel %vm1471_vm11, %v1455_v32, %v1487_v34 }
 0x21c   : > { %v1456_v44 = vadd.f32 %v2545_v47, %v1410_v43  ;;  %v1502_v46 = vsel %vm1470_vm12, %v1454_v21, %v1486_v24  ;;  %1519 = vst.msk [vmem:[%s2555_s21 + $0x48] sm:$0xff] %vm539_vm0, %v1503_v36  ;;  %v1553_v52 = vsel %vm539_vm0, %v1503_v36, 0.0 }
 0x21d   : > { %v1489_v35 = vmul.f32 0.2, %v1457_v33  ;;  %1548 = vadd.xlane.f32.xlu1 %v1547_v45  ;;  %v1550_v48 = vsel %vm539_vm0, %v1502_v46, 0.0  ;;  %1518 = vst.msk [vmem:[%s2555_s21 + $0x40] sm:$0xff] %vm539_vm0, %v1502_v46  ;;  %vm1473_vm13 = vcmp.ge.f32.partialorder %v1457_v33, 0.0 }
 0x21e   : > { %v1488_v38 = vmul.f32 0.2, %v1456_v44  ;;  %1551 = vadd.xlane.f32.xlu0 %v1550_v48  ;;  %v2058_v49 = vpop.f32.mrb[12].mxu0  ;;  %vm1472_vm14 = vcmp.ge.f32.partialorder %v1456_v44, 0.0 }
 0x21f   : > { %v1459_v50 = vadd.f32 %v2058_v49, %v2545_v47  ;;  %v1420_v37 = vpop.f32.mrb[13].mxu0  ;;  %v1505_v51 = vsel %vm1473_vm13, %v1457_v33, %v1489_v35 }
 0x220   : > { %v1458_v40 = vadd.f32 %v2545_v47, %v1420_v37  ;;  %v1504_v53 = vsel %vm1472_vm14, %v1456_v44, %v1488_v38  ;;  %1521 = vst.msk [vmem:[%s2555_s21 + $0x58] sm:$0xff] %vm539_vm0, %v1505_v51  ;;  %v1559_v61 = vsel %vm539_vm0, %v1505_v51, 0.0 }
 0x221   : > { %v1491_v39 = vmul.f32 0.2, %v1459_v50  ;;  %1554 = vadd.xlane.f32.xlu1 %v1553_v52  ;;  %v1556_v54 = vsel %vm539_vm0, %v1504_v53, 0.0  ;;  %1520 = vst.msk [vmem:[%s2555_s21 + $0x50] sm:$0xff] %vm539_vm0, %v1504_v53  ;;  %vm1475_vm15 = vcmp.ge.f32.partialorder %v1459_v50, 0.0 }
 0x222   : > { %v1490_v55 = vmul.f32 0.2, %v1458_v40  ;;  %1557 = vadd.xlane.f32.xlu0 %v1556_v54  ;;  %v2061_v56 = vpop.f32.mrb[14].mxu0  ;;  %vm1474_vm1 = vcmp.ge.f32.partialorder %v1458_v40, 0.0 }
 0x223   : > { %v1461_v57 = vadd.f32 %v2061_v56, %v2545_v47  ;;  %v1430_v58 = vpop.f32.mrb[15].mxu0  ;;  %v1507_v59 = vsel %vm1475_vm15, %v1459_v50, %v1491_v39 }
 0x224   : > { %v1460_v60 = vadd.f32 %v2545_v47, %v1430_v58  ;;  %v1506_v62 = vsel %vm1474_vm1, %v1458_v40, %v1490_v55  ;;  %1523 = vst.msk [vmem:[%s2555_s21 + $0x68] sm:$0xff] %vm539_vm0, %v1507_v59  ;;  %v1565_v47 = vsel %vm539_vm0, %v1507_v59, 0.0 }
 0x225   : > { %v1493_v63 = vmul.f32 0.2, %v1461_v57  ;;  %1560 = vadd.xlane.f32.xlu1 %v1559_v61  ;;  %v1562_v0 = vsel %vm539_vm0, %v1506_v62, 0.0  ;;  %1522 = vst.msk [vmem:[%s2555_s21 + $0x60] sm:$0xff] %vm539_vm0, %v1506_v62  ;;  %vm1477_vm2 = vcmp.ge.f32.partialorder %v1461_v57, 0.0 }
 0x226   : > { %v1492_v1 = vmul.f32 0.2, %v1460_v60  ;;  %1563 = vadd.xlane.f32.xlu0 %v1562_v0  ;;  %vm1476_vm3 = vcmp.ge.f32.partialorder %v1460_v60, 0.0 }
 0x227   : > { %v1509_v26 = vsel %vm1477_vm2, %v1461_v57, %v1493_v63 }
 0x228   : > { %v1508_v2 = vsel %vm1476_vm3, %v1460_v60, %v1492_v1  ;;  %1525 = vst.msk [vmem:[%s2555_s21 + $0x78] sm:$0xff] %vm539_vm0, %v1509_v26  ;;  %v1571_v4 = vsel %vm539_vm0, %v1509_v26, 0.0 }
 0x229   : > { %1566 = vadd.xlane.f32.xlu1 %v1565_v47  ;;  %v1568_v3 = vsel %vm539_vm0, %v1508_v2, 0.0  ;;  %1524 = vst.msk [vmem:[%s2555_s21 + $0x70] sm:$0xff] %vm539_vm0, %v1508_v2 }
 0x22a   : > { %1569 = vadd.xlane.f32.xlu0 %v1568_v3 }
 0x22d   : > { %1572 = vadd.xlane.f32.xlu1 %v1571_v4 }
 0x29a   : > { %v1531_v5 = vpop.xlane.xlu0 %1530 }
 0x29b   : > { %1576 = vst.msk [vmem:[%s2624_s24 + $0x8] sm:$0xff] %vm1574_vm4, %v1531_v5 }
 0x29e   : > { %v1528_v6 = vpop.xlane.xlu0 %1527  ;;  %v1537_v41 = vpop.xlane.xlu1 %1536 }
 0x29f   : > { %1575 = vst.msk [vmem:[%s2624_s24] sm:$0xff] %vm1574_vm4, %v1528_v6  ;;  %1578 = vst.msk [vmem:[%s2624_s24 + $0x18] sm:$0xff] %vm1574_vm4, %v1537_v41 }
 0x2a2   : > { %v1534_v7 = vpop.xlane.xlu1 %1533 }
 0x2a3   : > { %1577 = vst.msk [vmem:[%s2624_s24 + $0x10] sm:$0xff] %vm1574_vm4, %v1534_v7  ;;  %v1540_v25 = vpop.xlane.xlu0 %1539 }
 0x2a4   : > { %1579 = vst.msk [vmem:[%s2624_s24 + $0x20] sm:$0xff] %vm1574_vm4, %v1540_v25 }
 0x2a6   : > { %v1543_v8 = vpop.xlane.xlu1 %1542 }
 0x2a7   : > { %1580 = vst.msk [vmem:[%s2624_s24 + $0x28] sm:$0xff] %vm1574_vm4, %v1543_v8  ;;  %v1546_v9 = vpop.xlane.xlu0 %1545 }
 0x2a8   : > { %1581 = vst.msk [vmem:[%s2624_s24 + $0x30] sm:$0xff] %vm1574_vm4, %v1546_v9 }
 0x2aa   : > { %v1549_v28 = vpop.xlane.xlu1 %1548 }
 0x2ab   : > { %1582 = vst.msk [vmem:[%s2624_s24 + $0x38] sm:$0xff] %vm1574_vm4, %v1549_v28  ;;  %v1552_v10 = vpop.xlane.xlu0 %1551 }
 0x2ac   : > { %1583 = vst.msk [vmem:[%s2624_s24 + $0x40] sm:$0xff] %vm1574_vm4, %v1552_v10 }
 0x2ae   : > { %v1555_v11 = vpop.xlane.xlu1 %1554 }
 0x2af   : > { %1584 = vst.msk [vmem:[%s2624_s24 + $0x48] sm:$0xff] %vm1574_vm4, %v1555_v11  ;;  %v1558_v12 = vpop.xlane.xlu0 %1557 }
 0x2b0   : > { %1585 = vst.msk [vmem:[%s2624_s24 + $0x50] sm:$0xff] %vm1574_vm4, %v1558_v12 }
 0x2b2   : > { %v1561_v27 = vpop.xlane.xlu1 %1560 }
 0x2b3   : > { %1586 = vst.msk [vmem:[%s2624_s24 + $0x58] sm:$0xff] %vm1574_vm4, %v1561_v27  ;;  %v1564_v13 = vpop.xlane.xlu0 %1563 }
 0x2b4   : > { %1587 = vst.msk [vmem:[%s2624_s24 + $0x60] sm:$0xff] %vm1574_vm4, %v1564_v13 }
 0x2b6   : > { %v1567_v14 = vpop.xlane.xlu1 %1566 }
 0x2b7   : > { %1588 = vst.msk [vmem:[%s2624_s24 + $0x68] sm:$0xff] %vm1574_vm4, %v1567_v14  ;;  %v1570_v30 = vpop.xlane.xlu0 %1569 }
 0x2b8   : > { %1589 = vst.msk [vmem:[%s2624_s24 + $0x70] sm:$0xff] %vm1574_vm4, %v1570_v30 }
 0x2ba   : > { %v1573_v15 = vpop.xlane.xlu1 %1572 }
 0x2bb   : > { %1590 = vst.msk [vmem:[%s2624_s24 + $0x78] sm:$0xff] %vm1574_vm4, %v1573_v15 }
 0x2bc PF: > { %s22_s17 = sadd.s32 1, %s2156_s17  }
 0x2bd   : > { %p19_p4 = scmp.ge.s32.totalorder %s22_s17, 6  }
 0x2bf   :  { %21 = sbr.rel (!%p19_p4) target bundleno = 1 (0x1), region = 114 }

// kernel: squeeze.0
= control target key start
LH: loop header
LB: loop body
LE: loop exit
PB: predicated region body
PF: predicated region fallthrough
CT: control target
= control target key end

     0   :  { %s284_s0 = inlined_call_operand.vmem [shape: f32[98], index: 0, kind: input, shape index: {}]   ;;  %s285_s1 = inlined_call_operand.hbm [shape: f32[2,1,7,7], index: 1, kind: output, shape index: {}]  }
   0x1   :  { %v5_v0 = vld [vmem:[%s284_s0] sm:$0x1] }
   0x2   :  { %6 = vst [vmem:[#allocation3] sm:$0x1] %v5_v0 }
   0x3   :  { %2 = vsyncpa [#allocation1], 0  ;;  %s231_s0 = smov 121   ;;  %s232_s8 = smov 107   ;;  %vm8_vm0 = vcmask 56320  }
   0x4   :  { %s233_s9 = smov 114   ;;  %s234_s10 = smov 100  }
   0x5   :  { %s235_s11 = smov 93   ;;  %s236_s12 = smov 86  }
   0x6   :  { %s237_s13 = smov 79   ;;  %s238_s14 = smov 72  }
   0x7   :  { %s239_s15 = smov 65   ;;  %s240_s16 = smov 58  }
   0x8   :  { %s241_s17 = smov 51   ;;  %s242_s18 = smov 44  }
   0x9   :  { %v10_v1 = vld [vmem:[#allocation3] sm:$0x1]   ;;  %s243_s19 = smov 37   ;;  %s244_s20 = smov [#allocation0]  }
   0xa   :  { %v22_v2 = vld [vmem:[#allocation3] sm:$0x1]   ;;  %11 = vrot.lane.b32.xlu0 %v10_v1, %s231_s0  ;;  %s175_s21 = sshll.u32 %s244_s20, 4  ;;  %s176_s21 = int_to_ptr.vmem [resolvable:$true] %s175_s21 }
   0xb   :  { %23 = vrot.lane.b32.xlu1 %v22_v2, %s232_s8  ;;  %v16_v3 = vld [vmem:[#allocation3] sm:$0x1]   ;;  %s207_s22 = scalar_lea.vmem %s176_s21, 224  ;;  %p212_p1 = scmp.lt.s32.totalorder %s176_s21, %s176_s21 }
   0xc   :  { %v28_v4 = vld [vmem:[#allocation3] sm:$0x1]   ;;  %p208_p0 = scmp.ne.s32.totalorder %s176_s21, %s207_s22  ;;  %p213_p2 = scmp.lt.s32.totalorder %s207_s22, %s207_s22 }
   0xd   :  { %v34_v5 = vld [vmem:[#allocation3] sm:$0x1]  }
   0xe   :  { %17 = vrot.lane.b32.xlu0 %v16_v3, %s233_s9  ;;  %v40_v6 = vld [vmem:[#allocation3] sm:$0x1]   ;;  %p214_p3 = por %p213_p2, %p212_p1 }
   0xf   :  { %29 = vrot.lane.b32.xlu1 %v28_v4, %s234_s10  ;;  %v46_v7 = vld [vmem:[#allocation3] sm:$0x1]  }
  0x10   :  { %v52_v8 = vld [vmem:[#allocation3] sm:$0x1]   ;;  %p215_p4 = pnand %p214_p3, %p208_p0 }
  0x11   :  { %v7_v9 = vld [vmem:[#allocation3] sm:$0x1]  }
  0x12   :  { %35 = vrot.lane.b32.xlu0 %v34_v5, %s235_s11  ;;  %9 = vst.msk [vmem:[#allocation2] sm:$0x1] %vm8_vm0, %v7_v9   ;;  %v58_v10 = vld [vmem:[#allocation3] sm:$0x1]  }
  0x13   :  { %41 = vrot.lane.b32.xlu1 %v40_v6, %s236_s12  ;;  %v64_v11 = vld [vmem:[#allocation3] sm:$0x1]  }
  0x14   :  { %v70_v12 = vld [vmem:[#allocation3] sm:$0x1]  }
  0x15   :  { %v76_v13 = vld [vmem:[#allocation3] sm:$0x1]  }
  0x16   :  { %47 = vrot.lane.b32.xlu0 %v46_v7, %s237_s13  ;;  %v82_v15 = vld [vmem:[#allocation3] sm:$0x1]  }
  0x17   :  { %53 = vrot.lane.b32.xlu1 %v52_v8, %s238_s14 }
  0x19   :  { %v91_v14 = vld [vmem:[#allocation2] sm:$0x1] }
  0x1a   :  { %59 = vrot.lane.b32.xlu0 %v58_v10, %s239_s15  ;;  %93 = vst [vmem:[#allocation0] sm:$0x1] %v91_v14 }
  0x1b   :  { %65 = vrot.lane.b32.xlu1 %v64_v11, %s240_s16 }
  0x1e   :  { %71 = vrot.lane.b32.xlu0 %v70_v12, %s241_s17 }
  0x1f   :  { %77 = vrot.lane.b32.xlu1 %v76_v13, %s242_s18 }
  0x22   :  { %83 = vrot.lane.b32.xlu0 %v82_v15, %s243_s19 }
  0x7c   :  { %v12_v16 = vpop.permute.xlu0 %11  }
  0x7d   :  { %v24_v17 = vpop.permute.xlu1 %23   ;;  %15 = vst.msk [vmem:[#allocation2 + $0x8] sm:$0x1] %vm8_vm0, %v12_v16  }
  0x7e   :  { %27 = vst.msk [vmem:[#allocation2 + $0x18] sm:$0x1] %vm8_vm0, %v24_v17  }
  0x80   :  { %v18_v18 = vpop.permute.xlu0 %17  }
  0x81   :  { %v30_v19 = vpop.permute.xlu1 %29   ;;  %21 = vst.msk [vmem:[#allocation2 + $0x10] sm:$0x1] %vm8_vm0, %v18_v18  }
  0x82   :  { %33 = vst.msk [vmem:[#allocation2 + $0x20] sm:$0x1] %vm8_vm0, %v30_v19  }
  0x84   :  { %v95_v20 = vld [vmem:[#allocation2 + $0x8] sm:$0x1]  ;;  %v36_v22 = vpop.permute.xlu0 %35  }
  0x85   :  { %v106_v21 = vld [vmem:[#allocation2 + $0x18] sm:$0x1]  ;;  %v42_v23 = vpop.permute.xlu1 %41   ;;  %98 = vst [vmem:[#allocation0 + $0x1] sm:$0x1] %v95_v20  ;;  %39 = vst.msk [vmem:[#allocation2 + $0x28] sm:$0x1] %vm8_vm0, %v36_v22  }
  0x86   :  { %110 = vst [vmem:[#allocation0 + $0x3] sm:$0x1] %v106_v21  ;;  %45 = vst.msk [vmem:[#allocation2 + $0x30] sm:$0x1] %vm8_vm0, %v42_v23  }
  0x88   :  { %v100_v24 = vld [vmem:[#allocation2 + $0x10] sm:$0x1]  ;;  %v48_v26 = vpop.permute.xlu0 %47  }
  0x89   :  { %v112_v25 = vld [vmem:[#allocation2 + $0x20] sm:$0x1]  ;;  %v54_v27 = vpop.permute.xlu1 %53   ;;  %104 = vst [vmem:[#allocation0 + $0x2] sm:$0x1] %v100_v24  ;;  %51 = vst.msk [vmem:[#allocation2 + $0x38] sm:$0x1] %vm8_vm0, %v48_v26  }
  0x8a   :  { %116 = vst [vmem:[#allocation0 + $0x4] sm:$0x1] %v112_v25  ;;  %57 = vst.msk [vmem:[#allocation2 + $0x40] sm:$0x1] %vm8_vm0, %v54_v27  }
  0x8c   :  { %v118_v28 = vld [vmem:[#allocation2 + $0x28] sm:$0x1]  ;;  %v60_v30 = vpop.permute.xlu0 %59  }
  0x8d   :  { %v124_v29 = vld [vmem:[#allocation2 + $0x30] sm:$0x1]  ;;  %v66_v31 = vpop.permute.xlu1 %65   ;;  %122 = vst [vmem:[#allocation0 + $0x5] sm:$0x1] %v118_v28  ;;  %63 = vst.msk [vmem:[#allocation2 + $0x48] sm:$0x1] %vm8_vm0, %v60_v30  }
  0x8e   :  { %128 = vst [vmem:[#allocation0 + $0x6] sm:$0x1] %v124_v29  ;;  %69 = vst.msk [vmem:[#allocation2 + $0x50] sm:$0x1] %vm8_vm0, %v66_v31  }
  0x90   :  { %v130_v32 = vld [vmem:[#allocation2 + $0x38] sm:$0x1]  ;;  %v72_v34 = vpop.permute.xlu0 %71  }
  0x91   :  { %v136_v33 = vld [vmem:[#allocation2 + $0x40] sm:$0x1]  ;;  %v78_v35 = vpop.permute.xlu1 %77   ;;  %134 = vst [vmem:[#allocation0 + $0x7] sm:$0x1] %v130_v32  ;;  %75 = vst.msk [vmem:[#allocation2 + $0x58] sm:$0x1] %vm8_vm0, %v72_v34  }
  0x92   :  { %140 = vst [vmem:[#allocation0 + $0x8] sm:$0x1] %v136_v33  ;;  %81 = vst.msk [vmem:[#allocation2 + $0x60] sm:$0x1] %vm8_vm0, %v78_v35  }
  0x94   :  { %v142_v36 = vld [vmem:[#allocation2 + $0x48] sm:$0x1]  ;;  %v84_v38 = vpop.permute.xlu0 %83  }
  0x95   :  { %v148_v37 = vld [vmem:[#allocation2 + $0x50] sm:$0x1]  ;;  %146 = vst [vmem:[#allocation0 + $0x9] sm:$0x1] %v142_v36  ;;  %87 = vst.msk [vmem:[#allocation2 + $0x68] sm:$0x1] %vm8_vm0, %v84_v38  }
  0x96   :  { %152 = vst [vmem:[#allocation0 + $0xa] sm:$0x1] %v148_v37 }
  0x98   :  { %v154_v39 = vld [vmem:[#allocation2 + $0x58] sm:$0x1] }
  0x99   :  { %v160_v40 = vld [vmem:[#allocation2 + $0x60] sm:$0x1]  ;;  %158 = vst [vmem:[#allocation0 + $0xb] sm:$0x1] %v154_v39 }
  0x9a   :  { %164 = vst [vmem:[#allocation0 + $0xc] sm:$0x1] %v160_v40 }
  0x9c   :  { %v166_v41 = vld [vmem:[#allocation2 + $0x68] sm:$0x1] }
  0x9d   :  { %170 = vst [vmem:[#allocation0 + $0xd] sm:$0x1] %v166_v41 }
  0x9e   :  { %218 = shalt.err (!%p215_p4)
}
  0x9f   :  { %s219_s25 = scalar_lea.hbm %s285_s1, 224 }
  0xa0   :  { %p220_p5 = scmp.ne.s32.totalorder %s285_s1, %s219_s25  ;;  %p223_p6 = scmp.lt.u32.totalorder %s219_s25, %s285_s1 }
  0xa2   :  { %p225_p7 = pnand %p223_p6, %p220_p5 }
  0xa4   :  { %228 = shalt.err (!%p225_p7)
}
  0xa5   :  { %178 = dma.vmem_to_hbm [thread:$0]  %s176_s21, 224, %s285_s1, [#allocation1]  }
  0xa6   :  { %229 = dma.done.wait [#allocation1], 224  }
  0xa7   :  { %230 = vsyncadd [#allocation1], 4294967072 }
  0xa8   :  { %180 = vsyncpa [#allocation1], 1 }

// kernel: discriminator_forward.13
= control target key start
LH: loop header
LB: loop body
LE: loop exit
PB: predicated region body
PF: predicated region fallthrough
CT: control target
= control target key end

     0   :  { %s1455_s9 = smov 0   ;;  %s1782_s0 = inlined_call_operand.vmem [shape: f32[5,98,1024], index: 0, kind: input, shape index: {}]   ;;  %s1783_s1 = inlined_call_operand.vmem [shape: f32[5,1024,1], index: 1, kind: input, shape index: {}]   ;;  %s1784_s2 = inlined_call_operand.vmem [shape: f32[5,98,1], index: 2, kind: output, shape index: {}]  }
   0x1 LB: > { %s998_s10 = sadd.s32 4294967295, %s1438_s9   ;;  %p1002_p0 = scmp.ge.s32.totalorder %s1438_s9, 1  ;;  %s1438_s9 = sphi %s1455_s9, %s12_s9  }
   0x2   : > { %p122_p1 = scmp.lt.s32.totalorder %s1438_s9, 6 }
   0x4   : > { %p123_p2 = pnand %p1002_p0, %p122_p1 }
   0x5   : > { %p149_p3 = scmp.lt.s32.totalorder (!%p123_p2), %s998_s10, 4  ;;  %vm916_vm0 = vcmask (!%p123_p2), 7168   ;;  %vm929_vm1 = vcmask (!%p123_p2), 1024  }
   0x6   : > { %126 = sbr.rel (%p123_p2) target bundleno = 372 (0x174), region = 28 }
   0xd   : > { %s1786_s10 = smov (!%p149_p3, %s998_s10), 4 }
   0xe   : > { %s1009_s11 = sshll.u32 %s1786_s10, 10  ;;  %s1422_s15 = smul.u32 832, %s1786_s10 }
   0xf   : > { %s1469_s14 = scalar_lea.vmem %s1783_s1, %s1009_s11  ;;  %s1423_s19 = smul.u32 104, %s1786_s10 }
  0x10   : > { %v284_v0 = vld [vmem:[%s1469_s14 + $0x80] sm:$0xff]  ;;  %v285_v1 = vld [vmem:[%s1469_s14 + $0x88] sm:$0xff]  ;;  %v286_v11 = vld [vmem:[%s1469_s14 + $0x90] sm:$0xff]  ;;  %s1525_s18 = scalar_lea.vmem %s1782_s0, %s1422_s15 }
  0x11   : > { %v316_v2 = vld [vmem:[%s1469_s14 + $0x180] sm:$0xff]  ;;  %v1294_v3 = vpack.c.bf16 %v285_v1, %v284_v0  ;;  %v317_v4 = vld [vmem:[%s1469_s14 + $0x188] sm:$0xff]  ;;  %v287_v13 = vld [vmem:[%s1469_s14 + $0x98] sm:$0xff]  ;;  %s1740_s22 = scalar_lea.vmem %s1784_s2, %s1423_s19 }
  0x12   : > { %v268_v5 = vld [vmem:[%s1469_s14] sm:$0xff]  ;;  %v269_v6 = vld [vmem:[%s1469_s14 + $0x8] sm:$0xff]  ;;  %v1326_v7 = vpack.c.bf16 %v317_v4, %v316_v2  ;;  %v318_v14 = vld [vmem:[%s1469_s14 + $0x190] sm:$0xff]  ;;  %v1298_v16 = vpack.c.bf16 %v287_v13, %v286_v11 }
  0x13   : > { %v1296_v8 = vpack.c.bf16 %v269_v6, %v268_v5  ;;  %v300_v9 = vld [vmem:[%s1469_s14 + $0x100] sm:$0xff]  ;;  %v301_v10 = vld [vmem:[%s1469_s14 + $0x108] sm:$0xff]  ;;  %1295 = vmatprep.subr.bf16.mxu0 %v1294_v3  ;;  %v319_v15 = vld [vmem:[%s1469_s14 + $0x198] sm:$0xff] }
  0x14   : > { %v1328_v12 = vpack.c.bf16 %v301_v10, %v300_v9  ;;  %1327 = vmatprep.subr.bf16.mxu1 %v1326_v7  ;;  %v1330_v17 = vpack.c.bf16 %v319_v15, %v318_v14  ;;  %v270_v18 = vld [vmem:[%s1469_s14 + $0x10] sm:$0xff]  ;;  %v271_v19 = vld [vmem:[%s1469_s14 + $0x18] sm:$0xff]  ;;  %v288_v23 = vld [vmem:[%s1469_s14 + $0xa0] sm:$0xff] }
  0x15   : > { %1297 = vmatpush3.bf16.msra.mxu0 %v1296_v8  ;;  %v302_v20 = vld [vmem:[%s1469_s14 + $0x110] sm:$0xff]  ;;  %v1300_v21 = vpack.c.bf16 %v271_v19, %v270_v18  ;;  %v303_v22 = vld [vmem:[%s1469_s14 + $0x118] sm:$0xff]  ;;  %v289_v24 = vld [vmem:[%s1469_s14 + $0xa8] sm:$0xff] }
  0x16   : > { %1329 = vmatpush3.bf16.msra.mxu1 %v1328_v12  ;;  %1299 = vmatprep.subr.bf16.mxu0 %v1298_v16  ;;  %v1332_v25 = vpack.c.bf16 %v303_v22, %v302_v20  ;;  %v1302_v26 = vpack.c.bf16 %v289_v24, %v288_v23  ;;  %v320_v27 = vld [vmem:[%s1469_s14 + $0x1a0] sm:$0xff]  ;;  %v321_v28 = vld [vmem:[%s1469_s14 + $0x1a8] sm:$0xff]  ;;  %v290_v35 = vld [vmem:[%s1469_s14 + $0xb0] sm:$0xff] }
  0x17   : > { %1331 = vmatprep.subr.bf16.mxu1 %v1330_v17  ;;  %v272_v29 = vld [vmem:[%s1469_s14 + $0x20] sm:$0xff]  ;;  %v1334_v30 = vpack.c.bf16 %v321_v28, %v320_v27  ;;  %v273_v31 = vld [vmem:[%s1469_s14 + $0x28] sm:$0xff]  ;;  %v291_v36 = vld [vmem:[%s1469_s14 + $0xb8] sm:$0xff] }
  0x18   : > { %v304_v32 = vld [vmem:[%s1469_s14 + $0x120] sm:$0xff]  ;;  %v305_v33 = vld [vmem:[%s1469_s14 + $0x128] sm:$0xff]  ;;  %v1304_v34 = vpack.c.bf16 %v273_v31, %v272_v29  ;;  %v322_v37 = vld [vmem:[%s1469_s14 + $0x1b0] sm:$0xff]  ;;  %v1306_v39 = vpack.c.bf16 %v291_v36, %v290_v35 }
  0x19   : > { %1301 = vmatpush3.bf16.msra.mxu0 %v1300_v21  ;;  %v1336_v38 = vpack.c.bf16 %v305_v33, %v304_v32  ;;  %v323_v40 = vld [vmem:[%s1469_s14 + $0x1b8] sm:$0xff]  ;;  %v274_v41 = vld [vmem:[%s1469_s14 + $0x30] sm:$0xff]  ;;  %v292_v46 = vld [vmem:[%s1469_s14 + $0xc0] sm:$0xff] }
  0x1a   : > { %1333 = vmatpush3.bf16.msra.mxu1 %v1332_v25  ;;  %1303 = vmatprep.subr.bf16.mxu0 %v1302_v26  ;;  %v275_v42 = vld [vmem:[%s1469_s14 + $0x38] sm:$0xff]  ;;  %v1338_v43 = vpack.c.bf16 %v323_v40, %v322_v37  ;;  %v306_v44 = vld [vmem:[%s1469_s14 + $0x130] sm:$0xff]  ;;  %v293_v47 = vld [vmem:[%s1469_s14 + $0xc8] sm:$0xff] }
  0x1b   : > { %1335 = vmatprep.subr.bf16.mxu1 %v1334_v30  ;;  %v307_v45 = vld [vmem:[%s1469_s14 + $0x138] sm:$0xff]  ;;  %v324_v48 = vld [vmem:[%s1469_s14 + $0x1c0] sm:$0xff]  ;;  %v325_v49 = vld [vmem:[%s1469_s14 + $0x1c8] sm:$0xff]  ;;  %v1308_v50 = vpack.c.bf16 %v275_v42, %v274_v41  ;;  %v1310_v52 = vpack.c.bf16 %v293_v47, %v292_v46 }
  0x1c   : > { %v1340_v51 = vpack.c.bf16 %v307_v45, %v306_v44  ;;  %v276_v53 = vld [vmem:[%s1469_s14 + $0x40] sm:$0xff]  ;;  %v277_v54 = vld [vmem:[%s1469_s14 + $0x48] sm:$0xff]  ;;  %v1342_v56 = vpack.c.bf16 %v325_v49, %v324_v48  ;;  %v294_v58 = vld [vmem:[%s1469_s14 + $0xd0] sm:$0xff] }
  0x1d   : > { %1305 = vmatpush3.bf16.msra.mxu0 %v1304_v34  ;;  %v308_v55 = vld [vmem:[%s1469_s14 + $0x140] sm:$0xff]  ;;  %v309_v57 = vld [vmem:[%s1469_s14 + $0x148] sm:$0xff]  ;;  %v295_v59 = vld [vmem:[%s1469_s14 + $0xd8] sm:$0xff]  ;;  %v1312_v62 = vpack.c.bf16 %v277_v54, %v276_v53 }
  0x1e   : > { %1337 = vmatpush3.bf16.msra.mxu1 %v1336_v38  ;;  %1307 = vmatprep.subr.bf16.mxu0 %v1306_v39  ;;  %v326_v60 = vld [vmem:[%s1469_s14 + $0x1d0] sm:$0xff]  ;;  %v327_v61 = vld [vmem:[%s1469_s14 + $0x1d8] sm:$0xff]  ;;  %v1344_v63 = vpack.c.bf16 %v309_v57, %v308_v55  ;;  %v1314_v0 = vpack.c.bf16 %v295_v59, %v294_v58  ;;  %v296_v6 = vld [vmem:[%s1469_s14 + $0xe0] sm:$0xff] }
  0x1f   : > { %1339 = vmatprep.subr.bf16.mxu1 %v1338_v43  ;;  %v278_v1 = vld [vmem:[%s1469_s14 + $0x50] sm:$0xff]  ;;  %v279_v2 = vld [vmem:[%s1469_s14 + $0x58] sm:$0xff]  ;;  %v1346_v4 = vpack.c.bf16 %v327_v61, %v326_v60  ;;  %v297_v7 = vld [vmem:[%s1469_s14 + $0xe8] sm:$0xff] }
  0x20   : > { %v310_v3 = vld [vmem:[%s1469_s14 + $0x150] sm:$0xff]  ;;  %v311_v5 = vld [vmem:[%s1469_s14 + $0x158] sm:$0xff]  ;;  %v328_v8 = vld [vmem:[%s1469_s14 + $0x1e0] sm:$0xff]  ;;  %v1316_v10 = vpack.c.bf16 %v279_v2, %v278_v1  ;;  %v1318_v14 = vpack.c.bf16 %v297_v7, %v296_v6 }
  0x21   : > { %1309 = vmatpush3.bf16.msra.mxu0 %v1308_v50  ;;  %v329_v9 = vld [vmem:[%s1469_s14 + $0x1e8] sm:$0xff]  ;;  %v280_v11 = vld [vmem:[%s1469_s14 + $0x60] sm:$0xff]  ;;  %v1348_v13 = vpack.c.bf16 %v311_v5, %v310_v3  ;;  %v167_v17 = vld [vmem:[%s1525_s18 + $0x18] sm:$0xff] }
  0x22   : > { %1341 = vmatpush3.bf16.msra.mxu1 %v1340_v51  ;;  %1311 = vmatprep.subr.bf16.mxu0 %v1310_v52  ;;  %v281_v12 = vld [vmem:[%s1469_s14 + $0x68] sm:$0xff]  ;;  %v312_v15 = vld [vmem:[%s1469_s14 + $0x160] sm:$0xff]  ;;  %v1350_v18 = vpack.c.bf16 %v329_v9, %v328_v8  ;;  %v298_v20 = vld [vmem:[%s1469_s14 + $0xf0] sm:$0xff] }
  0x23   : > { %1343 = vmatprep.subr.bf16.mxu1 %v1342_v56  ;;  %v165_v16 = vld [vmem:[%s1525_s18 + $0x8] sm:$0xff]  ;;  %v299_v21 = vld [vmem:[%s1469_s14 + $0xf8] sm:$0xff]  ;;  %v330_v22 = vld [vmem:[%s1469_s14 + $0x1f0] sm:$0xff]  ;;  %590 = vmatprep.mubr.f32.mxu1 %v167_v17  ;;  %v1320_v24 = vpack.c.bf16 %v281_v12, %v280_v11 }
  0x24   : > { %v313_v19 = vld [vmem:[%s1469_s14 + $0x168] sm:$0xff]  ;;  %460 = vmatprep.mubr.f32.mxu0 %v165_v16  ;;  %v331_v23 = vld [vmem:[%s1469_s14 + $0x1f8] sm:$0xff]  ;;  %v1322_v26 = vpack.c.bf16 %v299_v21, %v298_v20  ;;  %v282_v27 = vld [vmem:[%s1469_s14 + $0x70] sm:$0xff] }
  0x25   : > { %1313 = vmatpush3.bf16.msra.mxu0 %v1312_v62  ;;  %v1352_v25 = vpack.c.bf16 %v313_v19, %v312_v15  ;;  %v283_v28 = vld [vmem:[%s1469_s14 + $0x78] sm:$0xff]  ;;  %v314_v29 = vld [vmem:[%s1469_s14 + $0x170] sm:$0xff]  ;;  %v1354_v30 = vpack.c.bf16 %v331_v23, %v330_v22  ;;  %v348_v32 = vld [vmem:[%s1469_s14 + $0x280] sm:$0xff] }
  0x26   : > { %1345 = vmatpush3.bf16.msra.mxu1 %v1344_v63  ;;  %1315 = vmatprep.subr.bf16.mxu0 %v1314_v0  ;;  %v315_v31 = vld [vmem:[%s1469_s14 + $0x178] sm:$0xff]  ;;  %v349_v33 = vld [vmem:[%s1469_s14 + $0x288] sm:$0xff]  ;;  %v380_v34 = vld [vmem:[%s1469_s14 + $0x380] sm:$0xff]  ;;  %v1324_v36 = vpack.c.bf16 %v283_v28, %v282_v27 }
  0x27   : > { %1347 = vmatprep.subr.bf16.mxu1 %v1346_v4  ;;  %v381_v35 = vld [vmem:[%s1469_s14 + $0x388] sm:$0xff]  ;;  %v1356_v37 = vpack.c.bf16 %v315_v31, %v314_v29  ;;  %v1358_v38 = vpack.c.bf16 %v349_v33, %v348_v32  ;;  %v332_v39 = vld [vmem:[%s1469_s14 + $0x200] sm:$0xff]  ;;  %v350_v44 = vld [vmem:[%s1469_s14 + $0x290] sm:$0xff] }
  0x28   : > { %v333_v40 = vld [vmem:[%s1469_s14 + $0x208] sm:$0xff]  ;;  %v1390_v41 = vpack.c.bf16 %v381_v35, %v380_v34  ;;  %v364_v42 = vld [vmem:[%s1469_s14 + $0x300] sm:$0xff]  ;;  %v351_v45 = vld [vmem:[%s1469_s14 + $0x298] sm:$0xff] }
  0x29   : > { %1317 = vmatpush3.bf16.msra.mxu0 %v1316_v10  ;;  %v365_v43 = vld [vmem:[%s1469_s14 + $0x308] sm:$0xff]  ;;  %v164_v46 = vld [vmem:[%s1525_s18] sm:$0xff]  ;;  %v1360_v47 = vpack.c.bf16 %v333_v40, %v332_v39  ;;  %v382_v48 = vld [vmem:[%s1469_s14 + $0x390] sm:$0xff]  ;;  %v1362_v54 = vpack.c.bf16 %v351_v45, %v350_v44 }
  0x2a   : > { %1349 = vmatpush3.bf16.msra.mxu1 %v1348_v13  ;;  %1319 = vmatprep.subr.bf16.mxu0 %v1318_v14  ;;  %v383_v49 = vld [vmem:[%s1469_s14 + $0x398] sm:$0xff]  ;;  %v166_v50 = vld [vmem:[%s1525_s18 + $0x10] sm:$0xff]  ;;  %v173_v51 = vld [vmem:[%s1525_s18 + $0x48] sm:$0xff]  ;;  %v1392_v53 = vpack.c.bf16 %v365_v43, %v364_v42 }
  0x2b   : > { %1351 = vmatprep.subr.bf16.mxu1 %v1350_v18  ;;  %v175_v52 = vld [vmem:[%s1525_s18 + $0x58] sm:$0xff]  ;;  %v334_v55 = vld [vmem:[%s1469_s14 + $0x210] sm:$0xff]  ;;  %v1394_v58 = vpack.c.bf16 %v383_v49, %v382_v48  ;;  %v352_v60 = vld [vmem:[%s1469_s14 + $0x2a0] sm:$0xff] }
  0x2c   : > { %v335_v56 = vld [vmem:[%s1469_s14 + $0x218] sm:$0xff]  ;;  %v366_v57 = vld [vmem:[%s1469_s14 + $0x310] sm:$0xff]  ;;  %v353_v61 = vld [vmem:[%s1469_s14 + $0x2a8] sm:$0xff] }
  0x2d   : > { %1321 = vmatpush3.bf16.msra.mxu0 %v1320_v24  ;;  %v367_v59 = vld [vmem:[%s1469_s14 + $0x318] sm:$0xff]  ;;  %v172_v62 = vld [vmem:[%s1525_s18 + $0x40] sm:$0xff]  ;;  %v385_v0 = vld [vmem:[%s1469_s14 + $0x3a8] sm:$0xff]  ;;  %v1364_v4 = vpack.c.bf16 %v335_v56, %v334_v55  ;;  %v1366_v6 = vpack.c.bf16 %v353_v61, %v352_v60 }
  0x2e   : > { %1353 = vmatpush3.bf16.msra.mxu1 %v1352_v25  ;;  %1323 = vmatprep.subr.bf16.mxu0 %v1322_v26  ;;  %v384_v63 = vld [vmem:[%s1469_s14 + $0x3a0] sm:$0xff]  ;;  %v174_v1 = vld [vmem:[%s1525_s18 + $0x50] sm:$0xff]  ;;  %v181_v2 = vld [vmem:[%s1525_s18 + $0x88] sm:$0xff]  ;;  %v1396_v5 = vpack.c.bf16 %v367_v59, %v366_v57 }
  0x2f   : > { %1355 = vmatprep.subr.bf16.mxu1 %v1354_v30  ;;  %v183_v3 = vld [vmem:[%s1525_s18 + $0x98] sm:$0xff]  ;;  %v336_v7 = vld [vmem:[%s1469_s14 + $0x220] sm:$0xff]  ;;  %v337_v8 = vld [vmem:[%s1469_s14 + $0x228] sm:$0xff]  ;;  %v1398_v10 = vpack.c.bf16 %v385_v0, %v384_v63 }
  0x30   : > { %v368_v9 = vld [vmem:[%s1469_s14 + $0x320] sm:$0xff]  ;;  %v369_v11 = vld [vmem:[%s1469_s14 + $0x328] sm:$0xff]  ;;  %v354_v12 = vld [vmem:[%s1469_s14 + $0x2b0] sm:$0xff]  ;;  %v1368_v20 = vpack.c.bf16 %v337_v8, %v336_v7 }
  0x31   : > { %1325 = vmatpush3.bf16.msra.mxu0 %v1324_v36  ;;  %v355_v13 = vld [vmem:[%s1469_s14 + $0x2b8] sm:$0xff]  ;;  %v180_v14 = vld [vmem:[%s1525_s18 + $0x80] sm:$0xff]  ;;  %v386_v15 = vld [vmem:[%s1469_s14 + $0x3b0] sm:$0xff]  ;;  %v1400_v21 = vpack.c.bf16 %v369_v11, %v368_v9 }
  0x32   : > { %1357 = vmatpush3.bf16.msra.mxu1 %v1356_v37  ;;  %1359 = vmatprep.subr.bf16.mxu0 %v1358_v38  ;;  %v387_v16 = vld [vmem:[%s1469_s14 + $0x3b8] sm:$0xff]  ;;  %v182_v17 = vld [vmem:[%s1525_s18 + $0x90] sm:$0xff]  ;;  %v189_v18 = vld [vmem:[%s1525_s18 + $0xc8] sm:$0xff]  ;;  %v1370_v22 = vpack.c.bf16 %v355_v13, %v354_v12 }
  0x33   : > { %1391 = vmatprep.subr.bf16.mxu1 %v1390_v41  ;;  %v191_v19 = vld [vmem:[%s1525_s18 + $0xd8] sm:$0xff]  ;;  %v338_v23 = vld [vmem:[%s1469_s14 + $0x230] sm:$0xff]  ;;  %v1402_v26 = vpack.c.bf16 %v387_v16, %v386_v15  ;;  %v356_v28 = vld [vmem:[%s1469_s14 + $0x2c0] sm:$0xff] }
  0x34   : > { %461 = vmatmul.mubr.f32.vlgmr.msra.gmra.mrb[0].mxu0 %v164_v46  ;;  %v339_v24 = vld [vmem:[%s1469_s14 + $0x238] sm:$0xff]  ;;  %v370_v25 = vld [vmem:[%s1469_s14 + $0x330] sm:$0xff]  ;;  %v357_v29 = vld [vmem:[%s1469_s14 + $0x2c8] sm:$0xff] }
  0x35   : > { %591 = vmatmul.mubr.f32.vlgmr.msra.gmra.mrb[0].mxu1 %v166_v50  ;;  %1361 = vmatpush3.bf16.msra.mxu0 %v1360_v47  ;;  %v371_v27 = vld [vmem:[%s1469_s14 + $0x338] sm:$0xff]  ;;  %v188_v30 = vld [vmem:[%s1525_s18 + $0xc0] sm:$0xff]  ;;  %v389_v32 = vld [vmem:[%s1469_s14 + $0x3c8] sm:$0xff]  ;;  %v1372_v36 = vpack.c.bf16 %v339_v24, %v338_v23  ;;  %v1374_v38 = vpack.c.bf16 %v357_v29, %v356_v28 }
  0x36   : > { %465 = vmatprep.mubr.f32.mxu0 %v173_v51  ;;  %595 = vmatprep.mubr.f32.mxu1 %v175_v52  ;;  %v388_v31 = vld [vmem:[%s1469_s14 + $0x3c0] sm:$0xff]  ;;  %v190_v33 = vld [vmem:[%s1525_s18 + $0xd0] sm:$0xff]  ;;  %v197_v34 = vld [vmem:[%s1525_s18 + $0x108] sm:$0xff]  ;;  %v1404_v37 = vpack.c.bf16 %v371_v27, %v370_v25 }
  0x37   : > { %1393 = vmatpush3.bf16.msra.mxu1 %v1392_v53  ;;  %1363 = vmatprep.subr.bf16.mxu0 %v1362_v54  ;;  %v199_v35 = vld [vmem:[%s1525_s18 + $0x118] sm:$0xff]  ;;  %v340_v39 = vld [vmem:[%s1469_s14 + $0x240] sm:$0xff]  ;;  %v341_v40 = vld [vmem:[%s1469_s14 + $0x248] sm:$0xff]  ;;  %v1406_v42 = vpack.c.bf16 %v389_v32, %v388_v31 }
  0x38   : > { %466 = vmatmul.mubr.f32.gmra.mrb[2].mxu0 %v172_v62  ;;  %1395 = vmatprep.subr.bf16.mxu1 %v1394_v58  ;;  %v372_v41 = vld [vmem:[%s1469_s14 + $0x340] sm:$0xff]  ;;  %v373_v43 = vld [vmem:[%s1469_s14 + $0x348] sm:$0xff]  ;;  %v358_v44 = vld [vmem:[%s1469_s14 + $0x2d0] sm:$0xff]  ;;  %v1376_v51 = vpack.c.bf16 %v341_v40, %v340_v39 }
  0x39   : > { %596 = vmatmul.mubr.f32.gmra.mrb[2].mxu1 %v174_v1  ;;  %470 = vmatprep.mubr.f32.mxu0 %v181_v2  ;;  %v359_v45 = vld [vmem:[%s1469_s14 + $0x2d8] sm:$0xff]  ;;  %v196_v46 = vld [vmem:[%s1525_s18 + $0x100] sm:$0xff]  ;;  %v198_v47 = vld [vmem:[%s1525_s18 + $0x110] sm:$0xff]  ;;  %v1408_v53 = vpack.c.bf16 %v373_v43, %v372_v41 }
  0x3a   : > { %600 = vmatprep.mubr.f32.mxu1 %v183_v3  ;;  %1365 = vmatpush3.bf16.msra.mxu0 %v1364_v4  ;;  %v390_v48 = vld [vmem:[%s1469_s14 + $0x3d0] sm:$0xff]  ;;  %v205_v49 = vld [vmem:[%s1525_s18 + $0x148] sm:$0xff]  ;;  %v207_v50 = vld [vmem:[%s1525_s18 + $0x158] sm:$0xff]  ;;  %v1378_v54 = vpack.c.bf16 %v359_v45, %v358_v44 }
  0x3b   : > { %1397 = vmatpush3.bf16.msra.mxu1 %v1396_v5  ;;  %1367 = vmatprep.subr.bf16.mxu0 %v1366_v6  ;;  %v391_v52 = vld [vmem:[%s1469_s14 + $0x3d8] sm:$0xff]  ;;  %v342_v55 = vld [vmem:[%s1469_s14 + $0x250] sm:$0xff]  ;;  %v360_v60 = vld [vmem:[%s1469_s14 + $0x2e0] sm:$0xff] }
  0x3c   : > { %471 = vmatmul.mubr.f32.gmra.mrb[4].mxu0 %v180_v14  ;;  %1399 = vmatprep.subr.bf16.mxu1 %v1398_v10  ;;  %v343_v56 = vld [vmem:[%s1469_s14 + $0x258] sm:$0xff]  ;;  %v374_v57 = vld [vmem:[%s1469_s14 + $0x350] sm:$0xff]  ;;  %v1410_v58 = vpack.c.bf16 %v391_v52, %v390_v48  ;;  %v361_v61 = vld [vmem:[%s1469_s14 + $0x2e8] sm:$0xff] }
  0x3d   : > { %601 = vmatmul.mubr.f32.gmra.mrb[4].mxu1 %v182_v17  ;;  %475 = vmatprep.mubr.f32.mxu0 %v189_v18  ;;  %v375_v59 = vld [vmem:[%s1469_s14 + $0x358] sm:$0xff]  ;;  %v204_v62 = vld [vmem:[%s1525_s18 + $0x140] sm:$0xff]  ;;  %v206_v63 = vld [vmem:[%s1525_s18 + $0x150] sm:$0xff]  ;;  %v1380_v1 = vpack.c.bf16 %v343_v56, %v342_v55  ;;  %v1382_v6 = vpack.c.bf16 %v361_v61, %v360_v60 }
  0x3e   : > { %605 = vmatprep.mubr.f32.mxu1 %v191_v19  ;;  %1369 = vmatpush3.bf16.msra.mxu0 %v1368_v20  ;;  %v213_v0 = vld [vmem:[%s1525_s18 + $0x188] sm:$0xff]  ;;  %v392_v2 = vld [vmem:[%s1469_s14 + $0x3e0] sm:$0xff]  ;;  %v215_v4 = vld [vmem:[%s1525_s18 + $0x198] sm:$0xff]  ;;  %v1412_v5 = vpack.c.bf16 %v375_v59, %v374_v57 }
  0x3f   : > { %1401 = vmatpush3.bf16.msra.mxu1 %v1400_v21  ;;  %1371 = vmatprep.subr.bf16.mxu0 %v1370_v22  ;;  %v393_v3 = vld [vmem:[%s1469_s14 + $0x3e8] sm:$0xff]  ;;  %v344_v7 = vld [vmem:[%s1469_s14 + $0x260] sm:$0xff]  ;;  %v362_v13 = vld [vmem:[%s1469_s14 + $0x2f0] sm:$0xff] }
  0x40   : > { %476 = vmatmul.mubr.f32.gmra.mrb[6].mxu0 %v188_v30  ;;  %1403 = vmatprep.subr.bf16.mxu1 %v1402_v26  ;;  %v345_v8 = vld [vmem:[%s1469_s14 + $0x268] sm:$0xff]  ;;  %v1414_v9 = vpack.c.bf16 %v393_v3, %v392_v2  ;;  %v376_v10 = vld [vmem:[%s1469_s14 + $0x360] sm:$0xff]  ;;  %v363_v14 = vld [vmem:[%s1469_s14 + $0x2f8] sm:$0xff] }
  0x41   : > { %606 = vmatmul.mubr.f32.gmra.mrb[6].mxu1 %v190_v33  ;;  %480 = vmatprep.mubr.f32.mxu0 %v197_v34  ;;  %v377_v11 = vld [vmem:[%s1469_s14 + $0x368] sm:$0xff]  ;;  %v212_v12 = vld [vmem:[%s1525_s18 + $0x180] sm:$0xff]  ;;  %v214_v15 = vld [vmem:[%s1525_s18 + $0x190] sm:$0xff]  ;;  %v1384_v18 = vpack.c.bf16 %v345_v8, %v344_v7  ;;  %v1386_v20 = vpack.c.bf16 %v363_v14, %v362_v13 }
  0x42   : > { %610 = vmatprep.mubr.f32.mxu1 %v199_v35  ;;  %1373 = vmatpush3.bf16.msra.mxu0 %v1372_v36  ;;  %v221_v16 = vld [vmem:[%s1525_s18 + $0x1c8] sm:$0xff]  ;;  %v223_v17 = vld [vmem:[%s1525_s18 + $0x1d8] sm:$0xff]  ;;  %v1416_v19 = vpack.c.bf16 %v377_v11, %v376_v10  ;;  %v346_v21 = vld [vmem:[%s1469_s14 + $0x270] sm:$0xff] }
  0x43   : > { %1405 = vmatpush3.bf16.msra.mxu1 %v1404_v37  ;;  %1375 = vmatprep.subr.bf16.mxu0 %v1374_v38  ;;  %v347_v22 = vld [vmem:[%s1469_s14 + $0x278] sm:$0xff]  ;;  %v394_v23 = vld [vmem:[%s1469_s14 + $0x3f0] sm:$0xff]  ;;  %v220_v27 = vld [vmem:[%s1525_s18 + $0x1c0] sm:$0xff] }
  0x44   : > { %481 = vmatmul.mubr.f32.gmra.mrb[8].mxu0 %v196_v46  ;;  %1407 = vmatprep.subr.bf16.mxu1 %v1406_v42  ;;  %v395_v24 = vld [vmem:[%s1469_s14 + $0x3f8] sm:$0xff]  ;;  %v378_v25 = vld [vmem:[%s1469_s14 + $0x370] sm:$0xff]  ;;  %v229_v30 = vld [vmem:[%s1525_s18 + $0x208] sm:$0xff]  ;;  %v1388_v31 = vpack.c.bf16 %v347_v22, %v346_v21 }
  0x45   : > { %611 = vmatmul.mubr.f32.gmra.mrb[8].mxu1 %v198_v47  ;;  %485 = vmatprep.mubr.f32.mxu0 %v205_v49  ;;  %v379_v26 = vld [vmem:[%s1469_s14 + $0x378] sm:$0xff]  ;;  %v1418_v28 = vpack.c.bf16 %v395_v24, %v394_v23  ;;  %v222_v29 = vld [vmem:[%s1525_s18 + $0x1d0] sm:$0xff]  ;;  %v228_v34 = vld [vmem:[%s1525_s18 + $0x200] sm:$0xff] }
  0x46   : > { %615 = vmatprep.mubr.f32.mxu1 %v207_v50  ;;  %1377 = vmatpush3.bf16.msra.mxu0 %v1376_v51  ;;  %v231_v32 = vld [vmem:[%s1525_s18 + $0x218] sm:$0xff]  ;;  %v1420_v33 = vpack.c.bf16 %v379_v26, %v378_v25  ;;  %v230_v35 = vld [vmem:[%s1525_s18 + $0x210] sm:$0xff]  ;;  %v237_v36 = vld [vmem:[%s1525_s18 + $0x248] sm:$0xff] }
  0x47   : > { %1409 = vmatpush3.bf16.msra.mxu1 %v1408_v53  ;;  %1379 = vmatprep.subr.bf16.mxu0 %v1378_v54  ;;  %v239_v37 = vld [vmem:[%s1525_s18 + $0x258] sm:$0xff]  ;;  %v236_v38 = vld [vmem:[%s1525_s18 + $0x240] sm:$0xff]  ;;  %v238_v39 = vld [vmem:[%s1525_s18 + $0x250] sm:$0xff] }
  0x48   : > { %486 = vmatmul.mubr.f32.gmra.mrb[10].mxu0 %v204_v62  ;;  %1411 = vmatprep.subr.bf16.mxu1 %v1410_v58  ;;  %v245_v40 = vld [vmem:[%s1525_s18 + $0x288] sm:$0xff]  ;;  %v247_v41 = vld [vmem:[%s1525_s18 + $0x298] sm:$0xff]  ;;  %v244_v42 = vld [vmem:[%s1525_s18 + $0x280] sm:$0xff] }
  0x49   : > { %616 = vmatmul.mubr.f32.gmra.mrb[10].mxu1 %v206_v63  ;;  %490 = vmatprep.mubr.f32.mxu0 %v213_v0  ;;  %v246_v43 = vld [vmem:[%s1525_s18 + $0x290] sm:$0xff]  ;;  %v253_v44 = vld [vmem:[%s1525_s18 + $0x2c8] sm:$0xff]  ;;  %v255_v45 = vld [vmem:[%s1525_s18 + $0x2d8] sm:$0xff] }
  0x4a   : > { %620 = vmatprep.mubr.f32.mxu1 %v215_v4  ;;  %1381 = vmatpush3.bf16.msra.mxu0 %v1380_v1  ;;  %v252_v46 = vld [vmem:[%s1525_s18 + $0x2c0] sm:$0xff]  ;;  %v254_v47 = vld [vmem:[%s1525_s18 + $0x2d0] sm:$0xff]  ;;  %v261_v48 = vld [vmem:[%s1525_s18 + $0x308] sm:$0x3] }
  0x4b   : > { %1413 = vmatpush3.bf16.msra.mxu1 %v1412_v5  ;;  %1383 = vmatprep.subr.bf16.mxu0 %v1382_v6  ;;  %v263_v49 = vld [vmem:[%s1525_s18 + $0x318] sm:$0x3]  ;;  %v260_v50 = vld [vmem:[%s1525_s18 + $0x300] sm:$0x3]  ;;  %v262_v51 = vld [vmem:[%s1525_s18 + $0x310] sm:$0x3] }
  0x4c   : > { %491 = vmatmul.mubr.f32.gmra.mrb[12].mxu0 %v212_v12  ;;  %1415 = vmatprep.subr.bf16.mxu1 %v1414_v9  ;;  %v169_v52 = vld [vmem:[%s1525_s18 + $0x28] sm:$0xff]  ;;  %v171_v53 = vld [vmem:[%s1525_s18 + $0x38] sm:$0xff]  ;;  %v168_v54 = vld [vmem:[%s1525_s18 + $0x20] sm:$0xff] }
  0x4d   : > { %621 = vmatmul.mubr.f32.gmra.mrb[12].mxu1 %v214_v15  ;;  %495 = vmatprep.mubr.f32.mxu0 %v221_v16  ;;  %v170_v55 = vld [vmem:[%s1525_s18 + $0x30] sm:$0xff]  ;;  %v177_v56 = vld [vmem:[%s1525_s18 + $0x68] sm:$0xff]  ;;  %v179_v57 = vld [vmem:[%s1525_s18 + $0x78] sm:$0xff] }
  0x4e   : > { %625 = vmatprep.mubr.f32.mxu1 %v223_v17  ;;  %1385 = vmatpush3.bf16.msra.mxu0 %v1384_v18  ;;  %v176_v58 = vld [vmem:[%s1525_s18 + $0x60] sm:$0xff]  ;;  %v178_v59 = vld [vmem:[%s1525_s18 + $0x70] sm:$0xff]  ;;  %v185_v60 = vld [vmem:[%s1525_s18 + $0xa8] sm:$0xff] }
  0x4f   : > { %1417 = vmatpush3.bf16.msra.mxu1 %v1416_v19  ;;  %1387 = vmatprep.subr.bf16.mxu0 %v1386_v20  ;;  %v187_v61 = vld [vmem:[%s1525_s18 + $0xb8] sm:$0xff]  ;;  %v184_v62 = vld [vmem:[%s1525_s18 + $0xa0] sm:$0xff]  ;;  %v186_v63 = vld [vmem:[%s1525_s18 + $0xb0] sm:$0xff] }
  0x50   : > { %496 = vmatmul.mubr.f32.gmra.mrb[14].mxu0 %v220_v27  ;;  %1419 = vmatprep.subr.bf16.mxu1 %v1418_v28  ;;  %v193_v0 = vld [vmem:[%s1525_s18 + $0xe8] sm:$0xff]  ;;  %v195_v1 = vld [vmem:[%s1525_s18 + $0xf8] sm:$0xff]  ;;  %v192_v2 = vld [vmem:[%s1525_s18 + $0xe0] sm:$0xff] }
  0x51   : > { %626 = vmatmul.mubr.f32.gmra.mrb[14].mxu1 %v222_v29  ;;  %500 = vmatprep.mubr.f32.mxu0 %v229_v30  ;;  %v194_v3 = vld [vmem:[%s1525_s18 + $0xf0] sm:$0xff]  ;;  %v201_v4 = vld [vmem:[%s1525_s18 + $0x128] sm:$0xff]  ;;  %v203_v5 = vld [vmem:[%s1525_s18 + $0x138] sm:$0xff] }
  0x52   : > { %630 = vmatprep.mubr.f32.mxu1 %v231_v32  ;;  %1389 = vmatpush3.bf16.msra.mxu0 %v1388_v31  ;;  %v200_v6 = vld [vmem:[%s1525_s18 + $0x120] sm:$0xff]  ;;  %v202_v7 = vld [vmem:[%s1525_s18 + $0x130] sm:$0xff]  ;;  %v209_v8 = vld [vmem:[%s1525_s18 + $0x168] sm:$0xff] }
  0x53   : > { %1421 = vmatpush3.bf16.msra.mxu1 %v1420_v33  ;;  %v211_v9 = vld [vmem:[%s1525_s18 + $0x178] sm:$0xff]  ;;  %v208_v10 = vld [vmem:[%s1525_s18 + $0x160] sm:$0xff]  ;;  %v210_v11 = vld [vmem:[%s1525_s18 + $0x170] sm:$0xff] }
  0x54   : > { %501 = vmatmul.mubr.f32.gmra.mrb[16].mxu0 %v228_v34  ;;  %v217_v12 = vld [vmem:[%s1525_s18 + $0x1a8] sm:$0xff]  ;;  %v219_v13 = vld [vmem:[%s1525_s18 + $0x1b8] sm:$0xff]  ;;  %v216_v14 = vld [vmem:[%s1525_s18 + $0x1a0] sm:$0xff] }
  0x55   : > { %631 = vmatmul.mubr.f32.gmra.mrb[16].mxu1 %v230_v35  ;;  %505 = vmatprep.mubr.f32.mxu0 %v237_v36  ;;  %v218_v15 = vld [vmem:[%s1525_s18 + $0x1b0] sm:$0xff]  ;;  %v225_v16 = vld [vmem:[%s1525_s18 + $0x1e8] sm:$0xff]  ;;  %v227_v17 = vld [vmem:[%s1525_s18 + $0x1f8] sm:$0xff] }
  0x56   : > { %635 = vmatprep.mubr.f32.mxu1 %v239_v37  ;;  %v224_v18 = vld [vmem:[%s1525_s18 + $0x1e0] sm:$0xff]  ;;  %v226_v19 = vld [vmem:[%s1525_s18 + $0x1f0] sm:$0xff]  ;;  %v233_v20 = vld [vmem:[%s1525_s18 + $0x228] sm:$0xff] }
  0x57   : > { %v235_v21 = vld [vmem:[%s1525_s18 + $0x238] sm:$0xff]  ;;  %v232_v22 = vld [vmem:[%s1525_s18 + $0x220] sm:$0xff]  ;;  %v234_v23 = vld [vmem:[%s1525_s18 + $0x230] sm:$0xff] }
  0x58   : > { %506 = vmatmul.mubr.f32.gmra.mrb[18].mxu0 %v236_v38  ;;  %v241_v24 = vld [vmem:[%s1525_s18 + $0x268] sm:$0xff]  ;;  %v243_v25 = vld [vmem:[%s1525_s18 + $0x278] sm:$0xff]  ;;  %v240_v26 = vld [vmem:[%s1525_s18 + $0x260] sm:$0xff] }
  0x59   : > { %636 = vmatmul.mubr.f32.gmra.mrb[18].mxu1 %v238_v39  ;;  %510 = vmatprep.mubr.f32.mxu0 %v245_v40  ;;  %v242_v27 = vld [vmem:[%s1525_s18 + $0x270] sm:$0xff]  ;;  %v249_v28 = vld [vmem:[%s1525_s18 + $0x2a8] sm:$0xff]  ;;  %v251_v29 = vld [vmem:[%s1525_s18 + $0x2b8] sm:$0xff] }
  0x5a   : > { %640 = vmatprep.mubr.f32.mxu1 %v247_v41  ;;  %v248_v30 = vld [vmem:[%s1525_s18 + $0x2a0] sm:$0xff]  ;;  %v250_v31 = vld [vmem:[%s1525_s18 + $0x2b0] sm:$0xff]  ;;  %v257_v32 = vld [vmem:[%s1525_s18 + $0x2e8] sm:$0xff] }
  0x5b   : > { %v259_v33 = vld [vmem:[%s1525_s18 + $0x2f8] sm:$0xff]  ;;  %v256_v34 = vld [vmem:[%s1525_s18 + $0x2e0] sm:$0xff]  ;;  %v258_v35 = vld [vmem:[%s1525_s18 + $0x2f0] sm:$0xff] }
  0x5c   : > { %511 = vmatmul.mubr.f32.gmra.mrb[20].mxu0 %v244_v42  ;;  %v265_v36 = vld [vmem:[%s1525_s18 + $0x328] sm:$0x3]  ;;  %v267_v37 = vld [vmem:[%s1525_s18 + $0x338] sm:$0x3]  ;;  %v264_v38 = vld [vmem:[%s1525_s18 + $0x320] sm:$0x3] }
  0x5d   : > { %641 = vmatmul.mubr.f32.gmra.mrb[20].mxu1 %v246_v43  ;;  %515 = vmatprep.mubr.f32.mxu0 %v253_v44  ;;  %v266_v39 = vld [vmem:[%s1525_s18 + $0x330] sm:$0x3] }
  0x5e   : > { %645 = vmatprep.mubr.f32.mxu1 %v255_v45 }
  0x60   : > { %516 = vmatmul.mubr.f32.gmra.mrb[22].mxu0 %v252_v46 }
  0x61   : > { %646 = vmatmul.mubr.f32.gmra.mrb[22].mxu1 %v254_v47  ;;  %520 = vmatprep.mubr.f32.mxu0 %v261_v48 }
  0x62   : > { %650 = vmatprep.mubr.f32.mxu1 %v263_v49 }
  0x64   : > { %521 = vmatmul.mubr.f32.gmra.mrb[24].mxu0 %v260_v50 }
  0x65   : > { %651 = vmatmul.mubr.f32.gmra.mrb[24].mxu1 %v262_v51  ;;  %720 = vmatprep.mubr.f32.mxu0 %v169_v52 }
  0x66   : > { %850 = vmatprep.mubr.f32.mxu1 %v171_v53 }
  0x68   : > { %721 = vmatmul.mubr.f32.vlgmr.msra.gmra.mrb[26].mxu0 %v168_v54 }
  0x69   : > { %851 = vmatmul.mubr.f32.vlgmr.msra.gmra.mrb[26].mxu1 %v170_v55  ;;  %725 = vmatprep.mubr.f32.mxu0 %v177_v56 }
  0x6a   : > { %855 = vmatprep.mubr.f32.mxu1 %v179_v57 }
  0x6c   : > { %726 = vmatmul.mubr.f32.gmra.mrb[28].mxu0 %v176_v58 }
  0x6d   : > { %856 = vmatmul.mubr.f32.gmra.mrb[28].mxu1 %v178_v59  ;;  %730 = vmatprep.mubr.f32.mxu0 %v185_v60 }
  0x6e   : > { %860 = vmatprep.mubr.f32.mxu1 %v187_v61 }
  0x70   : > { %731 = vmatmul.mubr.f32.gmra.mrb[30].mxu0 %v184_v62 }
  0x71   : > { %861 = vmatmul.mubr.f32.gmra.mrb[30].mxu1 %v186_v63  ;;  %735 = vmatprep.mubr.f32.mxu0 %v193_v0 }
  0x72   : > { %865 = vmatprep.mubr.f32.mxu1 %v195_v1 }
  0x74   : > { %736 = vmatmul.mubr.f32.gmra.mrb[32].mxu0 %v192_v2 }
  0x75   : > { %866 = vmatmul.mubr.f32.gmra.mrb[32].mxu1 %v194_v3  ;;  %740 = vmatprep.mubr.f32.mxu0 %v201_v4 }
  0x76   : > { %870 = vmatprep.mubr.f32.mxu1 %v203_v5 }
  0x78   : > { %741 = vmatmul.mubr.f32.gmra.mrb[34].mxu0 %v200_v6 }
  0x79   : > { %871 = vmatmul.mubr.f32.gmra.mrb[34].mxu1 %v202_v7  ;;  %745 = vmatprep.mubr.f32.mxu0 %v209_v8 }
  0x7a   : > { %875 = vmatprep.mubr.f32.mxu1 %v211_v9 }
  0x7c   : > { %746 = vmatmul.mubr.f32.gmra.mrb[36].mxu0 %v208_v10 }
  0x7d   : > { %876 = vmatmul.mubr.f32.gmra.mrb[36].mxu1 %v210_v11  ;;  %750 = vmatprep.mubr.f32.mxu0 %v217_v12 }
  0x7e   : > { %880 = vmatprep.mubr.f32.mxu1 %v219_v13 }
  0x80   : > { %751 = vmatmul.mubr.f32.gmra.mrb[38].mxu0 %v216_v14 }
  0x81   : > { %881 = vmatmul.mubr.f32.gmra.mrb[38].mxu1 %v218_v15  ;;  %755 = vmatprep.mubr.f32.mxu0 %v225_v16 }
  0x82   : > { %885 = vmatprep.mubr.f32.mxu1 %v227_v17 }
  0x84   : > { %756 = vmatmul.mubr.f32.gmra.mrb[40].mxu0 %v224_v18 }
  0x85   : > { %886 = vmatmul.mubr.f32.gmra.mrb[40].mxu1 %v226_v19  ;;  %760 = vmatprep.mubr.f32.mxu0 %v233_v20 }
  0x86   : > { %890 = vmatprep.mubr.f32.mxu1 %v235_v21 }
  0x88   : > { %761 = vmatmul.mubr.f32.gmra.mrb[42].mxu0 %v232_v22 }
  0x89   : > { %891 = vmatmul.mubr.f32.gmra.mrb[42].mxu1 %v234_v23  ;;  %765 = vmatprep.mubr.f32.mxu0 %v241_v24 }
  0x8a   : > { %895 = vmatprep.mubr.f32.mxu1 %v243_v25 }
  0x8c   : > { %766 = vmatmul.mubr.f32.gmra.mrb[44].mxu0 %v240_v26 }
  0x8d   : > { %896 = vmatmul.mubr.f32.gmra.mrb[44].mxu1 %v242_v27  ;;  %770 = vmatprep.mubr.f32.mxu0 %v249_v28 }
  0x8e   : > { %900 = vmatprep.mubr.f32.mxu1 %v251_v29 }
  0x90   : > { %771 = vmatmul.mubr.f32.gmra.mrb[46].mxu0 %v248_v30 }
  0x91   : > { %901 = vmatmul.mubr.f32.gmra.mrb[46].mxu1 %v250_v31  ;;  %775 = vmatprep.mubr.f32.mxu0 %v257_v32 }
  0x92   : > { %905 = vmatprep.mubr.f32.mxu1 %v259_v33 }
  0x94   : > { %776 = vmatmul.mubr.f32.gmra.mrb[48].mxu0 %v256_v34 }
  0x95   : > { %906 = vmatmul.mubr.f32.gmra.mrb[48].mxu1 %v258_v35  ;;  %780 = vmatprep.mubr.f32.mxu0 %v265_v36 }
  0x96   : > { %910 = vmatprep.mubr.f32.mxu1 %v267_v37 }
  0x98   : > { %781 = vmatmul.mubr.f32.gmra.mrb[50].mxu0 %v264_v38 }
  0x99   : > { %911 = vmatmul.mubr.f32.gmra.mrb[50].mxu1 %v266_v39 }
 0x107   : > { %v1042_v40 = vpop.f32.mrb[0].mxu0 }
 0x108   : > { %v1113_v41 = vpop.f32.mrb[0].mxu1  ;;  %v1043_v42 = vpop.f32.mrb[1].mxu0 }
 0x109   : > { %v1044_v43 = vadd.f32 %v1043_v42, %v1042_v40  ;;  %v1114_v44 = vpop.f32.mrb[1].mxu1 }
 0x10a   : > { %v1115_v45 = vadd.f32 %v1114_v44, %v1113_v41 }
 0x10b   : > { %v1045_v46 = vpop.f32.mrb[2].mxu0 }
 0x10c   : > { %v1709_v47 = vadd.f32 %v1115_v45, %v1044_v43  ;;  %v1116_v48 = vpop.f32.mrb[2].mxu1  ;;  %v1046_v49 = vpop.f32.mrb[3].mxu0 }
 0x10d   : > { %v1047_v50 = vadd.f32 %v1046_v49, %v1045_v46  ;;  %v1117_v51 = vpop.f32.mrb[3].mxu1 }
 0x10e   : > { %v1118_v52 = vadd.f32 %v1117_v51, %v1116_v48 }
 0x10f   : > { %v1048_v53 = vpop.f32.mrb[4].mxu0 }
 0x110   : > { %v1711_v54 = vadd.f32 %v1118_v52, %v1047_v50  ;;  %v1119_v55 = vpop.f32.mrb[4].mxu1  ;;  %v1049_v56 = vpop.f32.mrb[5].mxu0 }
 0x111   : > { %v1050_v57 = vadd.f32 %v1049_v56, %v1048_v53  ;;  %v1120_v58 = vpop.f32.mrb[5].mxu1 }
 0x112   : > { %v1121_v59 = vadd.f32 %v1120_v58, %v1119_v55 }
 0x113   : > { %v1051_v60 = vpop.f32.mrb[6].mxu0 }
 0x114   : > { %v1713_v61 = vadd.f32 %v1121_v59, %v1050_v57  ;;  %v1122_v62 = vpop.f32.mrb[6].mxu1  ;;  %v1052_v63 = vpop.f32.mrb[7].mxu0 }
 0x115   : > { %v1053_v0 = vadd.f32 %v1052_v63, %v1051_v60  ;;  %v1123_v1 = vpop.f32.mrb[7].mxu1 }
 0x116   : > { %v1124_v2 = vadd.f32 %v1123_v1, %v1122_v62 }
 0x117   : > { %v1054_v3 = vpop.f32.mrb[8].mxu0 }
 0x118   : > { %v1715_v4 = vadd.f32 %v1124_v2, %v1053_v0  ;;  %v1125_v5 = vpop.f32.mrb[8].mxu1  ;;  %v1055_v6 = vpop.f32.mrb[9].mxu0 }
 0x119   : > { %v1056_v7 = vadd.f32 %v1055_v6, %v1054_v3  ;;  %v1126_v8 = vpop.f32.mrb[9].mxu1 }
 0x11a   : > { %v1127_v9 = vadd.f32 %v1126_v8, %v1125_v5 }
 0x11b   : > { %v1057_v10 = vpop.f32.mrb[10].mxu0 }
 0x11c   : > { %v1717_v11 = vadd.f32 %v1127_v9, %v1056_v7  ;;  %v1128_v12 = vpop.f32.mrb[10].mxu1  ;;  %v1058_v13 = vpop.f32.mrb[11].mxu0 }
 0x11d   : > { %v1059_v14 = vadd.f32 %v1058_v13, %v1057_v10  ;;  %v1129_v15 = vpop.f32.mrb[11].mxu1 }
 0x11e   : > { %v1130_v16 = vadd.f32 %v1129_v15, %v1128_v12 }
 0x11f   : > { %v1060_v17 = vpop.f32.mrb[12].mxu0 }
 0x120   : > { %v1719_v18 = vadd.f32 %v1130_v16, %v1059_v14  ;;  %v1131_v19 = vpop.f32.mrb[12].mxu1  ;;  %v1061_v20 = vpop.f32.mrb[13].mxu0 }
 0x121   : > { %v1062_v21 = vadd.f32 %v1061_v20, %v1060_v17  ;;  %v1132_v22 = vpop.f32.mrb[13].mxu1 }
 0x122   : > { %v1133_v23 = vadd.f32 %v1132_v22, %v1131_v19 }
 0x123   : > { %v1063_v24 = vpop.f32.mrb[14].mxu0 }
 0x124   : > { %v1721_v25 = vadd.f32 %v1133_v23, %v1062_v21  ;;  %v1134_v26 = vpop.f32.mrb[14].mxu1  ;;  %v1064_v27 = vpop.f32.mrb[15].mxu0 }
 0x125   : > { %v1065_v28 = vadd.f32 %v1064_v27, %v1063_v24  ;;  %v1135_v29 = vpop.f32.mrb[15].mxu1 }
 0x126   : > { %v1136_v30 = vadd.f32 %v1135_v29, %v1134_v26 }
 0x127   : > { %v1066_v31 = vpop.f32.mrb[16].mxu0 }
 0x128   : > { %v1723_v32 = vadd.f32 %v1136_v30, %v1065_v28  ;;  %v1137_v33 = vpop.f32.mrb[16].mxu1  ;;  %v1067_v34 = vpop.f32.mrb[17].mxu0 }
 0x129   : > { %v1068_v35 = vadd.f32 %v1067_v34, %v1066_v31  ;;  %v1138_v36 = vpop.f32.mrb[17].mxu1 }
 0x12a   : > { %v1139_v37 = vadd.f32 %v1138_v36, %v1137_v33 }
 0x12b   : > { %v1069_v38 = vpop.f32.mrb[18].mxu0 }
 0x12c   : > { %v1725_v39 = vadd.f32 %v1139_v37, %v1068_v35  ;;  %v1140_v40 = vpop.f32.mrb[18].mxu1  ;;  %v1070_v41 = vpop.f32.mrb[19].mxu0 }
 0x12d   : > { %v1071_v42 = vadd.f32 %v1070_v41, %v1069_v38  ;;  %v1141_v43 = vpop.f32.mrb[19].mxu1 }
 0x12e   : > { %v1142_v44 = vadd.f32 %v1141_v43, %v1140_v40 }
 0x12f   : > { %v1072_v45 = vpop.f32.mrb[20].mxu0 }
 0x130   : > { %v1727_v46 = vadd.f32 %v1142_v44, %v1071_v42  ;;  %v1143_v48 = vpop.f32.mrb[20].mxu1  ;;  %v1073_v49 = vpop.f32.mrb[21].mxu0 }
 0x131   : > { %v1074_v50 = vadd.f32 %v1073_v49, %v1072_v45  ;;  %v1144_v51 = vpop.f32.mrb[21].mxu1 }
 0x132   : > { %v1145_v52 = vadd.f32 %v1144_v51, %v1143_v48 }
 0x133   : > { %v1075_v53 = vpop.f32.mrb[22].mxu0 }
 0x134   : > { %v1729_v55 = vadd.f32 %v1145_v52, %v1074_v50  ;;  %v1146_v56 = vpop.f32.mrb[22].mxu1  ;;  %v1076_v57 = vpop.f32.mrb[23].mxu0 }
 0x135   : > { %v1077_v58 = vadd.f32 %v1076_v57, %v1075_v53  ;;  %v1147_v59 = vpop.f32.mrb[23].mxu1 }
 0x136   : > { %v1148_v60 = vadd.f32 %v1147_v59, %v1146_v56 }
 0x137   : > { %v1078_v62 = vpop.f32.mrb[24].mxu0 }
 0x138   : > { %v1731_v63 = vadd.f32 %v1148_v60, %v1077_v58  ;;  %v1149_v0 = vpop.f32.mrb[24].mxu1  ;;  %v1079_v1 = vpop.f32.mrb[25].mxu0 }
 0x139   : > { %v1080_v2 = vadd.f32 %v1079_v1, %v1078_v62  ;;  %v1150_v3 = vpop.f32.mrb[25].mxu1 }
 0x13a   : > { %v1151_v5 = vadd.f32 %v1150_v3, %v1149_v0 }
 0x13b   : > { %v1184_v6 = vpop.f32.mrb[26].mxu0 }
 0x13c   : > { %v1733_v7 = vadd.f32 %v1151_v5, %v1080_v2  ;;  %v1185_v8 = vpop.f32.mrb[27].mxu0  ;;  %v1255_v9 = vpop.f32.mrb[26].mxu1 }
 0x13d   : > { %v1186_v10 = vadd.f32 %v1185_v8, %v1184_v6  ;;  %v1256_v12 = vpop.f32.mrb[27].mxu1 }
 0x13e   : > { %v1257_v13 = vadd.f32 %v1256_v12, %v1255_v9 }
 0x13f   : > { %v723_v14 = vadd.f32 %v1186_v10, %v1709_v47  ;;  %v1187_v15 = vpop.f32.mrb[28].mxu0 }
 0x140   : > { %v1188_v16 = vpop.f32.mrb[29].mxu0  ;;  %v1258_v17 = vpop.f32.mrb[28].mxu1 }
 0x141   : > { %v853_v19 = vadd.f32 %v1257_v13, %v723_v14  ;;  %v1189_v20 = vadd.f32 %v1188_v16, %v1187_v15  ;;  %v1259_v21 = vpop.f32.mrb[29].mxu1 }
 0x142   : > { %v1260_v22 = vadd.f32 %v1259_v21, %v1258_v17 }
 0x143   : > { %917 = vst.msk [vmem:[%s1740_s22] sm:$0xff] %vm916_vm0, %v853_v19  ;;  %v728_v23 = vadd.f32 %v1189_v20, %v1711_v54  ;;  %v1190_v47 = vpop.f32.mrb[30].mxu0 }
 0x144   : > { %v1191_v24 = vpop.f32.mrb[31].mxu0  ;;  %v1261_v26 = vpop.f32.mrb[30].mxu1 }
 0x145   : > { %v858_v27 = vadd.f32 %v1260_v22, %v728_v23  ;;  %v1192_v28 = vadd.f32 %v1191_v24, %v1190_v47  ;;  %v1262_v29 = vpop.f32.mrb[31].mxu1 }
 0x146   : > { %v1263_v30 = vadd.f32 %v1262_v29, %v1261_v26 }
 0x147   : > { %918 = vst.msk [vmem:[%s1740_s22 + $0x8] sm:$0xff] %vm916_vm0, %v858_v27  ;;  %v733_v31 = vadd.f32 %v1192_v28, %v1713_v61  ;;  %v1193_v33 = vpop.f32.mrb[32].mxu0 }
 0x148   : > { %v1194_v34 = vpop.f32.mrb[33].mxu0  ;;  %v1264_v35 = vpop.f32.mrb[32].mxu1 }
 0x149   : > { %v863_v36 = vadd.f32 %v1263_v30, %v733_v31  ;;  %v1195_v37 = vadd.f32 %v1194_v34, %v1193_v33  ;;  %v1265_v38 = vpop.f32.mrb[33].mxu1 }
 0x14a   : > { %v1266_v54 = vadd.f32 %v1265_v38, %v1264_v35 }
 0x14b   : > { %919 = vst.msk [vmem:[%s1740_s22 + $0x10] sm:$0xff] %vm916_vm0, %v863_v36  ;;  %v738_v40 = vadd.f32 %v1195_v37, %v1715_v4  ;;  %v1196_v41 = vpop.f32.mrb[34].mxu0 }
 0x14c   : > { %v1197_v42 = vpop.f32.mrb[35].mxu0  ;;  %v1267_v43 = vpop.f32.mrb[34].mxu1 }
 0x14d   : > { %v868_v44 = vadd.f32 %v1266_v54, %v738_v40  ;;  %v1198_v45 = vadd.f32 %v1197_v42, %v1196_v41  ;;  %v1268_v48 = vpop.f32.mrb[35].mxu1 }
 0x14e   : > { %v1269_v61 = vadd.f32 %v1268_v48, %v1267_v43 }
 0x14f   : > { %920 = vst.msk [vmem:[%s1740_s22 + $0x18] sm:$0xff] %vm916_vm0, %v868_v44  ;;  %v743_v49 = vadd.f32 %v1198_v45, %v1717_v11  ;;  %v1199_v50 = vpop.f32.mrb[36].mxu0 }
 0x150   : > { %v1200_v51 = vpop.f32.mrb[37].mxu0  ;;  %v1270_v52 = vpop.f32.mrb[36].mxu1 }
 0x151   : > { %v873_v53 = vadd.f32 %v1269_v61, %v743_v49  ;;  %v1201_v56 = vadd.f32 %v1200_v51, %v1199_v50  ;;  %v1271_v57 = vpop.f32.mrb[37].mxu1 }
 0x152   : > { %v1272_v4 = vadd.f32 %v1271_v57, %v1270_v52 }
 0x153   : > { %921 = vst.msk [vmem:[%s1740_s22 + $0x20] sm:$0xff] %vm916_vm0, %v873_v53  ;;  %v748_v58 = vadd.f32 %v1201_v56, %v1719_v18  ;;  %v1202_v59 = vpop.f32.mrb[38].mxu0 }
 0x154   : > { %v1203_v60 = vpop.f32.mrb[39].mxu0  ;;  %v1273_v62 = vpop.f32.mrb[38].mxu1 }
 0x155   : > { %v878_v0 = vadd.f32 %v1272_v4, %v748_v58  ;;  %v1204_v1 = vadd.f32 %v1203_v60, %v1202_v59  ;;  %v1274_v2 = vpop.f32.mrb[39].mxu1 }
 0x156   : > { %v1275_v11 = vadd.f32 %v1274_v2, %v1273_v62 }
 0x157   : > { %922 = vst.msk [vmem:[%s1740_s22 + $0x28] sm:$0xff] %vm916_vm0, %v878_v0  ;;  %v753_v3 = vadd.f32 %v1204_v1, %v1721_v25  ;;  %v1205_v5 = vpop.f32.mrb[40].mxu0 }
 0x158   : > { %v1206_v6 = vpop.f32.mrb[41].mxu0  ;;  %v1276_v8 = vpop.f32.mrb[40].mxu1 }
 0x159   : > { %v883_v9 = vadd.f32 %v1275_v11, %v753_v3  ;;  %v1207_v10 = vadd.f32 %v1206_v6, %v1205_v5  ;;  %v1277_v12 = vpop.f32.mrb[41].mxu1 }
 0x15a   : > { %v1278_v18 = vadd.f32 %v1277_v12, %v1276_v8 }
 0x15b   : > { %923 = vst.msk [vmem:[%s1740_s22 + $0x30] sm:$0xff] %vm916_vm0, %v883_v9  ;;  %v758_v13 = vadd.f32 %v1207_v10, %v1723_v32  ;;  %v1208_v14 = vpop.f32.mrb[42].mxu0 }
 0x15c   : > { %v1209_v15 = vpop.f32.mrb[43].mxu0  ;;  %v1279_v16 = vpop.f32.mrb[42].mxu1 }
 0x15d   : > { %v888_v17 = vadd.f32 %v1278_v18, %v758_v13  ;;  %v1210_v19 = vadd.f32 %v1209_v15, %v1208_v14  ;;  %v1280_v20 = vpop.f32.mrb[43].mxu1 }
 0x15e   : > { %v1281_v25 = vadd.f32 %v1280_v20, %v1279_v16 }
 0x15f   : > { %924 = vst.msk [vmem:[%s1740_s22 + $0x38] sm:$0xff] %vm916_vm0, %v888_v17  ;;  %v763_v21 = vadd.f32 %v1210_v19, %v1725_v39  ;;  %v1211_v22 = vpop.f32.mrb[44].mxu0 }
 0x160   : > { %v1212_v23 = vpop.f32.mrb[45].mxu0  ;;  %v1282_v47 = vpop.f32.mrb[44].mxu1 }
 0x161   : > { %v893_v24 = vadd.f32 %v1281_v25, %v763_v21  ;;  %v1213_v26 = vadd.f32 %v1212_v23, %v1211_v22  ;;  %v1283_v27 = vpop.f32.mrb[45].mxu1 }
 0x162   : > { %v1284_v32 = vadd.f32 %v1283_v27, %v1282_v47 }
 0x163   : > { %925 = vst.msk [vmem:[%s1740_s22 + $0x40] sm:$0xff] %vm916_vm0, %v893_v24  ;;  %v768_v28 = vadd.f32 %v1213_v26, %v1727_v46  ;;  %v1214_v29 = vpop.f32.mrb[46].mxu0 }
 0x164   : > { %v1215_v30 = vpop.f32.mrb[47].mxu0  ;;  %v1285_v31 = vpop.f32.mrb[46].mxu1 }
 0x165   : > { %v898_v33 = vadd.f32 %v1284_v32, %v768_v28  ;;  %v1216_v34 = vadd.f32 %v1215_v30, %v1214_v29  ;;  %v1286_v35 = vpop.f32.mrb[47].mxu1 }
 0x166   : > { %v1287_v39 = vadd.f32 %v1286_v35, %v1285_v31 }
 0x167   : > { %926 = vst.msk [vmem:[%s1740_s22 + $0x48] sm:$0xff] %vm916_vm0, %v898_v33  ;;  %v773_v36 = vadd.f32 %v1216_v34, %v1729_v55  ;;  %v1217_v37 = vpop.f32.mrb[48].mxu0 }
 0x168   : > { %v1218_v38 = vpop.f32.mrb[49].mxu0  ;;  %v1288_v54 = vpop.f32.mrb[48].mxu1 }
 0x169   : > { %v903_v40 = vadd.f32 %v1287_v39, %v773_v36  ;;  %v1219_v41 = vadd.f32 %v1218_v38, %v1217_v37  ;;  %v1289_v46 = vpop.f32.mrb[49].mxu1 }
 0x16a   : > { %v1290_v42 = vadd.f32 %v1289_v46, %v1288_v54 }
 0x16b   : > { %927 = vst.msk [vmem:[%s1740_s22 + $0x50] sm:$0xff] %vm916_vm0, %v903_v40  ;;  %v778_v43 = vadd.f32 %v1219_v41, %v1731_v63  ;;  %v1220_v44 = vpop.f32.mrb[50].mxu0 }
 0x16c   : > { %v1221_v45 = vpop.f32.mrb[51].mxu0  ;;  %v1291_v48 = vpop.f32.mrb[50].mxu1 }
 0x16d   : > { %v908_v61 = vadd.f32 %v1290_v42, %v778_v43  ;;  %v1222_v49 = vadd.f32 %v1221_v45, %v1220_v44  ;;  %v1292_v50 = vpop.f32.mrb[51].mxu1 }
 0x16e   : > { %v1293_v55 = vadd.f32 %v1292_v50, %v1291_v48 }
 0x16f   : > { %928 = vst.msk [vmem:[%s1740_s22 + $0x58] sm:$0xff] %vm916_vm0, %v908_v61  ;;  %v783_v51 = vadd.f32 %v1222_v49, %v1733_v7 }
 0x171   : > { %v913_v52 = vadd.f32 %v1293_v55, %v783_v51 }
 0x173   : > { %930 = vst.msk [vmem:[%s1740_s22 + $0x60] sm:$0x3] %vm929_vm1, %v913_v52 }
 0x174 PF: > { %s12_s9 = sadd.s32 1, %s1438_s9  }
 0x175   : > { %p9_p4 = scmp.ge.s32.totalorder %s12_s9, 7  }
 0x177   :  { %11 = sbr.rel (!%p9_p4) target bundleno = 1 (0x1), region = 61 }

</bundles_post_ra>
